<compile_context>
chip_gen: v7x
topology: tpu7x:2x2x1
jax: 0.10.0
libtpu: 0.0.40
codegen_flags: <defaults>
</compile_context>

<pallas_src>
import functools

import jax
import jax.numpy as jnp
from jax.experimental import pallas as pl
from jax.experimental.pallas import tpu as pltpu


# ----------------------------------------------------------------------------
# Helpers
# ----------------------------------------------------------------------------
def _pick_tm(M, cap=512):
    """Largest row-tile <= cap that divides M (falls back to min(cap, M))."""
    for cand in (cap, 256, 128, 64, 32, 16, 8):
        if cand <= M and M % cand == 0:
            return cand
    return min(cap, M)


# ----------------------------------------------------------------------------
# Pallas kernels
# ----------------------------------------------------------------------------
def _dual_conv1x1_kernel(x_ref, w1_ref, b1_ref, w2_ref, b2_ref, o1_ref, o2_ref):
    """Fused conv1 + conv2 (both 1x1 + folded-BN + SiLU) sharing one x read.

    x_ref : (tm, Cin)
    w*_ref: (Cin, Cout)   BN scale already folded into the weights
    b*_ref: (1, Cout)
    o*_ref: (tm, Cout)
    """
    x = x_ref[...]
    y1 = jnp.dot(x, w1_ref[...], preferred_element_type=jnp.float32) + b1_ref[...]
    o1_ref[...] = (y1 * jax.nn.sigmoid(y1)).astype(o1_ref.dtype)
    y2 = jnp.dot(x, w2_ref[...], preferred_element_type=jnp.float32) + b2_ref[...]
    o2_ref[...] = (y2 * jax.nn.sigmoid(y2)).astype(o2_ref.dtype)


def _concat_conv1x1_kernel(y1_ref, y2_ref, wa_ref, wb_ref, b_ref, o_ref):
    """Final 1x1 conv over the channel-concat of y1/y2 without materializing it.

    out = SiLU(y1 @ W[:c2] + y2 @ W[c2:] + bias)
    """
    y = (jnp.dot(y1_ref[...], wa_ref[...], preferred_element_type=jnp.float32)
         + jnp.dot(y2_ref[...], wb_ref[...], preferred_element_type=jnp.float32)
         + b_ref[...])
    o_ref[...] = (y * jax.nn.sigmoid(y)).astype(o_ref.dtype)


def _residual_block_kernel(y_ref, w1_ref, b1_ref, w3_ref, b3_ref,
                           caw1_ref, cab1_ref, caw2_ref, cab2_ref,
                           o_ref, pad_ref):
    """Fused ResidualBlock: 1x1 conv -> 3x3 conv -> channel attention + residual.

    One batch element per grid step; the intermediate activation never leaves
    VMEM.

    y_ref / o_ref : (1, H, W, C)
    w1_ref        : (C, C)        1x1 weights, BN scale folded
    b1_ref        : (1, C)
    w3_ref        : (3, 3, C, C)  3x3 weights, BN scale folded
    b3_ref        : (1, C)
    caw1_ref      : (C, C//4)   cab1_ref: (1, C//4)
    caw2_ref      : (C//4, C)   cab2_ref: (1, C)
    pad_ref       : VMEM scratch (H+2, W+16, C) f32 for SAME padding
    """
    H, W, C = o_ref.shape[1], o_ref.shape[2], o_ref.shape[3]
    WOFF = 8  # sublane-aligned column offset of the real data inside pad_ref

    iden = y_ref[0].astype(jnp.float32)                                 # (H, W, C)

    # --- 1x1 conv + folded BN + SiLU -------------------------------------
    t = jnp.einsum("hwc,cd->hwd", iden, w1_ref[...],
                   preferred_element_type=jnp.float32)
    t = t + b1_ref[...].reshape(1, 1, C)
    t = t * jax.nn.sigmoid(t)

    # --- 3x3 SAME conv + folded BN + SiLU (padding done in VMEM) ---------
    pad_ref[...] = jnp.zeros(pad_ref.shape, jnp.float32)
    pad_ref[1:H + 1, WOFF:WOFF + W, :] = t          # aligned (offset 8) store

    acc = jnp.zeros((H, W, C), jnp.float32)
    for dy in range(3):
        for dx in range(3):
            patch = pad_ref[dy:dy + H, WOFF - 1 + dx:WOFF - 1 + dx + W, :]
            acc = acc + jnp.einsum("hwc,cd->hwd", patch, w3_ref[dy, dx],
                                   preferred_element_type=jnp.float32)
    y = acc + b3_ref[...].reshape(1, 1, C)
    out2 = y * jax.nn.sigmoid(y)                                        # (H, W, C)

    # --- channel attention (global avg pool -> MLP -> sigmoid) + residual -
    pooled = jnp.mean(out2.reshape(H * W, C), axis=0, keepdims=True)    # (1, C)
    h = jnp.dot(pooled, caw1_ref[...], preferred_element_type=jnp.float32)
    h = jnp.maximum(h + cab1_ref[...], 0.0)
    s = jnp.dot(h, caw2_ref[...], preferred_element_type=jnp.float32)
    s = jax.nn.sigmoid(s + cab2_ref[...])                               # (1, C)
    o_ref[0] = (out2 * s.reshape(1, 1, C) + iden).astype(o_ref.dtype)


# ----------------------------------------------------------------------------
# Pallas wrappers
# ----------------------------------------------------------------------------
def dual_conv1x1_bn_silu(x2d, w1, b1, w2, b2, tm_cap=512):
    """x2d: (M, Cin) -> (y1 (M, C1), y2 (M, C2)); x is read from HBM once."""
    M, Cin = x2d.shape
    C1, C2 = w1.shape[1], w2.shape[1]
    tm = _pick_tm(M, tm_cap)
    return pl.pallas_call(
        _dual_conv1x1_kernel,
        out_shape=(jax.ShapeDtypeStruct((M, C1), x2d.dtype),
                   jax.ShapeDtypeStruct((M, C2), x2d.dtype)),
        grid=(pl.cdiv(M, tm),),
        in_specs=[
            pl.BlockSpec((tm, Cin), lambda i: (i, 0)),
            pl.BlockSpec((Cin, C1), lambda i: (0, 0)),
            pl.BlockSpec((1, C1), lambda i: (0, 0)),
            pl.BlockSpec((Cin, C2), lambda i: (0, 0)),
            pl.BlockSpec((1, C2), lambda i: (0, 0)),
        ],
        out_specs=(pl.BlockSpec((tm, C1), lambda i: (i, 0)),
                   pl.BlockSpec((tm, C2), lambda i: (i, 0))),
        compiler_params=pltpu.CompilerParams(dimension_semantics=("parallel",)),
    )(x2d, w1, b1, w2, b2)


def concat_conv1x1_bn_silu(y1, y2, wa, wb, b, tm_cap=512):
    """SiLU((cat[y1,y2]) @ W + b) without materializing the concat."""
    M, C1 = y1.shape
    C2 = y2.shape[1]
    Cout = wa.shape[1]
    tm = _pick_tm(M, tm_cap)
    return pl.pallas_call(
        _concat_conv1x1_kernel,
        out_shape=jax.ShapeDtypeStruct((M, Cout), y1.dtype),
        grid=(pl.cdiv(M, tm),),
        in_specs=[
            pl.BlockSpec((tm, C1), lambda i: (i, 0)),
            pl.BlockSpec((tm, C2), lambda i: (i, 0)),
            pl.BlockSpec((C1, Cout), lambda i: (0, 0)),
            pl.BlockSpec((C2, Cout), lambda i: (0, 0)),
            pl.BlockSpec((1, Cout), lambda i: (0, 0)),
        ],
        out_specs=pl.BlockSpec((tm, Cout), lambda i: (i, 0)),
        compiler_params=pltpu.CompilerParams(dimension_semantics=("parallel",)),
    )(y1, y2, wa, wb, b)


def residual_block(y2, w1, b1, w3, b3, caw1, cab1, caw2, cab2):
    """Fused ResidualBlock over (N, H, W, C); one batch element per grid step."""
    N, H, W, C = y2.shape
    Ch = caw1.shape[1]
    return pl.pallas_call(
        _residual_block_kernel,
        out_shape=jax.ShapeDtypeStruct((N, H, W, C), y2.dtype),
        grid=(N,),
        in_specs=[
            pl.BlockSpec((1, H, W, C), lambda n: (n, 0, 0, 0)),
            pl.BlockSpec((C, C), lambda n: (0, 0)),
            pl.BlockSpec((1, C), lambda n: (0, 0)),
            pl.BlockSpec((3, 3, C, C), lambda n: (0, 0, 0, 0)),
            pl.BlockSpec((1, C), lambda n: (0, 0)),
            pl.BlockSpec((C, Ch), lambda n: (0, 0)),
            pl.BlockSpec((1, Ch), lambda n: (0, 0)),
            pl.BlockSpec((Ch, C), lambda n: (0, 0)),
            pl.BlockSpec((1, C), lambda n: (0, 0)),
        ],
        out_specs=pl.BlockSpec((1, H, W, C), lambda n: (n, 0, 0, 0)),
        scratch_shapes=[pltpu.VMEM((H + 2, W + 16, C), jnp.float32)],
        compiler_params=pltpu.CompilerParams(dimension_semantics=("parallel",)),
    )(y2, w1, b1, w3, b3, caw1, cab1, caw2, cab2)


# ----------------------------------------------------------------------------
# Parameter construction (deterministic, inference-mode BN folded)
# ----------------------------------------------------------------------------
def make_conv_bn(key, cin, cout, k):
    k1, k2, k3, k4, k5 = jax.random.split(key, 5)
    w = jax.random.normal(k1, (k, k, cin, cout), jnp.float32) / jnp.sqrt(cin * k * k)
    gamma = 1.0 + 0.1 * jax.random.normal(k2, (cout,), jnp.float32)
    beta = 0.1 * jax.random.normal(k3, (cout,), jnp.float32)
    mean = 0.1 * jax.random.normal(k4, (cout,), jnp.float32)
    var = 1.0 + 0.1 * jnp.abs(jax.random.normal(k5, (cout,), jnp.float32))
    scale = gamma / jnp.sqrt(var + 1e-5)
    bias = beta - mean * scale
    return {"w": w, "scale": scale, "bias": bias}


def make_residual_block(key, c):
    ch = c // 4
    k1, k2, k3, k4, k5, k6 = jax.random.split(key, 6)
    return {
        "c1": make_conv_bn(k1, c, c, 1),
        "c2": make_conv_bn(k2, c, c, 3),
        "w1": jax.random.normal(k3, (c, ch), jnp.float32) / jnp.sqrt(c),
        "b1": 0.1 * jax.random.normal(k4, (1, ch), jnp.float32),
        "w2": jax.random.normal(k5, (ch, c), jnp.float32) / jnp.sqrt(ch),
        "b2": 0.1 * jax.random.normal(k6, (1, c), jnp.float32),
    }


def make_csp_block(key, in_c, out_c, n):
    ks = jax.random.split(key, 3 + n)
    return {
        "conv1": make_conv_bn(ks[0], in_c, out_c // 2, 1),
        "conv2": make_conv_bn(ks[1], in_c, out_c // 2, 1),
        "conv3": make_conv_bn(ks[2], out_c, out_c, 1),
        "blocks": [make_residual_block(ks[3 + i], out_c // 2) for i in range(n)],
    }


# ----------------------------------------------------------------------------
# CSPBlock forward (Pallas)
# ----------------------------------------------------------------------------
def csp_block_forward(params, x_nchw):
    """x_nchw: (N, Cin, H, W) -> (N, out_c, H, W)."""
    N, Cin, H, W = x_nchw.shape
    x = jnp.transpose(x_nchw, (0, 2, 3, 1))                      # NCHW -> NHWC
    M = N * H * W
    x2d = x.reshape(M, Cin)

    p1, p2, p3 = params["conv1"], params["conv2"], params["conv3"]
    c2 = p1["w"].shape[-1]
    out_c = p3["w"].shape[-1]

    # fold BN scale into conv weights (constant-folded under jit)
    w1 = p1["w"][0, 0] * p1["scale"][None, :]
    w2 = p2["w"][0, 0] * p2["scale"][None, :]
    b1 = p1["bias"].reshape(1, c2)
    b2 = p2["bias"].reshape(1, c2)

    # conv1 / conv2 branches, fused (x streamed once)
    y1, y2 = dual_conv1x1_bn_silu(x2d, w1, b1, w2, b2)
    y2 = y2.reshape(N, H, W, c2)

    # residual blocks on the y2 branch (fully fused per block)
    for bp in params["blocks"]:
        wc1 = bp["c1"]["w"][0, 0] * bp["c1"]["scale"][None, :]
        bc1 = bp["c1"]["bias"].reshape(1, c2)
        wc3 = bp["c2"]["w"] * bp["c2"]["scale"]                  # (3, 3, c2, c2)
        bc3 = bp["c2"]["bias"].reshape(1, c2)
        y2 = residual_block(y2, wc1, bc1, wc3, bc3,
                            bp["w1"], bp["b1"], bp["w2"], bp["b2"])

    # final conv3 over the (virtual) channel concat of y1 / y2
    w3 = p3["w"][0, 0] * p3["scale"][None, :]                    # (2*c2, out_c)
    wa, wb = w3[:c2], w3[c2:]
    b3 = p3["bias"].reshape(1, out_c)
    out2d = concat_conv1x1_bn_silu(y1, y2.reshape(M, c2), wa, wb, b3)
    out = out2d.reshape(N, H, W, out_c)
    return jnp.transpose(out, (0, 3, 1, 2))                      # NHWC -> NCHW


# ----------------------------------------------------------------------------
# Pure-JAX reference (for correctness check)
# ----------------------------------------------------------------------------
def _silu(x):
    return x * jax.nn.sigmoid(x)


def _ref_conv1x1(x, p):
    y = jnp.einsum("nhwc,cd->nhwd", x, p["w"][0, 0], precision="highest")
    return _silu(y * p["scale"] + p["bias"])


def _ref_conv3x3(x, p):
    y = jax.lax.conv_general_dilated(
        x, p["w"], (1, 1), "SAME",
        dimension_numbers=("NHWC", "HWIO", "NHWC"), precision="highest")
    return _silu(y * p["scale"] + p["bias"])


def _ref_residual(x, bp):
    t = _ref_conv1x1(x, bp["c1"])
    t = _ref_conv3x3(t, bp["c2"])
    pooled = jnp.mean(t, axis=(1, 2))                            # (N, C)
    h = jnp.maximum(pooled @ bp["w1"] + bp["b1"], 0.0)
    s = jax.nn.sigmoid(h @ bp["w2"] + bp["b2"])                  # (N, C)
    return t * s[:, None, None, :] + x


def csp_block_reference(params, x_nchw):
    x = jnp.transpose(x_nchw, (0, 2, 3, 1))
    y1 = _ref_conv1x1(x, params["conv1"])
    y2 = _ref_conv1x1(x, params["conv2"])
    for bp in params["blocks"]:
        y2 = _ref_residual(y2, bp)
    cat = jnp.concatenate([y1, y2], axis=-1)
    out = _ref_conv1x1(cat, params["conv3"])
    return jnp.transpose(out, (0, 3, 1, 2))


# ----------------------------------------------------------------------------
if __name__ == "__main__":
    N, IN_C, OUT_C, H, W, N_BLOCKS = 2, 8, 16, 16, 16, 2

    key = jax.random.PRNGKey(0)
    kx, kp = jax.random.split(key)
    x = jax.random.normal(kx, (N, IN_C, H, W), jnp.float32)
    params = make_csp_block(kp, IN_C, OUT_C, N_BLOCKS)

    fwd = jax.jit(functools.partial(csp_block_forward, params))
    out = fwd(x)
    jax.block_until_ready(out)

    assert out.shape == (N, OUT_C, H, W), out.shape

    ref = csp_block_reference(params, x)
    max_err = float(jnp.max(jnp.abs(out - ref)))
    assert max_err < 1e-2, f"max abs err {max_err}"

    print("KERNEL_OK")
</pallas_src>

<mosaic_0001>
module attributes {stable_mosaic.version = 11 : i64} {
  func.func @_dual_conv1x1_kernel(%arg0: i32, %arg1: memref<512x8xf32, #tpu.memory_space<vmem>>, %arg2: memref<8x8xf32, #tpu.memory_space<vmem>>, %arg3: memref<1x8xf32, #tpu.memory_space<vmem>>, %arg4: memref<8x8xf32, #tpu.memory_space<vmem>>, %arg5: memref<1x8xf32, #tpu.memory_space<vmem>>, %arg6: memref<512x8xf32, #tpu.memory_space<vmem>>, %arg7: memref<512x8xf32, #tpu.memory_space<vmem>>) attributes {dimension_semantics = [#tpu.dimension_semantics<parallel>], iteration_bounds = array<i64: 1>, scalar_prefetch = 0 : i64, scratch_operands = 0 : i64, tpu.core_type = #tpu.core_type<tc>, window_params = [{transform_indices = @transform_0, window_bounds = array<i64: 512, 8>}, {pipeline_mode = #tpu.pipeline_mode<synchronous>, transform_indices = @transform_1, window_bounds = array<i64: 8, 8>}, {pipeline_mode = #tpu.pipeline_mode<synchronous>, transform_indices = @transform_2, window_bounds = array<i64: 1, 8>}, {pipeline_mode = #tpu.pipeline_mode<synchronous>, transform_indices = @transform_3, window_bounds = array<i64: 8, 8>}, {pipeline_mode = #tpu.pipeline_mode<synchronous>, transform_indices = @transform_4, window_bounds = array<i64: 1, 8>}, {transform_indices = @transform_5, window_bounds = array<i64: 512, 8>}, {transform_indices = @transform_6, window_bounds = array<i64: 512, 8>}]} {
    %c0 = arith.constant 0 : index
    %c0_0 = arith.constant 0 : index
    %0 = vector.load %arg1[%c0, %c0_0] : memref<512x8xf32, #tpu.memory_space<vmem>>, vector<512x8xf32>
    %c0_1 = arith.constant 0 : index
    %c0_2 = arith.constant 0 : index
    %1 = vector.load %arg2[%c0_1, %c0_2] : memref<8x8xf32, #tpu.memory_space<vmem>>, vector<8x8xf32>
    %cst = arith.constant dense<0.000000e+00> : vector<512x8xf32>
    %2 = tpu.matmul %0, %1, %cst {dimension_numbers = #tpu.dot_dimension_numbers<[1], [0], [0], [1], [0, 0, 1, 1], [], []>} : vector<512x8xf32>, vector<8x8xf32>, vector<512x8xf32> -> vector<512x8xf32>
    %c0_3 = arith.constant 0 : index
    %c0_4 = arith.constant 0 : index
    %3 = vector.load %arg3[%c0_3, %c0_4] : memref<1x8xf32, #tpu.memory_space<vmem>>, vector<1x8xf32>
    %4 = vector.broadcast %3 : vector<1x8xf32> to vector<512x8xf32>
    %5 = arith.addf %2, %4 : vector<512x8xf32>
    %6 = arith.negf %5 : vector<512x8xf32>
    %7 = math.exp %6 : vector<512x8xf32>
    %cst_5 = arith.constant 1.000000e+00 : f32
    %8 = vector.broadcast %cst_5 : f32 to vector<512x8xf32>
    %9 = arith.addf %8, %7 : vector<512x8xf32>
    %10 = arith.divf %8, %9 : vector<512x8xf32>
    %11 = arith.mulf %5, %10 : vector<512x8xf32>
    %c0_6 = arith.constant 0 : index
    %c0_7 = arith.constant 0 : index
    %12 = vector.load %arg6[%c0_6, %c0_7] : memref<512x8xf32, #tpu.memory_space<vmem>>, vector<512x8xf32>
    tpu.vector_store %arg6[%c0_6, %c0_7], %11 {strides = array<i32>} : memref<512x8xf32, #tpu.memory_space<vmem>>, vector<512x8xf32>,
    %c0_8 = arith.constant 0 : index
    %c0_9 = arith.constant 0 : index
    %13 = vector.load %arg4[%c0_8, %c0_9] : memref<8x8xf32, #tpu.memory_space<vmem>>, vector<8x8xf32>
    %cst_10 = arith.constant dense<0.000000e+00> : vector<512x8xf32>
    %14 = tpu.matmul %0, %13, %cst_10 {dimension_numbers = #tpu.dot_dimension_numbers<[1], [0], [0], [1], [0, 0, 1, 1], [], []>} : vector<512x8xf32>, vector<8x8xf32>, vector<512x8xf32> -> vector<512x8xf32>
    %c0_11 = arith.constant 0 : index
    %c0_12 = arith.constant 0 : index
    %15 = vector.load %arg5[%c0_11, %c0_12] : memref<1x8xf32, #tpu.memory_space<vmem>>, vector<1x8xf32>
    %16 = vector.broadcast %15 : vector<1x8xf32> to vector<512x8xf32>
    %17 = arith.addf %14, %16 : vector<512x8xf32>
    %18 = arith.negf %17 : vector<512x8xf32>
    %19 = math.exp %18 : vector<512x8xf32>
    %cst_13 = arith.constant 1.000000e+00 : f32
    %20 = vector.broadcast %cst_13 : f32 to vector<512x8xf32>
    %21 = arith.addf %20, %19 : vector<512x8xf32>
    %22 = arith.divf %20, %21 : vector<512x8xf32>
    %23 = arith.mulf %17, %22 : vector<512x8xf32>
    %c0_14 = arith.constant 0 : index
    %c0_15 = arith.constant 0 : index
    %24 = vector.load %arg7[%c0_14, %c0_15] : memref<512x8xf32, #tpu.memory_space<vmem>>, vector<512x8xf32>
    tpu.vector_store %arg7[%c0_14, %c0_15], %23 {strides = array<i32>} : memref<512x8xf32, #tpu.memory_space<vmem>>, vector<512x8xf32>,
    return
  }
  func.func @transform_0(%arg0: i32) -> (i32, i32) {
    %c0_i32 = arith.constant 0 : i32
    %c0_i32_0 = arith.constant 0 : i32
    return %arg0, %c0_i32 : i32, i32
  }
  func.func @transform_1(%arg0: i32) -> (i32, i32) {
    %c0_i32 = arith.constant 0 : i32
    %c0_i32_0 = arith.constant 0 : i32
    %c0_i32_1 = arith.constant 0 : i32
    return %c0_i32, %c0_i32_0 : i32, i32
  }
  func.func @transform_2(%arg0: i32) -> (i32, i32) {
    %c0_i32 = arith.constant 0 : i32
    %c0_i32_0 = arith.constant 0 : i32
    %c0_i32_1 = arith.constant 0 : i32
    return %c0_i32, %c0_i32_0 : i32, i32
  }
  func.func @transform_3(%arg0: i32) -> (i32, i32) {
    %c0_i32 = arith.constant 0 : i32
    %c0_i32_0 = arith.constant 0 : i32
    %c0_i32_1 = arith.constant 0 : i32
    return %c0_i32, %c0_i32_0 : i32, i32
  }
  func.func @transform_4(%arg0: i32) -> (i32, i32) {
    %c0_i32 = arith.constant 0 : i32
    %c0_i32_0 = arith.constant 0 : i32
    %c0_i32_1 = arith.constant 0 : i32
    return %c0_i32, %c0_i32_0 : i32, i32
  }
  func.func @transform_5(%arg0: i32) -> (i32, i32) {
    %c0_i32 = arith.constant 0 : i32
    %c0_i32_0 = arith.constant 0 : i32
    return %arg0, %c0_i32 : i32, i32
  }
  func.func @transform_6(%arg0: i32) -> (i32, i32) {
    %c0_i32 = arith.constant 0 : i32
    %c0_i32_0 = arith.constant 0 : i32
    return %arg0, %c0_i32 : i32, i32
  }
}

module attributes {stable_mosaic.version = 11 : i64} {
  func.func @_concat_conv1x1_kernel(%arg0: i32, %arg1: memref<512x8xf32, #tpu.memory_space<vmem>>, %arg2: memref<512x8xf32, #tpu.memory_space<vmem>>, %arg3: memref<8x16xf32, #tpu.memory_space<vmem>>, %arg4: memref<8x16xf32, #tpu.memory_space<vmem>>, %arg5: memref<1x16xf32, #tpu.memory_space<vmem>>, %arg6: memref<512x16xf32, #tpu.memory_space<vmem>>) attributes {dimension_semantics = [#tpu.dimension_semantics<parallel>], iteration_bounds = array<i64: 1>, scalar_prefetch = 0 : i64, scratch_operands = 0 : i64, tpu.core_type = #tpu.core_type<tc>, window_params = [{transform_indices = @transform_0, window_bounds = array<i64: 512, 8>}, {transform_indices = @transform_1, window_bounds = array<i64: 512, 8>}, {pipeline_mode = #tpu.pipeline_mode<synchronous>, transform_indices = @transform_2, window_bounds = array<i64: 8, 16>}, {pipeline_mode = #tpu.pipeline_mode<synchronous>, transform_indices = @transform_3, window_bounds = array<i64: 8, 16>}, {pipeline_mode = #tpu.pipeline_mode<synchronous>, transform_indices = @transform_4, window_bounds = array<i64: 1, 16>}, {transform_indices = @transform_5, window_bounds = array<i64: 512, 16>}]} {
    %c0 = arith.constant 0 : index
    %c0_0 = arith.constant 0 : index
    %0 = vector.load %arg1[%c0, %c0_0] : memref<512x8xf32, #tpu.memory_space<vmem>>, vector<512x8xf32>
    %c0_1 = arith.constant 0 : index
    %c0_2 = arith.constant 0 : index
    %1 = vector.load %arg3[%c0_1, %c0_2] : memref<8x16xf32, #tpu.memory_space<vmem>>, vector<8x16xf32>
    %cst = arith.constant dense<0.000000e+00> : vector<512x16xf32>
    %2 = tpu.matmul %0, %1, %cst {dimension_numbers = #tpu.dot_dimension_numbers<[1], [0], [0], [1], [0, 0, 1, 1], [], []>} : vector<512x8xf32>, vector<8x16xf32>, vector<512x16xf32> -> vector<512x16xf32>
    %c0_3 = arith.constant 0 : index
    %c0_4 = arith.constant 0 : index
    %3 = vector.load %arg2[%c0_3, %c0_4] : memref<512x8xf32, #tpu.memory_space<vmem>>, vector<512x8xf32>
    %c0_5 = arith.constant 0 : index
    %c0_6 = arith.constant 0 : index
    %4 = vector.load %arg4[%c0_5, %c0_6] : memref<8x16xf32, #tpu.memory_space<vmem>>, vector<8x16xf32>
    %cst_7 = arith.constant dense<0.000000e+00> : vector<512x16xf32>
    %5 = tpu.matmul %3, %4, %cst_7 {dimension_numbers = #tpu.dot_dimension_numbers<[1], [0], [0], [1], [0, 0, 1, 1], [], []>} : vector<512x8xf32>, vector<8x16xf32>, vector<512x16xf32> -> vector<512x16xf32>
    %6 = arith.addf %2, %5 : vector<512x16xf32>
    %c0_8 = arith.constant 0 : index
    %c0_9 = arith.constant 0 : index
    %7 = vector.load %arg5[%c0_8, %c0_9] : memref<1x16xf32, #tpu.memory_space<vmem>>, vector<1x16xf32>
    %8 = vector.broadcast %7 : vector<1x16xf32> to vector<512x16xf32>
    %9 = arith.addf %6, %8 : vector<512x16xf32>
    %10 = arith.negf %9 : vector<512x16xf32>
    %11 = math.exp %10 : vector<512x16xf32>
    %cst_10 = arith.constant 1.000000e+00 : f32
    %12 = vector.broadcast %cst_10 : f32 to vector<512x16xf32>
    %13 = arith.addf %12, %11 : vector<512x16xf32>
    %14 = arith.divf %12, %13 : vector<512x16xf32>
    %15 = arith.mulf %9, %14 : vector<512x16xf32>
    %c0_11 = arith.constant 0 : index
    %c0_12 = arith.constant 0 : index
    %16 = vector.load %arg6[%c0_11, %c0_12] : memref<512x16xf32, #tpu.memory_space<vmem>>, vector<512x16xf32>
    tpu.vector_store %arg6[%c0_11, %c0_12], %15 {strides = array<i32>} : memref<512x16xf32, #tpu.memory_space<vmem>>, vector<512x16xf32>,
    return
  }
  func.func @transform_0(%arg0: i32) -> (i32, i32) {
    %c0_i32 = arith.constant 0 : i32
    %c0_i32_0 = arith.constant 0 : i32
    return %arg0, %c0_i32 : i32, i32
  }
  func.func @transform_1(%arg0: i32) -> (i32, i32) {
    %c0_i32 = arith.constant 0 : i32
    %c0_i32_0 = arith.constant 0 : i32
    return %arg0, %c0_i32 : i32, i32
  }
  func.func @transform_2(%arg0: i32) -> (i32, i32) {
    %c0_i32 = arith.constant 0 : i32
    %c0_i32_0 = arith.constant 0 : i32
    %c0_i32_1 = arith.constant 0 : i32
    return %c0_i32, %c0_i32_0 : i32, i32
  }
  func.func @transform_3(%arg0: i32) -> (i32, i32) {
    %c0_i32 = arith.constant 0 : i32
    %c0_i32_0 = arith.constant 0 : i32
    %c0_i32_1 = arith.constant 0 : i32
    return %c0_i32, %c0_i32_0 : i32, i32
  }
  func.func @transform_4(%arg0: i32) -> (i32, i32) {
    %c0_i32 = arith.constant 0 : i32
    %c0_i32_0 = arith.constant 0 : i32
    %c0_i32_1 = arith.constant 0 : i32
    return %c0_i32, %c0_i32_0 : i32, i32
  }
  func.func @transform_5(%arg0: i32) -> (i32, i32) {
    %c0_i32 = arith.constant 0 : i32
    %c0_i32_0 = arith.constant 0 : i32
    return %arg0, %c0_i32 : i32, i32
  }
}

module attributes {stable_mosaic.version = 11 : i64} {
  func.func @_residual_block_kernel(%arg0: i32, %arg1: memref<1x16x16x8xf32, #tpu.memory_space<vmem>>, %arg2: memref<8x8xf32, #tpu.memory_space<vmem>>, %arg3: memref<1x8xf32, #tpu.memory_space<vmem>>, %arg4: memref<3x3x8x8xf32, #tpu.memory_space<vmem>>, %arg5: memref<1x8xf32, #tpu.memory_space<vmem>>, %arg6: memref<8x2xf32, #tpu.memory_space<vmem>>, %arg7: memref<1x2xf32, #tpu.memory_space<vmem>>, %arg8: memref<2x8xf32, #tpu.memory_space<vmem>>, %arg9: memref<1x8xf32, #tpu.memory_space<vmem>>, %arg10: memref<1x16x16x8xf32, #tpu.memory_space<vmem>>, %arg11: memref<18x32x8xf32, #tpu.memory_space<vmem>>) attributes {dimension_semantics = [#tpu.dimension_semantics<parallel>], iteration_bounds = array<i64: 2>, scalar_prefetch = 0 : i64, scratch_operands = 1 : i64, tpu.core_type = #tpu.core_type<tc>, window_params = [{transform_indices = @transform_0, window_bounds = array<i64: 1, 16, 16, 8>}, {pipeline_mode = #tpu.pipeline_mode<synchronous>, transform_indices = @transform_1, window_bounds = array<i64: 8, 8>}, {pipeline_mode = #tpu.pipeline_mode<synchronous>, transform_indices = @transform_2, window_bounds = array<i64: 1, 8>}, {pipeline_mode = #tpu.pipeline_mode<synchronous>, transform_indices = @transform_3, window_bounds = array<i64: 3, 3, 8, 8>}, {pipeline_mode = #tpu.pipeline_mode<synchronous>, transform_indices = @transform_4, window_bounds = array<i64: 1, 8>}, {pipeline_mode = #tpu.pipeline_mode<synchronous>, transform_indices = @transform_5, window_bounds = array<i64: 8, 2>}, {pipeline_mode = #tpu.pipeline_mode<synchronous>, transform_indices = @transform_6, window_bounds = array<i64: 1, 2>}, {pipeline_mode = #tpu.pipeline_mode<synchronous>, transform_indices = @transform_7, window_bounds = array<i64: 2, 8>}, {pipeline_mode = #tpu.pipeline_mode<synchronous>, transform_indices = @transform_8, window_bounds = array<i64: 1, 8>}, {transform_indices = @transform_9, window_bounds = array<i64: 1, 16, 16, 8>}]} {
    %c0 = arith.constant 0 : index
    %c0_0 = arith.constant 0 : index
    %c0_1 = arith.constant 0 : index
    %c0_2 = arith.constant 0 : index
    %0 = vector.load %arg1[%c0, %c0_0, %c0_1, %c0_2] : memref<1x16x16x8xf32, #tpu.memory_space<vmem>>, vector<1x16x16x8xf32>
    %1 = vector.shape_cast %0 : vector<1x16x16x8xf32> to vector<16x16x8xf32>
    %c0_3 = arith.constant 0 : index
    %c0_4 = arith.constant 0 : index
    %2 = vector.load %arg2[%c0_3, %c0_4] : memref<8x8xf32, #tpu.memory_space<vmem>>, vector<8x8xf32>
    "tpu.trace_start"() <{level = 10 : i32, message = "hwc,cd->hwd"}> : () -> ()
    %cst = arith.constant dense<0.000000e+00> : vector<16x16x8xf32>
    %3 = tpu.matmul %1, %2, %cst {dimension_numbers = #tpu.dot_dimension_numbers<[2], [0], [0, 1], [1], [0, 0, 0, 1, 1, 1], [], []>} : vector<16x16x8xf32>, vector<8x8xf32>, vector<16x16x8xf32> -> vector<16x16x8xf32>
    "tpu.trace_stop"() : () -> ()
    %c0_5 = arith.constant 0 : index
    %c0_6 = arith.constant 0 : index
    %4 = vector.load %arg3[%c0_5, %c0_6] : memref<1x8xf32, #tpu.memory_space<vmem>>, vector<1x8xf32>
    %5 = vector.shape_cast %4 : vector<1x8xf32> to vector<1x1x8xf32>
    %6 = vector.broadcast %5 : vector<1x1x8xf32> to vector<16x16x8xf32>
    %7 = arith.addf %3, %6 : vector<16x16x8xf32>
    %8 = arith.negf %7 : vector<16x16x8xf32>
    %9 = math.exp %8 : vector<16x16x8xf32>
    %cst_7 = arith.constant 1.000000e+00 : f32
    %10 = vector.broadcast %cst_7 : f32 to vector<16x16x8xf32>
    %11 = arith.addf %10, %9 : vector<16x16x8xf32>
    %12 = arith.divf %10, %11 : vector<16x16x8xf32>
    %13 = arith.mulf %7, %12 : vector<16x16x8xf32>
    %cst_8 = arith.constant 0.000000e+00 : f32
    %14 = vector.broadcast %cst_8 : f32 to vector<18x32x8xf32>
    %c0_9 = arith.constant 0 : index
    %c0_10 = arith.constant 0 : index
    %c0_11 = arith.constant 0 : index
    %15 = vector.load %arg11[%c0_9, %c0_10, %c0_11] : memref<18x32x8xf32, #tpu.memory_space<vmem>>, vector<18x32x8xf32>
    tpu.vector_store %arg11[%c0_9, %c0_10, %c0_11], %14 {strides = array<i32>} : memref<18x32x8xf32, #tpu.memory_space<vmem>>, vector<18x32x8xf32>,
    %c1 = arith.constant 1 : index
    %c8 = arith.constant 8 : index
    %c0_12 = arith.constant 0 : index
    %16 = vector.load %arg11[%c1, %c8, %c0_12] : memref<18x32x8xf32, #tpu.memory_space<vmem>>, vector<16x16x8xf32>
    tpu.vector_store %arg11[%c1, %c8, %c0_12], %13 {strides = array<i32>} : memref<18x32x8xf32, #tpu.memory_space<vmem>>, vector<16x16x8xf32>,
    %cst_13 = arith.constant 0.000000e+00 : f32
    %17 = vector.broadcast %cst_13 : f32 to vector<16x16x8xf32>
    %c0_14 = arith.constant 0 : index
    %c7 = arith.constant 7 : index
    %c0_15 = arith.constant 0 : index
    %18 = vector.load %arg11[%c0_14, %c7, %c0_15] : memref<18x32x8xf32, #tpu.memory_space<vmem>>, vector<16x16x8xf32>
    %c0_16 = arith.constant 0 : index
    %c0_17 = arith.constant 0 : index
    %c0_18 = arith.constant 0 : index
    %c0_19 = arith.constant 0 : index
    %19 = vector.load %arg4[%c0_16, %c0_17, %c0_18, %c0_19] : memref<3x3x8x8xf32, #tpu.memory_space<vmem>>, vector<1x1x8x8xf32>
    %20 = vector.shape_cast %19 : vector<1x1x8x8xf32> to vector<8x8xf32>
    "tpu.trace_start"() <{level = 10 : i32, message = "hwc,cd->hwd"}> : () -> ()
    %cst_20 = arith.constant dense<0.000000e+00> : vector<16x16x8xf32>
    %21 = tpu.matmul %18, %20, %cst_20 {dimension_numbers = #tpu.dot_dimension_numbers<[2], [0], [0, 1], [1], [0, 0, 0, 1, 1, 1], [], []>} : vector<16x16x8xf32>, vector<8x8xf32>, vector<16x16x8xf32> -> vector<16x16x8xf32>
    "tpu.trace_stop"() : () -> ()
    %22 = arith.addf %17, %21 : vector<16x16x8xf32>
    %c0_21 = arith.constant 0 : index
    %c8_22 = arith.constant 8 : index
    %c0_23 = arith.constant 0 : index
    %23 = vector.load %arg11[%c0_21, %c8_22, %c0_23] : memref<18x32x8xf32, #tpu.memory_space<vmem>>, vector<16x16x8xf32>
    %c0_24 = arith.constant 0 : index
    %c1_25 = arith.constant 1 : index
    %c0_26 = arith.constant 0 : index
    %c0_27 = arith.constant 0 : index
    %24 = vector.load %arg4[%c0_24, %c1_25, %c0_26, %c0_27] : memref<3x3x8x8xf32, #tpu.memory_space<vmem>>, vector<1x1x8x8xf32>
    %25 = vector.shape_cast %24 : vector<1x1x8x8xf32> to vector<8x8xf32>
    "tpu.trace_start"() <{level = 10 : i32, message = "hwc,cd->hwd"}> : () -> ()
    %cst_28 = arith.constant dense<0.000000e+00> : vector<16x16x8xf32>
    %26 = tpu.matmul %23, %25, %cst_28 {dimension_numbers = #tpu.dot_dimension_numbers<[2], [0], [0, 1], [1], [0, 0, 0, 1, 1, 1], [], []>} : vector<16x16x8xf32>, vector<8x8xf32>, vector<16x16x8xf32> -> vector<16x16x8xf32>
    "tpu.trace_stop"() : () -> ()
    %27 = arith.addf %22, %26 : vector<16x16x8xf32>
    %c0_29 = arith.constant 0 : index
    %c9 = arith.constant 9 : index
    %c0_30 = arith.constant 0 : index
    %28 = vector.load %arg11[%c0_29, %c9, %c0_30] : memref<18x32x8xf32, #tpu.memory_space<vmem>>, vector<16x16x8xf32>
    %c0_31 = arith.constant 0 : index
    %c2 = arith.constant 2 : index
    %c0_32 = arith.constant 0 : index
    %c0_33 = arith.constant 0 : index
    %29 = vector.load %arg4[%c0_31, %c2, %c0_32, %c0_33] : memref<3x3x8x8xf32, #tpu.memory_space<vmem>>, vector<1x1x8x8xf32>
    %30 = vector.shape_cast %29 : vector<1x1x8x8xf32> to vector<8x8xf32>
    "tpu.trace_start"() <{level = 10 : i32, message = "hwc,cd->hwd"}> : () -> ()
    %cst_34 = arith.constant dense<0.000000e+00> : vector<16x16x8xf32>
    %31 = tpu.matmul %28, %30, %cst_34 {dimension_numbers = #tpu.dot_dimension_numbers<[2], [0], [0, 1], [1], [0, 0, 0, 1, 1, 1], [], []>} : vector<16x16x8xf32>, vector<8x8xf32>, vector<16x16x8xf32> -> vector<16x16x8xf32>
    "tpu.trace_stop"() : () -> ()
    %32 = arith.addf %27, %31 : vector<16x16x8xf32>
    %c1_35 = arith.constant 1 : index
    %c7_36 = arith.constant 7 : index
    %c0_37 = arith.constant 0 : index
    %33 = vector.load %arg11[%c1_35, %c7_36, %c0_37] : memref<18x32x8xf32, #tpu.memory_space<vmem>>, vector<16x16x8xf32>
    %c1_38 = arith.constant 1 : index
    %c0_39 = arith.constant 0 : index
    %c0_40 = arith.constant 0 : index
    %c0_41 = arith.constant 0 : index
    %34 = vector.load %arg4[%c1_38, %c0_39, %c0_40, %c0_41] : memref<3x3x8x8xf32, #tpu.memory_space<vmem>>, vector<1x1x8x8xf32>
    %35 = vector.shape_cast %34 : vector<1x1x8x8xf32> to vector<8x8xf32>
    "tpu.trace_start"() <{level = 10 : i32, message = "hwc,cd->hwd"}> : () -> ()
    %cst_42 = arith.constant dense<0.000000e+00> : vector<16x16x8xf32>
    %36 = tpu.matmul %33, %35, %cst_42 {dimension_numbers = #tpu.dot_dimension_numbers<[2], [0], [0, 1], [1], [0, 0, 0, 1, 1, 1], [], []>} : vector<16x16x8xf32>, vector<8x8xf32>, vector<16x16x8xf32> -> vector<16x16x8xf32>
    "tpu.trace_stop"() : () -> ()
    %37 = arith.addf %32, %36 : vector<16x16x8xf32>
    %c1_43 = arith.constant 1 : index
    %c8_44 = arith.constant 8 : index
    %c0_45 = arith.constant 0 : index
    %38 = vector.load %arg11[%c1_43, %c8_44, %c0_45] : memref<18x32x8xf32, #tpu.memory_space<vmem>>, vector<16x16x8xf32>
    %c1_46 = arith.constant 1 : index
    %c1_47 = arith.constant 1 : index
    %c0_48 = arith.constant 0 : index
    %c0_49 = arith.constant 0 : index
    %39 = vector.load %arg4[%c1_46, %c1_47, %c0_48, %c0_49] : memref<3x3x8x8xf32, #tpu.memory_space<vmem>>, vector<1x1x8x8xf32>
    %40 = vector.shape_cast %39 : vector<1x1x8x8xf32> to vector<8x8xf32>
    "tpu.trace_start"() <{level = 10 : i32, message = "hwc,cd->hwd"}> : () -> ()
    %cst_50 = arith.constant dense<0.000000e+00> : vector<16x16x8xf32>
    %41 = tpu.matmul %38, %40, %cst_50 {dimension_numbers = #tpu.dot_dimension_numbers<[2], [0], [0, 1], [1], [0, 0, 0, 1, 1, 1], [], []>} : vector<16x16x8xf32>, vector<8x8xf32>, vector<16x16x8xf32> -> vector<16x16x8xf32>
    "tpu.trace_stop"() : () -> ()
    %42 = arith.addf %37, %41 : vector<16x16x8xf32>
    %c1_51 = arith.constant 1 : index
    %c9_52 = arith.constant 9 : index
    %c0_53 = arith.constant 0 : index
    %43 = vector.load %arg11[%c1_51, %c9_52, %c0_53] : memref<18x32x8xf32, #tpu.memory_space<vmem>>, vector<16x16x8xf32>
    %c1_54 = arith.constant 1 : index
    %c2_55 = arith.constant 2 : index
    %c0_56 = arith.constant 0 : index
    %c0_57 = arith.constant 0 : index
    %44 = vector.load %arg4[%c1_54, %c2_55, %c0_56, %c0_57] : memref<3x3x8x8xf32, #tpu.memory_space<vmem>>, vector<1x1x8x8xf32>
    %45 = vector.shape_cast %44 : vector<1x1x8x8xf32> to vector<8x8xf32>
    "tpu.trace_start"() <{level = 10 : i32, message = "hwc,cd->hwd"}> : () -> ()
    %cst_58 = arith.constant dense<0.000000e+00> : vector<16x16x8xf32>
    %46 = tpu.matmul %43, %45, %cst_58 {dimension_numbers = #tpu.dot_dimension_numbers<[2], [0], [0, 1], [1], [0, 0, 0, 1, 1, 1], [], []>} : vector<16x16x8xf32>, vector<8x8xf32>, vector<16x16x8xf32> -> vector<16x16x8xf32>
    "tpu.trace_stop"() : () -> ()
    %47 = arith.addf %42, %46 : vector<16x16x8xf32>
    %c2_59 = arith.constant 2 : index
    %c7_60 = arith.constant 7 : index
    %c0_61 = arith.constant 0 : index
    %48 = vector.load %arg11[%c2_59, %c7_60, %c0_61] : memref<18x32x8xf32, #tpu.memory_space<vmem>>, vector<16x16x8xf32>
    %c2_62 = arith.constant 2 : index
    %c0_63 = arith.constant 0 : index
    %c0_64 = arith.constant 0 : index
    %c0_65 = arith.constant 0 : index
    %49 = vector.load %arg4[%c2_62, %c0_63, %c0_64, %c0_65] : memref<3x3x8x8xf32, #tpu.memory_space<vmem>>, vector<1x1x8x8xf32>
    %50 = vector.shape_cast %49 : vector<1x1x8x8xf32> to vector<8x8xf32>
    "tpu.trace_start"() <{level = 10 : i32, message = "hwc,cd->hwd"}> : () -> ()
    %cst_66 = arith.constant dense<0.000000e+00> : vector<16x16x8xf32>
    %51 = tpu.matmul %48, %50, %cst_66 {dimension_numbers = #tpu.dot_dimension_numbers<[2], [0], [0, 1], [1], [0, 0, 0, 1, 1, 1], [], []>} : vector<16x16x8xf32>, vector<8x8xf32>, vector<16x16x8xf32> -> vector<16x16x8xf32>
    "tpu.trace_stop"() : () -> ()
    %52 = arith.addf %47, %51 : vector<16x16x8xf32>
    %c2_67 = arith.constant 2 : index
    %c8_68 = arith.constant 8 : index
    %c0_69 = arith.constant 0 : index
    %53 = vector.load %arg11[%c2_67, %c8_68, %c0_69] : memref<18x32x8xf32, #tpu.memory_space<vmem>>, vector<16x16x8xf32>
    %c2_70 = arith.constant 2 : index
    %c1_71 = arith.constant 1 : index
    %c0_72 = arith.constant 0 : index
    %c0_73 = arith.constant 0 : index
    %54 = vector.load %arg4[%c2_70, %c1_71, %c0_72, %c0_73] : memref<3x3x8x8xf32, #tpu.memory_space<vmem>>, vector<1x1x8x8xf32>
    %55 = vector.shape_cast %54 : vector<1x1x8x8xf32> to vector<8x8xf32>
    "tpu.trace_start"() <{level = 10 : i32, message = "hwc,cd->hwd"}> : () -> ()
    %cst_74 = arith.constant dense<0.000000e+00> : vector<16x16x8xf32>
    %56 = tpu.matmul %53, %55, %cst_74 {dimension_numbers = #tpu.dot_dimension_numbers<[2], [0], [0, 1], [1], [0, 0, 0, 1, 1, 1], [], []>} : vector<16x16x8xf32>, vector<8x8xf32>, vector<16x16x8xf32> -> vector<16x16x8xf32>
    "tpu.trace_stop"() : () -> ()
    %57 = arith.addf %52, %56 : vector<16x16x8xf32>
    %c2_75 = arith.constant 2 : index
    %c9_76 = arith.constant 9 : index
    %c0_77 = arith.constant 0 : index
    %58 = vector.load %arg11[%c2_75, %c9_76, %c0_77] : memref<18x32x8xf32, #tpu.memory_space<vmem>>, vector<16x16x8xf32>
    %c2_78 = arith.constant 2 : index
    %c2_79 = arith.constant 2 : index
    %c0_80 = arith.constant 0 : index
    %c0_81 = arith.constant 0 : index
    %59 = vector.load %arg4[%c2_78, %c2_79, %c0_80, %c0_81] : memref<3x3x8x8xf32, #tpu.memory_space<vmem>>, vector<1x1x8x8xf32>
    %60 = vector.shape_cast %59 : vector<1x1x8x8xf32> to vector<8x8xf32>
    "tpu.trace_start"() <{level = 10 : i32, message = "hwc,cd->hwd"}> : () -> ()
    %cst_82 = arith.constant dense<0.000000e+00> : vector<16x16x8xf32>
    %61 = tpu.matmul %58, %60, %cst_82 {dimension_numbers = #tpu.dot_dimension_numbers<[2], [0], [0, 1], [1], [0, 0, 0, 1, 1, 1], [], []>} : vector<16x16x8xf32>, vector<8x8xf32>, vector<16x16x8xf32> -> vector<16x16x8xf32>
    "tpu.trace_stop"() : () -> ()
    %62 = arith.addf %57, %61 : vector<16x16x8xf32>
    %c0_83 = arith.constant 0 : index
    %c0_84 = arith.constant 0 : index
    %63 = vector.load %arg5[%c0_83, %c0_84] : memref<1x8xf32, #tpu.memory_space<vmem>>, vector<1x8xf32>
    %64 = vector.shape_cast %63 : vector<1x8xf32> to vector<1x1x8xf32>
    %65 = vector.broadcast %64 : vector<1x1x8xf32> to vector<16x16x8xf32>
    %66 = arith.addf %62, %65 : vector<16x16x8xf32>
    %67 = arith.negf %66 : vector<16x16x8xf32>
    %68 = math.exp %67 : vector<16x16x8xf32>
    %cst_85 = arith.constant 1.000000e+00 : f32
    %69 = vector.broadcast %cst_85 : f32 to vector<16x16x8xf32>
    %70 = arith.addf %69, %68 : vector<16x16x8xf32>
    %71 = arith.divf %69, %70 : vector<16x16x8xf32>
    %72 = arith.mulf %66, %71 : vector<16x16x8xf32>
    %73 = vector.shape_cast %72 : vector<16x16x8xf32> to vector<256x8xf32>
    %cst_86 = arith.constant dense<0.000000e+00> : vector<8xf32>
    %74 = vector.multi_reduction <add>, %73, %cst_86 [0] : vector<256x8xf32> to vector<8xf32>
    %75 = vector.shape_cast %74 : vector<8xf32> to vector<1x8xf32>
    %cst_87 = arith.constant 2.560000e+02 : f32
    %76 = vector.broadcast %cst_87 : f32 to vector<1x8xf32>
    %77 = arith.divf %75, %76 : vector<1x8xf32>
    %c0_88 = arith.constant 0 : index
    %c0_89 = arith.constant 0 : index
    %78 = vector.load %arg6[%c0_88, %c0_89] : memref<8x2xf32, #tpu.memory_space<vmem>>, vector<8x2xf32>
    %cst_90 = arith.constant dense<0.000000e+00> : vector<1x2xf32>
    %79 = tpu.matmul %77, %78, %cst_90 {dimension_numbers = #tpu.dot_dimension_numbers<[1], [0], [0], [1], [0, 0, 1, 1], [], []>} : vector<1x8xf32>, vector<8x2xf32>, vector<1x2xf32> -> vector<1x2xf32>
    %c0_91 = arith.constant 0 : index
    %c0_92 = arith.constant 0 : index
    %80 = vector.load %arg7[%c0_91, %c0_92] : memref<1x2xf32, #tpu.memory_space<vmem>>, vector<1x2xf32>
    %81 = arith.addf %79, %80 : vector<1x2xf32>
    %cst_93 = arith.constant 0.000000e+00 : f32
    %82 = vector.broadcast %cst_93 : f32 to vector<1x2xf32>
    %83 = arith.maximumf %81, %82 : vector<1x2xf32>
    %c0_94 = arith.constant 0 : index
    %c0_95 = arith.constant 0 : index
    %84 = vector.load %arg8[%c0_94, %c0_95] : memref<2x8xf32, #tpu.memory_space<vmem>>, vector<2x8xf32>
    %cst_96 = arith.constant dense<0.000000e+00> : vector<1x8xf32>
    %85 = tpu.matmul %83, %84, %cst_96 {dimension_numbers = #tpu.dot_dimension_numbers<[1], [0], [0], [1], [0, 0, 1, 1], [], []>} : vector<1x2xf32>, vector<2x8xf32>, vector<1x8xf32> -> vector<1x8xf32>
    %c0_97 = arith.constant 0 : index
    %c0_98 = arith.constant 0 : index
    %86 = vector.load %arg9[%c0_97, %c0_98] : memref<1x8xf32, #tpu.memory_space<vmem>>, vector<1x8xf32>
    %87 = arith.addf %85, %86 : vector<1x8xf32>
    %88 = arith.negf %87 : vector<1x8xf32>
    %89 = math.exp %88 : vector<1x8xf32>
    %cst_99 = arith.constant 1.000000e+00 : f32
    %90 = vector.broadcast %cst_99 : f32 to vector<1x8xf32>
    %91 = arith.addf %90, %89 : vector<1x8xf32>
    %92 = arith.divf %90, %91 : vector<1x8xf32>
    %93 = vector.shape_cast %92 : vector<1x8xf32> to vector<1x1x8xf32>
    %94 = vector.broadcast %93 : vector<1x1x8xf32> to vector<16x16x8xf32>
    %95 = arith.mulf %72, %94 : vector<16x16x8xf32>
    %96 = arith.addf %95, %1 : vector<16x16x8xf32>
    %c0_100 = arith.constant 0 : index
    %c0_101 = arith.constant 0 : index
    %c0_102 = arith.constant 0 : index
    %c0_103 = arith.constant 0 : index
    %97 = vector.load %arg10[%c0_100, %c0_101, %c0_102, %c0_103] : memref<1x16x16x8xf32, #tpu.memory_space<vmem>>, vector<1x16x16x8xf32>
    %98 = vector.shape_cast %97 : vector<1x16x16x8xf32> to vector<16x16x8xf32>
    %99 = vector.shape_cast %96 : vector<16x16x8xf32> to vector<1x16x16x8xf32>
    tpu.vector_store %arg10[%c0_100, %c0_101, %c0_102, %c0_103], %99 {strides = array<i32>} : memref<1x16x16x8xf32, #tpu.memory_space<vmem>>, vector<1x16x16x8xf32>,
    return
  }
  func.func @transform_0(%arg0: i32) -> (i32, i32, i32, i32) {
    %c0_i32 = arith.constant 0 : i32
    %c0_i32_0 = arith.constant 0 : i32
    %c0_i32_1 = arith.constant 0 : i32
    %c0_i32_2 = arith.constant 0 : i32
    return %arg0, %c0_i32, %c0_i32_0, %c0_i32_1 : i32, i32, i32, i32
  }
  func.func @transform_1(%arg0: i32) -> (i32, i32) {
    %c0_i32 = arith.constant 0 : i32
    %c0_i32_0 = arith.constant 0 : i32
    %c0_i32_1 = arith.constant 0 : i32
    return %c0_i32, %c0_i32_0 : i32, i32
  }
  func.func @transform_2(%arg0: i32) -> (i32, i32) {
    %c0_i32 = arith.constant 0 : i32
    %c0_i32_0 = arith.constant 0 : i32
    %c0_i32_1 = arith.constant 0 : i32
    return %c0_i32, %c0_i32_0 : i32, i32
  }
  func.func @transform_3(%arg0: i32) -> (i32, i32, i32, i32) {
    %c0_i32 = arith.constant 0 : i32
    %c0_i32_0 = arith.constant 0 : i32
    %c0_i32_1 = arith.constant 0 : i32
    %c0_i32_2 = arith.constant 0 : i32
    %c0_i32_3 = arith.constant 0 : i32
    return %c0_i32, %c0_i32_0, %c0_i32_1, %c0_i32_2 : i32, i32, i32, i32
  }
  func.func @transform_4(%arg0: i32) -> (i32, i32) {
    %c0_i32 = arith.constant 0 : i32
    %c0_i32_0 = arith.constant 0 : i32
    %c0_i32_1 = arith.constant 0 : i32
    return %c0_i32, %c0_i32_0 : i32, i32
  }
  func.func @transform_5(%arg0: i32) -> (i32, i32) {
    %c0_i32 = arith.constant 0 : i32
    %c0_i32_0 = arith.constant 0 : i32
    %c0_i32_1 = arith.constant 0 : i32
    return %c0_i32, %c0_i32_0 : i32, i32
  }
  func.func @transform_6(%arg0: i32) -> (i32, i32) {
    %c0_i32 = arith.constant 0 : i32
    %c0_i32_0 = arith.constant 0 : i32
    %c0_i32_1 = arith.constant 0 : i32
    return %c0_i32, %c0_i32_0 : i32, i32
  }
  func.func @transform_7(%arg0: i32) -> (i32, i32) {
    %c0_i32 = arith.constant 0 : i32
    %c0_i32_0 = arith.constant 0 : i32
    %c0_i32_1 = arith.constant 0 : i32
    return %c0_i32, %c0_i32_0 : i32, i32
  }
  func.func @transform_8(%arg0: i32) -> (i32, i32) {
    %c0_i32 = arith.constant 0 : i32
    %c0_i32_0 = arith.constant 0 : i32
    %c0_i32_1 = arith.constant 0 : i32
    return %c0_i32, %c0_i32_0 : i32, i32
  }
  func.func @transform_9(%arg0: i32) -> (i32, i32, i32, i32) {
    %c0_i32 = arith.constant 0 : i32
    %c0_i32_0 = arith.constant 0 : i32
    %c0_i32_1 = arith.constant 0 : i32
    %c0_i32_2 = arith.constant 0 : i32
    return %arg0, %c0_i32, %c0_i32_0, %c0_i32_1 : i32, i32, i32, i32
  }
}

</mosaic_0001>

<bundles_post_ra>
// kernel: csp_block_forward.4
= control target key start
LH: loop header
LB: loop body
LE: loop exit
PB: predicated region body
PF: predicated region fallthrough
CT: control target
= control target key end

     0   :  { %vm94_vm0 = vcmask 64512   ;;  %s5055_s1 = inlined_call_operand.vmem [shape: f32[8,8], index: 1, kind: input, shape index: {}]   ;;  %s5056_s3 = inlined_call_operand.vmem [shape: f32[8,8], index: 3, kind: input, shape index: {}]   ;;  %s5057_s0 = inlined_call_operand.vmem [shape: f32[512,8], index: 0, kind: input, shape index: {}]   ;;  %s5058_s2 = inlined_call_operand.vmem [shape: f32[1,8], index: 2, kind: input, shape index: {}]   ;;  %s5059_s4 = inlined_call_operand.vmem [shape: f32[1,8], index: 4, kind: input, shape index: {}]   ;;  %s5060_s5 = inlined_call_operand.vmem [shape: f32[512,8], index: 5, kind: output, shape index: {0}]   ;;  %s5061_s6 = inlined_call_operand.vmem [shape: f32[512,8], index: 6, kind: output, shape index: {1}]  }
   0x1   :  { %v86_v0 = vld [vmem:[%s5055_s1] sm:$0xff]  ;;  %v23_v3 = vld [vmem:[%s5057_s0 + $0x8] sm:$0xff]  ;;  %v24_v4 = vld [vmem:[%s5057_s0 + $0x10] sm:$0xff] }
   0x2   :  { %v1184_v1 = vld [vmem:[%s5056_s3] sm:$0xff]  ;;  %2485 = vmatprep.subr.mxu0 %v86_v0  ;;  %v25_v5 = vld [vmem:[%s5057_s0 + $0x18] sm:$0xff]  ;;  %v27_v7 = vld [vmem:[%s5057_s0 + $0x28] sm:$0xff] }
   0x3   :  { %v22_v2 = vld [vmem:[%s5057_s0] sm:$0xff]  ;;  %2583 = vmatprep.subr.mxu1 %v1184_v1  ;;  %2486 = vmatpush3.msra.mxu0 %v86_v0  ;;  %v28_v8 = vld [vmem:[%s5057_s0 + $0x30] sm:$0xff]  ;;  %v29_v9 = vld [vmem:[%s5057_s0 + $0x38] sm:$0xff] }
   0x4   :  { %2487 = vmatprep.mubr.msk.f32.mxu0 %vm94_vm0, %v22_v2  ;;  %2584 = vmatpush3.msra.mxu1 %v1184_v1  ;;  %v26_v6 = vld [vmem:[%s5057_s0 + $0x20] sm:$0xff]  ;;  %v31_v11 = vld [vmem:[%s5057_s0 + $0x48] sm:$0xff]  ;;  %v32_v12 = vld [vmem:[%s5057_s0 + $0x50] sm:$0xff] }
   0x5   :  { %2585 = vmatprep.mubr.msk.f32.mxu1 %vm94_vm0, %v22_v2  ;;  %2488 = vmatmul.mubr.msk.f32.vlgmr.msra.gmra.mrb[0].mxu0 %vm94_vm0, %v23_v3  ;;  %v30_v10 = vld [vmem:[%s5057_s0 + $0x40] sm:$0xff]  ;;  %v33_v13 = vld [vmem:[%s5057_s0 + $0x58] sm:$0xff]  ;;  %v35_v15 = vld [vmem:[%s5057_s0 + $0x68] sm:$0xff] }
   0x6   :  { %2586 = vmatmul.mubr.msk.f32.vlgmr.msra.gmra.mrb[0].mxu1 %vm94_vm0, %v23_v3  ;;  %2490 = vmatprep.mubr.msk.f32.mxu0 %vm94_vm0, %v24_v4  ;;  %v34_v14 = vld [vmem:[%s5057_s0 + $0x60] sm:$0xff]  ;;  %v36_v16 = vld [vmem:[%s5057_s0 + $0x70] sm:$0xff]  ;;  %v37_v17 = vld [vmem:[%s5057_s0 + $0x78] sm:$0xff] }
   0x7   :  { %2588 = vmatprep.mubr.msk.f32.mxu1 %vm94_vm0, %v24_v4  ;;  %v38_v18 = vld [vmem:[%s5057_s0 + $0x80] sm:$0xff]  ;;  %v39_v19 = vld [vmem:[%s5057_s0 + $0x88] sm:$0xff]  ;;  %v40_v20 = vld [vmem:[%s5057_s0 + $0x90] sm:$0xff] }
   0x8   :  { %v41_v21 = vld [vmem:[%s5057_s0 + $0x98] sm:$0xff]  ;;  %v42_v22 = vld [vmem:[%s5057_s0 + $0xa0] sm:$0xff]  ;;  %v43_v23 = vld [vmem:[%s5057_s0 + $0xa8] sm:$0xff] }
   0x9   :  { %2491 = vmatmul.mubr.msk.f32.gmra.mrb[2].mxu0 %vm94_vm0, %v25_v5  ;;  %v44_v24 = vld [vmem:[%s5057_s0 + $0xb0] sm:$0xff]  ;;  %v45_v25 = vld [vmem:[%s5057_s0 + $0xb8] sm:$0xff]  ;;  %v46_v26 = vld [vmem:[%s5057_s0 + $0xc0] sm:$0xff] }
   0xa   :  { %2589 = vmatmul.mubr.msk.f32.gmra.mrb[2].mxu1 %vm94_vm0, %v25_v5  ;;  %2493 = vmatprep.mubr.msk.f32.mxu0 %vm94_vm0, %v26_v6  ;;  %v47_v27 = vld [vmem:[%s5057_s0 + $0xc8] sm:$0xff]  ;;  %v48_v28 = vld [vmem:[%s5057_s0 + $0xd0] sm:$0xff]  ;;  %v49_v29 = vld [vmem:[%s5057_s0 + $0xd8] sm:$0xff] }
   0xb   :  { %2591 = vmatprep.mubr.msk.f32.mxu1 %vm94_vm0, %v26_v6  ;;  %v50_v30 = vld [vmem:[%s5057_s0 + $0xe0] sm:$0xff]  ;;  %v51_v31 = vld [vmem:[%s5057_s0 + $0xe8] sm:$0xff]  ;;  %v52_v32 = vld [vmem:[%s5057_s0 + $0xf0] sm:$0xff] }
   0xc   :  { %v53_v33 = vld [vmem:[%s5057_s0 + $0xf8] sm:$0xff]  ;;  %v54_v34 = vld [vmem:[%s5057_s0 + $0x100] sm:$0xff]  ;;  %v55_v35 = vld [vmem:[%s5057_s0 + $0x108] sm:$0xff] }
   0xd   :  { %2494 = vmatmul.mubr.msk.f32.gmra.mrb[4].mxu0 %vm94_vm0, %v27_v7  ;;  %v56_v36 = vld [vmem:[%s5057_s0 + $0x110] sm:$0xff]  ;;  %v57_v37 = vld [vmem:[%s5057_s0 + $0x118] sm:$0xff]  ;;  %v58_v38 = vld [vmem:[%s5057_s0 + $0x120] sm:$0xff] }
   0xe   :  { %2592 = vmatmul.mubr.msk.f32.gmra.mrb[4].mxu1 %vm94_vm0, %v27_v7  ;;  %2496 = vmatprep.mubr.msk.f32.mxu0 %vm94_vm0, %v28_v8  ;;  %v59_v39 = vld [vmem:[%s5057_s0 + $0x128] sm:$0xff]  ;;  %v60_v40 = vld [vmem:[%s5057_s0 + $0x130] sm:$0xff]  ;;  %v61_v41 = vld [vmem:[%s5057_s0 + $0x138] sm:$0xff] }
   0xf   :  { %2594 = vmatprep.mubr.msk.f32.mxu1 %vm94_vm0, %v28_v8  ;;  %v62_v42 = vld [vmem:[%s5057_s0 + $0x140] sm:$0xff]  ;;  %v63_v43 = vld [vmem:[%s5057_s0 + $0x148] sm:$0xff]  ;;  %v64_v44 = vld [vmem:[%s5057_s0 + $0x150] sm:$0xff] }
  0x10   :  { %v65_v45 = vld [vmem:[%s5057_s0 + $0x158] sm:$0xff]  ;;  %v66_v46 = vld [vmem:[%s5057_s0 + $0x160] sm:$0xff]  ;;  %v67_v47 = vld [vmem:[%s5057_s0 + $0x168] sm:$0xff] }
  0x11   :  { %2497 = vmatmul.mubr.msk.f32.gmra.mrb[6].mxu0 %vm94_vm0, %v29_v9  ;;  %v68_v48 = vld [vmem:[%s5057_s0 + $0x170] sm:$0xff]  ;;  %v69_v49 = vld [vmem:[%s5057_s0 + $0x178] sm:$0xff]  ;;  %v70_v50 = vld [vmem:[%s5057_s0 + $0x180] sm:$0xff] }
  0x12   :  { %2595 = vmatmul.mubr.msk.f32.gmra.mrb[6].mxu1 %vm94_vm0, %v29_v9  ;;  %2499 = vmatprep.mubr.msk.f32.mxu0 %vm94_vm0, %v30_v10  ;;  %v71_v51 = vld [vmem:[%s5057_s0 + $0x188] sm:$0xff]  ;;  %v72_v52 = vld [vmem:[%s5057_s0 + $0x190] sm:$0xff]  ;;  %v73_v53 = vld [vmem:[%s5057_s0 + $0x198] sm:$0xff] }
  0x13   :  { %2597 = vmatprep.mubr.msk.f32.mxu1 %vm94_vm0, %v30_v10  ;;  %v74_v54 = vld [vmem:[%s5057_s0 + $0x1a0] sm:$0xff]  ;;  %v75_v55 = vld [vmem:[%s5057_s0 + $0x1a8] sm:$0xff]  ;;  %v76_v56 = vld [vmem:[%s5057_s0 + $0x1b0] sm:$0xff] }
  0x14   :  { %v77_v57 = vld [vmem:[%s5057_s0 + $0x1b8] sm:$0xff]  ;;  %v78_v58 = vld [vmem:[%s5057_s0 + $0x1c0] sm:$0xff]  ;;  %v79_v59 = vld [vmem:[%s5057_s0 + $0x1c8] sm:$0xff] }
  0x15   :  { %2500 = vmatmul.mubr.msk.f32.gmra.mrb[8].mxu0 %vm94_vm0, %v31_v11  ;;  %v80_v60 = vld [vmem:[%s5057_s0 + $0x1d0] sm:$0xff]  ;;  %v81_v61 = vld [vmem:[%s5057_s0 + $0x1d8] sm:$0xff]  ;;  %v82_v62 = vld [vmem:[%s5057_s0 + $0x1e0] sm:$0xff] }
  0x16   :  { %2598 = vmatmul.mubr.msk.f32.gmra.mrb[8].mxu1 %vm94_vm0, %v31_v11  ;;  %2502 = vmatprep.mubr.msk.f32.mxu0 %vm94_vm0, %v32_v12  ;;  %v83_v63 = vld [vmem:[%s5057_s0 + $0x1e8] sm:$0xff]  ;;  %v84_v0 = vld [vmem:[%s5057_s0 + $0x1f0] sm:$0xff]  ;;  %v85_v1 = vld [vmem:[%s5057_s0 + $0x1f8] sm:$0xff] }
  0x17   :  { %2600 = vmatprep.mubr.msk.f32.mxu1 %vm94_vm0, %v32_v12  ;;  %v3561_v2 = vld [vmem:[%s5058_s2] ss:$0 sm:$0xff] }
  0x18   :  { %v3566_v3 = vld [vmem:[%s5059_s4] ss:$0 sm:$0xff] }
  0x19   :  { %2503 = vmatmul.mubr.msk.f32.gmra.mrb[10].mxu0 %vm94_vm0, %v33_v13 }
  0x1a   :  { %2601 = vmatmul.mubr.msk.f32.gmra.mrb[10].mxu1 %vm94_vm0, %v33_v13  ;;  %2505 = vmatprep.mubr.msk.f32.mxu0 %vm94_vm0, %v34_v14 }
  0x1b   :  { %2603 = vmatprep.mubr.msk.f32.mxu1 %vm94_vm0, %v34_v14 }
  0x1d   :  { %2506 = vmatmul.mubr.msk.f32.gmra.mrb[12].mxu0 %vm94_vm0, %v35_v15 }
  0x1e   :  { %2604 = vmatmul.mubr.msk.f32.gmra.mrb[12].mxu1 %vm94_vm0, %v35_v15  ;;  %2508 = vmatprep.mubr.msk.f32.mxu0 %vm94_vm0, %v36_v16 }
  0x1f   :  { %2606 = vmatprep.mubr.msk.f32.mxu1 %vm94_vm0, %v36_v16 }
  0x21   :  { %2509 = vmatmul.mubr.msk.f32.gmra.mrb[14].mxu0 %vm94_vm0, %v37_v17 }
  0x22   :  { %2607 = vmatmul.mubr.msk.f32.gmra.mrb[14].mxu1 %vm94_vm0, %v37_v17  ;;  %2511 = vmatprep.mubr.msk.f32.mxu0 %vm94_vm0, %v38_v18 }
  0x23   :  { %2609 = vmatprep.mubr.msk.f32.mxu1 %vm94_vm0, %v38_v18 }
  0x25   :  { %2512 = vmatmul.mubr.msk.f32.gmra.mrb[16].mxu0 %vm94_vm0, %v39_v19 }
  0x26   :  { %2610 = vmatmul.mubr.msk.f32.gmra.mrb[16].mxu1 %vm94_vm0, %v39_v19  ;;  %2514 = vmatprep.mubr.msk.f32.mxu0 %vm94_vm0, %v40_v20 }
  0x27   :  { %2612 = vmatprep.mubr.msk.f32.mxu1 %vm94_vm0, %v40_v20 }
  0x29   :  { %2515 = vmatmul.mubr.msk.f32.gmra.mrb[18].mxu0 %vm94_vm0, %v41_v21 }
  0x2a   :  { %2613 = vmatmul.mubr.msk.f32.gmra.mrb[18].mxu1 %vm94_vm0, %v41_v21  ;;  %2517 = vmatprep.mubr.msk.f32.mxu0 %vm94_vm0, %v42_v22 }
  0x2b   :  { %2615 = vmatprep.mubr.msk.f32.mxu1 %vm94_vm0, %v42_v22 }
  0x2d   :  { %2518 = vmatmul.mubr.msk.f32.gmra.mrb[20].mxu0 %vm94_vm0, %v43_v23 }
  0x2e   :  { %2616 = vmatmul.mubr.msk.f32.gmra.mrb[20].mxu1 %vm94_vm0, %v43_v23  ;;  %2520 = vmatprep.mubr.msk.f32.mxu0 %vm94_vm0, %v44_v24 }
  0x2f   :  { %2618 = vmatprep.mubr.msk.f32.mxu1 %vm94_vm0, %v44_v24 }
  0x31   :  { %2521 = vmatmul.mubr.msk.f32.gmra.mrb[22].mxu0 %vm94_vm0, %v45_v25 }
  0x32   :  { %2619 = vmatmul.mubr.msk.f32.gmra.mrb[22].mxu1 %vm94_vm0, %v45_v25  ;;  %2523 = vmatprep.mubr.msk.f32.mxu0 %vm94_vm0, %v46_v26 }
  0x33   :  { %2621 = vmatprep.mubr.msk.f32.mxu1 %vm94_vm0, %v46_v26 }
  0x35   :  { %2524 = vmatmul.mubr.msk.f32.gmra.mrb[24].mxu0 %vm94_vm0, %v47_v27 }
  0x36   :  { %2622 = vmatmul.mubr.msk.f32.gmra.mrb[24].mxu1 %vm94_vm0, %v47_v27  ;;  %2526 = vmatprep.mubr.msk.f32.mxu0 %vm94_vm0, %v48_v28 }
  0x37   :  { %2624 = vmatprep.mubr.msk.f32.mxu1 %vm94_vm0, %v48_v28 }
  0x39   :  { %2527 = vmatmul.mubr.msk.f32.gmra.mrb[26].mxu0 %vm94_vm0, %v49_v29 }
  0x3a   :  { %2625 = vmatmul.mubr.msk.f32.gmra.mrb[26].mxu1 %vm94_vm0, %v49_v29  ;;  %2529 = vmatprep.mubr.msk.f32.mxu0 %vm94_vm0, %v50_v30 }
  0x3b   :  { %2627 = vmatprep.mubr.msk.f32.mxu1 %vm94_vm0, %v50_v30 }
  0x3d   :  { %2530 = vmatmul.mubr.msk.f32.gmra.mrb[28].mxu0 %vm94_vm0, %v51_v31 }
  0x3e   :  { %2628 = vmatmul.mubr.msk.f32.gmra.mrb[28].mxu1 %vm94_vm0, %v51_v31  ;;  %2532 = vmatprep.mubr.msk.f32.mxu0 %vm94_vm0, %v52_v32 }
  0x3f   :  { %2630 = vmatprep.mubr.msk.f32.mxu1 %vm94_vm0, %v52_v32 }
  0x41   :  { %2533 = vmatmul.mubr.msk.f32.gmra.mrb[30].mxu0 %vm94_vm0, %v53_v33 }
  0x42   :  { %2631 = vmatmul.mubr.msk.f32.gmra.mrb[30].mxu1 %vm94_vm0, %v53_v33  ;;  %2535 = vmatprep.mubr.msk.f32.mxu0 %vm94_vm0, %v54_v34 }
  0x43   :  { %2633 = vmatprep.mubr.msk.f32.mxu1 %vm94_vm0, %v54_v34 }
  0x45   :  { %2536 = vmatmul.mubr.msk.f32.gmra.mrb[32].mxu0 %vm94_vm0, %v55_v35 }
  0x46   :  { %2634 = vmatmul.mubr.msk.f32.gmra.mrb[32].mxu1 %vm94_vm0, %v55_v35  ;;  %2538 = vmatprep.mubr.msk.f32.mxu0 %vm94_vm0, %v56_v36 }
  0x47   :  { %2636 = vmatprep.mubr.msk.f32.mxu1 %vm94_vm0, %v56_v36 }
  0x49   :  { %2539 = vmatmul.mubr.msk.f32.gmra.mrb[34].mxu0 %vm94_vm0, %v57_v37 }
  0x4a   :  { %2637 = vmatmul.mubr.msk.f32.gmra.mrb[34].mxu1 %vm94_vm0, %v57_v37  ;;  %2541 = vmatprep.mubr.msk.f32.mxu0 %vm94_vm0, %v58_v38 }
  0x4b   :  { %2639 = vmatprep.mubr.msk.f32.mxu1 %vm94_vm0, %v58_v38 }
  0x4d   :  { %2542 = vmatmul.mubr.msk.f32.gmra.mrb[36].mxu0 %vm94_vm0, %v59_v39 }
  0x4e   :  { %2640 = vmatmul.mubr.msk.f32.gmra.mrb[36].mxu1 %vm94_vm0, %v59_v39  ;;  %2544 = vmatprep.mubr.msk.f32.mxu0 %vm94_vm0, %v60_v40 }
  0x4f   :  { %2642 = vmatprep.mubr.msk.f32.mxu1 %vm94_vm0, %v60_v40 }
  0x51   :  { %2545 = vmatmul.mubr.msk.f32.gmra.mrb[38].mxu0 %vm94_vm0, %v61_v41 }
  0x52   :  { %2643 = vmatmul.mubr.msk.f32.gmra.mrb[38].mxu1 %vm94_vm0, %v61_v41  ;;  %2547 = vmatprep.mubr.msk.f32.mxu0 %vm94_vm0, %v62_v42 }
  0x53   :  { %2645 = vmatprep.mubr.msk.f32.mxu1 %vm94_vm0, %v62_v42 }
  0x55   :  { %2548 = vmatmul.mubr.msk.f32.gmra.mrb[40].mxu0 %vm94_vm0, %v63_v43 }
  0x56   :  { %2646 = vmatmul.mubr.msk.f32.gmra.mrb[40].mxu1 %vm94_vm0, %v63_v43  ;;  %2550 = vmatprep.mubr.msk.f32.mxu0 %vm94_vm0, %v64_v44 }
  0x57   :  { %2648 = vmatprep.mubr.msk.f32.mxu1 %vm94_vm0, %v64_v44 }
  0x59   :  { %2551 = vmatmul.mubr.msk.f32.gmra.mrb[42].mxu0 %vm94_vm0, %v65_v45 }
  0x5a   :  { %2649 = vmatmul.mubr.msk.f32.gmra.mrb[42].mxu1 %vm94_vm0, %v65_v45  ;;  %2553 = vmatprep.mubr.msk.f32.mxu0 %vm94_vm0, %v66_v46 }
  0x5b   :  { %2651 = vmatprep.mubr.msk.f32.mxu1 %vm94_vm0, %v66_v46 }
  0x5d   :  { %2554 = vmatmul.mubr.msk.f32.gmra.mrb[44].mxu0 %vm94_vm0, %v67_v47 }
  0x5e   :  { %2652 = vmatmul.mubr.msk.f32.gmra.mrb[44].mxu1 %vm94_vm0, %v67_v47  ;;  %2556 = vmatprep.mubr.msk.f32.mxu0 %vm94_vm0, %v68_v48 }
  0x5f   :  { %2654 = vmatprep.mubr.msk.f32.mxu1 %vm94_vm0, %v68_v48 }
  0x61   :  { %2557 = vmatmul.mubr.msk.f32.gmra.mrb[46].mxu0 %vm94_vm0, %v69_v49 }
  0x62   :  { %2655 = vmatmul.mubr.msk.f32.gmra.mrb[46].mxu1 %vm94_vm0, %v69_v49  ;;  %2559 = vmatprep.mubr.msk.f32.mxu0 %vm94_vm0, %v70_v50 }
  0x63   :  { %2657 = vmatprep.mubr.msk.f32.mxu1 %vm94_vm0, %v70_v50 }
  0x65   :  { %2560 = vmatmul.mubr.msk.f32.gmra.mrb[48].mxu0 %vm94_vm0, %v71_v51 }
  0x66   :  { %2658 = vmatmul.mubr.msk.f32.gmra.mrb[48].mxu1 %vm94_vm0, %v71_v51  ;;  %2562 = vmatprep.mubr.msk.f32.mxu0 %vm94_vm0, %v72_v52 }
  0x67   :  { %2660 = vmatprep.mubr.msk.f32.mxu1 %vm94_vm0, %v72_v52 }
  0x69   :  { %2563 = vmatmul.mubr.msk.f32.gmra.mrb[50].mxu0 %vm94_vm0, %v73_v53 }
  0x6a   :  { %2661 = vmatmul.mubr.msk.f32.gmra.mrb[50].mxu1 %vm94_vm0, %v73_v53  ;;  %2565 = vmatprep.mubr.msk.f32.mxu0 %vm94_vm0, %v74_v54 }
  0x6b   :  { %2663 = vmatprep.mubr.msk.f32.mxu1 %vm94_vm0, %v74_v54 }
  0x6d   :  { %2566 = vmatmul.mubr.msk.f32.gmra.mrb[52].mxu0 %vm94_vm0, %v75_v55 }
  0x6e   :  { %2664 = vmatmul.mubr.msk.f32.gmra.mrb[52].mxu1 %vm94_vm0, %v75_v55  ;;  %2568 = vmatprep.mubr.msk.f32.mxu0 %vm94_vm0, %v76_v56 }
  0x6f   :  { %2666 = vmatprep.mubr.msk.f32.mxu1 %vm94_vm0, %v76_v56 }
  0x71   :  { %2569 = vmatmul.mubr.msk.f32.gmra.mrb[54].mxu0 %vm94_vm0, %v77_v57 }
  0x72   :  { %2667 = vmatmul.mubr.msk.f32.gmra.mrb[54].mxu1 %vm94_vm0, %v77_v57  ;;  %2571 = vmatprep.mubr.msk.f32.mxu0 %vm94_vm0, %v78_v58 }
  0x73   :  { %2669 = vmatprep.mubr.msk.f32.mxu1 %vm94_vm0, %v78_v58 }
  0x75   :  { %2572 = vmatmul.mubr.msk.f32.gmra.mrb[56].mxu0 %vm94_vm0, %v79_v59 }
  0x76   :  { %2670 = vmatmul.mubr.msk.f32.gmra.mrb[56].mxu1 %vm94_vm0, %v79_v59  ;;  %2574 = vmatprep.mubr.msk.f32.mxu0 %vm94_vm0, %v80_v60 }
  0x77   :  { %2672 = vmatprep.mubr.msk.f32.mxu1 %vm94_vm0, %v80_v60 }
  0x79   :  { %2575 = vmatmul.mubr.msk.f32.gmra.mrb[58].mxu0 %vm94_vm0, %v81_v61 }
  0x7a   :  { %2673 = vmatmul.mubr.msk.f32.gmra.mrb[58].mxu1 %vm94_vm0, %v81_v61  ;;  %2577 = vmatprep.mubr.msk.f32.mxu0 %vm94_vm0, %v82_v62 }
  0x7b   :  { %2675 = vmatprep.mubr.msk.f32.mxu1 %vm94_vm0, %v82_v62 }
  0x7d   :  { %2578 = vmatmul.mubr.msk.f32.gmra.mrb[60].mxu0 %vm94_vm0, %v83_v63 }
  0x7e   :  { %2676 = vmatmul.mubr.msk.f32.gmra.mrb[60].mxu1 %vm94_vm0, %v83_v63  ;;  %2580 = vmatprep.mubr.msk.f32.mxu0 %vm94_vm0, %v84_v0 }
  0x7f   :  { %2678 = vmatprep.mubr.msk.f32.mxu1 %vm94_vm0, %v84_v0 }
  0x81   :  { %2581 = vmatmul.mubr.msk.f32.gmra.mrb[62].mxu0 %vm94_vm0, %v85_v1 }
  0x82   :  { %2679 = vmatmul.mubr.msk.f32.gmra.mrb[62].mxu1 %vm94_vm0, %v85_v1 }
  0xd8   :  { %v2489_v4 = vpop.f32.mrb[0].mxu0 }
  0xd9   :  { %v2587_v5 = vpop.f32.mrb[0].mxu1  ;;  %v3569_v6 = vadd.f32 %v2489_v4, %v3561_v2  ;;  %v353_v8 = vpop.f32.mrb[1].mxu0 }
  0xda   :  { %v3572_v7 = vadd.f32 %v2587_v5, %v3566_v3  ;;  %v1258_v9 = vpop.f32.mrb[1].mxu1  ;;  %v3575_v10 = vadd.f32 %v3561_v2, %v353_v8 }
  0xdb   :  { %v3578_v11 = vadd.f32 %v3566_v3, %v1258_v9  ;;  %v2163_v12 = vmul.f32 -1.442695, %v3569_v6 }
  0xdc   :  { %v2292_v13 = vmul.f32 -1.442695, %v3572_v7  ;;  %v2162_v14 = vmul.f32 -1.442695, %v3575_v10  ;;  %v2492_v16 = vpop.f32.mrb[2].mxu0 }
  0xdd   :  { %v2291_v15 = vmul.f32 -1.442695, %v3578_v11  ;;  %v2590_v17 = vpop.f32.mrb[2].mxu1  ;;  %2681 = vpow2.f32 %v2163_v12  ;;  %v3585_v18 = vadd.f32 %v2492_v16, %v3561_v2  ;;  %v363_v20 = vpop.f32.mrb[3].mxu0 }
  0xde   :  { %v3588_v19 = vadd.f32 %v2590_v17, %v3566_v3  ;;  %v1268_v21 = vpop.f32.mrb[3].mxu1  ;;  %2683 = vpow2.f32 %v2292_v13  ;;  %v3591_v22 = vadd.f32 %v3561_v2, %v363_v20 }
  0xdf   :  { %v3594_v23 = vadd.f32 %v3566_v3, %v1268_v21  ;;  %2685 = vpow2.f32 %v2162_v14  ;;  %v2165_v24 = vmul.f32 -1.442695, %v3585_v18 }
  0xe0   :  { %v2294_v25 = vmul.f32 -1.442695, %v3588_v19  ;;  %2687 = vpow2.f32 %v2291_v15  ;;  %v2164_v26 = vmul.f32 -1.442695, %v3591_v22  ;;  %v2495_v28 = vpop.f32.mrb[4].mxu0 }
  0xe1   :  { %v2293_v27 = vmul.f32 -1.442695, %v3594_v23  ;;  %v2593_v29 = vpop.f32.mrb[4].mxu1  ;;  %2689 = vpow2.f32 %v2165_v24  ;;  %v3601_v30 = vadd.f32 %v2495_v28, %v3561_v2  ;;  %v373_v32 = vpop.f32.mrb[5].mxu0 }
  0xe2   :  { %v3604_v31 = vadd.f32 %v2593_v29, %v3566_v3  ;;  %v1278_v33 = vpop.f32.mrb[5].mxu1  ;;  %2691 = vpow2.f32 %v2294_v25  ;;  %v3607_v34 = vadd.f32 %v3561_v2, %v373_v32 }
  0xe3   :  { %v3610_v35 = vadd.f32 %v3566_v3, %v1278_v33  ;;  %2693 = vpow2.f32 %v2164_v26  ;;  %v2167_v36 = vmul.f32 -1.442695, %v3601_v30 }
  0xe4   :  { %v2296_v37 = vmul.f32 -1.442695, %v3604_v31  ;;  %2695 = vpow2.f32 %v2293_v27  ;;  %v2166_v38 = vmul.f32 -1.442695, %v3607_v34  ;;  %v2498_v40 = vpop.f32.mrb[6].mxu0 }
  0xe5   :  { %v2295_v39 = vmul.f32 -1.442695, %v3610_v35  ;;  %v2596_v41 = vpop.f32.mrb[6].mxu1  ;;  %2697 = vpow2.f32 %v2167_v36  ;;  %v3617_v42 = vadd.f32 %v2498_v40, %v3561_v2  ;;  %v383_v43 = vpop.f32.mrb[7].mxu0 }
  0xe6   :  { %v1288_v44 = vpop.f32.mrb[7].mxu1  ;;  %2699 = vpow2.f32 %v2296_v37  ;;  %v3623_v13 = vadd.f32 %v2596_v41, %v3566_v3  ;;  %v3626_v16 = vadd.f32 %v3561_v2, %v383_v43 }
  0xe7   :  { %v2682_v45 = vpop.eup %2681  ;;  %2701 = vpow2.f32 %v2166_v38  ;;  %v2169_v46 = vmul.f32 -1.442695, %v3617_v42  ;;  %v3631_v24 = vadd.f32 %v3566_v3, %v1288_v44 }
  0xe8   :  { %v2684_v47 = vpop.eup %2683  ;;  %v865_v48 = vadd.f32 1.0, %v2682_v45  ;;  %2703 = vpow2.f32 %v2295_v39  ;;  %v2501_v49 = vpop.f32.mrb[8].mxu0  ;;  %v2298_v37 = vmul.f32 -1.442695, %v3623_v13  ;;  %v2168_v41 = vmul.f32 -1.442695, %v3626_v16 }
  0xe9   :  { %v2686_v50 = vpop.eup %2685  ;;  %v1770_v51 = vadd.f32 1.0, %v2684_v47  ;;  %2705 = vpow2.f32 %v2169_v46  ;;  %v2599_v52 = vpop.f32.mrb[8].mxu1  ;;  %v3638_v29 = vadd.f32 %v2501_v49, %v3561_v2  ;;  %v2297_v47 = vmul.f32 -1.442695, %v3631_v24 }
  0xea   :  { %v393_v53 = vpop.f32.mrb[9].mxu0  ;;  %v2688_v54 = vpop.eup %2687  ;;  %2707 = vrcp.f32 %v865_v48  ;;  %v864_v55 = vadd.f32 1.0, %v2686_v50  ;;  %v3644_v38 = vadd.f32 %v2599_v52, %v3566_v3 }
  0xeb   :  { %v1298_v56 = vpop.f32.mrb[9].mxu1  ;;  %v2690_v57 = vpop.eup %2689  ;;  %2709 = vrcp.f32 %v1770_v51  ;;  %v1769_v58 = vadd.f32 1.0, %v2688_v54  ;;  %v3648_v43 = vadd.f32 %v3561_v2, %v393_v53  ;;  %v2171_v53 = vmul.f32 -1.442695, %v3638_v29 }
  0xec   :  { %v2692_v59 = vpop.eup %2691  ;;  %2711 = vrcp.f32 %v864_v55  ;;  %v867_v60 = vadd.f32 1.0, %v2690_v57  ;;  %v2504_v61 = vpop.f32.mrb[10].mxu0  ;;  %v3655_v48 = vadd.f32 %v3566_v3, %v1298_v56  ;;  %v2300_v57 = vmul.f32 -1.442695, %v3644_v38 }
  0xed   :  { %v2694_v62 = vpop.eup %2693  ;;  %2713 = vrcp.f32 %v1769_v58  ;;  %v1772_v63 = vadd.f32 1.0, %v2692_v59  ;;  %v2602_v0 = vpop.f32.mrb[10].mxu1  ;;  %v3664_v54 = vadd.f32 %v2504_v61, %v3561_v2 }
  0xee   :  { %v403_v1 = vpop.f32.mrb[11].mxu0  ;;  %v2696_v4 = vpop.eup %2695  ;;  %2715 = vrcp.f32 %v867_v60  ;;  %v866_v5 = vadd.f32 1.0, %v2694_v62  ;;  %v2170_v60 = vmul.f32 -1.442695, %v3648_v43 }
  0xef   :  { %v3620_v8 = vpop.f32.mrb[11].mxu1  ;;  %v2698_v9 = vpop.eup %2697  ;;  %2717 = vrcp.f32 %v1772_v63  ;;  %v1771_v12 = vadd.f32 1.0, %v2696_v4  ;;  %v3684_v61 = vadd.f32 %v3561_v2, %v403_v1 }
  0xf0   :  { %v2700_v14 = vpop.eup %2699  ;;  %2719 = vrcp.f32 %v866_v5  ;;  %v869_v15 = vadd.f32 1.0, %v2698_v9  ;;  %v3628_v17 = vpop.f32.mrb[12].mxu0  ;;  %v3698_v4 = vadd.f32 %v3566_v3, %v3620_v8 }
  0xf1   :  { %v2702_v20 = vpop.eup %2701  ;;  %2721 = vrcp.f32 %v1771_v12  ;;  %v1774_v21 = vadd.f32 1.0, %v2700_v14  ;;  %v3633_v25 = vpop.f32.mrb[12].mxu1  ;;  %v3712_v14 = vadd.f32 %v3628_v17, %v3561_v2 }
  0xf2   :  { %v3635_v26 = vpop.f32.mrb[13].mxu0  ;;  %v2704_v27 = vpop.eup %2703  ;;  %2723 = vrcp.f32 %v869_v15  ;;  %v868_v28 = vadd.f32 1.0, %v2702_v20 }
  0xf3   :  { %v3640_v32 = vpop.f32.mrb[13].mxu1  ;;  %v2706_v33 = vpop.eup %2705  ;;  %2725 = vrcp.f32 %v1774_v21  ;;  %v1773_v36 = vadd.f32 1.0, %v2704_v27  ;;  %v2172_v27 = vmul.f32 -1.442695, %v3684_v61 }
  0xf4   :  { %v2708_v39 = vpop.eup %2707  ;;  %2727 = vrcp.f32 %v868_v28  ;;  %v871_v40 = vadd.f32 1.0, %v2706_v33  ;;  %v3650_v44 = vpop.f32.mrb[14].mxu0 }
  0xf5   :  { %v2710_v45 = vpop.eup %2709  ;;  %v1057_v46 = vmul.f32 %v2708_v39, %v3569_v6  ;;  %2729 = vrcp.f32 %v1773_v36  ;;  %v3657_v49 = vpop.f32.mrb[14].mxu1  ;;  %v2301_v36 = vmul.f32 -1.442695, %v3698_v4 }
  0xf6   :  { %v3659_v50 = vpop.f32.mrb[15].mxu0  ;;  %v2712_v51 = vpop.eup %2711  ;;  %v1962_v52 = vmul.f32 %v2710_v45, %v3572_v7  ;;  %2731 = vrcp.f32 %v871_v40  ;;  %v3675_v7 = vadd.f32 %v2602_v0, %v3566_v3 }
  0xf7   :  { %v3666_v6 = vpop.f32.mrb[15].mxu1  ;;  %v2714_v55 = vpop.eup %2713  ;;  %1121 = vst.msk [vmem:[%s5060_s5 + $0x8] sm:$0xff] %vm94_vm0, %v1057_v46  ;;  %v1056_v56 = vmul.f32 %v2712_v51, %v3575_v10  ;;  %2733 = vpow2.f32 %v2298_v37 }
  0xf8   :  { %v2716_v58 = vpop.eup %2715  ;;  %2026 = vst.msk [vmem:[%s5061_s6 + $0x8] sm:$0xff] %vm94_vm0, %v1962_v52  ;;  %v1961_v59 = vmul.f32 %v2714_v55, %v3578_v11  ;;  %2735 = vpow2.f32 %v2168_v41  ;;  %v3686_v10 = vpop.f32.mrb[16].mxu0  ;;  %v2299_v11 = vmul.f32 -1.442695, %v3655_v48  ;;  %v2302_v20 = vmul.f32 -1.442695, %v3675_v7 }
  0xf9   :  { %v3688_v62 = vpop.f32.mrb[16].mxu1  ;;  %v2718_v63 = vpop.eup %2717  ;;  %1120 = vst.msk [vmem:[%s5060_s5] sm:$0xff] %vm94_vm0, %v1056_v56  ;;  %v1059_v0 = vmul.f32 %v2716_v58, %v3585_v18  ;;  %2737 = vpow2.f32 %v2297_v47  ;;  %v2173_v18 = vmul.f32 -1.442695, %v3664_v54  ;;  %v2175_v41 = vmul.f32 -1.442695, %v3712_v14 }
  0xfa   :  { %v3700_v1 = vpop.f32.mrb[17].mxu0  ;;  %v3702_v5 = vpop.f32.mrb[17].mxu1  ;;  %2025 = vst.msk [vmem:[%s5061_s6] sm:$0xff] %vm94_vm0, %v1961_v59  ;;  %v1964_v12 = vmul.f32 %v2718_v63, %v3588_v19  ;;  %2739 = vpow2.f32 %v2171_v53  ;;  %v3722_v19 = vadd.f32 %v3633_v25, %v3566_v3 }
  0xfb   :  { %v2720_v9 = vpop.eup %2719  ;;  %1123 = vst.msk [vmem:[%s5060_s5 + $0x18] sm:$0xff] %vm94_vm0, %v1059_v0  ;;  %2741 = vpow2.f32 %v2300_v57 }
  0xfc   :  { %v2722_v8 = vpop.eup %2721  ;;  %v1058_v15 = vmul.f32 %v2720_v9, %v3591_v22  ;;  %2028 = vst.msk [vmem:[%s5061_s6 + $0x18] sm:$0xff] %vm94_vm0, %v1964_v12  ;;  %2743 = vpow2.f32 %v2170_v60  ;;  %v3730_v28 = vpop.f32.mrb[18].mxu0  ;;  %v2304_v46 = vmul.f32 -1.442695, %v3722_v19 }
  0xfd   :  { %v2724_v21 = vpop.eup %2723  ;;  %v1963_v17 = vmul.f32 %v2722_v8, %v3594_v23  ;;  %v3732_v22 = vpop.f32.mrb[18].mxu1  ;;  %2745 = vpow2.f32 %v2299_v11 }
  0xfe   :  { %v2726_v33 = vpop.eup %2725  ;;  %1122 = vst.msk [vmem:[%s5060_s5 + $0x10] sm:$0xff] %vm94_vm0, %v1058_v15  ;;  %v1061_v25 = vmul.f32 %v2724_v21, %v3601_v30  ;;  %v3740_v37 = vpop.f32.mrb[19].mxu0  ;;  %2747 = vpow2.f32 %v2173_v18 }
  0xff   :  { %v3742_v23 = vpop.f32.mrb[19].mxu1  ;;  %v2728_v39 = vpop.eup %2727  ;;  %2027 = vst.msk [vmem:[%s5061_s6 + $0x10] sm:$0xff] %vm94_vm0, %v1963_v17  ;;  %v1966_v40 = vmul.f32 %v2726_v33, %v3604_v31  ;;  %2749 = vpow2.f32 %v2302_v20 }
 0x100   :  { %v2730_v45 = vpop.eup %2729  ;;  %1125 = vst.msk [vmem:[%s5060_s5 + $0x28] sm:$0xff] %vm94_vm0, %v1061_v25  ;;  %v1060_v30 = vmul.f32 %v2728_v39, %v3607_v34  ;;  %2751 = vpow2.f32 %v2172_v27  ;;  %v3761_v51 = vpop.f32.mrb[20].mxu0  ;;  %v3794_v39 = vadd.f32 %v3561_v2, %v3635_v26  ;;  %v3808_v26 = vadd.f32 %v3650_v44, %v3561_v2 }
 0x101   :  { %v2732_v47 = vpop.eup %2731  ;;  %2030 = vst.msk [vmem:[%s5061_s6 + $0x28] sm:$0xff] %vm94_vm0, %v1966_v40  ;;  %v1965_v31 = vmul.f32 %v2730_v45, %v3610_v35  ;;  %v3763_v52 = vpop.f32.mrb[20].mxu1  ;;  %2753 = vpow2.f32 %v2301_v36 }
 0x102   :  { %v2734_v53 = vpop.eup %2733  ;;  %1124 = vst.msk [vmem:[%s5060_s5 + $0x20] sm:$0xff] %vm94_vm0, %v1060_v30  ;;  %v1063_v34 = vmul.f32 %v2732_v47, %v3617_v42  ;;  %v3770_v55 = vpop.f32.mrb[21].mxu0  ;;  %2755 = vpow2.f32 %v2175_v41 }
 0x103   :  { %v3772_v56 = vpop.f32.mrb[21].mxu1  ;;  %v2736_v57 = vpop.eup %2735  ;;  %2029 = vst.msk [vmem:[%s5061_s6 + $0x20] sm:$0xff] %vm94_vm0, %v1965_v31  ;;  %v1776_v35 = vadd.f32 1.0, %v2734_v53  ;;  %2757 = vpow2.f32 %v2304_v46  ;;  %v3802_v46 = vadd.f32 %v3566_v3, %v3640_v32 }
 0x104   :  { %v2738_v58 = vpop.eup %2737  ;;  %1127 = vst.msk [vmem:[%s5060_s5 + $0x38] sm:$0xff] %vm94_vm0, %v1063_v34  ;;  %v870_v42 = vadd.f32 1.0, %v2736_v57  ;;  %v3782_v63 = vpop.f32.mrb[22].mxu0 }
 0x105   :  { %v2740_v59 = vpop.eup %2739  ;;  %2759 = vrcp.f32 %v1776_v35  ;;  %v1775_v60 = vadd.f32 1.0, %v2738_v58  ;;  %v3784_v9 = vpop.f32.mrb[22].mxu1  ;;  %v3812_v35 = vadd.f32 %v3657_v49, %v3566_v3  ;;  %v2303_v49 = vmul.f32 -1.442695, %v3802_v46 }
 0x106   :  { %v2742_v0 = vpop.eup %2741  ;;  %2761 = vrcp.f32 %v870_v42  ;;  %v873_v11 = vadd.f32 1.0, %v2740_v59  ;;  %v3786_v12 = vpop.f32.mrb[23].mxu0  ;;  %v2174_v59 = vmul.f32 -1.442695, %v3794_v39 }
 0x107   :  { %v2744_v18 = vpop.eup %2743  ;;  %2763 = vrcp.f32 %v1775_v60  ;;  %v1778_v8 = vadd.f32 1.0, %v2742_v0  ;;  %v3788_v15 = vpop.f32.mrb[23].mxu1  ;;  %v3819_v60 = vadd.f32 %v3561_v2, %v3659_v50  ;;  %v2177_v50 = vmul.f32 -1.442695, %v3808_v26 }
 0x108   :  { %v2746_v20 = vpop.eup %2745  ;;  %2765 = vrcp.f32 %v873_v11  ;;  %v872_v21 = vadd.f32 1.0, %v2744_v18  ;;  %v3790_v33 = vpop.f32.mrb[24].mxu0 }
 0x109   :  { %v2748_v17 = vpop.eup %2747  ;;  %2767 = vrcp.f32 %v1778_v8  ;;  %v1777_v27 = vadd.f32 1.0, %v2746_v20  ;;  %v3796_v40 = vpop.f32.mrb[24].mxu1  ;;  %v3828_v8 = vadd.f32 %v3566_v3, %v3666_v6  ;;  %v3842_v6 = vadd.f32 %v3688_v62, %v3566_v3 }
 0x10a   :  { %v2750_v25 = vpop.eup %2749  ;;  %2769 = vrcp.f32 %v872_v21  ;;  %v875_v36 = vadd.f32 1.0, %v2748_v17  ;;  %v3798_v41 = vpop.f32.mrb[25].mxu0 }
 0x10b   :  { %v2752_v45 = vpop.eup %2751  ;;  %2771 = vrcp.f32 %v1777_v27  ;;  %v1780_v30 = vadd.f32 1.0, %v2750_v25  ;;  %v3804_v47 = vpop.f32.mrb[25].mxu1  ;;  %v3836_v27 = vadd.f32 %v3686_v10, %v3561_v2 }
 0x10c   :  { %v2754_v31 = vpop.eup %2753  ;;  %2773 = vrcp.f32 %v875_v36  ;;  %v874_v53 = vadd.f32 1.0, %v2752_v45  ;;  %v3814_v58 = vpop.f32.mrb[26].mxu0  ;;  %v2306_v45 = vmul.f32 -1.442695, %v3812_v35 }
 0x10d   :  { %v2756_v34 = vpop.eup %2755  ;;  %2775 = vrcp.f32 %v1780_v30  ;;  %v1779_v57 = vadd.f32 1.0, %v2754_v31  ;;  %v3821_v44 = vpop.f32.mrb[26].mxu1 }
 0x10e   :  { %v2758_v32 = vpop.eup %2757  ;;  %2777 = vrcp.f32 %v874_v53  ;;  %v877_v42 = vadd.f32 1.0, %v2756_v34  ;;  %v3823_v0 = vpop.f32.mrb[27].mxu0  ;;  %v3856_v53 = vadd.f32 %v3561_v2, %v3700_v1 }
 0x10f   :  { %v2760_v11 = vpop.eup %2759  ;;  %2779 = vrcp.f32 %v1779_v57  ;;  %v1782_v18 = vadd.f32 1.0, %v2758_v32  ;;  %v3830_v20 = vpop.f32.mrb[27].mxu1 }
 0x110   :  { %v2762_v21 = vpop.eup %2761  ;;  %v1968_v17 = vmul.f32 %v2760_v11, %v3623_v13  ;;  %2781 = vrcp.f32 %v877_v42  ;;  %v3844_v30 = vpop.f32.mrb[28].mxu0  ;;  %v3870_v42 = vadd.f32 %v3566_v3, %v3702_v5  ;;  %v2179_v11 = vmul.f32 -1.442695, %v3836_v27 }
 0x111   :  { %v2764_v25 = vpop.eup %2763  ;;  %v1062_v36 = vmul.f32 %v2762_v21, %v3626_v16  ;;  %2783 = vrcp.f32 %v1782_v18  ;;  %v3846_v13 = vpop.f32.mrb[28].mxu1  ;;  %v2176_v16 = vmul.f32 -1.442695, %v3819_v60 }
 0x112   :  { %v2766_v31 = vpop.eup %2765  ;;  %2032 = vst.msk [vmem:[%s5061_s6 + $0x38] sm:$0xff] %vm94_vm0, %v1968_v17  ;;  %v1967_v10 = vmul.f32 %v2764_v25, %v3631_v24  ;;  %2785 = vpow2.f32 %v2174_v59  ;;  %v3858_v62 = vpop.f32.mrb[29].mxu0  ;;  %v2305_v24 = vmul.f32 -1.442695, %v3828_v8  ;;  %v3904_v25 = vadd.f32 %v3561_v2, %v3740_v37 }
 0x113   :  { %v3860_v34 = vpop.f32.mrb[29].mxu1  ;;  %v2768_v57 = vpop.eup %2767  ;;  %1126 = vst.msk [vmem:[%s5060_s5 + $0x30] sm:$0xff] %vm94_vm0, %v1062_v36  ;;  %v1065_v32 = vmul.f32 %v2766_v31, %v3638_v29  ;;  %2787 = vpow2.f32 %v2303_v49  ;;  %v3880_v29 = vadd.f32 %v3730_v28, %v3561_v2  ;;  %v2308_v49 = vmul.f32 -1.442695, %v3842_v6 }
 0x114   :  { %v2770_v1 = vpop.eup %2769  ;;  %2031 = vst.msk [vmem:[%s5061_s6 + $0x30] sm:$0xff] %vm94_vm0, %v1967_v10  ;;  %v1970_v59 = vmul.f32 %v2768_v57, %v3644_v38  ;;  %2789 = vpow2.f32 %v2177_v50  ;;  %v3890_v38 = vadd.f32 %v3732_v22, %v3566_v3  ;;  %v3892_v21 = vpop.f32.mrb[30].mxu0 }
 0x115   :  { %v2772_v18 = vpop.eup %2771  ;;  %1129 = vst.msk [vmem:[%s5060_s5 + $0x48] sm:$0xff] %vm94_vm0, %v1065_v32  ;;  %v1064_v5 = vmul.f32 %v2770_v1, %v3648_v43  ;;  %2791 = vpow2.f32 %v2306_v45  ;;  %v3894_v17 = vpop.f32.mrb[30].mxu1  ;;  %v2178_v43 = vmul.f32 -1.442695, %v3856_v53 }
 0x116   :  { %v2774_v28 = vpop.eup %2773  ;;  %2034 = vst.msk [vmem:[%s5061_s6 + $0x48] sm:$0xff] %vm94_vm0, %v1970_v59  ;;  %v1969_v50 = vmul.f32 %v2772_v18, %v3655_v48  ;;  %2793 = vpow2.f32 %v2176_v16  ;;  %v3906_v22 = vpop.f32.mrb[31].mxu0  ;;  %v2307_v48 = vmul.f32 -1.442695, %v3870_v42  ;;  %v2181_v16 = vmul.f32 -1.442695, %v3880_v29 }
 0x117   :  { %v3908_v36 = vpop.f32.mrb[31].mxu1  ;;  %v2776_v45 = vpop.eup %2775  ;;  %1128 = vst.msk [vmem:[%s5060_s5 + $0x40] sm:$0xff] %vm94_vm0, %v1064_v5  ;;  %v1067_v31 = vmul.f32 %v2774_v28, %v3664_v54  ;;  %2795 = vpow2.f32 %v2305_v24  ;;  %v2310_v32 = vmul.f32 -1.442695, %v3890_v38 }
 0x118   :  { %v2778_v10 = vpop.eup %2777  ;;  %2033 = vst.msk [vmem:[%s5061_s6 + $0x40] sm:$0xff] %vm94_vm0, %v1969_v50  ;;  %v1972_v37 = vmul.f32 %v2776_v45, %v3675_v7  ;;  %2797 = vpow2.f32 %v2179_v11  ;;  %v3928_v24 = vpop.f32.mrb[32].mxu0  ;;  %v2180_v11 = vmul.f32 -1.442695, %v3904_v25 }
 0x119   :  { %v2780_v57 = vpop.eup %2779  ;;  %1131 = vst.msk [vmem:[%s5060_s5 + $0x58] sm:$0xff] %vm94_vm0, %v1067_v31  ;;  %v1066_v54 = vmul.f32 %v2778_v10, %v3684_v61  ;;  %2799 = vpow2.f32 %v2308_v49  ;;  %v3930_v1 = vpop.f32.mrb[32].mxu1 }
 0x11a   :  { %v2782_v59 = vpop.eup %2781  ;;  %2036 = vst.msk [vmem:[%s5061_s6 + $0x58] sm:$0xff] %vm94_vm0, %v1972_v37  ;;  %v1971_v7 = vmul.f32 %v2780_v57, %v3698_v4  ;;  %2801 = vpow2.f32 %v2178_v43  ;;  %v3938_v18 = vpop.f32.mrb[33].mxu0 }
 0x11b   :  { %v3940_v61 = vpop.f32.mrb[33].mxu1  ;;  %v2784_v5 = vpop.eup %2783  ;;  %1130 = vst.msk [vmem:[%s5060_s5 + $0x50] sm:$0xff] %vm94_vm0, %v1066_v54  ;;  %v1069_v49 = vmul.f32 %v2782_v59, %v3712_v14  ;;  %2803 = vpow2.f32 %v2307_v48 }
 0x11c   :  { %v2786_v28 = vpop.eup %2785  ;;  %2035 = vst.msk [vmem:[%s5061_s6 + $0x50] sm:$0xff] %vm94_vm0, %v1971_v7  ;;  %v1974_v4 = vmul.f32 %v2784_v5, %v3722_v19  ;;  %2805 = vpow2.f32 %v2181_v16  ;;  %v3956_v45 = vpop.f32.mrb[34].mxu0 }
 0x11d   :  { %v2788_v50 = vpop.eup %2787  ;;  %1133 = vst.msk [vmem:[%s5060_s5 + $0x68] sm:$0xff] %vm94_vm0, %v1069_v49  ;;  %v876_v43 = vadd.f32 1.0, %v2786_v28  ;;  %2807 = vpow2.f32 %v2310_v32  ;;  %v3962_v19 = vpop.f32.mrb[34].mxu1 }
 0x11e   :  { %v2790_v14 = vpop.eup %2789  ;;  %2038 = vst.msk [vmem:[%s5061_s6 + $0x68] sm:$0xff] %vm94_vm0, %v1974_v4  ;;  %v1781_v31 = vadd.f32 1.0, %v2788_v50  ;;  %2809 = vpow2.f32 %v2180_v11  ;;  %v3964_v48 = vpop.f32.mrb[35].mxu0 }
 0x11f   :  { %v2792_v10 = vpop.eup %2791  ;;  %2811 = vrcp.f32 %v876_v43  ;;  %v879_v37 = vadd.f32 1.0, %v2790_v14  ;;  %v3966_v16 = vpop.f32.mrb[35].mxu1 }
 0x120   :  { %v2794_v57 = vpop.eup %2793  ;;  %2813 = vrcp.f32 %v1781_v31  ;;  %v1784_v54 = vadd.f32 1.0, %v2792_v10  ;;  %v3968_v7 = vpop.f32.mrb[36].mxu0  ;;  %v3978_v10 = vadd.f32 %v3566_v3, %v3742_v23 }
 0x121   :  { %v2796_v32 = vpop.eup %2795  ;;  %2815 = vrcp.f32 %v879_v37  ;;  %v878_v59 = vadd.f32 1.0, %v2794_v57  ;;  %v3970_v49 = vpop.f32.mrb[36].mxu1 }
 0x122   :  { %v2798_v5 = vpop.eup %2797  ;;  %2817 = vrcp.f32 %v1784_v54  ;;  %v1783_v11 = vadd.f32 1.0, %v2796_v32  ;;  %v3972_v28 = vpop.f32.mrb[37].mxu0  ;;  %v3982_v54 = vadd.f32 %v3761_v51, %v3561_v2  ;;  %v3996_v51 = vadd.f32 %v3561_v2, %v3770_v55 }
 0x123   :  { %5062 = vst [vmem:[#allocation2_spill] sm:$0xff] %v3972_v28  ;;  %v2800_v4 = vpop.eup %2799  ;;  %2819 = vrcp.f32 %v878_v59  ;;  %v881_v50 = vadd.f32 1.0, %v2798_v5  ;;  %v3974_v43 = vpop.f32.mrb[37].mxu1  ;;  %v4008_v55 = vadd.f32 %v3782_v63, %v3561_v2 }
 0x124   :  { %5063 = vst [vmem:[#allocation3_spill] sm:$0xff] %v3974_v43  ;;  %v2802_v14 = vpop.eup %2801  ;;  %2821 = vrcp.f32 %v1783_v11  ;;  %v1786_v31 = vadd.f32 1.0, %v2800_v4  ;;  %v3984_v32 = vpop.f32.mrb[38].mxu0  ;;  %v3988_v11 = vadd.f32 %v3763_v52, %v3566_v3  ;;  %v4003_v52 = vadd.f32 %v3566_v3, %v3772_v56 }
 0x125   :  { %v2804_v37 = vpop.eup %2803  ;;  %2823 = vrcp.f32 %v881_v50  ;;  %v880_v57 = vadd.f32 1.0, %v2802_v14  ;;  %5064 = vst [vmem:[#allocation4_spill] sm:$0xff] %v3984_v32  ;;  %v3990_v4 = vpop.f32.mrb[38].mxu1  ;;  %v4016_v56 = vadd.f32 %v3784_v9, %v3566_v3 }
 0x126   :  { %v2806_v59 = vpop.eup %2805  ;;  %2825 = vrcp.f32 %v1786_v31  ;;  %v1785_v5 = vadd.f32 1.0, %v2804_v37  ;;  %5065 = vst [vmem:[#allocation5_spill] sm:$0xff] %v3990_v4  ;;  %v3992_v23 = vpop.f32.mrb[39].mxu0  ;;  %v2309_v37 = vmul.f32 -1.442695, %v3978_v10 }
 0x127   :  { %5066 = vst [vmem:[#allocation6_spill] sm:$0xff] %v3992_v23  ;;  %v2808_v43 = vpop.eup %2807  ;;  %2827 = vrcp.f32 %v880_v57  ;;  %v883_v50 = vadd.f32 1.0, %v2806_v59  ;;  %v3998_v14 = vpop.f32.mrb[39].mxu1  ;;  %v2183_v57 = vmul.f32 -1.442695, %v3982_v54 }
 0x128   :  { %5067 = vst [vmem:[#allocation7_spill] sm:$0xff] %v3998_v14  ;;  %v2810_v32 = vpop.eup %2809  ;;  %2829 = vrcp.f32 %v1785_v5  ;;  %v1788_v31 = vadd.f32 1.0, %v2808_v43  ;;  %v4010_v59 = vpop.f32.mrb[40].mxu0  ;;  %v2312_v5 = vmul.f32 -1.442695, %v3988_v11 }
 0x129   :  { %v2812_v4 = vpop.eup %2811  ;;  %2831 = vrcp.f32 %v883_v50  ;;  %v882_v23 = vadd.f32 1.0, %v2810_v32  ;;  %5068 = vst [vmem:[#allocation8_spill] sm:$0xff] %v4010_v59  ;;  %v4018_v50 = vpop.f32.mrb[40].mxu1  ;;  %v2182_v59 = vmul.f32 -1.442695, %v3996_v51 }
 0x12a   :  { %v2814_v14 = vpop.eup %2813  ;;  %v1068_v43 = vmul.f32 %v2812_v4, %v3794_v39  ;;  %2833 = vrcp.f32 %v1788_v31  ;;  %v4020_v32 = vpop.f32.mrb[41].mxu0  ;;  %v4026_v39 = vadd.f32 %v3561_v2, %v3786_v12 }
 0x12b   :  { %v2816_v28 = vpop.eup %2815  ;;  %v1973_v63 = vmul.f32 %v2814_v14, %v3802_v46  ;;  %2835 = vrcp.f32 %v882_v23  ;;  %v4028_v4 = vpop.f32.mrb[41].mxu1  ;;  %v2311_v46 = vmul.f32 -1.442695, %v4003_v52  ;;  %v4038_v23 = vadd.f32 %v3566_v3, %v3788_v15 }
 0x12c   :  { %v2818_v31 = vpop.eup %2817  ;;  %1132 = vst.msk [vmem:[%s5060_s5 + $0x60] sm:$0xff] %vm94_vm0, %v1068_v43  ;;  %v1071_v9 = vmul.f32 %v2816_v28, %v3808_v26  ;;  %2837 = vpow2.f32 %v2309_v37  ;;  %v2185_v43 = vmul.f32 -1.442695, %v4008_v55  ;;  %v4048_v26 = vadd.f32 %v3790_v33, %v3561_v2  ;;  %v4050_v28 = vpop.f32.mrb[42].mxu0 }
 0x12d   :  { %v2820_v14 = vpop.eup %2819  ;;  %2037 = vst.msk [vmem:[%s5061_s6 + $0x60] sm:$0xff] %vm94_vm0, %v1973_v63  ;;  %v1976_v12 = vmul.f32 %v2818_v31, %v3812_v35  ;;  %2839 = vpow2.f32 %v2183_v57  ;;  %v4052_v37 = vpop.f32.mrb[42].mxu1  ;;  %v2314_v35 = vmul.f32 -1.442695, %v4016_v56  ;;  %v4062_v57 = vadd.f32 %v3796_v40, %v3566_v3 }
 0x12e   :  { %5069 = vst [vmem:[#allocation9_spill] sm:$0xff] %v4052_v37  ;;  %v2822_v15 = vpop.eup %2821  ;;  %1135 = vst.msk [vmem:[%s5060_s5 + $0x78] sm:$0xff] %vm94_vm0, %v1071_v9  ;;  %v1070_v63 = vmul.f32 %v2820_v14, %v3819_v60  ;;  %2841 = vpow2.f32 %v2312_v5  ;;  %v4064_v33 = vpop.f32.mrb[43].mxu0  ;;  %v2184_v60 = vmul.f32 -1.442695, %v4026_v39  ;;  %v4076_v5 = vadd.f32 %v3561_v2, %v3798_v41 }
 0x12f   :  { %v4066_v31 = vpop.f32.mrb[43].mxu1  ;;  %v2824_v37 = vpop.eup %2823  ;;  %2040 = vst.msk [vmem:[%s5061_s6 + $0x78] sm:$0xff] %vm94_vm0, %v1976_v12  ;;  %v1975_v9 = vmul.f32 %v2822_v15, %v3828_v8  ;;  %2843 = vpow2.f32 %v2182_v59  ;;  %v2313_v12 = vmul.f32 -1.442695, %v4038_v23  ;;  %v4086_v8 = vadd.f32 %v3566_v3, %v3804_v47 }
 0x130   :  { %v2826_v40 = vpop.eup %2825  ;;  %1134 = vst.msk [vmem:[%s5060_s5 + $0x70] sm:$0xff] %vm94_vm0, %v1070_v63  ;;  %v1073_v14 = vmul.f32 %v2824_v37, %v3836_v27  ;;  %2845 = vpow2.f32 %v2311_v46  ;;  %v2187_v41 = vmul.f32 -1.442695, %v4048_v26  ;;  %v4094_v15 = vpop.f32.mrb[44].mxu0  ;;  %v2316_v47 = vmul.f32 -1.442695, %v4062_v57 }
 0x131   :  { %v2828_v59 = vpop.eup %2827  ;;  %2039 = vst.msk [vmem:[%s5061_s6 + $0x70] sm:$0xff] %vm94_vm0, %v1975_v9  ;;  %v1978_v2 = vmul.f32 %v2826_v40, %v3842_v6  ;;  %2847 = vpow2.f32 %v2185_v43  ;;  %v4096_v27 = vpop.f32.mrb[44].mxu1  ;;  %v2186_v9 = vmul.f32 -1.442695, %v4076_v5 }
 0x132   :  { %v2830_v46 = vpop.eup %2829  ;;  %1137 = vst.msk [vmem:[%s5060_s5 + $0x88] sm:$0xff] %vm94_vm0, %v1073_v14  ;;  %v1072_v3 = vmul.f32 %v2828_v59, %v3856_v53  ;;  %2849 = vpow2.f32 %v2314_v35  ;;  %v4104_v37 = vpop.f32.mrb[45].mxu0  ;;  %v2315_v35 = vmul.f32 -1.442695, %v4086_v8 }
 0x133   :  { %v4106_v6 = vpop.f32.mrb[45].mxu1  ;;  %v2832_v43 = vpop.eup %2831  ;;  %2042 = vst.msk [vmem:[%s5061_s6 + $0x88] sm:$0xff] %vm94_vm0, %v1978_v2  ;;  %v1977_v63 = vmul.f32 %v2830_v46, %v3870_v42  ;;  %2851 = vpow2.f32 %v2184_v60 }
 0x134   :  { %v2834_v40 = vpop.eup %2833  ;;  %1136 = vst.msk [vmem:[%s5060_s5 + $0x80] sm:$0xff] %vm94_vm0, %v1072_v3  ;;  %v1075_v53 = vmul.f32 %v2832_v43, %v3880_v29  ;;  %2853 = vpow2.f32 %v2313_v12  ;;  %v4125_v60 = vpop.f32.mrb[46].mxu0 }
 0x135   :  { %v2836_v14 = vpop.eup %2835  ;;  %2041 = vst.msk [vmem:[%s5061_s6 + $0x80] sm:$0xff] %vm94_vm0, %v1977_v63  ;;  %v1980_v42 = vmul.f32 %v2834_v40, %v3890_v38  ;;  %2855 = vpow2.f32 %v2187_v41  ;;  %v4127_v59 = vpop.f32.mrb[46].mxu1 }
 0x136   :  { %v2838_v2 = vpop.eup %2837  ;;  %1139 = vst.msk [vmem:[%s5060_s5 + $0x98] sm:$0xff] %vm94_vm0, %v1075_v53  ;;  %v1074_v29 = vmul.f32 %v2836_v14, %v3904_v25  ;;  %2857 = vpow2.f32 %v2316_v47  ;;  %v4134_v12 = vpop.f32.mrb[47].mxu0 }
 0x137   :  { %v4136_v46 = vpop.f32.mrb[47].mxu1  ;;  %v2840_v3 = vpop.eup %2839  ;;  %2044 = vst.msk [vmem:[%s5061_s6 + $0x98] sm:$0xff] %vm94_vm0, %v1980_v42  ;;  %v1787_v38 = vadd.f32 1.0, %v2838_v2  ;;  %2859 = vpow2.f32 %v2186_v9 }
 0x138   :  { %5070 = vst [vmem:[#allocation10_spill] sm:$0xff] %v4136_v46  ;;  %v2842_v41 = vpop.eup %2841  ;;  %1138 = vst.msk [vmem:[%s5060_s5 + $0x90] sm:$0xff] %vm94_vm0, %v1074_v29  ;;  %v885_v25 = vadd.f32 1.0, %v2840_v3  ;;  %2861 = vpow2.f32 %v2315_v35  ;;  %v4146_v63 = vpop.f32.mrb[48].mxu0 }
 0x139   :  { %v2844_v47 = vpop.eup %2843  ;;  %2863 = vrcp.f32 %v1787_v38  ;;  %v1790_v43 = vadd.f32 1.0, %v2842_v41  ;;  %5071 = vst [vmem:[#allocation11_spill] sm:$0xff] %v4146_v63  ;;  %v4148_v14 = vpop.f32.mrb[48].mxu1 }
 0x13a   :  { %v2846_v40 = vpop.eup %2845  ;;  %2865 = vrcp.f32 %v885_v25  ;;  %v884_v53 = vadd.f32 1.0, %v2844_v47  ;;  %5072 = vst [vmem:[#allocation12_spill] sm:$0xff] %v4148_v14  ;;  %v4150_v42 = vpop.f32.mrb[49].mxu0  ;;  %v4159_v47 = vld [vmem:[%s5058_s2] ss:$0 sm:$0xff] }
 0x13b   :  { %5073 = vst [vmem:[#allocation13_spill] sm:$0xff] %v4150_v42  ;;  %v2848_v9 = vpop.eup %2847  ;;  %2867 = vrcp.f32 %v1790_v43  ;;  %v1789_v2 = vadd.f32 1.0, %v2846_v40  ;;  %v4152_v46 = vpop.f32.mrb[49].mxu1  ;;  %v4163_v43 = vadd.f32 %v4159_v47, %v3814_v58 }
 0x13c   :  { %5074 = vst [vmem:[#allocation14_spill] sm:$0xff] %v4152_v46  ;;  %v2850_v29 = vpop.eup %2849  ;;  %2869 = vrcp.f32 %v884_v53  ;;  %v887_v35 = vadd.f32 1.0, %v2848_v9  ;;  %v4154_v41 = vpop.f32.mrb[50].mxu0 }
 0x13d   :  { %v2852_v3 = vpop.eup %2851  ;;  %2871 = vrcp.f32 %v1789_v2  ;;  %v1792_v38 = vadd.f32 1.0, %v2850_v29  ;;  %5075 = vst [vmem:[#allocation15_spill] sm:$0xff] %v4154_v41  ;;  %v4165_v40 = vpop.f32.mrb[50].mxu1  ;;  %v4172_v29 = vld [vmem:[%s5059_s4] ss:$0 sm:$0xff] }
 0x13e   :  { %v2854_v63 = vpop.eup %2853  ;;  %2873 = vrcp.f32 %v887_v35  ;;  %v886_v25 = vadd.f32 1.0, %v2852_v3  ;;  %5076 = vst [vmem:[#allocation16_spill] sm:$0xff] %v4165_v40  ;;  %v4167_v53 = vpop.f32.mrb[51].mxu0  ;;  %v4176_v35 = vadd.f32 %v4172_v29, %v3821_v44  ;;  %v4186_v40 = vadd.f32 %v4172_v29, %v3830_v20 }
 0x13f   :  { %5077 = vst [vmem:[#allocation17_spill] sm:$0xff] %v4167_v53  ;;  %v2856_v9 = vpop.eup %2855  ;;  %2875 = vrcp.f32 %v1792_v38  ;;  %v1791_v2 = vadd.f32 1.0, %v2854_v63  ;;  %v4178_v3 = vpop.f32.mrb[51].mxu1  ;;  %v4182_v53 = vadd.f32 %v4159_v47, %v3823_v0 }
 0x140   :  { %5078 = vst [vmem:[#allocation18_spill] sm:$0xff] %v4178_v3  ;;  %v2858_v58 = vpop.eup %2857  ;;  %2877 = vrcp.f32 %v886_v25  ;;  %v889_v41 = vadd.f32 1.0, %v2856_v9  ;;  %v4188_v46 = vpop.f32.mrb[52].mxu0  ;;  %v2189_v3 = vmul.f32 -1.442695, %v4163_v43  ;;  %v4193_v25 = vadd.f32 %v4159_v47, %v3844_v30 }
 0x141   :  { %v2860_v38 = vpop.eup %2859  ;;  %2879 = vrcp.f32 %v1791_v2  ;;  %v1794_v63 = vadd.f32 1.0, %v2858_v58  ;;  %5079 = vst [vmem:[#allocation19_spill] sm:$0xff] %v4188_v46  ;;  %v4195_v0 = vpop.f32.mrb[52].mxu1  ;;  %v2318_v20 = vmul.f32 -1.442695, %v4176_v35  ;;  %v4202_v46 = vadd.f32 %v4172_v29, %v3846_v13 }
 0x142   :  { %v2862_v44 = vpop.eup %2861  ;;  %2881 = vrcp.f32 %v889_v41  ;;  %v888_v42 = vadd.f32 1.0, %v2860_v38  ;;  %5080 = vst [vmem:[#allocation20_spill] sm:$0xff] %v4195_v0  ;;  %v4197_v9 = vpop.f32.mrb[53].mxu0  ;;  %v2188_v30 = vmul.f32 -1.442695, %v4182_v53  ;;  %v4216_v13 = vadd.f32 %v4172_v29, %v3860_v34 }
 0x143   :  { %5081 = vst [vmem:[#allocation21_spill] sm:$0xff] %v4197_v9  ;;  %v2864_v2 = vpop.eup %2863  ;;  %2883 = vrcp.f32 %v1794_v63  ;;  %v1793_v58 = vadd.f32 1.0, %v2862_v44  ;;  %v4204_v41 = vpop.f32.mrb[53].mxu1  ;;  %v4210_v9 = vadd.f32 %v4159_v47, %v3858_v62  ;;  %v2317_v0 = vmul.f32 -1.442695, %v4186_v40 }
 0x144   :  { %5082 = vst [vmem:[#allocation22_spill] sm:$0xff] %v4204_v41  ;;  %v2866_v38 = vpop.eup %2865  ;;  %v1979_v14 = vmul.f32 %v2864_v2, %v3978_v10  ;;  %2885 = vrcp.f32 %v888_v42  ;;  %v4218_v41 = vpop.f32.mrb[54].mxu0  ;;  %v4230_v2 = vadd.f32 %v4159_v47, %v3892_v21 }
 0x145   :  { %v2868_v63 = vpop.eup %2867  ;;  %v1077_v44 = vmul.f32 %v2866_v38, %v3982_v54  ;;  %2887 = vrcp.f32 %v1793_v58  ;;  %v4220_v10 = vpop.f32.mrb[54].mxu1  ;;  %v2191_v54 = vmul.f32 -1.442695, %v4193_v25 }
 0x146   :  { %v2870_v42 = vpop.eup %2869  ;;  %2043 = vst.msk [vmem:[%s5061_s6 + $0x90] sm:$0xff] %vm94_vm0, %v1979_v14  ;;  %v1982_v62 = vmul.f32 %v2868_v63, %v3988_v11  ;;  %2889 = vpow2.f32 %v2189_v3  ;;  %v4232_v34 = vpop.f32.mrb[55].mxu0  ;;  %v2320_v11 = vmul.f32 -1.442695, %v4202_v46  ;;  %v4244_v3 = vadd.f32 %v4172_v29, %v3894_v17 }
 0x147   :  { %v4234_v58 = vpop.f32.mrb[55].mxu1  ;;  %v2872_v38 = vpop.eup %2871  ;;  %1141 = vst.msk [vmem:[%s5060_s5 + $0xa8] sm:$0xff] %vm94_vm0, %v1077_v44  ;;  %v1076_v14 = vmul.f32 %v2870_v42, %v3996_v51  ;;  %2891 = vpow2.f32 %v2318_v20  ;;  %v2190_v44 = vmul.f32 -1.442695, %v4210_v9  ;;  %v4254_v51 = vadd.f32 %v4159_v47, %v3906_v22 }
 0x148   :  { %v2874_v21 = vpop.eup %2873  ;;  %2046 = vst.msk [vmem:[%s5061_s6 + $0xa8] sm:$0xff] %vm94_vm0, %v1982_v62  ;;  %v1981_v63 = vmul.f32 %v2872_v38, %v4003_v52  ;;  %2893 = vpow2.f32 %v2188_v30  ;;  %v2319_v42 = vmul.f32 -1.442695, %v4216_v13  ;;  %v4264_v52 = vadd.f32 %v4172_v29, %v3908_v36  ;;  %v4266_v30 = vpop.f32.mrb[56].mxu0 }
 0x149   :  { %v2876_v20 = vpop.eup %2875  ;;  %1140 = vst.msk [vmem:[%s5060_s5 + $0xa0] sm:$0xff] %vm94_vm0, %v1076_v14  ;;  %v1079_v17 = vmul.f32 %v2874_v21, %v4008_v55  ;;  %2895 = vpow2.f32 %v2317_v0  ;;  %v4268_v62 = vpop.f32.mrb[56].mxu1  ;;  %v2193_v55 = vmul.f32 -1.442695, %v4230_v2  ;;  %v4278_v0 = vadd.f32 %v4159_v47, %v3928_v24 }
 0x14a   :  { %v2878_v22 = vpop.eup %2877  ;;  %2045 = vst.msk [vmem:[%s5061_s6 + $0xa0] sm:$0xff] %vm94_vm0, %v1981_v63  ;;  %v1984_v38 = vmul.f32 %v2876_v20, %v4016_v56  ;;  %2897 = vpow2.f32 %v2191_v54  ;;  %v4280_v36 = vpop.f32.mrb[57].mxu0  ;;  %v2322_v56 = vmul.f32 -1.442695, %v4244_v3  ;;  %v2192_v20 = vmul.f32 -1.442695, %v4254_v51 }
 0x14b   :  { %v4282_v14 = vpop.f32.mrb[57].mxu1  ;;  %v2880_v21 = vpop.eup %2879  ;;  %1143 = vst.msk [vmem:[%s5060_s5 + $0xb8] sm:$0xff] %vm94_vm0, %v1079_v17  ;;  %v1078_v63 = vmul.f32 %v2878_v22, %v4026_v39  ;;  %2899 = vpow2.f32 %v2320_v11  ;;  %v2321_v11 = vmul.f32 -1.442695, %v4264_v52 }
 0x14c   :  { %5083 = vst [vmem:[#allocation23_spill] sm:$0xff] %v4282_v14  ;;  %v2882_v54 = vpop.eup %2881  ;;  %2048 = vst.msk [vmem:[%s5061_s6 + $0xb8] sm:$0xff] %vm94_vm0, %v1984_v38  ;;  %v1983_v24 = vmul.f32 %v2880_v21, %v4038_v23  ;;  %2901 = vpow2.f32 %v2190_v44  ;;  %v4302_v17 = vpop.f32.mrb[58].mxu0  ;;  %v2195_v44 = vmul.f32 -1.442695, %v4278_v0 }
 0x14d   :  { %v2884_v14 = vpop.eup %2883  ;;  %1142 = vst.msk [vmem:[%s5060_s5 + $0xb0] sm:$0xff] %vm94_vm0, %v1078_v63  ;;  %v1081_v39 = vmul.f32 %v2882_v54, %v4048_v26  ;;  %2903 = vpow2.f32 %v2319_v42  ;;  %v4304_v22 = vpop.f32.mrb[58].mxu1 }
 0x14e   :  { %v2886_v38 = vpop.eup %2885  ;;  %2047 = vst.msk [vmem:[%s5061_s6 + $0xb0] sm:$0xff] %vm94_vm0, %v1983_v24  ;;  %v1986_v23 = vmul.f32 %v2884_v14, %v4062_v57  ;;  %2905 = vpow2.f32 %v2193_v55  ;;  %v4312_v21 = vpop.f32.mrb[59].mxu0 }
 0x14f   :  { %v4314_v26 = vpop.f32.mrb[59].mxu1  ;;  %v2888_v42 = vpop.eup %2887  ;;  %1145 = vst.msk [vmem:[%s5060_s5 + $0xc8] sm:$0xff] %vm94_vm0, %v1081_v39  ;;  %v1080_v63 = vmul.f32 %v2886_v38, %v4076_v5  ;;  %2907 = vpow2.f32 %v2322_v56 }
 0x150   :  { %v2890_v54 = vpop.eup %2889  ;;  %2050 = vst.msk [vmem:[%s5061_s6 + $0xc8] sm:$0xff] %vm94_vm0, %v1986_v23  ;;  %v1985_v57 = vmul.f32 %v2888_v42, %v4086_v8  ;;  %2909 = vpow2.f32 %v2192_v20  ;;  %v4330_v24 = vpop.f32.mrb[60].mxu0 }
 0x151   :  { %v2892_v55 = vpop.eup %2891  ;;  %1144 = vst.msk [vmem:[%s5060_s5 + $0xc0] sm:$0xff] %vm94_vm0, %v1080_v63  ;;  %v891_v14 = vadd.f32 1.0, %v2890_v54  ;;  %2911 = vpow2.f32 %v2321_v11  ;;  %5084 = vst [vmem:[#allocation24_spill] sm:$0xff] %v4330_v24  ;;  %v4336_v8 = vpop.f32.mrb[60].mxu1 }
 0x152   :  { %v2894_v5 = vpop.eup %2893  ;;  %2049 = vst.msk [vmem:[%s5061_s6 + $0xc0] sm:$0xff] %vm94_vm0, %v1985_v57  ;;  %v1796_v56 = vadd.f32 1.0, %v2892_v55  ;;  %2913 = vpow2.f32 %v2195_v44  ;;  %5085 = vst [vmem:[#allocation25_spill] sm:$0xff] %v4336_v8  ;;  %v4338_v20 = vpop.f32.mrb[61].mxu0 }
 0x153   :  { %5086 = vst [vmem:[#allocation26_spill] sm:$0xff] %v4338_v20  ;;  %v2896_v39 = vpop.eup %2895  ;;  %2915 = vrcp.f32 %v891_v14  ;;  %v890_v38 = vadd.f32 1.0, %v2894_v5  ;;  %v4340_v23 = vpop.f32.mrb[61].mxu1 }
 0x154   :  { %5087 = vst [vmem:[#allocation27_spill] sm:$0xff] %v4340_v23  ;;  %v2898_v11 = vpop.eup %2897  ;;  %2917 = vrcp.f32 %v1796_v56  ;;  %v1795_v42 = vadd.f32 1.0, %v2896_v39  ;;  %v4342_v24 = vpop.f32.mrb[62].mxu0  ;;  %v4352_v39 = vadd.f32 %v4172_v29, %v3930_v1  ;;  %v4364_v1 = vadd.f32 %v4159_v47, %v3956_v45 }
 0x155   :  { %v2900_v63 = vpop.eup %2899  ;;  %2919 = vrcp.f32 %v890_v38  ;;  %v893_v54 = vadd.f32 1.0, %v2898_v11  ;;  %v4344_v55 = vpop.f32.mrb[62].mxu1 }
 0x156   :  { %v2902_v57 = vpop.eup %2901  ;;  %2921 = vrcp.f32 %v1795_v42  ;;  %v1798_v44 = vadd.f32 1.0, %v2900_v63  ;;  %v4346_v8 = vpop.f32.mrb[63].mxu0  ;;  %v4356_v42 = vadd.f32 %v4159_v47, %v3938_v18  ;;  %v2324_v18 = vmul.f32 -1.442695, %v4352_v39 }
 0x157   :  { %5088 = vst [vmem:[#allocation28_spill] sm:$0xff] %v4346_v8  ;;  %v2904_v20 = vpop.eup %2903  ;;  %2923 = vrcp.f32 %v893_v54  ;;  %v892_v14 = vadd.f32 1.0, %v2902_v57  ;;  %v4348_v5 = vpop.f32.mrb[63].mxu1  ;;  %v4360_v57 = vadd.f32 %v4172_v29, %v3940_v61 }
 0x158   :  { %5089 = vst [vmem:[#allocation29_spill] sm:$0xff] %v4348_v5  ;;  %v2906_v23 = vpop.eup %2905  ;;  %2925 = vrcp.f32 %v1798_v44  ;;  %v1797_v56 = vadd.f32 1.0, %v2904_v20  ;;  %v2194_v5 = vmul.f32 -1.442695, %v4356_v42 }
 0x159   :  { %v2908_v38 = vpop.eup %2907  ;;  %2927 = vrcp.f32 %v892_v14  ;;  %v895_v11 = vadd.f32 1.0, %v2906_v23 }
 0x15a   :  { %v2910_v63 = vpop.eup %2909  ;;  %2929 = vrcp.f32 %v1797_v56  ;;  %v1800_v54 = vadd.f32 1.0, %v2908_v38  ;;  %v4369_v56 = vadd.f32 %v4172_v29, %v3962_v19 }
 0x15b   :  { %v2912_v44 = vpop.eup %2911  ;;  %2931 = vrcp.f32 %v895_v11  ;;  %v894_v20 = vadd.f32 1.0, %v2910_v63  ;;  %v4374_v11 = vadd.f32 %v4159_v47, %v3964_v48  ;;  %v4386_v48 = vadd.f32 %v4159_v47, %v3968_v7 }
 0x15c   :  { %v2914_v14 = vpop.eup %2913  ;;  %2933 = vrcp.f32 %v1800_v54  ;;  %v1799_v23 = vadd.f32 1.0, %v2912_v44  ;;  %v2323_v54 = vmul.f32 -1.442695, %v4360_v57  ;;  %v4380_v44 = vadd.f32 %v4172_v29, %v3966_v16 }
 0x15d   :  { %v2916_v38 = vpop.eup %2915  ;;  %2935 = vrcp.f32 %v894_v20  ;;  %v897_v61 = vadd.f32 1.0, %v2914_v14  ;;  %v2197_v14 = vmul.f32 -1.442695, %v4364_v1  ;;  %v2326_v16 = vmul.f32 -1.442695, %v4369_v56 }
 0x15e   :  { %v2918_v45 = vpop.eup %2917  ;;  %v1083_v63 = vmul.f32 %v2916_v38, %v4163_v43  ;;  %2937 = vrcp.f32 %v1799_v23  ;;  %v2196_v38 = vmul.f32 -1.442695, %v4374_v11 }
 0x15f   :  { %v2920_v19 = vpop.eup %2919  ;;  %v1988_v20 = vmul.f32 %v2918_v45, %v4176_v35  ;;  %2939 = vrcp.f32 %v897_v61  ;;  %v4396_v35 = vadd.f32 %v4172_v29, %v3970_v49  ;;  %v5090_v61 = vld [vmem:[#allocation2_spill] sm:$0xff]  ;;  %v2325_v45 = vmul.f32 -1.442695, %v4380_v44 }
 0x160   :  { %v2922_v8 = vpop.eup %2921  ;;  %1147 = vst.msk [vmem:[%s5060_s5 + $0xd8] sm:$0xff] %vm94_vm0, %v1083_v63  ;;  %v1082_v43 = vmul.f32 %v2920_v19, %v4182_v53  ;;  %2941 = vpow2.f32 %v2324_v18  ;;  %v4406_v53 = vadd.f32 %v4159_v47, %v5090_v61  ;;  %v5091_v63 = vld [vmem:[#allocation3_spill] sm:$0xff]  ;;  %v2199_v19 = vmul.f32 -1.442695, %v4386_v48 }
 0x161   :  { %v2924_v23 = vpop.eup %2923  ;;  %2052 = vst.msk [vmem:[%s5061_s6 + $0xd8] sm:$0xff] %vm94_vm0, %v1988_v20  ;;  %v1987_v7 = vmul.f32 %v2922_v8, %v4186_v40  ;;  %2943 = vpow2.f32 %v2194_v5  ;;  %v4416_v40 = vadd.f32 %v4172_v29, %v5091_v63  ;;  %v5092_v20 = vld [vmem:[#allocation4_spill] sm:$0xff] }
 0x162   :  { %v2926_v18 = vpop.eup %2925  ;;  %1146 = vst.msk [vmem:[%s5060_s5 + $0xd0] sm:$0xff] %vm94_vm0, %v1082_v43  ;;  %v1085_v49 = vmul.f32 %v2924_v23, %v4193_v25  ;;  %2945 = vpow2.f32 %v2323_v54  ;;  %v4426_v25 = vadd.f32 %v4159_v47, %v5092_v20  ;;  %v2328_v23 = vmul.f32 -1.442695, %v4396_v35 }
 0x163   :  { %v2928_v8 = vpop.eup %2927  ;;  %2051 = vst.msk [vmem:[%s5061_s6 + $0xd0] sm:$0xff] %vm94_vm0, %v1987_v7  ;;  %v1990_v5 = vmul.f32 %v2926_v18, %v4202_v46  ;;  %2947 = vpow2.f32 %v2197_v14  ;;  %v5093_v7 = vld [vmem:[#allocation5_spill] sm:$0xff]  ;;  %v2198_v18 = vmul.f32 -1.442695, %v4406_v53 }
 0x164   :  { %v2930_v54 = vpop.eup %2929  ;;  %1149 = vst.msk [vmem:[%s5060_s5 + $0xe8] sm:$0xff] %vm94_vm0, %v1085_v49  ;;  %v1084_v43 = vmul.f32 %v2928_v8, %v4210_v9  ;;  %2949 = vpow2.f32 %v2326_v16  ;;  %v4436_v46 = vadd.f32 %v4172_v29, %v5093_v7  ;;  %v2327_v16 = vmul.f32 -1.442695, %v4416_v40 }
 0x165   :  { %v2932_v14 = vpop.eup %2931  ;;  %2054 = vst.msk [vmem:[%s5061_s6 + $0xe8] sm:$0xff] %vm94_vm0, %v1990_v5  ;;  %v1989_v61 = vmul.f32 %v2930_v54, %v4216_v13  ;;  %2951 = vpow2.f32 %v2196_v38  ;;  %v2201_v38 = vmul.f32 -1.442695, %v4426_v25 }
 0x166   :  { %v2934_v49 = vpop.eup %2933  ;;  %1148 = vst.msk [vmem:[%s5060_s5 + $0xe0] sm:$0xff] %vm94_vm0, %v1084_v43  ;;  %v1087_v9 = vmul.f32 %v2932_v14, %v4230_v2  ;;  %2953 = vpow2.f32 %v2325_v45  ;;  %v2330_v45 = vmul.f32 -1.442695, %v4436_v46 }
 0x167   :  { %v2936_v63 = vpop.eup %2935  ;;  %2053 = vst.msk [vmem:[%s5061_s6 + $0xe0] sm:$0xff] %vm94_vm0, %v1989_v61  ;;  %v1992_v13 = vmul.f32 %v2934_v49, %v4244_v3  ;;  %2955 = vpow2.f32 %v2199_v19 }
 0x168   :  { %v2938_v8 = vpop.eup %2937  ;;  %1151 = vst.msk [vmem:[%s5060_s5 + $0xf8] sm:$0xff] %vm94_vm0, %v1087_v9  ;;  %v1086_v2 = vmul.f32 %v2936_v63, %v4254_v51  ;;  %2957 = vpow2.f32 %v2328_v23 }
 0x169   :  { %v2940_v5 = vpop.eup %2939  ;;  %2056 = vst.msk [vmem:[%s5061_s6 + $0xf8] sm:$0xff] %vm94_vm0, %v1992_v13  ;;  %v1991_v3 = vmul.f32 %v2938_v8, %v4264_v52  ;;  %2959 = vpow2.f32 %v2198_v18  ;;  %v5094_v8 = vld [vmem:[#allocation6_spill] sm:$0xff] }
 0x16a   :  { %v2942_v19 = vpop.eup %2941  ;;  %1150 = vst.msk [vmem:[%s5060_s5 + $0xf0] sm:$0xff] %vm94_vm0, %v1086_v2  ;;  %v1089_v51 = vmul.f32 %v2940_v5, %v4278_v0  ;;  %2961 = vpow2.f32 %v2327_v16  ;;  %v4482_v2 = vadd.f32 %v4159_v47, %v5094_v8  ;;  %v4510_v8 = vadd.f32 %v4159_v47, %v4050_v28 }
 0x16b   :  { %v2944_v20 = vpop.eup %2943  ;;  %2055 = vst.msk [vmem:[%s5061_s6 + $0xf0] sm:$0xff] %vm94_vm0, %v1991_v3  ;;  %v1802_v54 = vadd.f32 1.0, %v2942_v19  ;;  %2963 = vpow2.f32 %v2201_v38  ;;  %v5095_v3 = vld [vmem:[#allocation7_spill] sm:$0xff] }
 0x16c   :  { %v2946_v43 = vpop.eup %2945  ;;  %1153 = vst.msk [vmem:[%s5060_s5 + $0x108] sm:$0xff] %vm94_vm0, %v1089_v51  ;;  %v896_v52 = vadd.f32 1.0, %v2944_v20  ;;  %2965 = vpow2.f32 %v2330_v45  ;;  %v4486_v19 = vadd.f32 %v4172_v29, %v5095_v3  ;;  %v5097_v3 = vld [vmem:[#allocation9_spill] sm:$0xff] }
 0x16d   :  { %v2948_v23 = vpop.eup %2947  ;;  %2967 = vrcp.f32 %v1802_v54  ;;  %v1801_v0 = vadd.f32 1.0, %v2946_v43  ;;  %v5096_v54 = vld [vmem:[#allocation8_spill] sm:$0xff] }
 0x16e   :  { %v2950_v7 = vpop.eup %2949  ;;  %2969 = vrcp.f32 %v896_v52  ;;  %v899_v14 = vadd.f32 1.0, %v2948_v23  ;;  %v4490_v43 = vadd.f32 %v4159_v47, %v5096_v54 }
 0x16f   :  { %v2952_v61 = vpop.eup %2951  ;;  %2971 = vrcp.f32 %v1801_v0  ;;  %v1804_v18 = vadd.f32 1.0, %v2950_v7  ;;  %v4494_v0 = vadd.f32 %v4172_v29, %v4018_v50 }
 0x170   :  { %v2954_v49 = vpop.eup %2953  ;;  %2973 = vrcp.f32 %v899_v14  ;;  %v898_v9 = vadd.f32 1.0, %v2952_v61  ;;  %v2200_v61 = vmul.f32 -1.442695, %v4482_v2 }
 0x171   :  { %v2956_v16 = vpop.eup %2955  ;;  %2975 = vrcp.f32 %v1804_v18  ;;  %v1803_v63 = vadd.f32 1.0, %v2954_v49  ;;  %v4499_v18 = vadd.f32 %v4159_v47, %v4020_v32 }
 0x172   :  { %v2958_v13 = vpop.eup %2957  ;;  %2977 = vrcp.f32 %v898_v9  ;;  %v901_v38 = vadd.f32 1.0, %v2956_v16  ;;  %v2329_v16 = vmul.f32 -1.442695, %v4486_v19 }
 0x173   :  { %v2960_v45 = vpop.eup %2959  ;;  %2979 = vrcp.f32 %v1803_v63  ;;  %v1806_v5 = vadd.f32 1.0, %v2958_v13  ;;  %v4504_v63 = vadd.f32 %v4172_v29, %v4028_v4  ;;  %v4516_v4 = vadd.f32 %v4172_v29, %v5097_v3 }
 0x174   :  { %v2962_v51 = vpop.eup %2961  ;;  %2981 = vrcp.f32 %v901_v38  ;;  %v900_v20 = vadd.f32 1.0, %v2960_v45  ;;  %v2203_v38 = vmul.f32 -1.442695, %v4490_v43  ;;  %v2202_v28 = vmul.f32 -1.442695, %v4499_v18 }
 0x175   :  { %v2964_v52 = vpop.eup %2963  ;;  %2983 = vrcp.f32 %v1806_v5  ;;  %v1805_v23 = vadd.f32 1.0, %v2962_v51  ;;  %v2332_v5 = vmul.f32 -1.442695, %v4494_v0 }
 0x176   :  { %v2966_v7 = vpop.eup %2965  ;;  %2985 = vrcp.f32 %v900_v20  ;;  %v903_v14 = vadd.f32 1.0, %v2964_v52  ;;  %v2331_v52 = vmul.f32 -1.442695, %v4504_v63 }
 0x177   :  { %v2968_v49 = vpop.eup %2967  ;;  %2987 = vrcp.f32 %v1805_v23  ;;  %v1808_v9 = vadd.f32 1.0, %v2966_v7  ;;  %v2205_v7 = vmul.f32 -1.442695, %v4510_v8 }
 0x178   :  { %v2970_v50 = vpop.eup %2969  ;;  %v1994_v13 = vmul.f32 %v2968_v49, %v4352_v39  ;;  %2989 = vrcp.f32 %v903_v14 }
 0x179   :  { %v2972_v32 = vpop.eup %2971  ;;  %v1088_v45 = vmul.f32 %v2970_v50, %v4356_v42  ;;  %2991 = vrcp.f32 %v1808_v9  ;;  %v4526_v42 = vadd.f32 %v4159_v47, %v4064_v33 }
 0x17a   :  { %v2974_v51 = vpop.eup %2973  ;;  %2058 = vst.msk [vmem:[%s5061_s6 + $0x108] sm:$0xff] %vm94_vm0, %v1994_v13  ;;  %v1993_v39 = vmul.f32 %v2972_v32, %v4360_v57  ;;  %2993 = vpow2.f32 %v2200_v61  ;;  %v4536_v57 = vadd.f32 %v4172_v29, %v4066_v31  ;;  %v2334_v61 = vmul.f32 -1.442695, %v4516_v4 }
 0x17b   :  { %v2976_v20 = vpop.eup %2975  ;;  %1152 = vst.msk [vmem:[%s5060_s5 + $0x100] sm:$0xff] %vm94_vm0, %v1088_v45  ;;  %v1091_v54 = vmul.f32 %v2974_v51, %v4364_v1  ;;  %2995 = vpow2.f32 %v2329_v16  ;;  %v4546_v1 = vadd.f32 %v4159_v47, %v4094_v15  ;;  %v2204_v9 = vmul.f32 -1.442695, %v4526_v42 }
 0x17c   :  { %v2978_v23 = vpop.eup %2977  ;;  %2057 = vst.msk [vmem:[%s5061_s6 + $0x100] sm:$0xff] %vm94_vm0, %v1993_v39  ;;  %v1996_v33 = vmul.f32 %v2976_v20, %v4369_v56  ;;  %2997 = vpow2.f32 %v2203_v38  ;;  %v4556_v56 = vadd.f32 %v4172_v29, %v4096_v27  ;;  %v2333_v50 = vmul.f32 -1.442695, %v4536_v57 }
 0x17d   :  { %v2980_v14 = vpop.eup %2979  ;;  %1155 = vst.msk [vmem:[%s5060_s5 + $0x118] sm:$0xff] %vm94_vm0, %v1091_v54  ;;  %v1090_v31 = vmul.f32 %v2978_v23, %v4374_v11  ;;  %2999 = vpow2.f32 %v2332_v5  ;;  %v4566_v11 = vadd.f32 %v4159_v47, %v4104_v37 }
 0x17e   :  { %v2982_v49 = vpop.eup %2981  ;;  %2060 = vst.msk [vmem:[%s5061_s6 + $0x118] sm:$0xff] %vm94_vm0, %v1996_v33  ;;  %v1995_v15 = vmul.f32 %v2980_v14, %v4380_v44  ;;  %3001 = vpow2.f32 %v2202_v28  ;;  %v2207_v44 = vmul.f32 -1.442695, %v4546_v1  ;;  %v2336_v32 = vmul.f32 -1.442695, %v4556_v56 }
 0x17f   :  { %v2984_v16 = vpop.eup %2983  ;;  %1154 = vst.msk [vmem:[%s5060_s5 + $0x110] sm:$0xff] %vm94_vm0, %v1090_v31  ;;  %v1093_v27 = vmul.f32 %v2982_v49, %v4386_v48  ;;  %3003 = vpow2.f32 %v2331_v52  ;;  %v2206_v5 = vmul.f32 -1.442695, %v4566_v11 }
 0x180   :  { %v2986_v13 = vpop.eup %2985  ;;  %2059 = vst.msk [vmem:[%s5061_s6 + $0x110] sm:$0xff] %vm94_vm0, %v1995_v15  ;;  %v1998_v37 = vmul.f32 %v2984_v16, %v4396_v35  ;;  %3005 = vpow2.f32 %v2205_v7  ;;  %v4612_v16 = vadd.f32 %v4172_v29, %v4106_v6  ;;  %v4624_v6 = vadd.f32 %v4159_v47, %v4134_v12 }
 0x181   :  { %v2988_v38 = vpop.eup %2987  ;;  %1157 = vst.msk [vmem:[%s5060_s5 + $0x128] sm:$0xff] %vm94_vm0, %v1093_v27  ;;  %v1092_v48 = vmul.f32 %v2986_v13, %v4406_v53  ;;  %3007 = vpow2.f32 %v2334_v61  ;;  %v4616_v13 = vadd.f32 %v4159_v47, %v4125_v60 }
 0x182   :  { %v2990_v45 = vpop.eup %2989  ;;  %2062 = vst.msk [vmem:[%s5061_s6 + $0x128] sm:$0xff] %vm94_vm0, %v1998_v37  ;;  %v1997_v35 = vmul.f32 %v2988_v38, %v4416_v40  ;;  %3009 = vpow2.f32 %v2204_v9  ;;  %v4620_v38 = vadd.f32 %v4172_v29, %v4127_v59  ;;  %v2335_v60 = vmul.f32 -1.442695, %v4612_v16 }
 0x183   :  { %v2992_v3 = vpop.eup %2991  ;;  %1156 = vst.msk [vmem:[%s5060_s5 + $0x120] sm:$0xff] %vm94_vm0, %v1092_v48  ;;  %v1095_v53 = vmul.f32 %v2990_v45, %v4426_v25  ;;  %3011 = vpow2.f32 %v2333_v50 }
 0x184   :  { %v2994_v51 = vpop.eup %2993  ;;  %2061 = vst.msk [vmem:[%s5061_s6 + $0x120] sm:$0xff] %vm94_vm0, %v1997_v35  ;;  %v2000_v40 = vmul.f32 %v2992_v3, %v4436_v46  ;;  %3013 = vpow2.f32 %v2207_v44 }
 0x185   :  { %v2996_v39 = vpop.eup %2995  ;;  %1159 = vst.msk [vmem:[%s5060_s5 + $0x138] sm:$0xff] %vm94_vm0, %v1095_v53  ;;  %v902_v28 = vadd.f32 1.0, %v2994_v51  ;;  %3015 = vpow2.f32 %v2336_v32  ;;  %v2209_v51 = vmul.f32 -1.442695, %v4616_v13 }
 0x186   :  { %v2998_v20 = vpop.eup %2997  ;;  %2064 = vst.msk [vmem:[%s5061_s6 + $0x138] sm:$0xff] %vm94_vm0, %v2000_v40  ;;  %v1807_v25 = vadd.f32 1.0, %v2996_v39  ;;  %3017 = vpow2.f32 %v2206_v5  ;;  %v5098_v5 = vld [vmem:[#allocation10_spill] sm:$0xff]  ;;  %v5099_v40 = vld [vmem:[#allocation11_spill] sm:$0xff] }
 0x187   :  { %v3000_v54 = vpop.eup %2999  ;;  %3019 = vrcp.f32 %v902_v28  ;;  %v905_v46 = vadd.f32 1.0, %v2998_v20  ;;  %v4629_v3 = vadd.f32 %v4172_v29, %v5098_v5  ;;  %v4634_v39 = vadd.f32 %v4159_v47, %v5099_v40 }
 0x188   :  { %v3002_v52 = vpop.eup %3001  ;;  %3021 = vrcp.f32 %v1807_v25  ;;  %v1810_v23 = vadd.f32 1.0, %v3000_v54  ;;  %v2338_v20 = vmul.f32 -1.442695, %v4620_v38  ;;  %v5100_v25 = vld [vmem:[#allocation12_spill] sm:$0xff] }
 0x189   :  { %v3004_v33 = vpop.eup %3003  ;;  %3023 = vrcp.f32 %v905_v46  ;;  %v904_v7 = vadd.f32 1.0, %v3002_v52  ;;  %v4640_v54 = vadd.f32 %v4172_v29, %v5100_v25 }
 0x18a   :  { %v3006_v14 = vpop.eup %3005  ;;  %3025 = vrcp.f32 %v1810_v23  ;;  %v1809_v31 = vadd.f32 1.0, %v3004_v33  ;;  %v2208_v23 = vmul.f32 -1.442695, %v4624_v6  ;;  %v5101_v33 = vld [vmem:[#allocation13_spill] sm:$0xff] }
 0x18b   :  { %v3008_v61 = vpop.eup %3007  ;;  %3027 = vrcp.f32 %v904_v7  ;;  %v907_v49 = vadd.f32 1.0, %v3006_v14  ;;  %v4646_v7 = vadd.f32 %v4159_v47, %v5101_v33 }
 0x18c   :  { %v3010_v15 = vpop.eup %3009  ;;  %3029 = vrcp.f32 %v1809_v31  ;;  %v1812_v9 = vadd.f32 1.0, %v3008_v61  ;;  %v2337_v31 = vmul.f32 -1.442695, %v4629_v3  ;;  %v5102_v61 = vld [vmem:[#allocation14_spill] sm:$0xff] }
 0x18d   :  { %v3012_v27 = vpop.eup %3011  ;;  %3031 = vrcp.f32 %v907_v49  ;;  %v906_v50 = vadd.f32 1.0, %v3010_v15 }
 0x18e   :  { %v3014_v37 = vpop.eup %3013  ;;  %3033 = vrcp.f32 %v1812_v9  ;;  %v1811_v44 = vadd.f32 1.0, %v3012_v27  ;;  %v2211_v9 = vmul.f32 -1.442695, %v4634_v39  ;;  %v5103_v27 = vld [vmem:[#allocation15_spill] sm:$0xff] }
 0x18f   :  { %v3016_v48 = vpop.eup %3015  ;;  %3035 = vrcp.f32 %v906_v50  ;;  %v909_v32 = vadd.f32 1.0, %v3014_v37 }
 0x190   :  { %v3018_v45 = vpop.eup %3017  ;;  %3037 = vrcp.f32 %v1811_v44  ;;  %v1814_v35 = vadd.f32 1.0, %v3016_v48  ;;  %v2340_v44 = vmul.f32 -1.442695, %v4640_v54  ;;  %v5104_v48 = vld [vmem:[#allocation16_spill] sm:$0xff] }
 0x191   :  { %v3020_v53 = vpop.eup %3019  ;;  %3039 = vrcp.f32 %v909_v32  ;;  %v908_v59 = vadd.f32 1.0, %v3018_v45 }
 0x192   :  { %v3022_v12 = vpop.eup %3021  ;;  %v1094_v28 = vmul.f32 %v3020_v53, %v4482_v2  ;;  %3041 = vrcp.f32 %v1814_v35  ;;  %v2210_v35 = vmul.f32 -1.442695, %v4646_v7 }
 0x193   :  { %v3024_v46 = vpop.eup %3023  ;;  %v1999_v52 = vmul.f32 %v3022_v12, %v4486_v19  ;;  %3043 = vrcp.f32 %v908_v59  ;;  %v4656_v19 = vadd.f32 %v4172_v29, %v5102_v61 }
 0x194   :  { %v3026_v14 = vpop.eup %3025  ;;  %1158 = vst.msk [vmem:[%s5060_s5 + $0x130] sm:$0xff] %vm94_vm0, %v1094_v28  ;;  %v1097_v2 = vmul.f32 %v3024_v46, %v4490_v43  ;;  %3045 = vpow2.f32 %v2335_v60  ;;  %v4666_v43 = vadd.f32 %v4159_v47, %v5103_v27  ;;  %v5105_v60 = vld [vmem:[#allocation17_spill] sm:$0xff] }
 0x195   :  { %v3028_v49 = vpop.eup %3027  ;;  %2063 = vst.msk [vmem:[%s5061_s6 + $0x130] sm:$0xff] %vm94_vm0, %v1999_v52  ;;  %v2002_v15 = vmul.f32 %v3026_v14, %v4494_v0  ;;  %3047 = vpow2.f32 %v2209_v51  ;;  %v4676_v0 = vadd.f32 %v4172_v29, %v5104_v48  ;;  %v2339_v59 = vmul.f32 -1.442695, %v4656_v19  ;;  %v5106_v51 = vld [vmem:[#allocation18_spill] sm:$0xff] }
 0x196   :  { %v3030_v50 = vpop.eup %3029  ;;  %1161 = vst.msk [vmem:[%s5060_s5 + $0x148] sm:$0xff] %vm94_vm0, %v1097_v2  ;;  %v1096_v37 = vmul.f32 %v3028_v49, %v4499_v18  ;;  %3049 = vpow2.f32 %v2338_v20  ;;  %v4686_v18 = vadd.f32 %v4159_v47, %v5105_v60  ;;  %v2213_v28 = vmul.f32 -1.442695, %v4666_v43 }
 0x197   :  { %v3032_v32 = vpop.eup %3031  ;;  %2066 = vst.msk [vmem:[%s5061_s6 + $0x148] sm:$0xff] %vm94_vm0, %v2002_v15  ;;  %v2001_v45 = vmul.f32 %v3030_v50, %v4504_v63  ;;  %3051 = vpow2.f32 %v2208_v23  ;;  %v4696_v63 = vadd.f32 %v4172_v29, %v5106_v51  ;;  %v2342_v25 = vmul.f32 -1.442695, %v4676_v0 }
 0x198   :  { %v3034_v5 = vpop.eup %3033  ;;  %1160 = vst.msk [vmem:[%s5060_s5 + $0x140] sm:$0xff] %vm94_vm0, %v1096_v37  ;;  %v1099_v53 = vmul.f32 %v3032_v32, %v4510_v8  ;;  %3053 = vpow2.f32 %v2337_v31  ;;  %v2212_v52 = vmul.f32 -1.442695, %v4686_v18 }
 0x199   :  { %v3036_v40 = vpop.eup %3035  ;;  %2065 = vst.msk [vmem:[%s5061_s6 + $0x140] sm:$0xff] %vm94_vm0, %v2001_v45  ;;  %v2004_v12 = vmul.f32 %v3034_v5, %v4516_v4  ;;  %3055 = vpow2.f32 %v2211_v9  ;;  %v2341_v33 = vmul.f32 -1.442695, %v4696_v63  ;;  %v5107_v5 = vld [vmem:[#allocation19_spill] sm:$0xff] }
 0x19a   :  { %v3038_v20 = vpop.eup %3037  ;;  %1163 = vst.msk [vmem:[%s5060_s5 + $0x158] sm:$0xff] %vm94_vm0, %v1099_v53  ;;  %v1098_v8 = vmul.f32 %v3036_v40, %v4526_v42  ;;  %3057 = vpow2.f32 %v2340_v44  ;;  %v4742_v53 = vadd.f32 %v4159_v47, %v5107_v5  ;;  %v5108_v40 = vld [vmem:[#allocation20_spill] sm:$0xff] }
 0x19b   :  { %v3040_v46 = vpop.eup %3039  ;;  %2068 = vst.msk [vmem:[%s5061_s6 + $0x158] sm:$0xff] %vm94_vm0, %v2004_v12  ;;  %v2003_v4 = vmul.f32 %v3038_v20, %v4536_v57  ;;  %3059 = vpow2.f32 %v2210_v35  ;;  %v4746_v12 = vadd.f32 %v4172_v29, %v5108_v40 }
 0x19c   :  { %v3042_v23 = vpop.eup %3041  ;;  %1162 = vst.msk [vmem:[%s5060_s5 + $0x150] sm:$0xff] %vm94_vm0, %v1098_v8  ;;  %v1101_v42 = vmul.f32 %v3040_v46, %v4546_v1  ;;  %3061 = vpow2.f32 %v2339_v59  ;;  %v5109_v8 = vld [vmem:[#allocation21_spill] sm:$0xff] }
 0x19d   :  { %v3044_v14 = vpop.eup %3043  ;;  %2067 = vst.msk [vmem:[%s5061_s6 + $0x150] sm:$0xff] %vm94_vm0, %v2003_v4  ;;  %v2006_v57 = vmul.f32 %v3042_v23, %v4556_v56  ;;  %3063 = vpow2.f32 %v2213_v28 }
 0x19e   :  { %v3046_v2 = vpop.eup %3045  ;;  %1165 = vst.msk [vmem:[%s5060_s5 + $0x168] sm:$0xff] %vm94_vm0, %v1101_v42  ;;  %v1100_v1 = vmul.f32 %v3044_v14, %v4566_v11  ;;  %3065 = vpow2.f32 %v2342_v25  ;;  %v4750_v25 = vadd.f32 %v4159_v47, %v5109_v8  ;;  %v2215_v14 = vmul.f32 -1.442695, %v4742_v53 }
 0x19f   :  { %v3048_v31 = vpop.eup %3047  ;;  %2070 = vst.msk [vmem:[%s5061_s6 + $0x168] sm:$0xff] %vm94_vm0, %v2006_v57  ;;  %v1813_v61 = vadd.f32 1.0, %v3046_v2  ;;  %3067 = vpow2.f32 %v2212_v52  ;;  %v5110_v52 = vld [vmem:[#allocation22_spill] sm:$0xff] }
 0x1a0   :  { %v3050_v49 = vpop.eup %3049  ;;  %1164 = vst.msk [vmem:[%s5060_s5 + $0x160] sm:$0xff] %vm94_vm0, %v1100_v1  ;;  %v911_v56 = vadd.f32 1.0, %v3048_v31  ;;  %3069 = vpow2.f32 %v2341_v33  ;;  %v4754_v23 = vadd.f32 %v4172_v29, %v5110_v52  ;;  %v4760_v57 = vld [vmem:[%s5058_s2] ss:$0 sm:$0xff]  ;;  %v2344_v31 = vmul.f32 -1.442695, %v4746_v12 }
 0x1a1   :  { %v3052_v15 = vpop.eup %3051  ;;  %3071 = vrcp.f32 %v1813_v61  ;;  %v1816_v11 = vadd.f32 1.0, %v3050_v49  ;;  %v4764_v47 = vadd.f32 %v4760_v57, %v4218_v41  ;;  %v4769_v61 = vadd.f32 %v4172_v29, %v4220_v10  ;;  %v4782_v29 = vld [vmem:[%s5059_s4] ss:$0 sm:$0xff] }
 0x1a2   :  { %v3054_v9 = vpop.eup %3053  ;;  %3073 = vrcp.f32 %v911_v56  ;;  %v910_v27 = vadd.f32 1.0, %v3052_v15  ;;  %v2214_v15 = vmul.f32 -1.442695, %v4750_v25  ;;  %v4786_v10 = vadd.f32 %v4782_v29, %v4234_v58 }
 0x1a3   :  { %v3056_v50 = vpop.eup %3055  ;;  %3075 = vrcp.f32 %v1816_v11  ;;  %v1815_v37 = vadd.f32 1.0, %v3054_v9  ;;  %v4775_v11 = vadd.f32 %v4760_v57, %v4232_v34 }
 0x1a4   :  { %v3058_v44 = vpop.eup %3057  ;;  %3077 = vrcp.f32 %v910_v27  ;;  %v913_v48 = vadd.f32 1.0, %v3056_v50  ;;  %v2343_v27 = vmul.f32 -1.442695, %v4754_v23  ;;  %v4796_v50 = vadd.f32 %v4760_v57, %v4266_v30 }
 0x1a5   :  { %v3060_v32 = vpop.eup %3059  ;;  %3079 = vrcp.f32 %v1815_v37  ;;  %v1818_v45 = vadd.f32 1.0, %v3058_v44  ;;  %v2346_v44 = vmul.f32 -1.442695, %v4769_v61 }
 0x1a6   :  { %v3062_v35 = vpop.eup %3061  ;;  %3081 = vrcp.f32 %v913_v48  ;;  %v912_v60 = vadd.f32 1.0, %v3060_v32  ;;  %v2216_v32 = vmul.f32 -1.442695, %v4775_v11 }
 0x1a7   :  { %v3064_v59 = vpop.eup %3063  ;;  %3083 = vrcp.f32 %v1818_v45  ;;  %v1817_v51 = vadd.f32 1.0, %v3062_v35  ;;  %v2345_v35 = vmul.f32 -1.442695, %v4786_v10 }
 0x1a8   :  { %v3066_v28 = vpop.eup %3065  ;;  %3085 = vrcp.f32 %v912_v60  ;;  %v915_v20 = vadd.f32 1.0, %v3064_v59  ;;  %v5111_v60 = vld [vmem:[#allocation23_spill] sm:$0xff]  ;;  %v2219_v59 = vmul.f32 -1.442695, %v4796_v50 }
 0x1a9   :  { %v3068_v46 = vpop.eup %3067  ;;  %3087 = vrcp.f32 %v1817_v51  ;;  %v1820_v4 = vadd.f32 1.0, %v3066_v28 }
 0x1aa   :  { %v3070_v42 = vpop.eup %3069  ;;  %3089 = vrcp.f32 %v915_v20  ;;  %v914_v33 = vadd.f32 1.0, %v3068_v46 }
 0x1ab   :  { %v3072_v2 = vpop.eup %3071  ;;  %3091 = vrcp.f32 %v1820_v4  ;;  %v1819_v1 = vadd.f32 1.0, %v3070_v42 }
 0x1ac   :  { %v3074_v49 = vpop.eup %3073  ;;  %v2005_v56 = vmul.f32 %v3072_v2, %v4612_v16  ;;  %3093 = vrcp.f32 %v914_v33 }
 0x1ad   :  { %v3076_v41 = vpop.eup %3075  ;;  %v1103_v9 = vmul.f32 %v3074_v49, %v4616_v13  ;;  %3095 = vrcp.f32 %v1819_v1  ;;  %v2217_v13 = vmul.f32 -1.442695, %v4764_v47 }
 0x1ae   :  { %v3078_v16 = vpop.eup %3077  ;;  %2069 = vst.msk [vmem:[%s5061_s6 + $0x160] sm:$0xff] %vm94_vm0, %v2005_v56  ;;  %v2008_v34 = vmul.f32 %v3076_v41, %v4620_v38  ;;  %3097 = vpow2.f32 %v2215_v14  ;;  %v4806_v38 = vadd.f32 %v4782_v29, %v4268_v62 }
 0x1af   :  { %v3080_v37 = vpop.eup %3079  ;;  %1167 = vst.msk [vmem:[%s5060_s5 + $0x178] sm:$0xff] %vm94_vm0, %v1103_v9  ;;  %v1102_v58 = vmul.f32 %v3078_v16, %v4624_v6  ;;  %3099 = vpow2.f32 %v2344_v31  ;;  %v4816_v6 = vadd.f32 %v4760_v57, %v4280_v36 }
 0x1b0   :  { %v3082_v48 = vpop.eup %3081  ;;  %2072 = vst.msk [vmem:[%s5061_s6 + $0x178] sm:$0xff] %vm94_vm0, %v2008_v34  ;;  %v2007_v30 = vmul.f32 %v3080_v37, %v4629_v3  ;;  %3101 = vpow2.f32 %v2214_v15  ;;  %v4826_v3 = vadd.f32 %v4782_v29, %v5111_v60  ;;  %v2348_v28 = vmul.f32 -1.442695, %v4806_v38 }
 0x1b1   :  { %v3084_v45 = vpop.eup %3083  ;;  %1166 = vst.msk [vmem:[%s5060_s5 + $0x170] sm:$0xff] %vm94_vm0, %v1102_v58  ;;  %v1105_v62 = vmul.f32 %v3082_v48, %v4634_v39  ;;  %3103 = vpow2.f32 %v2343_v27  ;;  %v4836_v39 = vadd.f32 %v4760_v57, %v4302_v17  ;;  %v4882_v58 = vadd.f32 %v4782_v29, %v4304_v22 }
 0x1b2   :  { %v3086_v5 = vpop.eup %3085  ;;  %2071 = vst.msk [vmem:[%s5061_s6 + $0x170] sm:$0xff] %vm94_vm0, %v2007_v30  ;;  %v2010_v36 = vmul.f32 %v3084_v45, %v4640_v54  ;;  %3105 = vpow2.f32 %v2217_v13  ;;  %v2218_v54 = vmul.f32 -1.442695, %v4816_v6  ;;  %v2347_v46 = vmul.f32 -1.442695, %v4826_v3 }
 0x1b3   :  { %v3088_v51 = vpop.eup %3087  ;;  %1169 = vst.msk [vmem:[%s5060_s5 + $0x188] sm:$0xff] %vm94_vm0, %v1105_v62  ;;  %v1104_v40 = vmul.f32 %v3086_v5, %v4646_v7  ;;  %3107 = vpow2.f32 %v2346_v44  ;;  %v2221_v52 = vmul.f32 -1.442695, %v4836_v39  ;;  %v4886_v30 = vadd.f32 %v4760_v57, %v4312_v21  ;;  %v5112_v5 = vld [vmem:[#allocation24_spill] sm:$0xff] }
 0x1b4   :  { %v3090_v20 = vpop.eup %3089  ;;  %2074 = vst.msk [vmem:[%s5061_s6 + $0x188] sm:$0xff] %vm94_vm0, %v2010_v36  ;;  %v2009_v17 = vmul.f32 %v3088_v51, %v4656_v19  ;;  %3109 = vpow2.f32 %v2216_v32  ;;  %v4890_v62 = vadd.f32 %v4782_v29, %v4314_v26  ;;  %v4894_v22 = vadd.f32 %v4760_v57, %v5112_v5  ;;  %v5113_v51 = vld [vmem:[#allocation25_spill] sm:$0xff] }
 0x1b5   :  { %v3092_v8 = vpop.eup %3091  ;;  %1168 = vst.msk [vmem:[%s5060_s5 + $0x180] sm:$0xff] %vm94_vm0, %v1104_v40  ;;  %v1107_v7 = vmul.f32 %v3090_v20, %v4666_v43  ;;  %3111 = vpow2.f32 %v2345_v35  ;;  %v2350_v21 = vmul.f32 -1.442695, %v4882_v58  ;;  %v4899_v40 = vadd.f32 %v4782_v29, %v5113_v51 }
 0x1b6   :  { %v3094_v4 = vpop.eup %3093  ;;  %2073 = vst.msk [vmem:[%s5061_s6 + $0x180] sm:$0xff] %vm94_vm0, %v2009_v17  ;;  %v2012_v19 = vmul.f32 %v3092_v8, %v4676_v0  ;;  %3113 = vpow2.f32 %v2219_v59  ;;  %v2220_v20 = vmul.f32 -1.442695, %v4886_v30  ;;  %v5114_v17 = vld [vmem:[#allocation26_spill] sm:$0xff] }
 0x1b7   :  { %v3096_v42 = vpop.eup %3095  ;;  %1171 = vst.msk [vmem:[%s5060_s5 + $0x198] sm:$0xff] %vm94_vm0, %v1107_v7  ;;  %v1106_v43 = vmul.f32 %v3094_v4, %v4686_v18  ;;  %3115 = vpow2.f32 %v2348_v28  ;;  %v5115_v4 = vld [vmem:[#allocation27_spill] sm:$0xff] }
 0x1b8   :  { %v3098_v33 = vpop.eup %3097  ;;  %2076 = vst.msk [vmem:[%s5061_s6 + $0x198] sm:$0xff] %vm94_vm0, %v2012_v19  ;;  %v2011_v0 = vmul.f32 %v3096_v42, %v4696_v63  ;;  %3117 = vpow2.f32 %v2218_v54  ;;  %v4904_v54 = vadd.f32 %v4760_v57, %v5114_v17  ;;  %v4910_v19 = vadd.f32 %v4782_v29, %v5115_v4 }
 0x1b9   :  { %v3100_v14 = vpop.eup %3099  ;;  %1170 = vst.msk [vmem:[%s5060_s5 + $0x190] sm:$0xff] %vm94_vm0, %v1106_v43  ;;  %v917_v2 = vadd.f32 1.0, %v3098_v33  ;;  %3119 = vpow2.f32 %v2347_v46  ;;  %v2349_v46 = vmul.f32 -1.442695, %v4890_v62  ;;  %v2223_v43 = vmul.f32 -1.442695, %v4894_v22 }
 0x1ba   :  { %v3102_v1 = vpop.eup %3101  ;;  %2075 = vst.msk [vmem:[%s5061_s6 + $0x190] sm:$0xff] %vm94_vm0, %v2011_v0  ;;  %v1822_v18 = vadd.f32 1.0, %v3100_v14  ;;  %3121 = vpow2.f32 %v2221_v52  ;;  %v4916_v33 = vadd.f32 %v4760_v57, %v4342_v24  ;;  %v2352_v14 = vmul.f32 -1.442695, %v4899_v40 }
 0x1bb   :  { %v3104_v31 = vpop.eup %3103  ;;  %3123 = vrcp.f32 %v917_v2  ;;  %v916_v63 = vadd.f32 1.0, %v3102_v1  ;;  %v2222_v1 = vmul.f32 -1.442695, %v4904_v54 }
 0x1bc   :  { %v3106_v49 = vpop.eup %3105  ;;  %3125 = vrcp.f32 %v1822_v18  ;;  %v1821_v56 = vadd.f32 1.0, %v3104_v31  ;;  %v5116_v18 = vld [vmem:[#allocation28_spill] sm:$0xff] }
 0x1bd   :  { %v3108_v15 = vpop.eup %3107  ;;  %3127 = vrcp.f32 %v916_v63  ;;  %v919_v41 = vadd.f32 1.0, %v3106_v49  ;;  %v2351_v63 = vmul.f32 -1.442695, %v4910_v19  ;;  %v5117_v49 = vld [vmem:[#allocation29_spill] sm:$0xff] }
 0x1be   :  { %v3110_v9 = vpop.eup %3109  ;;  %3129 = vrcp.f32 %v1821_v56  ;;  %v1824_v27 = vadd.f32 1.0, %v3108_v15  ;;  %v2225_v15 = vmul.f32 -1.442695, %v4916_v33 }
 0x1bf   :  { %v3112_v16 = vpop.eup %3111  ;;  %3131 = vrcp.f32 %v919_v41  ;;  %v918_v34 = vadd.f32 1.0, %v3110_v9 }
 0x1c0   :  { %v3114_v13 = vpop.eup %3113  ;;  %3133 = vrcp.f32 %v1824_v27  ;;  %v1823_v37 = vadd.f32 1.0, %v3112_v16 }
 0x1c1   :  { %v3116_v44 = vpop.eup %3115  ;;  %3135 = vrcp.f32 %v918_v34  ;;  %v921_v48 = vadd.f32 1.0, %v3114_v13 }
 0x1c2   :  { %v3118_v32 = vpop.eup %3117  ;;  %3137 = vrcp.f32 %v1823_v37  ;;  %v1826_v45 = vadd.f32 1.0, %v3116_v44 }
 0x1c3   :  { %v3120_v35 = vpop.eup %3119  ;;  %3139 = vrcp.f32 %v921_v48  ;;  %v920_v60 = vadd.f32 1.0, %v3118_v32 }
 0x1c4   :  { %v3122_v36 = vpop.eup %3121  ;;  %3141 = vrcp.f32 %v1826_v45  ;;  %v1825_v59 = vadd.f32 1.0, %v3120_v35 }
 0x1c5   :  { %v3124_v28 = vpop.eup %3123  ;;  %3143 = vrcp.f32 %v920_v60  ;;  %v923_v26 = vadd.f32 1.0, %v3122_v36 }
 0x1c6   :  { %v3126_v8 = vpop.eup %3125  ;;  %v1109_v7 = vmul.f32 %v3124_v28, %v4742_v53  ;;  %3145 = vrcp.f32 %v1825_v59 }
 0x1c7   :  { %v3128_v52 = vpop.eup %3127  ;;  %v2014_v42 = vmul.f32 %v3126_v8, %v4746_v12  ;;  %3147 = vrcp.f32 %v923_v26  ;;  %v4926_v12 = vadd.f32 %v4782_v29, %v4344_v55 }
 0x1c8   :  { %v3130_v0 = vpop.eup %3129  ;;  %1173 = vst.msk [vmem:[%s5060_s5 + $0x1a8] sm:$0xff] %vm94_vm0, %v1109_v7  ;;  %v1108_v53 = vmul.f32 %v3128_v52, %v4750_v25  ;;  %3149 = vpow2.f32 %v2350_v21  ;;  %v4936_v25 = vadd.f32 %v4760_v57, %v5116_v18 }
 0x1c9   :  { %v3132_v2 = vpop.eup %3131  ;;  %2078 = vst.msk [vmem:[%s5061_s6 + $0x1a8] sm:$0xff] %vm94_vm0, %v2014_v42  ;;  %v2013_v24 = vmul.f32 %v3130_v0, %v4754_v23  ;;  %3151 = vpow2.f32 %v2220_v20  ;;  %v4946_v23 = vadd.f32 %v4782_v29, %v5117_v49  ;;  %v2354_v29 = vmul.f32 -1.442695, %v4926_v12 }
 0x1ca   :  { %v3134_v31 = vpop.eup %3133  ;;  %1172 = vst.msk [vmem:[%s5060_s5 + $0x1a0] sm:$0xff] %vm94_vm0, %v1108_v53  ;;  %v1111_v55 = vmul.f32 %v3132_v2, %v4764_v47  ;;  %3153 = vpow2.f32 %v2349_v46  ;;  %v2224_v27 = vmul.f32 -1.442695, %v4936_v25 }
 0x1cb   :  { %v3136_v56 = vpop.eup %3135  ;;  %2077 = vst.msk [vmem:[%s5061_s6 + $0x1a0] sm:$0xff] %vm94_vm0, %v2013_v24  ;;  %v2016_v57 = vmul.f32 %v3134_v31, %v4769_v61  ;;  %3155 = vpow2.f32 %v2223_v43  ;;  %v2353_v34 = vmul.f32 -1.442695, %v4946_v23 }
 0x1cc   :  { %v3138_v41 = vpop.eup %3137  ;;  %1175 = vst.msk [vmem:[%s5060_s5 + $0x1b8] sm:$0xff] %vm94_vm0, %v1111_v55  ;;  %v1110_v47 = vmul.f32 %v3136_v56, %v4775_v11  ;;  %3157 = vpow2.f32 %v2352_v14 }
 0x1cd   :  { %v3140_v9 = vpop.eup %3139  ;;  %2080 = vst.msk [vmem:[%s5061_s6 + $0x1b8] sm:$0xff] %vm94_vm0, %v2016_v57  ;;  %v2015_v61 = vmul.f32 %v3138_v41, %v4786_v10  ;;  %3159 = vpow2.f32 %v2222_v1 }
 0x1ce   :  { %v3142_v16 = vpop.eup %3141  ;;  %1174 = vst.msk [vmem:[%s5060_s5 + $0x1b0] sm:$0xff] %vm94_vm0, %v1110_v47  ;;  %v1113_v11 = vmul.f32 %v3140_v9, %v4796_v50  ;;  %3161 = vpow2.f32 %v2351_v63 }
 0x1cf   :  { %v3144_v13 = vpop.eup %3143  ;;  %2079 = vst.msk [vmem:[%s5061_s6 + $0x1b0] sm:$0xff] %vm94_vm0, %v2015_v61  ;;  %v2018_v10 = vmul.f32 %v3142_v16, %v4806_v38  ;;  %3163 = vpow2.f32 %v2225_v15 }
 0x1d0   :  { %v3146_v37 = vpop.eup %3145  ;;  %1177 = vst.msk [vmem:[%s5060_s5 + $0x1c8] sm:$0xff] %vm94_vm0, %v1113_v11  ;;  %v1112_v50 = vmul.f32 %v3144_v13, %v4816_v6  ;;  %3165 = vpow2.f32 %v2354_v29 }
 0x1d1   :  { %v3148_v44 = vpop.eup %3147  ;;  %2082 = vst.msk [vmem:[%s5061_s6 + $0x1c8] sm:$0xff] %vm94_vm0, %v2018_v10  ;;  %v2017_v48 = vmul.f32 %v3146_v37, %v4826_v3  ;;  %3167 = vpow2.f32 %v2224_v27 }
 0x1d2   :  { %v3150_v38 = vpop.eup %3149  ;;  %1176 = vst.msk [vmem:[%s5060_s5 + $0x1c0] sm:$0xff] %vm94_vm0, %v1112_v50  ;;  %v1115_v32 = vmul.f32 %v3148_v44, %v4836_v39  ;;  %3169 = vpow2.f32 %v2353_v34 }
 0x1d3   :  { %v3152_v6 = vpop.eup %3151  ;;  %2081 = vst.msk [vmem:[%s5061_s6 + $0x1c0] sm:$0xff] %vm94_vm0, %v2017_v48  ;;  %v1828_v45 = vadd.f32 1.0, %v3150_v38 }
 0x1d4   :  { %v3154_v35 = vpop.eup %3153  ;;  %1179 = vst.msk [vmem:[%s5060_s5 + $0x1d8] sm:$0xff] %vm94_vm0, %v1115_v32  ;;  %v922_v3 = vadd.f32 1.0, %v3152_v6 }
 0x1d5   :  { %v3156_v60 = vpop.eup %3155  ;;  %3171 = vrcp.f32 %v1828_v45  ;;  %v1827_v5 = vadd.f32 1.0, %v3154_v35 }
 0x1d6   :  { %v3158_v36 = vpop.eup %3157  ;;  %3173 = vrcp.f32 %v922_v3  ;;  %v925_v39 = vadd.f32 1.0, %v3156_v60 }
 0x1d7   :  { %v3160_v59 = vpop.eup %3159  ;;  %3175 = vrcp.f32 %v1827_v5  ;;  %v1830_v21 = vadd.f32 1.0, %v3158_v36 }
 0x1d8   :  { %v3162_v51 = vpop.eup %3161  ;;  %3177 = vrcp.f32 %v925_v39  ;;  %v924_v28 = vadd.f32 1.0, %v3160_v59 }
 0x1d9   :  { %v3164_v26 = vpop.eup %3163  ;;  %3179 = vrcp.f32 %v1830_v21  ;;  %v1829_v20 = vadd.f32 1.0, %v3162_v51 }
 0x1da   :  { %v3166_v17 = vpop.eup %3165  ;;  %3181 = vrcp.f32 %v924_v28  ;;  %v927_v8 = vadd.f32 1.0, %v3164_v26 }
 0x1db   :  { %v3168_v7 = vpop.eup %3167  ;;  %3183 = vrcp.f32 %v1829_v20  ;;  %v1832_v46 = vadd.f32 1.0, %v3166_v17 }
 0x1dc   :  { %v3170_v4 = vpop.eup %3169  ;;  %3185 = vrcp.f32 %v927_v8  ;;  %v926_v52 = vadd.f32 1.0, %v3168_v7 }
 0x1dd   :  { %3187 = vrcp.f32 %v1832_v46  ;;  %v1831_v42 = vadd.f32 1.0, %v3170_v4 }
 0x1de   :  { %3189 = vrcp.f32 %v926_v52 }
 0x1df   :  { %v3172_v43 = vpop.eup %3171  ;;  %3191 = vrcp.f32 %v1831_v42 }
 0x1e0   :  { %v3174_v0 = vpop.eup %3173  ;;  %v2020_v53 = vmul.f32 %v3172_v43, %v4882_v58 }
 0x1e1   :  { %v3176_v14 = vpop.eup %3175  ;;  %v1114_v2 = vmul.f32 %v3174_v0, %v4886_v30 }
 0x1e2   :  { %v3178_v24 = vpop.eup %3177  ;;  %2084 = vst.msk [vmem:[%s5061_s6 + $0x1d8] sm:$0xff] %vm94_vm0, %v2020_v53  ;;  %v2019_v1 = vmul.f32 %v3176_v14, %v4890_v62 }
 0x1e3   :  { %v3180_v18 = vpop.eup %3179  ;;  %1178 = vst.msk [vmem:[%s5060_s5 + $0x1d0] sm:$0xff] %vm94_vm0, %v1114_v2  ;;  %v1117_v31 = vmul.f32 %v3178_v24, %v4894_v22 }
 0x1e4   :  { %v3182_v58 = vpop.eup %3181  ;;  %2083 = vst.msk [vmem:[%s5061_s6 + $0x1d0] sm:$0xff] %vm94_vm0, %v2019_v1  ;;  %v2022_v30 = vmul.f32 %v3180_v18, %v4899_v40 }
 0x1e5   :  { %v3184_v55 = vpop.eup %3183  ;;  %1181 = vst.msk [vmem:[%s5060_s5 + $0x1e8] sm:$0xff] %vm94_vm0, %v1117_v31  ;;  %v1116_v62 = vmul.f32 %v3182_v58, %v4904_v54 }
 0x1e6   :  { %v3186_v63 = vpop.eup %3185  ;;  %2086 = vst.msk [vmem:[%s5061_s6 + $0x1e8] sm:$0xff] %vm94_vm0, %v2022_v30  ;;  %v2021_v22 = vmul.f32 %v3184_v55, %v4910_v19 }
 0x1e7   :  { %v3188_v49 = vpop.eup %3187  ;;  %1180 = vst.msk [vmem:[%s5060_s5 + $0x1e0] sm:$0xff] %vm94_vm0, %v1116_v62  ;;  %v1119_v40 = vmul.f32 %v3186_v63, %v4916_v33 }
 0x1e8   :  { %v3190_v56 = vpop.eup %3189  ;;  %2085 = vst.msk [vmem:[%s5061_s6 + $0x1e0] sm:$0xff] %vm94_vm0, %v2021_v22  ;;  %v2024_v54 = vmul.f32 %v3188_v49, %v4926_v12 }
 0x1e9   :  { %v3192_v57 = vpop.eup %3191  ;;  %1183 = vst.msk [vmem:[%s5060_s5 + $0x1f8] sm:$0xff] %vm94_vm0, %v1119_v40  ;;  %v1118_v19 = vmul.f32 %v3190_v56, %v4936_v25 }
 0x1ea   :  { %2088 = vst.msk [vmem:[%s5061_s6 + $0x1f8] sm:$0xff] %vm94_vm0, %v2024_v54  ;;  %v2023_v33 = vmul.f32 %v3192_v57, %v4946_v23 }
 0x1eb   :  { %1182 = vst.msk [vmem:[%s5060_s5 + $0x1f0] sm:$0xff] %vm94_vm0, %v1118_v19 }
 0x1ec   :  { %2087 = vst.msk [vmem:[%s5061_s6 + $0x1f0] sm:$0xff] %vm94_vm0, %v2023_v33 }

// kernel: csp_block_forward.7
= control target key start
LH: loop header
LB: loop body
LE: loop exit
PB: predicated region body
PF: predicated region fallthrough
CT: control target
= control target key end

     0   :  { %vm150_vm0 = vcmask 64512   ;;  %vm1824_vm1 = vcmask 130048   ;;  %s3867_s3 = inlined_call_operand.vmem [shape: f32[8,16], index: 3, kind: input, shape index: {}]   ;;  %s3868_s2 = inlined_call_operand.vmem [shape: f32[8,16], index: 2, kind: input, shape index: {}]   ;;  %s3869_s1 = inlined_call_operand.vmem [shape: f32[512,8], index: 1, kind: input, shape index: {}]   ;;  %s3870_s0 = inlined_call_operand.vmem [shape: f32[512,8], index: 0, kind: input, shape index: {}]   ;;  %s3871_s4 = inlined_call_operand.vmem [shape: f32[1,16], index: 4, kind: input, shape index: {}]   ;;  %s3872_s5 = inlined_call_operand.vmem [shape: f32[512,16], index: 5, kind: output, shape index: {}]  }
   0x1   :  { %v149_v0 = vld [vmem:[%s3867_s3] sm:$0xff]  ;;  %v86_v4 = vld [vmem:[%s3869_s1 + $0x8] sm:$0xff]  ;;  %v87_v6 = vld [vmem:[%s3869_s1 + $0x10] sm:$0xff] }
   0x2   :  { %v84_v1 = vld [vmem:[%s3868_s2] sm:$0xff]  ;;  %2216 = vmatprep.subr.mxu1 %v149_v0  ;;  %v21_v5 = vld [vmem:[%s3870_s0 + $0x8] sm:$0xff]  ;;  %v22_v7 = vld [vmem:[%s3870_s0 + $0x10] sm:$0xff] }
   0x3   :  { %v85_v2 = vld [vmem:[%s3869_s1] sm:$0xff]  ;;  %2314 = vmatprep.subr.mxu0 %v84_v1  ;;  %2217 = vmatpush3.msra.mxu1 %v149_v0  ;;  %v88_v8 = vld [vmem:[%s3869_s1 + $0x18] sm:$0xff]  ;;  %v90_v12 = vld [vmem:[%s3869_s1 + $0x28] sm:$0xff] }
   0x4   :  { %v20_v3 = vld [vmem:[%s3870_s0] sm:$0xff]  ;;  %2218 = vmatprep.mubr.msk.f32.mxu1 %vm150_vm0, %v85_v2  ;;  %2315 = vmatpush3.msra.mxu0 %v84_v1  ;;  %v23_v9 = vld [vmem:[%s3870_s0 + $0x18] sm:$0xff]  ;;  %v25_v13 = vld [vmem:[%s3870_s0 + $0x28] sm:$0xff] }
   0x5   :  { %2316 = vmatprep.mubr.msk.f32.mxu0 %vm150_vm0, %v20_v3  ;;  %2219 = vmatmul.mubr.msk.f32.vlgmr.msra.gmra.mrb[0].mxu1 %vm150_vm0, %v86_v4  ;;  %v89_v10 = vld [vmem:[%s3869_s1 + $0x20] sm:$0xff]  ;;  %v91_v14 = vld [vmem:[%s3869_s1 + $0x30] sm:$0xff]  ;;  %v92_v16 = vld [vmem:[%s3869_s1 + $0x38] sm:$0xff] }
   0x6   :  { %2317 = vmatmul.mubr.msk.f32.vlgmr.msra.gmra.mrb[0].mxu0 %vm150_vm0, %v21_v5  ;;  %2221 = vmatprep.mubr.msk.f32.mxu1 %vm150_vm0, %v87_v6  ;;  %v24_v11 = vld [vmem:[%s3870_s0 + $0x20] sm:$0xff]  ;;  %v26_v15 = vld [vmem:[%s3870_s0 + $0x30] sm:$0xff]  ;;  %v27_v17 = vld [vmem:[%s3870_s0 + $0x38] sm:$0xff] }
   0x7   :  { %2319 = vmatprep.mubr.msk.f32.mxu0 %vm150_vm0, %v22_v7  ;;  %v93_v18 = vld [vmem:[%s3869_s1 + $0x40] sm:$0xff]  ;;  %v94_v20 = vld [vmem:[%s3869_s1 + $0x48] sm:$0xff]  ;;  %v95_v22 = vld [vmem:[%s3869_s1 + $0x50] sm:$0xff] }
   0x8   :  { %v28_v19 = vld [vmem:[%s3870_s0 + $0x40] sm:$0xff]  ;;  %v29_v21 = vld [vmem:[%s3870_s0 + $0x48] sm:$0xff]  ;;  %v30_v23 = vld [vmem:[%s3870_s0 + $0x50] sm:$0xff] }
   0x9   :  { %2222 = vmatmul.mubr.msk.f32.gmra.mrb[2].mxu1 %vm150_vm0, %v88_v8  ;;  %v96_v24 = vld [vmem:[%s3869_s1 + $0x58] sm:$0xff]  ;;  %v97_v26 = vld [vmem:[%s3869_s1 + $0x60] sm:$0xff]  ;;  %v98_v28 = vld [vmem:[%s3869_s1 + $0x68] sm:$0xff] }
   0xa   :  { %2320 = vmatmul.mubr.msk.f32.gmra.mrb[2].mxu0 %vm150_vm0, %v23_v9  ;;  %2224 = vmatprep.mubr.msk.f32.mxu1 %vm150_vm0, %v89_v10  ;;  %v31_v25 = vld [vmem:[%s3870_s0 + $0x58] sm:$0xff]  ;;  %v32_v27 = vld [vmem:[%s3870_s0 + $0x60] sm:$0xff]  ;;  %v33_v29 = vld [vmem:[%s3870_s0 + $0x68] sm:$0xff] }
   0xb   :  { %2322 = vmatprep.mubr.msk.f32.mxu0 %vm150_vm0, %v24_v11  ;;  %v99_v30 = vld [vmem:[%s3869_s1 + $0x70] sm:$0xff]  ;;  %v100_v32 = vld [vmem:[%s3869_s1 + $0x78] sm:$0xff]  ;;  %v101_v34 = vld [vmem:[%s3869_s1 + $0x80] sm:$0xff] }
   0xc   :  { %v34_v31 = vld [vmem:[%s3870_s0 + $0x70] sm:$0xff]  ;;  %v35_v33 = vld [vmem:[%s3870_s0 + $0x78] sm:$0xff]  ;;  %v36_v35 = vld [vmem:[%s3870_s0 + $0x80] sm:$0xff] }
   0xd   :  { %2225 = vmatmul.mubr.msk.f32.gmra.mrb[4].mxu1 %vm150_vm0, %v90_v12  ;;  %v102_v36 = vld [vmem:[%s3869_s1 + $0x88] sm:$0xff]  ;;  %v103_v38 = vld [vmem:[%s3869_s1 + $0x90] sm:$0xff]  ;;  %v104_v40 = vld [vmem:[%s3869_s1 + $0x98] sm:$0xff] }
   0xe   :  { %2323 = vmatmul.mubr.msk.f32.gmra.mrb[4].mxu0 %vm150_vm0, %v25_v13  ;;  %2227 = vmatprep.mubr.msk.f32.mxu1 %vm150_vm0, %v91_v14  ;;  %v37_v37 = vld [vmem:[%s3870_s0 + $0x88] sm:$0xff]  ;;  %v38_v39 = vld [vmem:[%s3870_s0 + $0x90] sm:$0xff]  ;;  %v39_v41 = vld [vmem:[%s3870_s0 + $0x98] sm:$0xff] }
   0xf   :  { %2325 = vmatprep.mubr.msk.f32.mxu0 %vm150_vm0, %v26_v15  ;;  %v105_v42 = vld [vmem:[%s3869_s1 + $0xa0] sm:$0xff]  ;;  %v106_v44 = vld [vmem:[%s3869_s1 + $0xa8] sm:$0xff]  ;;  %v107_v46 = vld [vmem:[%s3869_s1 + $0xb0] sm:$0xff] }
  0x10   :  { %v40_v43 = vld [vmem:[%s3870_s0 + $0xa0] sm:$0xff]  ;;  %v41_v45 = vld [vmem:[%s3870_s0 + $0xa8] sm:$0xff]  ;;  %v42_v47 = vld [vmem:[%s3870_s0 + $0xb0] sm:$0xff] }
  0x11   :  { %2228 = vmatmul.mubr.msk.f32.gmra.mrb[6].mxu1 %vm150_vm0, %v92_v16  ;;  %v108_v48 = vld [vmem:[%s3869_s1 + $0xb8] sm:$0xff]  ;;  %v109_v50 = vld [vmem:[%s3869_s1 + $0xc0] sm:$0xff]  ;;  %v110_v52 = vld [vmem:[%s3869_s1 + $0xc8] sm:$0xff] }
  0x12   :  { %2326 = vmatmul.mubr.msk.f32.gmra.mrb[6].mxu0 %vm150_vm0, %v27_v17  ;;  %2230 = vmatprep.mubr.msk.f32.mxu1 %vm150_vm0, %v93_v18  ;;  %v43_v49 = vld [vmem:[%s3870_s0 + $0xb8] sm:$0xff]  ;;  %v44_v51 = vld [vmem:[%s3870_s0 + $0xc0] sm:$0xff]  ;;  %v45_v53 = vld [vmem:[%s3870_s0 + $0xc8] sm:$0xff] }
  0x13   :  { %2328 = vmatprep.mubr.msk.f32.mxu0 %vm150_vm0, %v28_v19  ;;  %v111_v54 = vld [vmem:[%s3869_s1 + $0xd0] sm:$0xff]  ;;  %v112_v56 = vld [vmem:[%s3869_s1 + $0xd8] sm:$0xff]  ;;  %v113_v58 = vld [vmem:[%s3869_s1 + $0xe0] sm:$0xff] }
  0x14   :  { %v46_v55 = vld [vmem:[%s3870_s0 + $0xd0] sm:$0xff]  ;;  %v47_v57 = vld [vmem:[%s3870_s0 + $0xd8] sm:$0xff]  ;;  %v48_v59 = vld [vmem:[%s3870_s0 + $0xe0] sm:$0xff] }
  0x15   :  { %2231 = vmatmul.mubr.msk.f32.gmra.mrb[8].mxu1 %vm150_vm0, %v94_v20  ;;  %v114_v60 = vld [vmem:[%s3869_s1 + $0xe8] sm:$0xff]  ;;  %v115_v62 = vld [vmem:[%s3869_s1 + $0xf0] sm:$0xff]  ;;  %v116_v0 = vld [vmem:[%s3869_s1 + $0xf8] sm:$0xff] }
  0x16   :  { %2329 = vmatmul.mubr.msk.f32.gmra.mrb[8].mxu0 %vm150_vm0, %v29_v21  ;;  %2233 = vmatprep.mubr.msk.f32.mxu1 %vm150_vm0, %v95_v22  ;;  %v49_v61 = vld [vmem:[%s3870_s0 + $0xe8] sm:$0xff]  ;;  %v50_v63 = vld [vmem:[%s3870_s0 + $0xf0] sm:$0xff]  ;;  %v51_v1 = vld [vmem:[%s3870_s0 + $0xf8] sm:$0xff] }
  0x17   :  { %2331 = vmatprep.mubr.msk.f32.mxu0 %vm150_vm0, %v30_v23  ;;  %v117_v2 = vld [vmem:[%s3869_s1 + $0x100] sm:$0xff]  ;;  %v118_v4 = vld [vmem:[%s3869_s1 + $0x108] sm:$0xff]  ;;  %v119_v6 = vld [vmem:[%s3869_s1 + $0x110] sm:$0xff] }
  0x18   :  { %v52_v3 = vld [vmem:[%s3870_s0 + $0x100] sm:$0xff]  ;;  %v53_v5 = vld [vmem:[%s3870_s0 + $0x108] sm:$0xff]  ;;  %v54_v7 = vld [vmem:[%s3870_s0 + $0x110] sm:$0xff] }
  0x19   :  { %2234 = vmatmul.mubr.msk.f32.gmra.mrb[10].mxu1 %vm150_vm0, %v96_v24  ;;  %v120_v8 = vld [vmem:[%s3869_s1 + $0x118] sm:$0xff]  ;;  %v121_v10 = vld [vmem:[%s3869_s1 + $0x120] sm:$0xff]  ;;  %v122_v12 = vld [vmem:[%s3869_s1 + $0x128] sm:$0xff] }
  0x1a   :  { %2332 = vmatmul.mubr.msk.f32.gmra.mrb[10].mxu0 %vm150_vm0, %v31_v25  ;;  %2236 = vmatprep.mubr.msk.f32.mxu1 %vm150_vm0, %v97_v26  ;;  %v55_v9 = vld [vmem:[%s3870_s0 + $0x118] sm:$0xff]  ;;  %v56_v11 = vld [vmem:[%s3870_s0 + $0x120] sm:$0xff]  ;;  %v57_v13 = vld [vmem:[%s3870_s0 + $0x128] sm:$0xff] }
  0x1b   :  { %2334 = vmatprep.mubr.msk.f32.mxu0 %vm150_vm0, %v32_v27  ;;  %v123_v14 = vld [vmem:[%s3869_s1 + $0x130] sm:$0xff]  ;;  %v124_v16 = vld [vmem:[%s3869_s1 + $0x138] sm:$0xff]  ;;  %v125_v18 = vld [vmem:[%s3869_s1 + $0x140] sm:$0xff] }
  0x1c   :  { %v58_v15 = vld [vmem:[%s3870_s0 + $0x130] sm:$0xff]  ;;  %v59_v17 = vld [vmem:[%s3870_s0 + $0x138] sm:$0xff]  ;;  %v60_v19 = vld [vmem:[%s3870_s0 + $0x140] sm:$0xff] }
  0x1d   :  { %2237 = vmatmul.mubr.msk.f32.gmra.mrb[12].mxu1 %vm150_vm0, %v98_v28  ;;  %v126_v20 = vld [vmem:[%s3869_s1 + $0x148] sm:$0xff]  ;;  %v127_v22 = vld [vmem:[%s3869_s1 + $0x150] sm:$0xff]  ;;  %v128_v24 = vld [vmem:[%s3869_s1 + $0x158] sm:$0xff] }
  0x1e   :  { %2335 = vmatmul.mubr.msk.f32.gmra.mrb[12].mxu0 %vm150_vm0, %v33_v29  ;;  %2239 = vmatprep.mubr.msk.f32.mxu1 %vm150_vm0, %v99_v30  ;;  %v61_v21 = vld [vmem:[%s3870_s0 + $0x148] sm:$0xff]  ;;  %v62_v23 = vld [vmem:[%s3870_s0 + $0x150] sm:$0xff]  ;;  %v63_v25 = vld [vmem:[%s3870_s0 + $0x158] sm:$0xff] }
  0x1f   :  { %2337 = vmatprep.mubr.msk.f32.mxu0 %vm150_vm0, %v34_v31  ;;  %v129_v26 = vld [vmem:[%s3869_s1 + $0x160] sm:$0xff]  ;;  %v130_v28 = vld [vmem:[%s3869_s1 + $0x168] sm:$0xff]  ;;  %v131_v30 = vld [vmem:[%s3869_s1 + $0x170] sm:$0xff] }
  0x20   :  { %v64_v27 = vld [vmem:[%s3870_s0 + $0x160] sm:$0xff]  ;;  %v65_v29 = vld [vmem:[%s3870_s0 + $0x168] sm:$0xff]  ;;  %v66_v31 = vld [vmem:[%s3870_s0 + $0x170] sm:$0xff] }
  0x21   :  { %2240 = vmatmul.mubr.msk.f32.gmra.mrb[14].mxu1 %vm150_vm0, %v100_v32  ;;  %v132_v32 = vld [vmem:[%s3869_s1 + $0x178] sm:$0xff] }
  0x22   :  { %2338 = vmatmul.mubr.msk.f32.gmra.mrb[14].mxu0 %vm150_vm0, %v35_v33  ;;  %2242 = vmatprep.mubr.msk.f32.mxu1 %vm150_vm0, %v101_v34  ;;  %v67_v33 = vld [vmem:[%s3870_s0 + $0x178] sm:$0xff]  ;;  %v133_v34 = vld [vmem:[%s3869_s1 + $0x180] sm:$0xff] }
  0x23   :  { %2340 = vmatprep.mubr.msk.f32.mxu0 %vm150_vm0, %v36_v35  ;;  %v68_v35 = vld [vmem:[%s3870_s0 + $0x180] sm:$0xff] }
  0x25   :  { %2243 = vmatmul.mubr.msk.f32.gmra.mrb[16].mxu1 %vm150_vm0, %v102_v36  ;;  %v134_v36 = vld [vmem:[%s3869_s1 + $0x188] sm:$0xff] }
  0x26   :  { %2341 = vmatmul.mubr.msk.f32.gmra.mrb[16].mxu0 %vm150_vm0, %v37_v37  ;;  %2245 = vmatprep.mubr.msk.f32.mxu1 %vm150_vm0, %v103_v38  ;;  %v69_v37 = vld [vmem:[%s3870_s0 + $0x188] sm:$0xff]  ;;  %v135_v38 = vld [vmem:[%s3869_s1 + $0x190] sm:$0xff] }
  0x27   :  { %2343 = vmatprep.mubr.msk.f32.mxu0 %vm150_vm0, %v38_v39  ;;  %v70_v39 = vld [vmem:[%s3870_s0 + $0x190] sm:$0xff] }
  0x29   :  { %2246 = vmatmul.mubr.msk.f32.gmra.mrb[18].mxu1 %vm150_vm0, %v104_v40  ;;  %v136_v40 = vld [vmem:[%s3869_s1 + $0x198] sm:$0xff] }
  0x2a   :  { %2344 = vmatmul.mubr.msk.f32.gmra.mrb[18].mxu0 %vm150_vm0, %v39_v41  ;;  %2248 = vmatprep.mubr.msk.f32.mxu1 %vm150_vm0, %v105_v42  ;;  %v71_v41 = vld [vmem:[%s3870_s0 + $0x198] sm:$0xff]  ;;  %v137_v42 = vld [vmem:[%s3869_s1 + $0x1a0] sm:$0xff] }
  0x2b   :  { %2346 = vmatprep.mubr.msk.f32.mxu0 %vm150_vm0, %v40_v43  ;;  %v72_v43 = vld [vmem:[%s3870_s0 + $0x1a0] sm:$0xff] }
  0x2d   :  { %2249 = vmatmul.mubr.msk.f32.gmra.mrb[20].mxu1 %vm150_vm0, %v106_v44  ;;  %v138_v44 = vld [vmem:[%s3869_s1 + $0x1a8] sm:$0xff] }
  0x2e   :  { %2347 = vmatmul.mubr.msk.f32.gmra.mrb[20].mxu0 %vm150_vm0, %v41_v45  ;;  %2251 = vmatprep.mubr.msk.f32.mxu1 %vm150_vm0, %v107_v46  ;;  %v73_v45 = vld [vmem:[%s3870_s0 + $0x1a8] sm:$0xff]  ;;  %v139_v46 = vld [vmem:[%s3869_s1 + $0x1b0] sm:$0xff] }
  0x2f   :  { %2349 = vmatprep.mubr.msk.f32.mxu0 %vm150_vm0, %v42_v47  ;;  %v74_v47 = vld [vmem:[%s3870_s0 + $0x1b0] sm:$0xff] }
  0x31   :  { %2252 = vmatmul.mubr.msk.f32.gmra.mrb[22].mxu1 %vm150_vm0, %v108_v48  ;;  %v140_v48 = vld [vmem:[%s3869_s1 + $0x1b8] sm:$0xff] }
  0x32   :  { %2350 = vmatmul.mubr.msk.f32.gmra.mrb[22].mxu0 %vm150_vm0, %v43_v49  ;;  %2254 = vmatprep.mubr.msk.f32.mxu1 %vm150_vm0, %v109_v50  ;;  %v75_v49 = vld [vmem:[%s3870_s0 + $0x1b8] sm:$0xff]  ;;  %v141_v50 = vld [vmem:[%s3869_s1 + $0x1c0] sm:$0xff] }
  0x33   :  { %2352 = vmatprep.mubr.msk.f32.mxu0 %vm150_vm0, %v44_v51  ;;  %v76_v51 = vld [vmem:[%s3870_s0 + $0x1c0] sm:$0xff] }
  0x35   :  { %2255 = vmatmul.mubr.msk.f32.gmra.mrb[24].mxu1 %vm150_vm0, %v110_v52  ;;  %v142_v52 = vld [vmem:[%s3869_s1 + $0x1c8] sm:$0xff] }
  0x36   :  { %2353 = vmatmul.mubr.msk.f32.gmra.mrb[24].mxu0 %vm150_vm0, %v45_v53  ;;  %2257 = vmatprep.mubr.msk.f32.mxu1 %vm150_vm0, %v111_v54  ;;  %v77_v53 = vld [vmem:[%s3870_s0 + $0x1c8] sm:$0xff]  ;;  %v143_v54 = vld [vmem:[%s3869_s1 + $0x1d0] sm:$0xff] }
  0x37   :  { %2355 = vmatprep.mubr.msk.f32.mxu0 %vm150_vm0, %v46_v55  ;;  %v78_v55 = vld [vmem:[%s3870_s0 + $0x1d0] sm:$0xff] }
  0x39   :  { %2258 = vmatmul.mubr.msk.f32.gmra.mrb[26].mxu1 %vm150_vm0, %v112_v56  ;;  %v144_v56 = vld [vmem:[%s3869_s1 + $0x1d8] sm:$0xff] }
  0x3a   :  { %2356 = vmatmul.mubr.msk.f32.gmra.mrb[26].mxu0 %vm150_vm0, %v47_v57  ;;  %2260 = vmatprep.mubr.msk.f32.mxu1 %vm150_vm0, %v113_v58  ;;  %v79_v57 = vld [vmem:[%s3870_s0 + $0x1d8] sm:$0xff]  ;;  %v145_v58 = vld [vmem:[%s3869_s1 + $0x1e0] sm:$0xff] }
  0x3b   :  { %2358 = vmatprep.mubr.msk.f32.mxu0 %vm150_vm0, %v48_v59  ;;  %v80_v59 = vld [vmem:[%s3870_s0 + $0x1e0] sm:$0xff] }
  0x3d   :  { %2261 = vmatmul.mubr.msk.f32.gmra.mrb[28].mxu1 %vm150_vm0, %v114_v60  ;;  %v146_v60 = vld [vmem:[%s3869_s1 + $0x1e8] sm:$0xff] }
  0x3e   :  { %2359 = vmatmul.mubr.msk.f32.gmra.mrb[28].mxu0 %vm150_vm0, %v49_v61  ;;  %2263 = vmatprep.mubr.msk.f32.mxu1 %vm150_vm0, %v115_v62  ;;  %v81_v61 = vld [vmem:[%s3870_s0 + $0x1e8] sm:$0xff]  ;;  %v147_v62 = vld [vmem:[%s3869_s1 + $0x1f0] sm:$0xff] }
  0x3f   :  { %2361 = vmatprep.mubr.msk.f32.mxu0 %vm150_vm0, %v50_v63  ;;  %v82_v63 = vld [vmem:[%s3870_s0 + $0x1f0] sm:$0xff] }
  0x41   :  { %2264 = vmatmul.mubr.msk.f32.gmra.mrb[30].mxu1 %vm150_vm0, %v116_v0  ;;  %v148_v0 = vld [vmem:[%s3869_s1 + $0x1f8] sm:$0xff] }
  0x42   :  { %2362 = vmatmul.mubr.msk.f32.gmra.mrb[30].mxu0 %vm150_vm0, %v51_v1  ;;  %2266 = vmatprep.mubr.msk.f32.mxu1 %vm150_vm0, %v117_v2  ;;  %v83_v1 = vld [vmem:[%s3870_s0 + $0x1f8] sm:$0xff] }
  0x43   :  { %2364 = vmatprep.mubr.msk.f32.mxu0 %vm150_vm0, %v52_v3 }
  0x45   :  { %2267 = vmatmul.mubr.msk.f32.gmra.mrb[32].mxu1 %vm150_vm0, %v118_v4  ;;  %v3284_v4 = vld [vmem:[%s3871_s4] ss:$0 sm:$0xff] }
  0x46   :  { %2365 = vmatmul.mubr.msk.f32.gmra.mrb[32].mxu0 %vm150_vm0, %v53_v5  ;;  %2269 = vmatprep.mubr.msk.f32.mxu1 %vm150_vm0, %v119_v6 }
  0x47   :  { %2367 = vmatprep.mubr.msk.f32.mxu0 %vm150_vm0, %v54_v7 }
  0x49   :  { %2270 = vmatmul.mubr.msk.f32.gmra.mrb[34].mxu1 %vm150_vm0, %v120_v8 }
  0x4a   :  { %2368 = vmatmul.mubr.msk.f32.gmra.mrb[34].mxu0 %vm150_vm0, %v55_v9  ;;  %2272 = vmatprep.mubr.msk.f32.mxu1 %vm150_vm0, %v121_v10 }
  0x4b   :  { %2370 = vmatprep.mubr.msk.f32.mxu0 %vm150_vm0, %v56_v11 }
  0x4d   :  { %2273 = vmatmul.mubr.msk.f32.gmra.mrb[36].mxu1 %vm150_vm0, %v122_v12 }
  0x4e   :  { %2371 = vmatmul.mubr.msk.f32.gmra.mrb[36].mxu0 %vm150_vm0, %v57_v13  ;;  %2275 = vmatprep.mubr.msk.f32.mxu1 %vm150_vm0, %v123_v14 }
  0x4f   :  { %2373 = vmatprep.mubr.msk.f32.mxu0 %vm150_vm0, %v58_v15 }
  0x51   :  { %2276 = vmatmul.mubr.msk.f32.gmra.mrb[38].mxu1 %vm150_vm0, %v124_v16 }
  0x52   :  { %2374 = vmatmul.mubr.msk.f32.gmra.mrb[38].mxu0 %vm150_vm0, %v59_v17  ;;  %2278 = vmatprep.mubr.msk.f32.mxu1 %vm150_vm0, %v125_v18 }
  0x53   :  { %2376 = vmatprep.mubr.msk.f32.mxu0 %vm150_vm0, %v60_v19 }
  0x55   :  { %2279 = vmatmul.mubr.msk.f32.gmra.mrb[40].mxu1 %vm150_vm0, %v126_v20 }
  0x56   :  { %2377 = vmatmul.mubr.msk.f32.gmra.mrb[40].mxu0 %vm150_vm0, %v61_v21  ;;  %2281 = vmatprep.mubr.msk.f32.mxu1 %vm150_vm0, %v127_v22 }
  0x57   :  { %2379 = vmatprep.mubr.msk.f32.mxu0 %vm150_vm0, %v62_v23 }
  0x59   :  { %2282 = vmatmul.mubr.msk.f32.gmra.mrb[42].mxu1 %vm150_vm0, %v128_v24 }
  0x5a   :  { %2380 = vmatmul.mubr.msk.f32.gmra.mrb[42].mxu0 %vm150_vm0, %v63_v25  ;;  %2284 = vmatprep.mubr.msk.f32.mxu1 %vm150_vm0, %v129_v26 }
  0x5b   :  { %2382 = vmatprep.mubr.msk.f32.mxu0 %vm150_vm0, %v64_v27 }
  0x5d   :  { %2285 = vmatmul.mubr.msk.f32.gmra.mrb[44].mxu1 %vm150_vm0, %v130_v28 }
  0x5e   :  { %2383 = vmatmul.mubr.msk.f32.gmra.mrb[44].mxu0 %vm150_vm0, %v65_v29  ;;  %2287 = vmatprep.mubr.msk.f32.mxu1 %vm150_vm0, %v131_v30 }
  0x5f   :  { %2385 = vmatprep.mubr.msk.f32.mxu0 %vm150_vm0, %v66_v31 }
  0x61   :  { %2288 = vmatmul.mubr.msk.f32.gmra.mrb[46].mxu1 %vm150_vm0, %v132_v32 }
  0x62   :  { %2386 = vmatmul.mubr.msk.f32.gmra.mrb[46].mxu0 %vm150_vm0, %v67_v33  ;;  %2290 = vmatprep.mubr.msk.f32.mxu1 %vm150_vm0, %v133_v34 }
  0x63   :  { %2388 = vmatprep.mubr.msk.f32.mxu0 %vm150_vm0, %v68_v35 }
  0x65   :  { %2291 = vmatmul.mubr.msk.f32.gmra.mrb[48].mxu1 %vm150_vm0, %v134_v36 }
  0x66   :  { %2389 = vmatmul.mubr.msk.f32.gmra.mrb[48].mxu0 %vm150_vm0, %v69_v37  ;;  %2293 = vmatprep.mubr.msk.f32.mxu1 %vm150_vm0, %v135_v38 }
  0x67   :  { %2391 = vmatprep.mubr.msk.f32.mxu0 %vm150_vm0, %v70_v39 }
  0x69   :  { %2294 = vmatmul.mubr.msk.f32.gmra.mrb[50].mxu1 %vm150_vm0, %v136_v40 }
  0x6a   :  { %2392 = vmatmul.mubr.msk.f32.gmra.mrb[50].mxu0 %vm150_vm0, %v71_v41  ;;  %2296 = vmatprep.mubr.msk.f32.mxu1 %vm150_vm0, %v137_v42 }
  0x6b   :  { %2394 = vmatprep.mubr.msk.f32.mxu0 %vm150_vm0, %v72_v43 }
  0x6d   :  { %2297 = vmatmul.mubr.msk.f32.gmra.mrb[52].mxu1 %vm150_vm0, %v138_v44 }
  0x6e   :  { %2395 = vmatmul.mubr.msk.f32.gmra.mrb[52].mxu0 %vm150_vm0, %v73_v45  ;;  %2299 = vmatprep.mubr.msk.f32.mxu1 %vm150_vm0, %v139_v46 }
  0x6f   :  { %2397 = vmatprep.mubr.msk.f32.mxu0 %vm150_vm0, %v74_v47 }
  0x71   :  { %2300 = vmatmul.mubr.msk.f32.gmra.mrb[54].mxu1 %vm150_vm0, %v140_v48 }
  0x72   :  { %2398 = vmatmul.mubr.msk.f32.gmra.mrb[54].mxu0 %vm150_vm0, %v75_v49  ;;  %2302 = vmatprep.mubr.msk.f32.mxu1 %vm150_vm0, %v141_v50 }
  0x73   :  { %2400 = vmatprep.mubr.msk.f32.mxu0 %vm150_vm0, %v76_v51 }
  0x75   :  { %2303 = vmatmul.mubr.msk.f32.gmra.mrb[56].mxu1 %vm150_vm0, %v142_v52 }
  0x76   :  { %2401 = vmatmul.mubr.msk.f32.gmra.mrb[56].mxu0 %vm150_vm0, %v77_v53  ;;  %2305 = vmatprep.mubr.msk.f32.mxu1 %vm150_vm0, %v143_v54 }
  0x77   :  { %2403 = vmatprep.mubr.msk.f32.mxu0 %vm150_vm0, %v78_v55 }
  0x79   :  { %2306 = vmatmul.mubr.msk.f32.gmra.mrb[58].mxu1 %vm150_vm0, %v144_v56 }
  0x7a   :  { %2404 = vmatmul.mubr.msk.f32.gmra.mrb[58].mxu0 %vm150_vm0, %v79_v57  ;;  %2308 = vmatprep.mubr.msk.f32.mxu1 %vm150_vm0, %v145_v58 }
  0x7b   :  { %2406 = vmatprep.mubr.msk.f32.mxu0 %vm150_vm0, %v80_v59 }
  0x7d   :  { %2309 = vmatmul.mubr.msk.f32.gmra.mrb[60].mxu1 %vm150_vm0, %v146_v60 }
  0x7e   :  { %2407 = vmatmul.mubr.msk.f32.gmra.mrb[60].mxu0 %vm150_vm0, %v81_v61  ;;  %2311 = vmatprep.mubr.msk.f32.mxu1 %vm150_vm0, %v147_v62 }
  0x7f   :  { %2409 = vmatprep.mubr.msk.f32.mxu0 %vm150_vm0, %v82_v63 }
  0x81   :  { %2312 = vmatmul.mubr.msk.f32.gmra.mrb[62].mxu1 %vm150_vm0, %v148_v0 }
  0x82   :  { %2410 = vmatmul.mubr.msk.f32.gmra.mrb[62].mxu0 %vm150_vm0, %v83_v1 }
  0xd8   :  { %v2220_v2 = vpop.f32.mrb[0].mxu1 }
  0xd9   :  { %v2318_v3 = vpop.f32.mrb[0].mxu0  ;;  %v409_v6 = vpop.f32.mrb[1].mxu1 }
  0xda   :  { %v992_v5 = vadd.f32 %v2318_v3, %v2220_v2  ;;  %v986_v7 = vpop.f32.mrb[1].mxu0 }
  0xdb   :  { %v987_v8 = vadd.f32 %v986_v7, %v409_v6 }
  0xdc   :  { %v3287_v9 = vadd.f32 %v3284_v4, %v992_v5  ;;  %v2223_v11 = vpop.f32.mrb[2].mxu1 }
  0xdd   :  { %v3290_v10 = vadd.f32 %v3284_v4, %v987_v8  ;;  %v2321_v12 = vpop.f32.mrb[2].mxu0  ;;  %v419_v15 = vpop.f32.mrb[3].mxu1 }
  0xde   :  { %v2023_v13 = vmul.f32 -1.442695, %v3287_v9  ;;  %v1002_v14 = vadd.f32 %v2321_v12, %v2223_v11  ;;  %v996_v16 = vpop.f32.mrb[3].mxu0 }
  0xdf   :  { %v2022_v17 = vmul.f32 -1.442695, %v3290_v10  ;;  %v997_v18 = vadd.f32 %v996_v16, %v419_v15 }
  0xe0   :  { %2476 = vpow2.f32 %v2023_v13  ;;  %v3295_v19 = vadd.f32 %v3284_v4, %v1002_v14  ;;  %v2226_v21 = vpop.f32.mrb[4].mxu1 }
  0xe1   :  { %2478 = vpow2.f32 %v2022_v17  ;;  %v3298_v20 = vadd.f32 %v3284_v4, %v997_v18  ;;  %v2324_v22 = vpop.f32.mrb[4].mxu0  ;;  %v429_v25 = vpop.f32.mrb[5].mxu1 }
  0xe2   :  { %v2025_v23 = vmul.f32 -1.442695, %v3295_v19  ;;  %v1012_v24 = vadd.f32 %v2324_v22, %v2226_v21  ;;  %v1006_v26 = vpop.f32.mrb[5].mxu0 }
  0xe3   :  { %v2024_v27 = vmul.f32 -1.442695, %v3298_v20  ;;  %v1007_v28 = vadd.f32 %v1006_v26, %v429_v25 }
  0xe4   :  { %2480 = vpow2.f32 %v2025_v23  ;;  %v3303_v29 = vadd.f32 %v3284_v4, %v1012_v24  ;;  %v2229_v31 = vpop.f32.mrb[6].mxu1 }
  0xe5   :  { %2482 = vpow2.f32 %v2024_v27  ;;  %v3306_v30 = vadd.f32 %v3284_v4, %v1007_v28  ;;  %v2327_v32 = vpop.f32.mrb[6].mxu0  ;;  %v439_v35 = vpop.f32.mrb[7].mxu1 }
  0xe6   :  { %v2027_v33 = vmul.f32 -1.442695, %v3303_v29  ;;  %v1022_v34 = vadd.f32 %v2327_v32, %v2229_v31  ;;  %v1016_v36 = vpop.f32.mrb[7].mxu0 }
  0xe7   :  { %v2026_v37 = vmul.f32 -1.442695, %v3306_v30  ;;  %v1017_v38 = vadd.f32 %v1016_v36, %v439_v35 }
  0xe8   :  { %2484 = vpow2.f32 %v2027_v33  ;;  %v3311_v39 = vadd.f32 %v3284_v4, %v1022_v34  ;;  %v2232_v41 = vpop.f32.mrb[8].mxu1 }
  0xe9   :  { %2486 = vpow2.f32 %v2026_v37  ;;  %v3314_v40 = vadd.f32 %v3284_v4, %v1017_v38  ;;  %v2330_v42 = vpop.f32.mrb[8].mxu0  ;;  %v449_v46 = vpop.f32.mrb[9].mxu1 }
  0xea   :  { %v2477_v43 = vpop.eup %2476  ;;  %v2029_v44 = vmul.f32 -1.442695, %v3311_v39  ;;  %v1032_v45 = vadd.f32 %v2330_v42, %v2232_v41  ;;  %v1026_v47 = vpop.f32.mrb[9].mxu0 }
  0xeb   :  { %v2479_v48 = vpop.eup %2478  ;;  %v1569_v49 = vadd.f32 1.0, %v2477_v43  ;;  %v2028_v50 = vmul.f32 -1.442695, %v3314_v40  ;;  %v1027_v51 = vadd.f32 %v1026_v47, %v449_v46 }
  0xec   :  { %v1568_v52 = vadd.f32 1.0, %v2479_v48  ;;  %2488 = vpow2.f32 %v2029_v44  ;;  %v3319_v53 = vadd.f32 %v3284_v4, %v1032_v45  ;;  %v2235_v55 = vpop.f32.mrb[10].mxu1 }
  0xed   :  { %2490 = vrcp.f32 %v1569_v49  ;;  %v3322_v54 = vadd.f32 %v3284_v4, %v1027_v51  ;;  %v2333_v56 = vpop.f32.mrb[10].mxu0  ;;  %v459_v60 = vpop.f32.mrb[11].mxu1 }
  0xee   :  { %v2481_v57 = vpop.eup %2480  ;;  %2492 = vrcp.f32 %v1568_v52  ;;  %v2031_v58 = vmul.f32 -1.442695, %v3319_v53  ;;  %v1042_v59 = vadd.f32 %v2333_v56, %v2235_v55  ;;  %v1036_v61 = vpop.f32.mrb[11].mxu0 }
  0xef   :  { %v2483_v62 = vpop.eup %2482  ;;  %v1571_v63 = vadd.f32 1.0, %v2481_v57  ;;  %2494 = vpow2.f32 %v2028_v50  ;;  %v2030_v0 = vmul.f32 -1.442695, %v3322_v54  ;;  %v1037_v1 = vadd.f32 %v1036_v61, %v459_v60 }
  0xf0   :  { %v1570_v2 = vadd.f32 1.0, %v2483_v62  ;;  %2496 = vpow2.f32 %v2031_v58  ;;  %v3327_v3 = vadd.f32 %v3284_v4, %v1042_v59  ;;  %v2238_v6 = vpop.f32.mrb[12].mxu1 }
  0xf1   :  { %2498 = vrcp.f32 %v1571_v63  ;;  %v3330_v5 = vadd.f32 %v3284_v4, %v1037_v1  ;;  %v2336_v7 = vpop.f32.mrb[12].mxu0  ;;  %v469_v13 = vpop.f32.mrb[13].mxu1 }
  0xf2   :  { %v2485_v8 = vpop.eup %2484  ;;  %2500 = vrcp.f32 %v1570_v2  ;;  %v2033_v11 = vmul.f32 -1.442695, %v3327_v3  ;;  %v1052_v12 = vadd.f32 %v2336_v7, %v2238_v6  ;;  %v1046_v14 = vpop.f32.mrb[13].mxu0 }
  0xf3   :  { %v2487_v15 = vpop.eup %2486  ;;  %v1573_v16 = vadd.f32 1.0, %v2485_v8  ;;  %2502 = vpow2.f32 %v2030_v0  ;;  %v2032_v17 = vmul.f32 -1.442695, %v3330_v5  ;;  %v1047_v18 = vadd.f32 %v1046_v14, %v469_v13 }
  0xf4   :  { %v1572_v21 = vadd.f32 1.0, %v2487_v15  ;;  %2504 = vpow2.f32 %v2033_v11  ;;  %v3335_v22 = vadd.f32 %v3284_v4, %v1052_v12  ;;  %v2241_v24 = vpop.f32.mrb[14].mxu1 }
  0xf5   :  { %2506 = vrcp.f32 %v1573_v16  ;;  %v3338_v23 = vadd.f32 %v3284_v4, %v1047_v18  ;;  %v2339_v25 = vpop.f32.mrb[14].mxu0  ;;  %v479_v31 = vpop.f32.mrb[15].mxu1 }
  0xf6   :  { %v2489_v26 = vpop.eup %2488  ;;  %2508 = vrcp.f32 %v1572_v21  ;;  %v2035_v27 = vmul.f32 -1.442695, %v3335_v22  ;;  %v1062_v28 = vadd.f32 %v2339_v25, %v2241_v24  ;;  %v1056_v32 = vpop.f32.mrb[15].mxu0 }
  0xf7   :  { %v2491_v33 = vpop.eup %2490  ;;  %v1575_v34 = vadd.f32 1.0, %v2489_v26  ;;  %2510 = vpow2.f32 %v2032_v17  ;;  %v2034_v35 = vmul.f32 -1.442695, %v3338_v23  ;;  %v1057_v36 = vadd.f32 %v1056_v32, %v479_v31 }
  0xf8   :  { %v2493_v37 = vpop.eup %2492  ;;  %v1761_v38 = vmul.f32 %v2491_v33, %v3287_v9  ;;  %2512 = vpow2.f32 %v2035_v27  ;;  %v3344_v41 = vadd.f32 %v3284_v4, %v1062_v28  ;;  %v2244_v45 = vpop.f32.mrb[16].mxu1 }
  0xf9   :  { %v2495_v42 = vpop.eup %2494  ;;  %v1760_v43 = vmul.f32 %v2493_v37, %v3290_v10  ;;  %2514 = vrcp.f32 %v1575_v34  ;;  %v3348_v44 = vadd.f32 %v3284_v4, %v1057_v36  ;;  %v2342_v46 = vpop.f32.mrb[16].mxu0 }
  0xfa   :  { %v2497_v47 = vpop.eup %2496  ;;  %1826 = vst.msk [vmem:[%s3872_s5 + $0x8] sm:$0xff] %vm1824_vm1, %v1761_v38  ;;  %v1574_v9 = vadd.f32 1.0, %v2495_v42  ;;  %2516 = vpow2.f32 %v2034_v35  ;;  %v2037_v48 = vmul.f32 -1.442695, %v3344_v41  ;;  %v1072_v49 = vadd.f32 %v2342_v46, %v2244_v45  ;;  %v489_v50 = vpop.f32.mrb[17].mxu1 }
  0xfb   :  { %v1066_v51 = vpop.f32.mrb[17].mxu0  ;;  %v2499_v10 = vpop.eup %2498  ;;  %1825 = vst.msk [vmem:[%s3872_s5] sm:$0xff] %vm1824_vm1, %v1760_v43  ;;  %v1577_v52 = vadd.f32 1.0, %v2497_v47  ;;  %v2036_v55 = vmul.f32 -1.442695, %v3348_v44 }
  0xfc   :  { %v1067_v56 = vadd.f32 %v1066_v51, %v489_v50  ;;  %v2501_v57 = vpop.eup %2500  ;;  %v1763_v58 = vmul.f32 %v2499_v10, %v3295_v19  ;;  %2518 = vrcp.f32 %v1574_v9  ;;  %v3362_v59 = vadd.f32 %v3284_v4, %v1072_v49  ;;  %v2247_v63 = vpop.f32.mrb[18].mxu1 }
  0xfd   :  { %v2503_v60 = vpop.eup %2502  ;;  %v1762_v61 = vmul.f32 %v2501_v57, %v3298_v20  ;;  %2520 = vrcp.f32 %v1577_v52  ;;  %v2345_v0 = vpop.f32.mrb[18].mxu0 }
  0xfe   :  { %v3366_v62 = vadd.f32 %v3284_v4, %v1067_v56  ;;  %v2505_v1 = vpop.eup %2504  ;;  %1828 = vst.msk [vmem:[%s3872_s5 + $0x18] sm:$0xff] %vm1824_vm1, %v1763_v58  ;;  %v1576_v19 = vadd.f32 1.0, %v2503_v60  ;;  %2522 = vpow2.f32 %v2037_v48  ;;  %v2039_v2 = vmul.f32 -1.442695, %v3362_v59  ;;  %v499_v7 = vpop.f32.mrb[19].mxu1 }
  0xff   :  { %v1082_v6 = vadd.f32 %v2345_v0, %v2247_v63  ;;  %v1076_v8 = vpop.f32.mrb[19].mxu0  ;;  %v2507_v20 = vpop.eup %2506  ;;  %1827 = vst.msk [vmem:[%s3872_s5 + $0x10] sm:$0xff] %vm1824_vm1, %v1762_v61  ;;  %v1579_v11 = vadd.f32 1.0, %v2505_v1  ;;  %2524 = vpow2.f32 %v2036_v55 }
 0x100   :  { %v2038_v12 = vmul.f32 -1.442695, %v3366_v62  ;;  %v1077_v13 = vadd.f32 %v1076_v8, %v499_v7  ;;  %v2509_v14 = vpop.eup %2508  ;;  %v1765_v15 = vmul.f32 %v2507_v20, %v3303_v29  ;;  %2526 = vrcp.f32 %v1576_v19  ;;  %v2250_v24 = vpop.f32.mrb[20].mxu1 }
 0x101   :  { %v3380_v16 = vadd.f32 %v3284_v4, %v1082_v6  ;;  %v2511_v17 = vpop.eup %2510  ;;  %v1764_v18 = vmul.f32 %v2509_v14, %v3306_v30  ;;  %2528 = vrcp.f32 %v1579_v11  ;;  %v2348_v25 = vpop.f32.mrb[20].mxu0 }
 0x102   :  { %v3384_v21 = vadd.f32 %v3284_v4, %v1077_v13  ;;  %v2513_v26 = vpop.eup %2512  ;;  %1830 = vst.msk [vmem:[%s3872_s5 + $0x28] sm:$0xff] %vm1824_vm1, %v1765_v15  ;;  %v1578_v29 = vadd.f32 1.0, %v2511_v17  ;;  %2530 = vpow2.f32 %v2039_v2  ;;  %v1092_v28 = vadd.f32 %v2348_v25, %v2250_v24  ;;  %v509_v31 = vpop.f32.mrb[21].mxu1 }
 0x103   :  { %v2041_v27 = vmul.f32 -1.442695, %v3380_v16  ;;  %v1086_v32 = vpop.f32.mrb[21].mxu0  ;;  %v2515_v30 = vpop.eup %2514  ;;  %1829 = vst.msk [vmem:[%s3872_s5 + $0x20] sm:$0xff] %vm1824_vm1, %v1764_v18  ;;  %v1581_v33 = vadd.f32 1.0, %v2513_v26  ;;  %2532 = vpow2.f32 %v2038_v12 }
 0x104   :  { %v1087_v34 = vadd.f32 %v1086_v32, %v509_v31  ;;  %v2517_v35 = vpop.eup %2516  ;;  %v1767_v36 = vmul.f32 %v2515_v30, %v3311_v39  ;;  %2534 = vrcp.f32 %v1578_v29  ;;  %v2040_v37 = vmul.f32 -1.442695, %v3384_v21  ;;  %v2253_v45 = vpop.f32.mrb[22].mxu1 }
 0x105   :  { %v3398_v38 = vadd.f32 %v3284_v4, %v1092_v28  ;;  %2536 = vrcp.f32 %v1581_v33  ;;  %v1580_v42 = vadd.f32 1.0, %v2517_v35  ;;  %v2351_v46 = vpop.f32.mrb[22].mxu0  ;;  %v519_v48 = vpop.f32.mrb[23].mxu1 }
 0x106   :  { %v3401_v43 = vadd.f32 %v3284_v4, %v1087_v34  ;;  %v2519_v47 = vpop.eup %2518  ;;  %1832 = vst.msk [vmem:[%s3872_s5 + $0x38] sm:$0xff] %vm1824_vm1, %v1767_v36  ;;  %2538 = vpow2.f32 %v2041_v27  ;;  %v1102_v9 = vadd.f32 %v2351_v46, %v2253_v45  ;;  %v1096_v49 = vpop.f32.mrb[23].mxu0 }
 0x107   :  { %v2043_v39 = vmul.f32 -1.442695, %v3398_v38  ;;  %v2521_v50 = vpop.eup %2520  ;;  %v1766_v51 = vmul.f32 %v2519_v47, %v3314_v40  ;;  %2540 = vrcp.f32 %v1580_v42  ;;  %v1097_v52 = vadd.f32 %v1096_v49, %v519_v48 }
 0x108   :  { %v2042_v10 = vmul.f32 -1.442695, %v3401_v43  ;;  %v2523_v55 = vpop.eup %2522  ;;  %v1769_v56 = vmul.f32 %v2521_v50, %v3319_v53  ;;  %2542 = vpow2.f32 %v2040_v37  ;;  %v3412_v57 = vadd.f32 %v3284_v4, %v1102_v9  ;;  %v2256_v61 = vpop.f32.mrb[24].mxu1 }
 0x109   :  { %v2525_v58 = vpop.eup %2524  ;;  %1831 = vst.msk [vmem:[%s3872_s5 + $0x30] sm:$0xff] %vm1824_vm1, %v1766_v51  ;;  %v1583_v60 = vadd.f32 1.0, %v2523_v55  ;;  %2544 = vpow2.f32 %v2043_v39  ;;  %v3419_v40 = vadd.f32 %v3284_v4, %v1097_v52  ;;  %v2354_v63 = vpop.f32.mrb[24].mxu0 }
 0x10a   :  { %v2527_v0 = vpop.eup %2526  ;;  %1834 = vst.msk [vmem:[%s3872_s5 + $0x48] sm:$0xff] %vm1824_vm1, %v1769_v56  ;;  %v1582_v53 = vadd.f32 1.0, %v2525_v58  ;;  %2546 = vpow2.f32 %v2042_v10  ;;  %v2045_v1 = vmul.f32 -1.442695, %v3412_v57  ;;  %v1112_v19 = vadd.f32 %v2354_v63, %v2256_v61  ;;  %v529_v2 = vpop.f32.mrb[25].mxu1 }
 0x10b   :  { %v1106_v6 = vpop.f32.mrb[25].mxu0  ;;  %v2529_v7 = vpop.eup %2528  ;;  %v1768_v8 = vmul.f32 %v2527_v0, %v3322_v54  ;;  %2548 = vrcp.f32 %v1583_v60  ;;  %v2044_v20 = vmul.f32 -1.442695, %v3419_v40 }
 0x10c   :  { %v1107_v11 = vadd.f32 %v1106_v6, %v529_v2  ;;  %v2531_v12 = vpop.eup %2530  ;;  %v1771_v13 = vmul.f32 %v2529_v7, %v3327_v3  ;;  %2550 = vrcp.f32 %v1582_v53  ;;  %v3430_v14 = vadd.f32 %v3284_v4, %v1112_v19  ;;  %v2259_v18 = vpop.f32.mrb[26].mxu1 }
 0x10d   :  { %v2533_v15 = vpop.eup %2532  ;;  %1833 = vst.msk [vmem:[%s3872_s5 + $0x40] sm:$0xff] %vm1824_vm1, %v1768_v8  ;;  %v1585_v17 = vadd.f32 1.0, %v2531_v12  ;;  %2552 = vpow2.f32 %v2045_v1  ;;  %v2357_v24 = vpop.f32.mrb[26].mxu0 }
 0x10e   :  { %v3437_v54 = vadd.f32 %v3284_v4, %v1107_v11  ;;  %v2535_v25 = vpop.eup %2534  ;;  %1836 = vst.msk [vmem:[%s3872_s5 + $0x58] sm:$0xff] %vm1824_vm1, %v1771_v13  ;;  %v1584_v3 = vadd.f32 1.0, %v2533_v15  ;;  %2554 = vpow2.f32 %v2044_v20  ;;  %v2047_v26 = vmul.f32 -1.442695, %v3430_v14  ;;  %v539_v27 = vpop.f32.mrb[27].mxu1 }
 0x10f   :  { %v1122_v29 = vadd.f32 %v2357_v24, %v2259_v18  ;;  %v1116_v28 = vpop.f32.mrb[27].mxu0  ;;  %v2537_v31 = vpop.eup %2536  ;;  %v1770_v32 = vmul.f32 %v2535_v25, %v3330_v5  ;;  %2556 = vrcp.f32 %v1585_v17 }
 0x110   :  { %v2046_v30 = vmul.f32 -1.442695, %v3437_v54  ;;  %v1117_v33 = vadd.f32 %v1116_v28, %v539_v27  ;;  %v2539_v34 = vpop.eup %2538  ;;  %v1773_v35 = vmul.f32 %v2537_v31, %v3335_v22  ;;  %2558 = vrcp.f32 %v1584_v3  ;;  %v2262_v45 = vpop.f32.mrb[28].mxu1 }
 0x111   :  { %v3448_v36 = vadd.f32 %v3284_v4, %v1122_v29  ;;  %v2541_v37 = vpop.eup %2540  ;;  %1835 = vst.msk [vmem:[%s3872_s5 + $0x50] sm:$0xff] %vm1824_vm1, %v1770_v32  ;;  %v1587_v42 = vadd.f32 1.0, %v2539_v34  ;;  %2560 = vpow2.f32 %v2047_v26  ;;  %v2360_v46 = vpop.f32.mrb[28].mxu0 }
 0x112   :  { %v3455_v5 = vadd.f32 %v3284_v4, %v1117_v33  ;;  %v2543_v47 = vpop.eup %2542  ;;  %1838 = vst.msk [vmem:[%s3872_s5 + $0x68] sm:$0xff] %vm1824_vm1, %v1773_v35  ;;  %v1772_v22 = vmul.f32 %v2541_v37, %v3338_v23  ;;  %2562 = vpow2.f32 %v2046_v30  ;;  %v1132_v9 = vadd.f32 %v2360_v46, %v2262_v45  ;;  %v549_v48 = vpop.f32.mrb[29].mxu1 }
 0x113   :  { %v2049_v39 = vmul.f32 -1.442695, %v3448_v36  ;;  %v1126_v49 = vpop.f32.mrb[29].mxu0  ;;  %v2545_v50 = vpop.eup %2544  ;;  %2564 = vrcp.f32 %v1587_v42  ;;  %v1586_v51 = vadd.f32 1.0, %v2543_v47 }
 0x114   :  { %v1127_v10 = vadd.f32 %v1126_v49, %v549_v48  ;;  %v2547_v52 = vpop.eup %2546  ;;  %1837 = vst.msk [vmem:[%s3872_s5 + $0x60] sm:$0xff] %vm1824_vm1, %v1772_v22  ;;  %v1589_v55 = vadd.f32 1.0, %v2545_v50  ;;  %v2048_v23 = vmul.f32 -1.442695, %v3455_v5  ;;  %v3469_v56 = vadd.f32 %v3284_v4, %v1132_v9  ;;  %v2265_v63 = vpop.f32.mrb[30].mxu1 }
 0x115   :  { %2566 = vpow2.f32 %v2049_v39  ;;  %v2549_v58 = vpop.eup %2548  ;;  %v1588_v60 = vadd.f32 1.0, %v2547_v52  ;;  %v2363_v0 = vpop.f32.mrb[30].mxu0 }
 0x116   :  { %2568 = vrcp.f32 %v1586_v51  ;;  %v3472_v61 = vadd.f32 %v3284_v4, %v1127_v10  ;;  %v2551_v53 = vpop.eup %2550  ;;  %v1775_v1 = vmul.f32 %v2549_v58, %v3344_v41  ;;  %v2051_v19 = vmul.f32 -1.442695, %v3469_v56  ;;  %v559_v6 = vpop.f32.mrb[31].mxu1 }
 0x117   :  { %2570 = vrcp.f32 %v1589_v55  ;;  %v1142_v2 = vadd.f32 %v2363_v0, %v2265_v63  ;;  %v1136_v7 = vpop.f32.mrb[31].mxu0  ;;  %v2553_v8 = vpop.eup %2552  ;;  %v1774_v20 = vmul.f32 %v2551_v53, %v3348_v44 }
 0x118   :  { %2572 = vrcp.f32 %v1588_v60  ;;  %v1137_v11 = vadd.f32 %v1136_v7, %v559_v6  ;;  %v2555_v12 = vpop.eup %2554  ;;  %1840 = vst.msk [vmem:[%s3872_s5 + $0x78] sm:$0xff] %vm1824_vm1, %v1775_v1  ;;  %v1591_v13 = vadd.f32 1.0, %v2553_v8  ;;  %v2050_v41 = vmul.f32 -1.442695, %v3472_v61  ;;  %v2268_v24 = vpop.f32.mrb[32].mxu1 }
 0x119   :  { %2574 = vpow2.f32 %v2048_v23  ;;  %v3483_v15 = vadd.f32 %v3284_v4, %v1142_v2  ;;  %v2557_v17 = vpop.eup %2556  ;;  %1839 = vst.msk [vmem:[%s3872_s5 + $0x70] sm:$0xff] %vm1824_vm1, %v1774_v20  ;;  %v1590_v44 = vadd.f32 1.0, %v2555_v12  ;;  %v2366_v25 = vpop.f32.mrb[32].mxu0 }
 0x11a   :  { %2576 = vpow2.f32 %v2051_v19  ;;  %v3490_v18 = vadd.f32 %v3284_v4, %v1137_v11  ;;  %v2559_v3 = vpop.eup %2558  ;;  %v1777_v26 = vmul.f32 %v2557_v17, %v3362_v59  ;;  %v1152_v27 = vadd.f32 %v2366_v25, %v2268_v24  ;;  %v569_v28 = vpop.f32.mrb[33].mxu1 }
 0x11b   :  { %2578 = vrcp.f32 %v1591_v13  ;;  %v2053_v29 = vmul.f32 -1.442695, %v3483_v15  ;;  %v1146_v31 = vpop.f32.mrb[33].mxu0  ;;  %v2561_v32 = vpop.eup %2560  ;;  %v1776_v30 = vmul.f32 %v2559_v3, %v3366_v62 }
 0x11c   :  { %2580 = vrcp.f32 %v1590_v44  ;;  %v1147_v33 = vadd.f32 %v1146_v31, %v569_v28  ;;  %v2563_v34 = vpop.eup %2562  ;;  %1842 = vst.msk [vmem:[%s3872_s5 + $0x88] sm:$0xff] %vm1824_vm1, %v1777_v26  ;;  %v1593_v35 = vadd.f32 1.0, %v2561_v32  ;;  %v2052_v59 = vmul.f32 -1.442695, %v3490_v18  ;;  %v2271_v46 = vpop.f32.mrb[34].mxu1 }
 0x11d   :  { %2582 = vpow2.f32 %v2050_v41  ;;  %v3501_v37 = vadd.f32 %v3284_v4, %v1152_v27  ;;  %v2565_v42 = vpop.eup %2564  ;;  %1841 = vst.msk [vmem:[%s3872_s5 + $0x80] sm:$0xff] %vm1824_vm1, %v1776_v30  ;;  %v1592_v62 = vadd.f32 1.0, %v2563_v34  ;;  %v2369_v47 = vpop.f32.mrb[34].mxu0 }
 0x11e   :  { %2584 = vpow2.f32 %v2053_v29  ;;  %v3508_v45 = vadd.f32 %v3284_v4, %v1147_v33  ;;  %v1779_v39 = vmul.f32 %v2565_v42, %v3380_v16  ;;  %v1162_v48 = vadd.f32 %v2369_v47, %v2271_v46  ;;  %v579_v49 = vpop.f32.mrb[35].mxu1  ;;  %v1156_v50 = vpop.f32.mrb[35].mxu0 }
 0x11f   :  { %v2567_v22 = vpop.eup %2566  ;;  %2586 = vrcp.f32 %v1593_v35  ;;  %v2055_v9 = vmul.f32 -1.442695, %v3501_v37  ;;  %v1157_v55 = vadd.f32 %v1156_v50, %v579_v49 }
 0x120   :  { %v2569_v51 = vpop.eup %2568  ;;  %2588 = vrcp.f32 %v1592_v62  ;;  %v1595_v10 = vadd.f32 1.0, %v2567_v22  ;;  %v2054_v52 = vmul.f32 -1.442695, %v3508_v45  ;;  %1844 = vst.msk [vmem:[%s3872_s5 + $0x98] sm:$0xff] %vm1824_vm1, %v1779_v39  ;;  %v3519_v58 = vadd.f32 %v3284_v4, %v1162_v48  ;;  %v2274_v53 = vpop.f32.mrb[36].mxu1 }
 0x121   :  { %v2571_v23 = vpop.eup %2570  ;;  %v1778_v16 = vmul.f32 %v2569_v51, %v3384_v21  ;;  %2590 = vpow2.f32 %v2052_v59  ;;  %v3523_v0 = vadd.f32 %v3284_v4, %v1157_v55  ;;  %v2372_v1 = vpop.f32.mrb[36].mxu0 }
 0x122   :  { %v2573_v60 = vpop.eup %2572  ;;  %v1781_v63 = vmul.f32 %v2571_v23, %v3398_v38  ;;  %2592 = vrcp.f32 %v1595_v10  ;;  %v2057_v2 = vmul.f32 -1.442695, %v3519_v58  ;;  %v1172_v6 = vadd.f32 %v2372_v1, %v2274_v53  ;;  %v589_v7 = vpop.f32.mrb[37].mxu1 }
 0x123   :  { %v2575_v19 = vpop.eup %2574  ;;  %1843 = vst.msk [vmem:[%s3872_s5 + $0x90] sm:$0xff] %vm1824_vm1, %v1778_v16  ;;  %v1780_v21 = vmul.f32 %v2573_v60, %v3401_v43  ;;  %2594 = vpow2.f32 %v2055_v9  ;;  %v1166_v38 = vpop.f32.mrb[37].mxu0  ;;  %v2056_v11 = vmul.f32 -1.442695, %v3523_v0 }
 0x124   :  { %v2577_v8 = vpop.eup %2576  ;;  %1846 = vst.msk [vmem:[%s3872_s5 + $0xa8] sm:$0xff] %vm1824_vm1, %v1781_v63  ;;  %v1594_v20 = vadd.f32 1.0, %v2575_v19  ;;  %2596 = vpow2.f32 %v2054_v52  ;;  %v1167_v12 = vadd.f32 %v1166_v38, %v589_v7  ;;  %v3541_v41 = vadd.f32 %v3284_v4, %v1172_v6  ;;  %v2277_v25 = vpop.f32.mrb[38].mxu1 }
 0x125   :  { %v2579_v13 = vpop.eup %2578  ;;  %1845 = vst.msk [vmem:[%s3872_s5 + $0xa0] sm:$0xff] %vm1824_vm1, %v1780_v21  ;;  %v1597_v43 = vadd.f32 1.0, %v2577_v8  ;;  %2598 = vpow2.f32 %v2057_v2  ;;  %v2375_v3 = vpop.f32.mrb[38].mxu0 }
 0x126   :  { %v2581_v17 = vpop.eup %2580  ;;  %v1783_v44 = vmul.f32 %v2579_v13, %v3412_v57  ;;  %2600 = vrcp.f32 %v1594_v20  ;;  %v3545_v24 = vadd.f32 %v3284_v4, %v1167_v12  ;;  %v2059_v27 = vmul.f32 -1.442695, %v3541_v41  ;;  %v599_v31 = vpop.f32.mrb[39].mxu1 }
 0x127   :  { %v2583_v26 = vpop.eup %2582  ;;  %v1782_v29 = vmul.f32 %v2581_v17, %v3419_v40  ;;  %2602 = vrcp.f32 %v1597_v43  ;;  %v1182_v28 = vadd.f32 %v2375_v3, %v2277_v25  ;;  %v1176_v32 = vpop.f32.mrb[39].mxu0 }
 0x128   :  { %v2585_v30 = vpop.eup %2584  ;;  %1848 = vst.msk [vmem:[%s3872_s5 + $0xb8] sm:$0xff] %vm1824_vm1, %v1783_v44  ;;  %v1596_v57 = vadd.f32 1.0, %v2583_v26  ;;  %2604 = vpow2.f32 %v2056_v11  ;;  %v2058_v33 = vmul.f32 -1.442695, %v3545_v24  ;;  %v1177_v34 = vadd.f32 %v1176_v32, %v599_v31  ;;  %v2280_v47 = vpop.f32.mrb[40].mxu1 }
 0x129   :  { %v2587_v35 = vpop.eup %2586  ;;  %1847 = vst.msk [vmem:[%s3872_s5 + $0xb0] sm:$0xff] %vm1824_vm1, %v1782_v29  ;;  %v1599_v40 = vadd.f32 1.0, %v2585_v30  ;;  %2606 = vpow2.f32 %v2059_v27  ;;  %v3559_v59 = vadd.f32 %v3284_v4, %v1182_v28  ;;  %v2378_v22 = vpop.f32.mrb[40].mxu0 }
 0x12a   :  { %v2589_v42 = vpop.eup %2588  ;;  %v1785_v62 = vmul.f32 %v2587_v35, %v3430_v14  ;;  %2608 = vrcp.f32 %v1596_v57  ;;  %v3563_v46 = vadd.f32 %v3284_v4, %v1177_v34  ;;  %v1192_v49 = vadd.f32 %v2378_v22, %v2280_v47  ;;  %v609_v50 = vpop.f32.mrb[41].mxu1 }
 0x12b   :  { %v2591_v39 = vpop.eup %2590  ;;  %v1784_v9 = vmul.f32 %v2589_v42, %v3437_v54  ;;  %2610 = vrcp.f32 %v1599_v40  ;;  %v2061_v48 = vmul.f32 -1.442695, %v3559_v59  ;;  %v1186_v51 = vpop.f32.mrb[41].mxu0 }
 0x12c   :  { %v2593_v10 = vpop.eup %2592  ;;  %1850 = vst.msk [vmem:[%s3872_s5 + $0xc8] sm:$0xff] %vm1824_vm1, %v1785_v62  ;;  %v1598_v14 = vadd.f32 1.0, %v2591_v39  ;;  %2612 = vpow2.f32 %v2058_v33  ;;  %v2060_v52 = vmul.f32 -1.442695, %v3563_v46  ;;  %v1187_v55 = vadd.f32 %v1186_v51, %v609_v50  ;;  %v2283_v1 = vpop.f32.mrb[42].mxu1 }
 0x12d   :  { %v2595_v23 = vpop.eup %2594  ;;  %1849 = vst.msk [vmem:[%s3872_s5 + $0xc0] sm:$0xff] %vm1824_vm1, %v1784_v9  ;;  %v1787_v54 = vmul.f32 %v2593_v10, %v3448_v36  ;;  %2614 = vpow2.f32 %v2061_v48  ;;  %v3578_v16 = vadd.f32 %v3284_v4, %v1192_v49  ;;  %v2381_v19 = vpop.f32.mrb[42].mxu0 }
 0x12e   :  { %v2597_v60 = vpop.eup %2596  ;;  %2616 = vrcp.f32 %v1598_v14  ;;  %v1601_v63 = vadd.f32 1.0, %v2595_v23  ;;  %v3581_v53 = vadd.f32 %v3284_v4, %v1187_v55  ;;  %v1202_v6 = vadd.f32 %v2381_v19, %v2283_v1  ;;  %v619_v7 = vpop.f32.mrb[43].mxu1 }
 0x12f   :  { %v2599_v21 = vpop.eup %2598  ;;  %1852 = vst.msk [vmem:[%s3872_s5 + $0xd8] sm:$0xff] %vm1824_vm1, %v1787_v54  ;;  %v1600_v2 = vadd.f32 1.0, %v2597_v60  ;;  %2618 = vpow2.f32 %v2060_v52  ;;  %v2063_v36 = vmul.f32 -1.442695, %v3578_v16  ;;  %v1196_v38 = vpop.f32.mrb[43].mxu0 }
 0x130   :  { %v2601_v8 = vpop.eup %2600  ;;  %2620 = vrcp.f32 %v1601_v63  ;;  %v1603_v20 = vadd.f32 1.0, %v2599_v21  ;;  %v2062_v11 = vmul.f32 -1.442695, %v3581_v53  ;;  %v1197_v12 = vadd.f32 %v1196_v38, %v619_v7  ;;  %v2286_v26 = vpop.f32.mrb[44].mxu1 }
 0x131   :  { %v2603_v13 = vpop.eup %2602  ;;  %v1786_v43 = vmul.f32 %v2601_v8, %v3455_v5  ;;  %2622 = vrcp.f32 %v1600_v2  ;;  %v3591_v17 = vadd.f32 %v3284_v4, %v1202_v6  ;;  %v2384_v29 = vpop.f32.mrb[44].mxu0 }
 0x132   :  { %v2605_v44 = vpop.eup %2604  ;;  %v1789_v25 = vmul.f32 %v2603_v13, %v3469_v56  ;;  %2624 = vrcp.f32 %v1603_v20  ;;  %v3595_v3 = vadd.f32 %v3284_v4, %v1197_v12  ;;  %v1212_v31 = vadd.f32 %v2384_v29, %v2286_v26  ;;  %v629_v32 = vpop.f32.mrb[45].mxu1 }
 0x133   :  { %v2607_v27 = vpop.eup %2606  ;;  %1851 = vst.msk [vmem:[%s3872_s5 + $0xd0] sm:$0xff] %vm1824_vm1, %v1786_v43  ;;  %v1602_v5 = vadd.f32 1.0, %v2605_v44  ;;  %2626 = vpow2.f32 %v2063_v36  ;;  %v2065_v28 = vmul.f32 -1.442695, %v3591_v17  ;;  %v1206_v30 = vpop.f32.mrb[45].mxu0 }
 0x134   :  { %v2609_v56 = vpop.eup %2608  ;;  %1854 = vst.msk [vmem:[%s3872_s5 + $0xe8] sm:$0xff] %vm1824_vm1, %v1789_v25  ;;  %v1605_v57 = vadd.f32 1.0, %v2607_v27  ;;  %2628 = vpow2.f32 %v2062_v11  ;;  %v2064_v33 = vmul.f32 -1.442695, %v3595_v3  ;;  %v1207_v34 = vadd.f32 %v1206_v30, %v629_v32  ;;  %v2289_v39 = vpop.f32.mrb[46].mxu1 }
 0x135   :  { %v2611_v35 = vpop.eup %2610  ;;  %v1788_v40 = vmul.f32 %v2609_v56, %v3472_v61  ;;  %2630 = vrcp.f32 %v1602_v5  ;;  %v3609_v42 = vadd.f32 %v3284_v4, %v1212_v31  ;;  %v2387_v9 = vpop.f32.mrb[46].mxu0  ;;  %v3648_v43 = vld [vmem:[%s3871_s4] ss:$0 sm:$0xff] }
 0x136   :  { %v2613_v62 = vpop.eup %2612  ;;  %v1791_v47 = vmul.f32 %v2611_v35, %v3483_v15  ;;  %2632 = vrcp.f32 %v1605_v57  ;;  %v3613_v22 = vadd.f32 %v3284_v4, %v1207_v34  ;;  %v1222_v50 = vadd.f32 %v2387_v9, %v2289_v39  ;;  %v639_v51 = vpop.f32.mrb[47].mxu1 }
 0x137   :  { %v2615_v48 = vpop.eup %2614  ;;  %1853 = vst.msk [vmem:[%s3872_s5 + $0xe0] sm:$0xff] %vm1824_vm1, %v1788_v40  ;;  %v1604_v61 = vadd.f32 1.0, %v2613_v62  ;;  %2634 = vpow2.f32 %v2065_v28  ;;  %v2067_v49 = vmul.f32 -1.442695, %v3609_v42  ;;  %v1216_v10 = vpop.f32.mrb[47].mxu0 }
 0x138   :  { %v2617_v15 = vpop.eup %2616  ;;  %1856 = vst.msk [vmem:[%s3872_s5 + $0xf8] sm:$0xff] %vm1824_vm1, %v1791_v47  ;;  %v1607_v14 = vadd.f32 1.0, %v2615_v48  ;;  %2636 = vpow2.f32 %v2064_v33  ;;  %v1217_v52 = vadd.f32 %v1216_v10, %v639_v51  ;;  %v2066_v54 = vmul.f32 -1.442695, %v3613_v22  ;;  %v2292_v21 = vpop.f32.mrb[48].mxu1 }
 0x139   :  { %v2619_v55 = vpop.eup %2618  ;;  %v1790_v23 = vmul.f32 %v2617_v15, %v3490_v18  ;;  %2638 = vrcp.f32 %v1604_v61  ;;  %v3627_v60 = vadd.f32 %v3284_v4, %v1222_v50  ;;  %v2390_v2 = vpop.f32.mrb[48].mxu0 }
 0x13a   :  { %v2621_v63 = vpop.eup %2620  ;;  %2640 = vrcp.f32 %v1607_v14  ;;  %v1606_v1 = vadd.f32 1.0, %v2619_v55  ;;  %v3630_v19 = vadd.f32 %v3284_v4, %v1217_v52  ;;  %v1232_v7 = vadd.f32 %v2390_v2, %v2292_v21  ;;  %v649_v38 = vpop.f32.mrb[49].mxu1 }
 0x13b   :  { %v2623_v36 = vpop.eup %2622  ;;  %1855 = vst.msk [vmem:[%s3872_s5 + $0xf0] sm:$0xff] %vm1824_vm1, %v1790_v23  ;;  %v1793_v18 = vmul.f32 %v2621_v63, %v3501_v37  ;;  %2642 = vpow2.f32 %v2067_v49  ;;  %v2069_v6 = vmul.f32 -1.442695, %v3627_v60  ;;  %v1226_v8 = vpop.f32.mrb[49].mxu0 }
 0x13c   :  { %v2625_v20 = vpop.eup %2624  ;;  %v1792_v4 = vmul.f32 %v2623_v36, %v3508_v45  ;;  %2644 = vrcp.f32 %v1606_v1  ;;  %v2068_v11 = vmul.f32 -1.442695, %v3630_v19  ;;  %v1227_v12 = vadd.f32 %v1226_v8, %v649_v38 }
 0x13d   :  { %v2627_v13 = vpop.eup %2626  ;;  %1858 = vst.msk [vmem:[%s3872_s5 + $0x108] sm:$0xff] %vm1824_vm1, %v1793_v18  ;;  %v1795_v37 = vmul.f32 %v2625_v20, %v3519_v58  ;;  %2646 = vpow2.f32 %v2066_v54  ;;  %v3651_v45 = vadd.f32 %v3648_v43, %v1232_v7  ;;  %v2295_v58 = vpop.f32.mrb[50].mxu1 }
 0x13e   :  { %v2629_v44 = vpop.eup %2628  ;;  %1857 = vst.msk [vmem:[%s3872_s5 + $0x100] sm:$0xff] %vm1824_vm1, %v1792_v4  ;;  %v1609_v25 = vadd.f32 1.0, %v2627_v13  ;;  %2648 = vpow2.f32 %v2069_v6  ;;  %v3658_v26 = vadd.f32 %v3648_v43, %v1227_v12  ;;  %v2393_v29 = vpop.f32.mrb[50].mxu0 }
 0x13f   :  { %v2631_v27 = vpop.eup %2630  ;;  %1860 = vst.msk [vmem:[%s3872_s5 + $0x118] sm:$0xff] %vm1824_vm1, %v1795_v37  ;;  %v1608_v5 = vadd.f32 1.0, %v2629_v44  ;;  %2650 = vpow2.f32 %v2068_v11  ;;  %v2071_v28 = vmul.f32 -1.442695, %v3651_v45  ;;  %v1242_v31 = vadd.f32 %v2393_v29, %v2295_v58  ;;  %v659_v32 = vpop.f32.mrb[51].mxu1 }
 0x140   :  { %v1236_v30 = vpop.f32.mrb[51].mxu0  ;;  %v2633_v56 = vpop.eup %2632  ;;  %v1794_v57 = vmul.f32 %v2631_v27, %v3523_v0  ;;  %2652 = vrcp.f32 %v1609_v25  ;;  %v2070_v33 = vmul.f32 -1.442695, %v3658_v26 }
 0x141   :  { %v1237_v34 = vadd.f32 %v1236_v30, %v659_v32  ;;  %v2635_v35 = vpop.eup %2634  ;;  %v1797_v40 = vmul.f32 %v2633_v56, %v3541_v41  ;;  %2654 = vrcp.f32 %v1608_v5  ;;  %v3669_v62 = vadd.f32 %v3648_v43, %v1242_v31  ;;  %v2298_v9 = vpop.f32.mrb[52].mxu1 }
 0x142   :  { %v2637_v47 = vpop.eup %2636  ;;  %1859 = vst.msk [vmem:[%s3872_s5 + $0x110] sm:$0xff] %vm1824_vm1, %v1794_v57  ;;  %v1611_v39 = vadd.f32 1.0, %v2635_v35  ;;  %2656 = vpow2.f32 %v2071_v28  ;;  %v2396_v48 = vpop.f32.mrb[52].mxu0 }
 0x143   :  { %v3676_v0 = vadd.f32 %v3648_v43, %v1237_v34  ;;  %v2639_v61 = vpop.eup %2638  ;;  %1862 = vst.msk [vmem:[%s3872_s5 + $0x128] sm:$0xff] %vm1824_vm1, %v1797_v40  ;;  %v1610_v41 = vadd.f32 1.0, %v2637_v47  ;;  %2658 = vpow2.f32 %v2070_v33  ;;  %v2073_v49 = vmul.f32 -1.442695, %v3669_v62  ;;  %v669_v51 = vpop.f32.mrb[53].mxu1 }
 0x144   :  { %v1252_v50 = vadd.f32 %v2396_v48, %v2298_v9  ;;  %v1246_v10 = vpop.f32.mrb[53].mxu0  ;;  %v2641_v15 = vpop.eup %2640  ;;  %v1796_v14 = vmul.f32 %v2639_v61, %v3545_v24  ;;  %2660 = vrcp.f32 %v1611_v39 }
 0x145   :  { %v2072_v52 = vmul.f32 -1.442695, %v3676_v0  ;;  %v1247_v55 = vadd.f32 %v1246_v10, %v669_v51  ;;  %v2643_v23 = vpop.eup %2642  ;;  %v1799_v54 = vmul.f32 %v2641_v15, %v3559_v59  ;;  %2662 = vrcp.f32 %v1610_v41  ;;  %v2301_v2 = vpop.f32.mrb[54].mxu1 }
 0x146   :  { %v3687_v63 = vadd.f32 %v3648_v43, %v1252_v50  ;;  %v2645_v1 = vpop.eup %2644  ;;  %1861 = vst.msk [vmem:[%s3872_s5 + $0x120] sm:$0xff] %vm1824_vm1, %v1796_v14  ;;  %v1613_v21 = vadd.f32 1.0, %v2643_v23  ;;  %2664 = vpow2.f32 %v2073_v49  ;;  %v2399_v36 = vpop.f32.mrb[54].mxu0 }
 0x147   :  { %v3694_v24 = vadd.f32 %v3648_v43, %v1247_v55  ;;  %v2647_v18 = vpop.eup %2646  ;;  %1864 = vst.msk [vmem:[%s3872_s5 + $0x138] sm:$0xff] %vm1824_vm1, %v1799_v54  ;;  %v1798_v59 = vmul.f32 %v2645_v1, %v3563_v46  ;;  %2666 = vpow2.f32 %v2072_v52  ;;  %v1262_v7 = vadd.f32 %v2399_v36, %v2301_v2  ;;  %v679_v38 = vpop.f32.mrb[55].mxu1 }
 0x148   :  { %v2075_v6 = vmul.f32 -1.442695, %v3687_v63  ;;  %v1256_v8 = vpop.f32.mrb[55].mxu0  ;;  %v2649_v20 = vpop.eup %2648  ;;  %2668 = vrcp.f32 %v1613_v21  ;;  %v1612_v4 = vadd.f32 1.0, %v2647_v18 }
 0x149   :  { %v1257_v11 = vadd.f32 %v1256_v8, %v679_v38  ;;  %v2651_v12 = vpop.eup %2650  ;;  %1863 = vst.msk [vmem:[%s3872_s5 + $0x130] sm:$0xff] %vm1824_vm1, %v1798_v59  ;;  %v1615_v13 = vadd.f32 1.0, %v2649_v20  ;;  %v2074_v46 = vmul.f32 -1.442695, %v3694_v24  ;;  %v3708_v37 = vadd.f32 %v3648_v43, %v1262_v7  ;;  %v2304_v29 = vpop.f32.mrb[56].mxu1 }
 0x14a   :  { %2670 = vpow2.f32 %v2075_v6  ;;  %v2653_v44 = vpop.eup %2652  ;;  %v1614_v25 = vadd.f32 1.0, %v2651_v12  ;;  %v2402_v27 = vpop.f32.mrb[56].mxu0 }
 0x14b   :  { %2672 = vrcp.f32 %v1612_v4  ;;  %v3711_v58 = vadd.f32 %v3648_v43, %v1257_v11  ;;  %v2655_v5 = vpop.eup %2654  ;;  %v1801_v28 = vmul.f32 %v2653_v44, %v3578_v16  ;;  %v2077_v31 = vmul.f32 -1.442695, %v3708_v37  ;;  %v689_v30 = vpop.f32.mrb[57].mxu1 }
 0x14c   :  { %2674 = vrcp.f32 %v1615_v13  ;;  %v1272_v32 = vadd.f32 %v2402_v27, %v2304_v29  ;;  %v1266_v56 = vpop.f32.mrb[57].mxu0  ;;  %v2657_v57 = vpop.eup %2656  ;;  %v1800_v33 = vmul.f32 %v2655_v5, %v3581_v53 }
 0x14d   :  { %2676 = vrcp.f32 %v1614_v25  ;;  %v1267_v34 = vadd.f32 %v1266_v56, %v689_v30  ;;  %v2659_v35 = vpop.eup %2658  ;;  %1866 = vst.msk [vmem:[%s3872_s5 + $0x148] sm:$0xff] %vm1824_vm1, %v1801_v28  ;;  %v1617_v40 = vadd.f32 1.0, %v2657_v57  ;;  %v2076_v16 = vmul.f32 -1.442695, %v3711_v58  ;;  %v2307_v48 = vpop.f32.mrb[58].mxu1 }
 0x14e   :  { %2678 = vpow2.f32 %v2074_v46  ;;  %v3722_v47 = vadd.f32 %v3648_v43, %v1272_v32  ;;  %v2661_v39 = vpop.eup %2660  ;;  %1865 = vst.msk [vmem:[%s3872_s5 + $0x140] sm:$0xff] %vm1824_vm1, %v1800_v33  ;;  %v1616_v53 = vadd.f32 1.0, %v2659_v35  ;;  %v2405_v61 = vpop.f32.mrb[58].mxu0 }
 0x14f   :  { %2680 = vpow2.f32 %v2077_v31  ;;  %v3729_v9 = vadd.f32 %v3648_v43, %v1267_v34  ;;  %v2663_v41 = vpop.eup %2662  ;;  %v1803_v49 = vmul.f32 %v2661_v39, %v3591_v17  ;;  %v1282_v51 = vadd.f32 %v2405_v61, %v2307_v48  ;;  %v699_v10 = vpop.f32.mrb[59].mxu1 }
 0x150   :  { %2682 = vrcp.f32 %v1617_v40  ;;  %v2079_v50 = vmul.f32 -1.442695, %v3722_v47  ;;  %v1276_v15 = vpop.f32.mrb[59].mxu0  ;;  %v2665_v14 = vpop.eup %2664  ;;  %v1802_v52 = vmul.f32 %v2663_v41, %v3595_v3 }
 0x151   :  { %2684 = vrcp.f32 %v1616_v53  ;;  %v1277_v55 = vadd.f32 %v1276_v15, %v699_v10  ;;  %v2667_v23 = vpop.eup %2666  ;;  %1868 = vst.msk [vmem:[%s3872_s5 + $0x158] sm:$0xff] %vm1824_vm1, %v1803_v49  ;;  %v1619_v54 = vadd.f32 1.0, %v2665_v14  ;;  %v2078_v17 = vmul.f32 -1.442695, %v3729_v9  ;;  %v2310_v36 = vpop.f32.mrb[60].mxu1 }
 0x152   :  { %2686 = vpow2.f32 %v2076_v16  ;;  %v3740_v1 = vadd.f32 %v3648_v43, %v1282_v51  ;;  %v2669_v21 = vpop.eup %2668  ;;  %1867 = vst.msk [vmem:[%s3872_s5 + $0x150] sm:$0xff] %vm1824_vm1, %v1802_v52  ;;  %v1618_v3 = vadd.f32 1.0, %v2667_v23  ;;  %v2408_v18 = vpop.f32.mrb[60].mxu0 }
 0x153   :  { %2688 = vpow2.f32 %v2079_v50  ;;  %v3747_v2 = vadd.f32 %v3648_v43, %v1277_v55  ;;  %v1805_v6 = vmul.f32 %v2669_v21, %v3609_v42  ;;  %v1292_v38 = vadd.f32 %v2408_v18, %v2310_v36  ;;  %v709_v8 = vpop.f32.mrb[61].mxu1  ;;  %v1286_v20 = vpop.f32.mrb[61].mxu0 }
 0x154   :  { %v2671_v59 = vpop.eup %2670  ;;  %2690 = vrcp.f32 %v1619_v54  ;;  %v2081_v7 = vmul.f32 -1.442695, %v3740_v1  ;;  %v1287_v13 = vadd.f32 %v1286_v20, %v709_v8  ;;  %v2313_v5 = vpop.f32.mrb[62].mxu1 }
 0x155   :  { %v2673_v4 = vpop.eup %2672  ;;  %2692 = vrcp.f32 %v1618_v3  ;;  %v1621_v11 = vadd.f32 1.0, %v2671_v59  ;;  %v2080_v12 = vmul.f32 -1.442695, %v3747_v2  ;;  %1870 = vst.msk [vmem:[%s3872_s5 + $0x168] sm:$0xff] %vm1824_vm1, %v1805_v6  ;;  %v3758_v44 = vadd.f32 %v3648_v43, %v1292_v38  ;;  %v2411_v28 = vpop.f32.mrb[62].mxu0 }
 0x156   :  { %v2675_v46 = vpop.eup %2674  ;;  %v1804_v42 = vmul.f32 %v2673_v4, %v3613_v22  ;;  %2694 = vpow2.f32 %v2078_v17  ;;  %v3762_v27 = vadd.f32 %v3648_v43, %v1287_v13  ;;  %v1302_v30 = vadd.f32 %v2411_v28, %v2313_v5  ;;  %v719_v56 = vpop.f32.mrb[63].mxu1 }
 0x157   :  { %v2677_v25 = vpop.eup %2676  ;;  %v1807_v29 = vmul.f32 %v2675_v46, %v3627_v60  ;;  %2696 = vrcp.f32 %v1621_v11  ;;  %v2083_v32 = vmul.f32 -1.442695, %v3758_v44  ;;  %v1296_v60 = vpop.f32.mrb[63].mxu0 }
 0x158   :  { %v2679_v31 = vpop.eup %2678  ;;  %1869 = vst.msk [vmem:[%s3872_s5 + $0x160] sm:$0xff] %vm1824_vm1, %v1804_v42  ;;  %v1806_v22 = vmul.f32 %v2677_v25, %v3630_v19  ;;  %2698 = vpow2.f32 %v2081_v7  ;;  %v2082_v34 = vmul.f32 -1.442695, %v3762_v27  ;;  %v1297_v35 = vadd.f32 %v1296_v60, %v719_v56 }
 0x159   :  { %v2681_v57 = vpop.eup %2680  ;;  %1872 = vst.msk [vmem:[%s3872_s5 + $0x178] sm:$0xff] %vm1824_vm1, %v1807_v29  ;;  %v1620_v33 = vadd.f32 1.0, %v2679_v31  ;;  %2700 = vpow2.f32 %v2080_v12  ;;  %v3780_v16 = vadd.f32 %v3648_v43, %v1302_v30 }
 0x15a   :  { %v2683_v40 = vpop.eup %2682  ;;  %1871 = vst.msk [vmem:[%s3872_s5 + $0x170] sm:$0xff] %vm1824_vm1, %v1806_v22  ;;  %v1623_v19 = vadd.f32 1.0, %v2681_v57  ;;  %2702 = vpow2.f32 %v2083_v32  ;;  %v3784_v48 = vadd.f32 %v3648_v43, %v1297_v35 }
 0x15b   :  { %v2685_v39 = vpop.eup %2684  ;;  %v1809_v53 = vmul.f32 %v2683_v40, %v3651_v45  ;;  %2704 = vrcp.f32 %v1620_v33  ;;  %v2085_v49 = vmul.f32 -1.442695, %v3780_v16 }
 0x15c   :  { %v2687_v61 = vpop.eup %2686  ;;  %v1808_v41 = vmul.f32 %v2685_v39, %v3658_v26  ;;  %2706 = vrcp.f32 %v1623_v19  ;;  %v2084_v45 = vmul.f32 -1.442695, %v3784_v48 }
 0x15d   :  { %v2689_v50 = vpop.eup %2688  ;;  %1874 = vst.msk [vmem:[%s3872_s5 + $0x188] sm:$0xff] %vm1824_vm1, %v1809_v53  ;;  %v1622_v51 = vadd.f32 1.0, %v2687_v61  ;;  %2708 = vpow2.f32 %v2082_v34 }
 0x15e   :  { %v2691_v10 = vpop.eup %2690  ;;  %1873 = vst.msk [vmem:[%s3872_s5 + $0x180] sm:$0xff] %vm1824_vm1, %v1808_v41  ;;  %v1625_v43 = vadd.f32 1.0, %v2689_v50  ;;  %2710 = vpow2.f32 %v2085_v49 }
 0x15f   :  { %v2693_v26 = vpop.eup %2692  ;;  %v1811_v15 = vmul.f32 %v2691_v10, %v3669_v62  ;;  %2712 = vrcp.f32 %v1622_v51 }
 0x160   :  { %v2695_v14 = vpop.eup %2694  ;;  %v1810_v52 = vmul.f32 %v2693_v26, %v3676_v0  ;;  %2714 = vrcp.f32 %v1625_v43 }
 0x161   :  { %v2697_v55 = vpop.eup %2696  ;;  %1876 = vst.msk [vmem:[%s3872_s5 + $0x198] sm:$0xff] %vm1824_vm1, %v1811_v15  ;;  %v1624_v23 = vadd.f32 1.0, %v2695_v14  ;;  %2716 = vpow2.f32 %v2084_v45 }
 0x162   :  { %v2699_v54 = vpop.eup %2698  ;;  %1875 = vst.msk [vmem:[%s3872_s5 + $0x190] sm:$0xff] %vm1824_vm1, %v1810_v52  ;;  %v1813_v62 = vmul.f32 %v2697_v55, %v3687_v63 }
 0x163   :  { %v2701_v17 = vpop.eup %2700  ;;  %2718 = vrcp.f32 %v1624_v23  ;;  %v1627_v0 = vadd.f32 1.0, %v2699_v54 }
 0x164   :  { %v2703_v21 = vpop.eup %2702  ;;  %1878 = vst.msk [vmem:[%s3872_s5 + $0x1a8] sm:$0xff] %vm1824_vm1, %v1813_v62  ;;  %v1626_v3 = vadd.f32 1.0, %v2701_v17 }
 0x165   :  { %v2705_v36 = vpop.eup %2704  ;;  %2720 = vrcp.f32 %v1627_v0  ;;  %v1629_v18 = vadd.f32 1.0, %v2703_v21 }
 0x166   :  { %v2707_v59 = vpop.eup %2706  ;;  %v1812_v6 = vmul.f32 %v2705_v36, %v3694_v24  ;;  %2722 = vrcp.f32 %v1626_v3 }
 0x167   :  { %v2709_v7 = vpop.eup %2708  ;;  %v1815_v63 = vmul.f32 %v2707_v59, %v3708_v37  ;;  %2724 = vrcp.f32 %v1629_v18 }
 0x168   :  { %v2711_v38 = vpop.eup %2710  ;;  %1877 = vst.msk [vmem:[%s3872_s5 + $0x1a0] sm:$0xff] %vm1824_vm1, %v1812_v6  ;;  %v1628_v8 = vadd.f32 1.0, %v2709_v7 }
 0x169   :  { %v2713_v20 = vpop.eup %2712  ;;  %1880 = vst.msk [vmem:[%s3872_s5 + $0x1b8] sm:$0xff] %vm1824_vm1, %v1815_v63  ;;  %v1631_v4 = vadd.f32 1.0, %v2711_v38 }
 0x16a   :  { %v2715_v24 = vpop.eup %2714  ;;  %v1814_v11 = vmul.f32 %v2713_v20, %v3711_v58  ;;  %2726 = vrcp.f32 %v1628_v8 }
 0x16b   :  { %v2717_v37 = vpop.eup %2716  ;;  %v1817_v12 = vmul.f32 %v2715_v24, %v3722_v47  ;;  %2728 = vrcp.f32 %v1631_v4 }
 0x16c   :  { %1879 = vst.msk [vmem:[%s3872_s5 + $0x1b0] sm:$0xff] %vm1824_vm1, %v1814_v11  ;;  %v1630_v13 = vadd.f32 1.0, %v2717_v37 }
 0x16d   :  { %v2719_v46 = vpop.eup %2718  ;;  %1882 = vst.msk [vmem:[%s3872_s5 + $0x1c8] sm:$0xff] %vm1824_vm1, %v1817_v12 }
 0x16e   :  { %v1816_v42 = vmul.f32 %v2719_v46, %v3729_v9  ;;  %2730 = vrcp.f32 %v1630_v13 }
 0x16f   :  { %v2721_v58 = vpop.eup %2720 }
 0x170   :  { %v2723_v25 = vpop.eup %2722  ;;  %1881 = vst.msk [vmem:[%s3872_s5 + $0x1c0] sm:$0xff] %vm1824_vm1, %v1816_v42  ;;  %v1819_v47 = vmul.f32 %v2721_v58, %v3740_v1 }
 0x171   :  { %v2725_v29 = vpop.eup %2724  ;;  %v1818_v5 = vmul.f32 %v2723_v25, %v3747_v2 }
 0x172   :  { %1884 = vst.msk [vmem:[%s3872_s5 + $0x1d8] sm:$0xff] %vm1824_vm1, %v1819_v47  ;;  %v1821_v9 = vmul.f32 %v2725_v29, %v3758_v44 }
 0x173   :  { %1883 = vst.msk [vmem:[%s3872_s5 + $0x1d0] sm:$0xff] %vm1824_vm1, %v1818_v5 }
 0x174   :  { %v2727_v28 = vpop.eup %2726  ;;  %1886 = vst.msk [vmem:[%s3872_s5 + $0x1e8] sm:$0xff] %vm1824_vm1, %v1821_v9 }
 0x175   :  { %v2729_v1 = vpop.eup %2728  ;;  %v1820_v2 = vmul.f32 %v2727_v28, %v3762_v27 }
 0x176   :  { %v1823_v31 = vmul.f32 %v2729_v1, %v3780_v16 }
 0x177   :  { %1885 = vst.msk [vmem:[%s3872_s5 + $0x1e0] sm:$0xff] %vm1824_vm1, %v1820_v2 }
 0x178   :  { %v2731_v44 = vpop.eup %2730  ;;  %1888 = vst.msk [vmem:[%s3872_s5 + $0x1f8] sm:$0xff] %vm1824_vm1, %v1823_v31 }
 0x179   :  { %v1822_v22 = vmul.f32 %v2731_v44, %v3784_v48 }
 0x17b   :  { %1887 = vst.msk [vmem:[%s3872_s5 + $0x1f0] sm:$0xff] %vm1824_vm1, %v1822_v22 }

// kernel: csp_block_forward.5
= control target key start
LH: loop header
LB: loop body
LE: loop exit
PB: predicated region body
PF: predicated region fallthrough
CT: control target
= control target key end

     0   :  { %s6969_s30 = smov 0   ;;  %s8750_s0 = inlined_call_operand.vmem [shape: f32[2,16,16,8], index: 0, kind: input, shape index: {}]   ;;  %s8751_s1 = inlined_call_operand.vmem [shape: f32[8,8], index: 1, kind: input, shape index: {}]   ;;  %s8752_s2 = inlined_call_operand.vmem [shape: f32[1,8], index: 2, kind: input, shape index: {}]   ;;  %s8753_s3 = inlined_call_operand.vmem [shape: f32[3,3,8,8], index: 3, kind: input, shape index: {}]   ;;  %s8754_s4 = inlined_call_operand.vmem [shape: f32[1,8], index: 4, kind: input, shape index: {}]   ;;  %s8755_s5 = inlined_call_operand.vmem [shape: f32[8,2], index: 5, kind: input, shape index: {}]   ;;  %s8756_s6 = inlined_call_operand.vmem [shape: f32[1,2], index: 6, kind: input, shape index: {}]   ;;  %s8757_s7 = inlined_call_operand.vmem [shape: f32[2,8], index: 7, kind: input, shape index: {}]   ;;  %s8758_s8 = inlined_call_operand.vmem [shape: f32[1,8], index: 8, kind: input, shape index: {}]   ;;  %s8759_s9 = inlined_call_operand.vmem [shape: f32[2,16,16,8], index: 9, kind: output, shape index: {}]  }
   0x1 LB: > { %s5094_s10 = sadd.s32 4294967295, %s6915_s30   ;;  %p5098_p0 = scmp.ge.s32.totalorder %s6915_s30, 1  ;;  %s6915_s30 = sphi %s6969_s30, %s19_s30  }
   0x2   : > { %p287_p1 = scmp.lt.s32.totalorder %s6915_s30, 3 }
   0x4   : > { %p288_p2 = pnand %p5098_p0, %p287_p1 }
   0x6   : > { %291 = sbr.rel (%p288_p2) target bundleno = 1412 (0x584), region = 56 }
   0xd   : > { %v365_v0 = vld [vmem:[%s8751_s1] sm:$0xff]  ;;  %p323_p3 = scmp.lt.s32.totalorder %s5094_s10, 1  ;;  %vm373_vm0 = vcmask 64512   ;;  %v8760_v33 = vmov 0.0   ;;  %v5168_v34 = vld [vmem:[%s8753_s3 + $0x8] sm:$0xff]  ;;  %v7206_v37 = vld [vmem:[%s8753_s3 + $0x18] sm:$0xff] }
   0xe   : > { %5839 = vmatprep.subr.mxu0 %v365_v0  ;;  %925 = vst.msk [vmem:[#allocation2 + $0x30] sm:$0xff] %vm373_vm0, %v8760_v33  ;;  %919 = vst.msk [vmem:[#allocation2] sm:$0xff] %vm373_vm0, %v8760_v33  ;;  %v1056_v38 = vld [vmem:[%s8753_s3] sm:$0xff]  ;;  %6349 = vmatprep.subr.mxu1 %v7206_v37  ;;  %vm6918_vm1 = vmmov 0   ;;  %vm4859_vm2 = vcmask 1041408   ;;  %vm4855_vm3 = vcmask 15360  }
   0xf   : > { %5840 = vmatpush3.msra.mxu0 %v365_v0  ;;  %s8840_s10 = smov (!%p323_p3, %s5094_s10), 1  ;;  %920 = vst.msk [vmem:[#allocation2 + $0x8] sm:$0xff] %vm373_vm0, %v8760_v33  ;;  %921 = vst.msk [vmem:[#allocation2 + $0x10] sm:$0xff] %vm373_vm0, %v8760_v33  ;;  %6350 = vmatpush3.msra.mxu1 %v7206_v37  ;;  %v7216_v39 = vld [vmem:[%s8753_s3 + $0x20] sm:$0xff] }
  0x10   : > { %s5503_s13 = sshll.u32 %s8840_s10, 8  ;;  %922 = vst.msk [vmem:[#allocation2 + $0x18] sm:$0xff] %vm373_vm0, %v8760_v33  ;;  %923 = vst.msk [vmem:[#allocation2 + $0x20] sm:$0xff] %vm373_vm0, %v8760_v33  ;;  %5889 = vmatprep.subr.mxu0 %v5168_v34  ;;  %6089 = vmatprep.subr.mxu1 %v7216_v39  ;;  %v7222_v40 = vld [vmem:[%s8752_s2] ss:$0 sm:$0xff] }
  0x11   : > { %s6988_s16 = scalar_lea.vmem %s8750_s0, %s5503_s13  ;;  %924 = vst.msk [vmem:[#allocation2 + $0x28] sm:$0xff] %vm373_vm0, %v8760_v33  ;;  %926 = vst.msk [vmem:[#allocation2 + $0x38] sm:$0xff] %vm373_vm0, %v8760_v33  ;;  %s8625_s14 = scalar_lea.vmem %s8759_s9, %s5503_s13 }
  0x12   : > { %v333_v1 = vld [vmem:[%s6988_s16] sm:$0xff]  ;;  %v334_v2 = vld [vmem:[%s6988_s16 + $0x8] sm:$0xff]  ;;  %v335_v3 = vld [vmem:[%s6988_s16 + $0x10] sm:$0xff]  ;;  %927 = vst.msk [vmem:[#allocation2 + $0x40] sm:$0xff] %vm373_vm0, %v8760_v33 }
  0x13   : > { %5841 = vmatprep.mubr.msk.f32.mxu0 %vm373_vm0, %v333_v1  ;;  %v336_v4 = vld [vmem:[%s6988_s16 + $0x18] sm:$0xff]  ;;  %v337_v5 = vld [vmem:[%s6988_s16 + $0x20] sm:$0xff]  ;;  %v338_v6 = vld [vmem:[%s6988_s16 + $0x28] sm:$0xff]  ;;  %928 = vst.msk [vmem:[#allocation2 + $0x48] sm:$0xff] %vm373_vm0, %v8760_v33 }
  0x14   : > { %5842 = vmatmul.mubr.msk.f32.vlgmr.msra.gmra.mrb[0].mxu0 %vm373_vm0, %v334_v2  ;;  %v339_v7 = vld [vmem:[%s6988_s16 + $0x30] sm:$0xff]  ;;  %v340_v8 = vld [vmem:[%s6988_s16 + $0x38] sm:$0xff]  ;;  %v341_v9 = vld [vmem:[%s6988_s16 + $0x40] sm:$0xff]  ;;  %929 = vst.msk [vmem:[#allocation2 + $0x50] sm:$0xff] %vm373_vm0, %v8760_v33 }
  0x15   : > { %5844 = vmatprep.mubr.msk.f32.mxu0 %vm373_vm0, %v335_v3  ;;  %v342_v10 = vld [vmem:[%s6988_s16 + $0x48] sm:$0xff]  ;;  %v343_v11 = vld [vmem:[%s6988_s16 + $0x50] sm:$0xff]  ;;  %v344_v12 = vld [vmem:[%s6988_s16 + $0x58] sm:$0xff]  ;;  %930 = vst.msk [vmem:[#allocation2 + $0x58] sm:$0xff] %vm373_vm0, %v8760_v33  ;;  %5890 = vmatpush3.msra.mxu0 %v5168_v34 }
  0x16   : > { %v345_v13 = vld [vmem:[%s6988_s16 + $0x60] sm:$0xff]  ;;  %v346_v14 = vld [vmem:[%s6988_s16 + $0x68] sm:$0xff]  ;;  %v347_v15 = vld [vmem:[%s6988_s16 + $0x70] sm:$0xff]  ;;  %931 = vst.msk [vmem:[#allocation2 + $0x60] sm:$0xff] %vm373_vm0, %v8760_v33  ;;  %5939 = vmatprep.subr.mxu0 %v1056_v38 }
  0x17   : > { %v348_v16 = vld [vmem:[%s6988_s16 + $0x78] sm:$0xff]  ;;  %v349_v17 = vld [vmem:[%s6988_s16 + $0x80] sm:$0xff]  ;;  %v350_v18 = vld [vmem:[%s6988_s16 + $0x88] sm:$0xff]  ;;  %932 = vst.msk [vmem:[#allocation2 + $0x68] sm:$0xff] %vm373_vm0, %v8760_v33 }
  0x18   : > { %5845 = vmatmul.mubr.msk.f32.gmra.mrb[2].mxu0 %vm373_vm0, %v336_v4  ;;  %v351_v19 = vld [vmem:[%s6988_s16 + $0x90] sm:$0xff]  ;;  %v352_v20 = vld [vmem:[%s6988_s16 + $0x98] sm:$0xff]  ;;  %v353_v21 = vld [vmem:[%s6988_s16 + $0xa0] sm:$0xff]  ;;  %933 = vst.msk [vmem:[#allocation2 + $0x70] sm:$0xff] %vm373_vm0, %v8760_v33 }
  0x19   : > { %5847 = vmatprep.mubr.msk.f32.mxu0 %vm373_vm0, %v337_v5  ;;  %v354_v22 = vld [vmem:[%s6988_s16 + $0xa8] sm:$0xff]  ;;  %v355_v23 = vld [vmem:[%s6988_s16 + $0xb0] sm:$0xff]  ;;  %v356_v24 = vld [vmem:[%s6988_s16 + $0xb8] sm:$0xff]  ;;  %934 = vst.msk [vmem:[#allocation2 + $0x78] sm:$0xff] %vm373_vm0, %v8760_v33 }
  0x1a   : > { %v357_v25 = vld [vmem:[%s6988_s16 + $0xc0] sm:$0xff]  ;;  %v358_v26 = vld [vmem:[%s6988_s16 + $0xc8] sm:$0xff]  ;;  %v359_v27 = vld [vmem:[%s6988_s16 + $0xd0] sm:$0xff]  ;;  %935 = vst.msk [vmem:[#allocation2 + $0x80] sm:$0xff] %vm373_vm0, %v8760_v33 }
  0x1b   : > { %v360_v28 = vld [vmem:[%s6988_s16 + $0xd8] sm:$0xff]  ;;  %v361_v29 = vld [vmem:[%s6988_s16 + $0xe0] sm:$0xff]  ;;  %v362_v30 = vld [vmem:[%s6988_s16 + $0xe8] sm:$0xff]  ;;  %936 = vst.msk [vmem:[#allocation2 + $0x88] sm:$0xff] %vm373_vm0, %v8760_v33 }
  0x1c   : > { %5848 = vmatmul.mubr.msk.f32.gmra.mrb[4].mxu0 %vm373_vm0, %v338_v6  ;;  %v363_v31 = vld [vmem:[%s6988_s16 + $0xf0] sm:$0xff]  ;;  %v364_v32 = vld [vmem:[%s6988_s16 + $0xf8] sm:$0xff]  ;;  %937 = vst.msk [vmem:[#allocation2 + $0x90] sm:$0xff] %vm373_vm0, %v8760_v33  ;;  %938 = vst.msk [vmem:[#allocation2 + $0x98] sm:$0xff] %vm373_vm0, %v8760_v33 }
  0x1d   : > { %5850 = vmatprep.mubr.msk.f32.mxu0 %vm373_vm0, %v339_v7  ;;  %939 = vst.msk [vmem:[#allocation2 + $0xa0] sm:$0xff] %vm373_vm0, %v8760_v33  ;;  %940 = vst.msk [vmem:[#allocation2 + $0xa8] sm:$0xff] %vm373_vm0, %v8760_v33  ;;  %v1057_v35 = vld [vmem:[#allocation2 + $0x8] sm:$0xff]  ;;  %v1058_v36 = vld [vmem:[#allocation2 + $0x10] sm:$0xff] }
  0x1e   : > { %941 = vst.msk [vmem:[#allocation2 + $0xb0] sm:$0xff] %vm373_vm0, %v8760_v33  ;;  %942 = vst.msk [vmem:[#allocation2 + $0xb8] sm:$0xff] %vm373_vm0, %v8760_v33 }
  0x1f   : > { %943 = vst.msk [vmem:[#allocation2 + $0xc0] sm:$0xff] %vm373_vm0, %v8760_v33  ;;  %944 = vst.msk [vmem:[#allocation2 + $0xc8] sm:$0xff] %vm373_vm0, %v8760_v33 }
  0x20   : > { %5851 = vmatmul.mubr.msk.f32.gmra.mrb[6].mxu0 %vm373_vm0, %v340_v8  ;;  %945 = vst.msk [vmem:[#allocation2 + $0xd0] sm:$0xff] %vm373_vm0, %v8760_v33  ;;  %946 = vst.msk [vmem:[#allocation2 + $0xd8] sm:$0xff] %vm373_vm0, %v8760_v33 }
  0x21   : > { %5853 = vmatprep.mubr.msk.f32.mxu0 %vm373_vm0, %v341_v9  ;;  %947 = vst.msk [vmem:[#allocation2 + $0xe0] sm:$0xff] %vm373_vm0, %v8760_v33  ;;  %948 = vst.msk [vmem:[#allocation2 + $0xe8] sm:$0xff] %vm373_vm0, %v8760_v33 }
  0x22   : > { %949 = vst.msk [vmem:[#allocation2 + $0xf0] sm:$0xff] %vm373_vm0, %v8760_v33  ;;  %950 = vst.msk [vmem:[#allocation2 + $0xf8] sm:$0xff] %vm373_vm0, %v8760_v33 }
  0x23   : > { %951 = vst.msk [vmem:[#allocation2 + $0x100] sm:$0xff] %vm373_vm0, %v8760_v33  ;;  %952 = vst.msk [vmem:[#allocation2 + $0x108] sm:$0xff] %vm373_vm0, %v8760_v33 }
  0x24   : > { %5854 = vmatmul.mubr.msk.f32.gmra.mrb[8].mxu0 %vm373_vm0, %v342_v10  ;;  %953 = vst.msk [vmem:[#allocation2 + $0x110] sm:$0xff] %vm373_vm0, %v8760_v33  ;;  %954 = vst.msk [vmem:[#allocation2 + $0x118] sm:$0xff] %vm373_vm0, %v8760_v33 }
  0x25   : > { %5856 = vmatprep.mubr.msk.f32.mxu0 %vm373_vm0, %v343_v11  ;;  %955 = vst.msk [vmem:[#allocation2 + $0x120] sm:$0xff] %vm373_vm0, %v8760_v33  ;;  %956 = vst.msk [vmem:[#allocation2 + $0x128] sm:$0xff] %vm373_vm0, %v8760_v33 }
  0x26   : > { %957 = vst.msk [vmem:[#allocation2 + $0x130] sm:$0xff] %vm373_vm0, %v8760_v33  ;;  %958 = vst.msk [vmem:[#allocation2 + $0x138] sm:$0xff] %vm373_vm0, %v8760_v33 }
  0x27   : > { %959 = vst.msk [vmem:[#allocation2 + $0x140] sm:$0xff] %vm373_vm0, %v8760_v33  ;;  %960 = vst.msk [vmem:[#allocation2 + $0x148] sm:$0xff] %vm373_vm0, %v8760_v33 }
  0x28   : > { %5857 = vmatmul.mubr.msk.f32.gmra.mrb[10].mxu0 %vm373_vm0, %v344_v12  ;;  %961 = vst.msk [vmem:[#allocation2 + $0x150] sm:$0xff] %vm373_vm0, %v8760_v33  ;;  %962 = vst.msk [vmem:[#allocation2 + $0x158] sm:$0xff] %vm373_vm0, %v8760_v33 }
  0x29   : > { %5859 = vmatprep.mubr.msk.f32.mxu0 %vm373_vm0, %v345_v13  ;;  %963 = vst.msk [vmem:[#allocation2 + $0x160] sm:$0xff] %vm373_vm0, %v8760_v33  ;;  %964 = vst.msk [vmem:[#allocation2 + $0x168] sm:$0xff] %vm373_vm0, %v8760_v33 }
  0x2a   : > { %965 = vst.msk [vmem:[#allocation2 + $0x170] sm:$0xff] %vm373_vm0, %v8760_v33  ;;  %966 = vst.msk [vmem:[#allocation2 + $0x178] sm:$0xff] %vm373_vm0, %v8760_v33 }
  0x2b   : > { %967 = vst.msk [vmem:[#allocation2 + $0x180] sm:$0xff] %vm373_vm0, %v8760_v33  ;;  %968 = vst.msk [vmem:[#allocation2 + $0x188] sm:$0xff] %vm373_vm0, %v8760_v33 }
  0x2c   : > { %5860 = vmatmul.mubr.msk.f32.gmra.mrb[12].mxu0 %vm373_vm0, %v346_v14  ;;  %969 = vst.msk [vmem:[#allocation2 + $0x190] sm:$0xff] %vm373_vm0, %v8760_v33  ;;  %970 = vst.msk [vmem:[#allocation2 + $0x198] sm:$0xff] %vm373_vm0, %v8760_v33 }
  0x2d   : > { %5862 = vmatprep.mubr.msk.f32.mxu0 %vm373_vm0, %v347_v15  ;;  %971 = vst.msk [vmem:[#allocation2 + $0x1a0] sm:$0xff] %vm373_vm0, %v8760_v33  ;;  %972 = vst.msk [vmem:[#allocation2 + $0x1a8] sm:$0xff] %vm373_vm0, %v8760_v33 }
  0x2e   : > { %973 = vst.msk [vmem:[#allocation2 + $0x1b0] sm:$0xff] %vm373_vm0, %v8760_v33  ;;  %974 = vst.msk [vmem:[#allocation2 + $0x1b8] sm:$0xff] %vm373_vm0, %v8760_v33 }
  0x2f   : > { %975 = vst.msk [vmem:[#allocation2 + $0x1c0] sm:$0xff] %vm373_vm0, %v8760_v33  ;;  %976 = vst.msk [vmem:[#allocation2 + $0x1c8] sm:$0xff] %vm373_vm0, %v8760_v33 }
  0x30   : > { %5863 = vmatmul.mubr.msk.f32.gmra.mrb[14].mxu0 %vm373_vm0, %v348_v16  ;;  %977 = vst.msk [vmem:[#allocation2 + $0x1d0] sm:$0xff] %vm373_vm0, %v8760_v33  ;;  %978 = vst.msk [vmem:[#allocation2 + $0x1d8] sm:$0xff] %vm373_vm0, %v8760_v33 }
  0x31   : > { %5865 = vmatprep.mubr.msk.f32.mxu0 %vm373_vm0, %v349_v17  ;;  %979 = vst.msk [vmem:[#allocation2 + $0x1e0] sm:$0xff] %vm373_vm0, %v8760_v33  ;;  %980 = vst.msk [vmem:[#allocation2 + $0x1e8] sm:$0xff] %vm373_vm0, %v8760_v33 }
  0x32   : > { %981 = vst.msk [vmem:[#allocation2 + $0x1f0] sm:$0xff] %vm373_vm0, %v8760_v33  ;;  %982 = vst.msk [vmem:[#allocation2 + $0x1f8] sm:$0xff] %vm373_vm0, %v8760_v33 }
  0x33   : > { %983 = vst.msk [vmem:[#allocation2 + $0x200] sm:$0xff] %vm373_vm0, %v8760_v33  ;;  %984 = vst.msk [vmem:[#allocation2 + $0x208] sm:$0xff] %vm373_vm0, %v8760_v33 }
  0x34   : > { %5866 = vmatmul.mubr.msk.f32.gmra.mrb[16].mxu0 %vm373_vm0, %v350_v18  ;;  %985 = vst.msk [vmem:[#allocation2 + $0x210] sm:$0xff] %vm373_vm0, %v8760_v33  ;;  %986 = vst.msk [vmem:[#allocation2 + $0x218] sm:$0xff] %vm373_vm0, %v8760_v33 }
  0x35   : > { %5868 = vmatprep.mubr.msk.f32.mxu0 %vm373_vm0, %v351_v19  ;;  %987 = vst.msk [vmem:[#allocation2 + $0x220] sm:$0xff] %vm373_vm0, %v8760_v33  ;;  %988 = vst.msk [vmem:[#allocation2 + $0x228] sm:$0xff] %vm373_vm0, %v8760_v33 }
  0x36   : > { %989 = vst.msk [vmem:[#allocation2 + $0x230] sm:$0xff] %vm373_vm0, %v8760_v33  ;;  %990 = vst.msk [vmem:[#allocation2 + $0x238] sm:$0xff] %vm373_vm0, %v8760_v33 }
  0x38   : > { %5869 = vmatmul.mubr.msk.f32.gmra.mrb[18].mxu0 %vm373_vm0, %v352_v20 }
  0x39   : > { %5871 = vmatprep.mubr.msk.f32.mxu0 %vm373_vm0, %v353_v21 }
  0x3c   : > { %5872 = vmatmul.mubr.msk.f32.gmra.mrb[20].mxu0 %vm373_vm0, %v354_v22 }
  0x3d   : > { %5874 = vmatprep.mubr.msk.f32.mxu0 %vm373_vm0, %v355_v23 }
  0x40   : > { %5875 = vmatmul.mubr.msk.f32.gmra.mrb[22].mxu0 %vm373_vm0, %v356_v24 }
  0x41   : > { %5877 = vmatprep.mubr.msk.f32.mxu0 %vm373_vm0, %v357_v25 }
  0x44   : > { %5878 = vmatmul.mubr.msk.f32.gmra.mrb[24].mxu0 %vm373_vm0, %v358_v26 }
  0x45   : > { %5880 = vmatprep.mubr.msk.f32.mxu0 %vm373_vm0, %v359_v27 }
  0x48   : > { %5881 = vmatmul.mubr.msk.f32.gmra.mrb[26].mxu0 %vm373_vm0, %v360_v28 }
  0x49   : > { %5883 = vmatprep.mubr.msk.f32.mxu0 %vm373_vm0, %v361_v29 }
  0x4c   : > { %5884 = vmatmul.mubr.msk.f32.gmra.mrb[28].mxu0 %vm373_vm0, %v362_v30 }
  0x4d   : > { %5886 = vmatprep.mubr.msk.f32.mxu0 %vm373_vm0, %v363_v31 }
  0x50   : > { %5887 = vmatmul.mubr.msk.f32.gmra.mrb[30].mxu0 %vm373_vm0, %v364_v32 }
  0x51   : > { %5891 = vmatprep.mubr.msk.f32.mxu0 %vm373_vm0, %v1057_v35 }
  0x54   : > { %5892 = vmatmul.mubr.msk.f32.vlgmr.msra.gmra.mrb[32].mxu0 %vm373_vm0, %v1058_v36 }
  0x55   : > { %5940 = vmatpush3.msra.mxu0 %v1056_v38 }
  0xe7   : > { %v5843_v41 = vpop.f32.mrb[0].mxu0 }
  0xe8   : > { %v7225_v42 = vadd.f32 %v5843_v41, %v7222_v40  ;;  %v536_v43 = vpop.f32.mrb[1].mxu0 }
  0xe9   : > { %v7228_v44 = vadd.f32 %v7222_v40, %v536_v43 }
  0xea   : > { %v5137_v45 = vmul.f32 -1.442695, %v7225_v42 }
  0xeb   : > { %v5136_v46 = vmul.f32 -1.442695, %v7228_v44  ;;  %v5846_v47 = vpop.f32.mrb[2].mxu0 }
  0xec   : > { %6617 = vpow2.f32 %v5137_v45  ;;  %v7233_v48 = vadd.f32 %v5846_v47, %v7222_v40  ;;  %v546_v49 = vpop.f32.mrb[3].mxu0 }
  0xed   : > { %6619 = vpow2.f32 %v5136_v46  ;;  %v7236_v50 = vadd.f32 %v7222_v40, %v546_v49 }
  0xee   : > { %v5139_v51 = vmul.f32 -1.442695, %v7233_v48 }
  0xef   : > { %v5138_v52 = vmul.f32 -1.442695, %v7236_v50  ;;  %v5849_v53 = vpop.f32.mrb[4].mxu0 }
  0xf0   : > { %6621 = vpow2.f32 %v5139_v51  ;;  %v7241_v54 = vadd.f32 %v5849_v53, %v7222_v40  ;;  %v556_v55 = vpop.f32.mrb[5].mxu0 }
  0xf1   : > { %6623 = vpow2.f32 %v5138_v52  ;;  %v7244_v56 = vadd.f32 %v7222_v40, %v556_v55 }
  0xf2   : > { %v5141_v57 = vmul.f32 -1.442695, %v7241_v54 }
  0xf3   : > { %v5140_v58 = vmul.f32 -1.442695, %v7244_v56  ;;  %v5852_v59 = vpop.f32.mrb[6].mxu0 }
  0xf4   : > { %6625 = vpow2.f32 %v5141_v57  ;;  %v7249_v60 = vadd.f32 %v5852_v59, %v7222_v40  ;;  %v566_v61 = vpop.f32.mrb[7].mxu0 }
  0xf5   : > { %6627 = vpow2.f32 %v5140_v58  ;;  %v7252_v62 = vadd.f32 %v7222_v40, %v566_v61 }
  0xf6   : > { %v6618_v63 = vpop.eup %6617  ;;  %v5143_v0 = vmul.f32 -1.442695, %v7249_v60 }
  0xf7   : > { %v6620_v1 = vpop.eup %6619  ;;  %v792_v2 = vadd.f32 1.0, %v6618_v63  ;;  %v5142_v3 = vmul.f32 -1.442695, %v7252_v62  ;;  %v5855_v4 = vpop.f32.mrb[8].mxu0 }
  0xf8   : > { %v791_v5 = vadd.f32 1.0, %v6620_v1  ;;  %6629 = vpow2.f32 %v5143_v0  ;;  %v7257_v6 = vadd.f32 %v5855_v4, %v7222_v40  ;;  %v576_v7 = vpop.f32.mrb[9].mxu0 }
  0xf9   : > { %6631 = vrcp.f32 %v792_v2  ;;  %v7260_v8 = vadd.f32 %v7222_v40, %v576_v7 }
  0xfa   : > { %v6622_v9 = vpop.eup %6621  ;;  %6633 = vrcp.f32 %v791_v5  ;;  %v5145_v10 = vmul.f32 -1.442695, %v7257_v6 }
  0xfb   : > { %v6624_v11 = vpop.eup %6623  ;;  %v794_v12 = vadd.f32 1.0, %v6622_v9  ;;  %6635 = vpow2.f32 %v5142_v3  ;;  %v5144_v13 = vmul.f32 -1.442695, %v7260_v8  ;;  %v5858_v14 = vpop.f32.mrb[10].mxu0 }
  0xfc   : > { %v793_v15 = vadd.f32 1.0, %v6624_v11  ;;  %6637 = vpow2.f32 %v5145_v10  ;;  %v7265_v16 = vadd.f32 %v5858_v14, %v7222_v40  ;;  %v586_v17 = vpop.f32.mrb[11].mxu0 }
  0xfd   : > { %6639 = vrcp.f32 %v794_v12  ;;  %v7268_v18 = vadd.f32 %v7222_v40, %v586_v17 }
  0xfe   : > { %v6626_v19 = vpop.eup %6625  ;;  %6641 = vrcp.f32 %v793_v15  ;;  %v5147_v20 = vmul.f32 -1.442695, %v7265_v16 }
  0xff   : > { %v6628_v21 = vpop.eup %6627  ;;  %v796_v22 = vadd.f32 1.0, %v6626_v19  ;;  %6643 = vpow2.f32 %v5144_v13  ;;  %v5146_v23 = vmul.f32 -1.442695, %v7268_v18  ;;  %v5861_v24 = vpop.f32.mrb[12].mxu0  ;;  %v7311_v13 = vld [vmem:[%s8753_s3 + $0x10] sm:$0xff] }
 0x100   : > { %v795_v25 = vadd.f32 1.0, %v6628_v21  ;;  %6645 = vpow2.f32 %v5147_v20  ;;  %v7273_v26 = vadd.f32 %v5861_v24, %v7222_v40  ;;  %v596_v27 = vpop.f32.mrb[13].mxu0  ;;  %5989 = vmatprep.subr.mxu0 %v7311_v13 }
 0x101   : > { %6647 = vrcp.f32 %v796_v22  ;;  %v7276_v28 = vadd.f32 %v7222_v40, %v596_v27 }
 0x102   : > { %v6630_v29 = vpop.eup %6629  ;;  %6649 = vrcp.f32 %v795_v25  ;;  %v5149_v30 = vmul.f32 -1.442695, %v7273_v26 }
 0x103   : > { %v6632_v31 = vpop.eup %6631  ;;  %v798_v32 = vadd.f32 1.0, %v6630_v29  ;;  %6651 = vpow2.f32 %v5146_v23  ;;  %v5148_v34 = vmul.f32 -1.442695, %v7276_v28  ;;  %v5864_v35 = vpop.f32.mrb[14].mxu0 }
 0x104   : > { %v6634_v36 = vpop.eup %6633  ;;  %v888_v38 = vmul.f32 %v6632_v31, %v7225_v42  ;;  %6653 = vpow2.f32 %v5149_v30  ;;  %v7282_v41 = vadd.f32 %v5864_v35, %v7222_v40  ;;  %v606_v43 = vpop.f32.mrb[15].mxu0 }
 0x105   : > { %v6636_v45 = vpop.eup %6635  ;;  %v887_v46 = vmul.f32 %v6634_v36, %v7228_v44  ;;  %6655 = vrcp.f32 %v798_v32  ;;  %v7286_v47 = vadd.f32 %v7222_v40, %v606_v43 }
 0x106   : > { %v6638_v49 = vpop.eup %6637  ;;  %993 = vst.msk [vmem:[#allocation2 + $0x30] sm:$0xff] %vm373_vm0, %v888_v38  ;;  %v797_v51 = vadd.f32 1.0, %v6636_v45  ;;  %6657 = vpow2.f32 %v5148_v34  ;;  %v5151_v52 = vmul.f32 -1.442695, %v7282_v41 }
 0x107   : > { %v6640_v42 = vpop.eup %6639  ;;  %992 = vst.msk [vmem:[#allocation2 + $0x28] sm:$0xff] %vm373_vm0, %v887_v46  ;;  %v800_v53 = vadd.f32 1.0, %v6638_v49  ;;  %v5150_v55 = vmul.f32 -1.442695, %v7286_v47  ;;  %v5867_v57 = vpop.f32.mrb[16].mxu0 }
 0x108   : > { %v6642_v58 = vpop.eup %6641  ;;  %v890_v44 = vmul.f32 %v6640_v42, %v7233_v48  ;;  %6659 = vrcp.f32 %v797_v51  ;;  %v7294_v59 = vadd.f32 %v5867_v57, %v7222_v40  ;;  %v616_v61 = vpop.f32.mrb[17].mxu0 }
 0x109   : > { %v6644_v63 = vpop.eup %6643  ;;  %v889_v0 = vmul.f32 %v6642_v58, %v7236_v50  ;;  %6661 = vrcp.f32 %v800_v53  ;;  %v7298_v1 = vadd.f32 %v7222_v40, %v616_v61 }
 0x10a   : > { %v6646_v2 = vpop.eup %6645  ;;  %995 = vst.msk [vmem:[#allocation2 + $0x50] sm:$0xff] %vm373_vm0, %v890_v44  ;;  %v799_v3 = vadd.f32 1.0, %v6644_v63  ;;  %6663 = vpow2.f32 %v5151_v52  ;;  %v5153_v4 = vmul.f32 -1.442695, %v7294_v59 }
 0x10b   : > { %v6648_v48 = vpop.eup %6647  ;;  %994 = vst.msk [vmem:[#allocation2 + $0x48] sm:$0xff] %vm373_vm0, %v889_v0  ;;  %v802_v5 = vadd.f32 1.0, %v6646_v2  ;;  %6665 = vpow2.f32 %v5150_v55  ;;  %v5152_v7 = vmul.f32 -1.442695, %v7298_v1  ;;  %v5870_v9 = vpop.f32.mrb[18].mxu0 }
 0x10c   : > { %v6650_v50 = vpop.eup %6649  ;;  %v892_v10 = vmul.f32 %v6648_v48, %v7241_v54  ;;  %6667 = vrcp.f32 %v799_v3  ;;  %v7306_v11 = vadd.f32 %v5870_v9, %v7222_v40  ;;  %v626_v12 = vpop.f32.mrb[19].mxu0 }
 0x10d   : > { %v6652_v14 = vpop.eup %6651  ;;  %v891_v15 = vmul.f32 %v6650_v50, %v7244_v56  ;;  %6669 = vrcp.f32 %v802_v5  ;;  %v7315_v17 = vadd.f32 %v7222_v40, %v626_v12  ;;  %v7325_v24 = vld [vmem:[#allocation2 + $0x30] sm:$0xff] }
 0x10e   : > { %v6654_v54 = vpop.eup %6653  ;;  %997 = vst.msk [vmem:[#allocation2 + $0x70] sm:$0xff] %vm373_vm0, %v892_v10  ;;  %v801_v19 = vadd.f32 1.0, %v6652_v14  ;;  %6671 = vpow2.f32 %v5153_v4  ;;  %v5155_v20 = vmul.f32 -1.442695, %v7306_v11  ;;  %v7320_v21 = vld [vmem:[#allocation2 + $0x28] sm:$0xff]  ;;  %v1736_v33 = vld [vmem:[#allocation2 + $0x31] sm:$0xff] }
 0x10f   : > { %v6656_v22 = vpop.eup %6655  ;;  %996 = vst.msk [vmem:[#allocation2 + $0x68] sm:$0xff] %vm373_vm0, %v891_v15  ;;  %v804_v23 = vadd.f32 1.0, %v6654_v54  ;;  %6673 = vpow2.f32 %v5152_v7  ;;  %v5873_v56 = vpop.f32.mrb[20].mxu0  ;;  %5894 = vmatprep.mubr.msk.f32.mxu0 %vm373_vm0, %v7320_v21  ;;  %v5154_v29 = vmul.f32 -1.442695, %v7315_v17 }
 0x110   : > { %v6658_v25 = vpop.eup %6657  ;;  %v894_v27 = vmul.f32 %v6656_v22, %v7249_v60  ;;  %6675 = vrcp.f32 %v801_v19  ;;  %v7330_v30 = vadd.f32 %v5873_v56, %v7222_v40  ;;  %v636_v31 = vpop.f32.mrb[21].mxu0  ;;  %5895 = vmatmul.mubr.msk.f32.gmra.mrb[34].mxu0 %vm373_vm0, %v7325_v24 }
 0x111   : > { %6677 = vrcp.f32 %v804_v23  ;;  %v803_v32 = vadd.f32 1.0, %v6658_v25  ;;  %v7335_v34 = vadd.f32 %v7222_v40, %v636_v31  ;;  %v7345_v49 = vld [vmem:[#allocation2 + $0x50] sm:$0xff] }
 0x112   : > { %v6660_v35 = vpop.eup %6659  ;;  %999 = vst.msk [vmem:[#allocation2 + $0x90] sm:$0xff] %vm373_vm0, %v894_v27  ;;  %6679 = vpow2.f32 %v5155_v20  ;;  %v5157_v60 = vmul.f32 -1.442695, %v7330_v30  ;;  %v7339_v36 = vld [vmem:[#allocation2 + $0x48] sm:$0xff] }
 0x113   : > { %v6662_v38 = vpop.eup %6661  ;;  %v893_v43 = vmul.f32 %v6660_v35, %v7252_v62  ;;  %6681 = vrcp.f32 %v803_v32  ;;  %v5156_v45 = vmul.f32 -1.442695, %v7335_v34  ;;  %v5876_v46 = vpop.f32.mrb[22].mxu0  ;;  %5897 = vmatprep.mubr.msk.f32.mxu0 %vm373_vm0, %v7339_v36 }
 0x114   : > { %v6664_v51 = vpop.eup %6663  ;;  %v896_v52 = vmul.f32 %v6662_v38, %v7257_v6  ;;  %6683 = vpow2.f32 %v5154_v29  ;;  %v7349_v42 = vadd.f32 %v5876_v46, %v7222_v40  ;;  %v646_v53 = vpop.f32.mrb[23].mxu0  ;;  %5898 = vmatmul.mubr.msk.f32.gmra.mrb[36].mxu0 %vm373_vm0, %v7345_v49 }
 0x115   : > { %v6666_v62 = vpop.eup %6665  ;;  %998 = vst.msk [vmem:[#allocation2 + $0x88] sm:$0xff] %vm373_vm0, %v893_v43  ;;  %v806_v55 = vadd.f32 1.0, %v6664_v51  ;;  %6685 = vpow2.f32 %v5157_v60  ;;  %v7355_v57 = vadd.f32 %v7222_v40, %v646_v53  ;;  %v7365_v4 = vld [vmem:[#allocation2 + $0x70] sm:$0xff] }
 0x116   : > { %v6668_v58 = vpop.eup %6667  ;;  %1001 = vst.msk [vmem:[#allocation2 + $0xb0] sm:$0xff] %vm373_vm0, %v896_v52  ;;  %v805_v6 = vadd.f32 1.0, %v6666_v62  ;;  %6687 = vpow2.f32 %v5156_v45  ;;  %v5159_v44 = vmul.f32 -1.442695, %v7349_v42  ;;  %v7359_v61 = vld [vmem:[#allocation2 + $0x68] sm:$0xff] }
 0x117   : > { %v6670_v63 = vpop.eup %6669  ;;  %v895_v0 = vmul.f32 %v6668_v58, %v7260_v8  ;;  %6689 = vrcp.f32 %v806_v55  ;;  %v5158_v2 = vmul.f32 -1.442695, %v7355_v57  ;;  %v5879_v3 = vpop.f32.mrb[24].mxu0  ;;  %5900 = vmatprep.mubr.msk.f32.mxu0 %vm373_vm0, %v7359_v61 }
 0x118   : > { %v6672_v48 = vpop.eup %6671  ;;  %v898_v5 = vmul.f32 %v6670_v63, %v7265_v16  ;;  %6691 = vrcp.f32 %v805_v6  ;;  %v7369_v7 = vadd.f32 %v5879_v3, %v7222_v40  ;;  %v656_v9 = vpop.f32.mrb[25].mxu0  ;;  %5901 = vmatmul.mubr.msk.f32.gmra.mrb[38].mxu0 %vm373_vm0, %v7365_v4 }
 0x119   : > { %v6674_v8 = vpop.eup %6673  ;;  %1000 = vst.msk [vmem:[#allocation2 + $0xa8] sm:$0xff] %vm373_vm0, %v895_v0  ;;  %v808_v50 = vadd.f32 1.0, %v6672_v48  ;;  %6693 = vpow2.f32 %v5159_v44  ;;  %v7375_v10 = vadd.f32 %v7222_v40, %v656_v9  ;;  %v7393_v32 = vld [vmem:[#allocation2 + $0x90] sm:$0xff] }
 0x11a   : > { %v6676_v12 = vpop.eup %6675  ;;  %1003 = vst.msk [vmem:[#allocation2 + $0xd0] sm:$0xff] %vm373_vm0, %v898_v5  ;;  %v807_v16 = vadd.f32 1.0, %v6674_v8  ;;  %6695 = vpow2.f32 %v5158_v2  ;;  %v5161_v14 = vmul.f32 -1.442695, %v7369_v7 }
 0x11b   : > { %v6678_v15 = vpop.eup %6677  ;;  %v897_v54 = vmul.f32 %v6676_v12, %v7268_v18  ;;  %6697 = vrcp.f32 %v808_v50  ;;  %v5160_v19 = vmul.f32 -1.442695, %v7375_v10  ;;  %v5882_v20 = vpop.f32.mrb[26].mxu0 }
 0x11c   : > { %v6680_v22 = vpop.eup %6679  ;;  %v900_v23 = vmul.f32 %v6678_v15, %v7273_v26  ;;  %6699 = vrcp.f32 %v807_v16  ;;  %v7383_v56 = vadd.f32 %v5882_v20, %v7222_v40  ;;  %v7385_v25 = vld [vmem:[#allocation2 + $0x88] sm:$0xff]  ;;  %v666_v27 = vpop.f32.mrb[27].mxu0 }
 0x11d   : > { %v6682_v29 = vpop.eup %6681  ;;  %1002 = vst.msk [vmem:[#allocation2 + $0xc8] sm:$0xff] %vm373_vm0, %v897_v54  ;;  %v810_v31 = vadd.f32 1.0, %v6680_v22  ;;  %6701 = vpow2.f32 %v5161_v14  ;;  %5903 = vmatprep.mubr.msk.f32.mxu0 %vm373_vm0, %v7385_v25  ;;  %v7391_v18 = vadd.f32 %v7222_v40, %v666_v27  ;;  %v7412_v44 = vld [vmem:[#allocation2 + $0xb0] sm:$0xff] }
 0x11e   : > { %v6684_v26 = vpop.eup %6683  ;;  %1005 = vst.msk [vmem:[#allocation2 + $0xf0] sm:$0xff] %vm373_vm0, %v900_v23  ;;  %v899_v35 = vmul.f32 %v6682_v29, %v7276_v28  ;;  %6703 = vpow2.f32 %v5160_v19  ;;  %v5163_v60 = vmul.f32 -1.442695, %v7383_v56  ;;  %5904 = vmatmul.mubr.msk.f32.gmra.mrb[40].mxu0 %vm373_vm0, %v7393_v32 }
 0x11f   : > { %v6686_v38 = vpop.eup %6685  ;;  %6705 = vrcp.f32 %v810_v31  ;;  %v809_v43 = vadd.f32 1.0, %v6684_v26  ;;  %v5885_v45 = vpop.f32.mrb[28].mxu0  ;;  %v5162_v52 = vmul.f32 -1.442695, %v7391_v18 }
 0x120   : > { %v6688_v46 = vpop.eup %6687  ;;  %1004 = vst.msk [vmem:[#allocation2 + $0xe8] sm:$0xff] %vm373_vm0, %v899_v35  ;;  %v812_v51 = vadd.f32 1.0, %v6686_v38  ;;  %6707 = vpow2.f32 %v5163_v60  ;;  %v7403_v53 = vadd.f32 %v5885_v45, %v7222_v40  ;;  %v7405_v28 = vld [vmem:[#allocation2 + $0xa8] sm:$0xff]  ;;  %v676_v62 = vpop.f32.mrb[29].mxu0 }
 0x121   : > { %v6690_v55 = vpop.eup %6689  ;;  %6709 = vrcp.f32 %v809_v43  ;;  %v811_v58 = vadd.f32 1.0, %v6688_v46  ;;  %5906 = vmatprep.mubr.msk.f32.mxu0 %vm373_vm0, %v7405_v28  ;;  %v7410_v6 = vadd.f32 %v7222_v40, %v676_v62  ;;  %v7432_v54 = vld [vmem:[#allocation2 + $0xd0] sm:$0xff] }
 0x122   : > { %v6692_v63 = vpop.eup %6691  ;;  %v902_v0 = vmul.f32 %v6690_v55, %v7282_v41  ;;  %6711 = vrcp.f32 %v812_v51  ;;  %v5165_v2 = vmul.f32 -1.442695, %v7403_v53  ;;  %5907 = vmatmul.mubr.msk.f32.gmra.mrb[42].mxu0 %vm373_vm0, %v7412_v44 }
 0x123   : > { %v6694_v3 = vpop.eup %6693  ;;  %v901_v48 = vmul.f32 %v6692_v63, %v7286_v47  ;;  %6713 = vrcp.f32 %v811_v58  ;;  %v5888_v5 = vpop.f32.mrb[30].mxu0  ;;  %v5164_v50 = vmul.f32 -1.442695, %v7410_v6 }
 0x124   : > { %v6696_v9 = vpop.eup %6695  ;;  %1007 = vst.msk [vmem:[#allocation2 + $0x110] sm:$0xff] %vm373_vm0, %v902_v0  ;;  %v814_v8 = vadd.f32 1.0, %v6694_v3  ;;  %6715 = vpow2.f32 %v5162_v52  ;;  %v7422_v41 = vadd.f32 %v5888_v5, %v7222_v40  ;;  %v7424_v12 = vld [vmem:[#allocation2 + $0xc8] sm:$0xff]  ;;  %v686_v16 = vpop.f32.mrb[31].mxu0 }
 0x125   : > { %v6698_v14 = vpop.eup %6697  ;;  %1006 = vst.msk [vmem:[#allocation2 + $0x108] sm:$0xff] %vm373_vm0, %v901_v48  ;;  %v813_v15 = vadd.f32 1.0, %v6696_v9  ;;  %6717 = vpow2.f32 %v5165_v2  ;;  %5909 = vmatprep.mubr.msk.f32.mxu0 %vm373_vm0, %v7424_v12  ;;  %v7430_v47 = vadd.f32 %v7222_v40, %v686_v16  ;;  %v7446_v60 = vld [vmem:[#allocation2 + $0xf0] sm:$0xff] }
 0x126   : > { %v6700_v19 = vpop.eup %6699  ;;  %v904_v20 = vmul.f32 %v6698_v14, %v7294_v59  ;;  %6719 = vrcp.f32 %v814_v8  ;;  %v5167_v22 = vmul.f32 -1.442695, %v7422_v41  ;;  %5910 = vmatmul.mubr.msk.f32.gmra.mrb[44].mxu0 %vm373_vm0, %v7432_v54 }
 0x127   : > { %v6702_v23 = vpop.eup %6701  ;;  %v903_v27 = vmul.f32 %v6700_v19, %v7298_v1  ;;  %6721 = vrcp.f32 %v813_v15  ;;  %v7439_v29 = vld [vmem:[#allocation2 + $0xe8] sm:$0xff]  ;;  %v5166_v26 = vmul.f32 -1.442695, %v7430_v47 }
 0x128   : > { %v6704_v31 = vpop.eup %6703  ;;  %1009 = vst.msk [vmem:[#allocation2 + $0x130] sm:$0xff] %vm373_vm0, %v904_v20  ;;  %v816_v40 = vadd.f32 1.0, %v6702_v23  ;;  %6723 = vpow2.f32 %v5164_v50  ;;  %5912 = vmatprep.mubr.msk.f32.mxu0 %vm373_vm0, %v7439_v29 }
 0x129   : > { %v6706_v59 = vpop.eup %6705  ;;  %1008 = vst.msk [vmem:[#allocation2 + $0x128] sm:$0xff] %vm373_vm0, %v903_v27  ;;  %v815_v35 = vadd.f32 1.0, %v6704_v31  ;;  %6725 = vpow2.f32 %v5167_v22 }
 0x12a   : > { %v6708_v1 = vpop.eup %6707  ;;  %v906_v38 = vmul.f32 %v6706_v59, %v7306_v11  ;;  %6727 = vrcp.f32 %v816_v40  ;;  %5913 = vmatmul.mubr.msk.f32.gmra.mrb[46].mxu0 %vm373_vm0, %v7446_v60 }
 0x12b   : > { %v6710_v43 = vpop.eup %6709  ;;  %6729 = vrcp.f32 %v815_v35  ;;  %v818_v45 = vadd.f32 1.0, %v6708_v1  ;;  %v7458_v11 = vld [vmem:[#allocation2 + $0x110] sm:$0xff] }
 0x12c   : > { %v6712_v46 = vpop.eup %6711  ;;  %1011 = vst.msk [vmem:[#allocation2 + $0x150] sm:$0xff] %vm373_vm0, %v906_v38  ;;  %v905_v51 = vmul.f32 %v6710_v43, %v7315_v17  ;;  %6731 = vpow2.f32 %v5166_v26  ;;  %v7453_v52 = vld [vmem:[#allocation2 + $0x108] sm:$0xff] }
 0x12d   : > { %v6714_v62 = vpop.eup %6713  ;;  %v908_v55 = vmul.f32 %v6712_v46, %v7330_v30  ;;  %6733 = vrcp.f32 %v818_v45  ;;  %5915 = vmatprep.mubr.msk.f32.mxu0 %vm373_vm0, %v7453_v52 }
 0x12e   : > { %v6716_v58 = vpop.eup %6715  ;;  %1010 = vst.msk [vmem:[#allocation2 + $0x148] sm:$0xff] %vm373_vm0, %v905_v51  ;;  %v907_v63 = vmul.f32 %v6714_v62, %v7335_v34  ;;  %5916 = vmatmul.mubr.msk.f32.gmra.mrb[48].mxu0 %vm373_vm0, %v7458_v11 }
 0x12f   : > { %v6718_v17 = vpop.eup %6717  ;;  %1013 = vst.msk [vmem:[#allocation2 + $0x170] sm:$0xff] %vm373_vm0, %v908_v55  ;;  %v817_v0 = vadd.f32 1.0, %v6716_v58  ;;  %v7471_v34 = vld [vmem:[#allocation2 + $0x130] sm:$0xff] }
 0x130   : > { %v6720_v2 = vpop.eup %6719  ;;  %1012 = vst.msk [vmem:[#allocation2 + $0x168] sm:$0xff] %vm373_vm0, %v907_v63  ;;  %v820_v30 = vadd.f32 1.0, %v6718_v17  ;;  %v7466_v3 = vld [vmem:[#allocation2 + $0x128] sm:$0xff] }
 0x131   : > { %v6722_v48 = vpop.eup %6721  ;;  %v910_v5 = vmul.f32 %v6720_v2, %v7349_v42  ;;  %6735 = vrcp.f32 %v817_v0  ;;  %5918 = vmatprep.mubr.msk.f32.mxu0 %vm373_vm0, %v7466_v3  ;;  %v1024_v63 = vld [vmem:[#allocation2 + $0x7] sm:$0xff] }
 0x132   : > { %v6724_v9 = vpop.eup %6723  ;;  %v909_v8 = vmul.f32 %v6722_v48, %v7355_v57  ;;  %6737 = vrcp.f32 %v820_v30  ;;  %5919 = vmatmul.mubr.msk.f32.gmra.mrb[50].mxu0 %vm373_vm0, %v7471_v34  ;;  %v5332_v30 = vld [vmem:[%s8753_s3 + $0x28] sm:$0xff] }
 0x133   : > { %v6726_v50 = vpop.eup %6725  ;;  %1015 = vst.msk [vmem:[#allocation2 + $0x190] sm:$0xff] %vm373_vm0, %v910_v5  ;;  %v819_v16 = vadd.f32 1.0, %v6724_v9  ;;  %v7484_v23 = vld [vmem:[#allocation2 + $0x150] sm:$0xff]  ;;  %v7555_v48 = vld [vmem:[#allocation2 + $0x27] sm:$0xff] }
 0x134   : > { %v6728_v14 = vpop.eup %6727  ;;  %1014 = vst.msk [vmem:[#allocation2 + $0x188] sm:$0xff] %vm373_vm0, %v909_v8  ;;  %v822_v42 = vadd.f32 1.0, %v6726_v50  ;;  %v7562_v5 = vld [vmem:[#allocation2 + $0x2f] sm:$0xff]  ;;  %v7624_v8 = vld [vmem:[#allocation2 + $0xc7] sm:$0xff] }
 0x135   : > { %v6730_v15 = vpop.eup %6729  ;;  %v912_v19 = vmul.f32 %v6728_v14, %v7369_v7  ;;  %6739 = vrcp.f32 %v819_v16  ;;  %v7479_v20 = vld [vmem:[#allocation2 + $0x148] sm:$0xff]  ;;  %v7568_v9 = vld [vmem:[%s8753_s3 + $0x30] sm:$0xff] }
 0x136   : > { %v6732_v22 = vpop.eup %6731  ;;  %v911_v57 = vmul.f32 %v6730_v15, %v7375_v10  ;;  %6741 = vrcp.f32 %v822_v42  ;;  %5921 = vmatprep.mubr.msk.f32.mxu0 %vm373_vm0, %v7479_v20  ;;  %v7496_v10 = vld [vmem:[#allocation2 + $0x170] sm:$0xff]  ;;  %v7636_v16 = vld [vmem:[#allocation2 + $0xe7] sm:$0xff] }
 0x137   : > { %v6734_v27 = vpop.eup %6733  ;;  %1017 = vst.msk [vmem:[#allocation2 + $0x1b0] sm:$0xff] %vm373_vm0, %v912_v19  ;;  %v821_v31 = vadd.f32 1.0, %v6732_v22  ;;  %5922 = vmatmul.mubr.msk.f32.gmra.mrb[52].mxu0 %vm373_vm0, %v7484_v23  ;;  %v7489_v7 = vld [vmem:[#allocation2 + $0x168] sm:$0xff] }
 0x138   : > { %1016 = vst.msk [vmem:[#allocation2 + $0x1a8] sm:$0xff] %vm373_vm0, %v911_v57  ;;  %v914_v40 = vmul.f32 %v6734_v27, %v7383_v56  ;;  %5924 = vmatprep.mubr.msk.f32.mxu0 %vm373_vm0, %v7489_v7  ;;  %v7630_v50 = vld [vmem:[#allocation2 + $0xcf] sm:$0xff]  ;;  %v7648_v42 = vld [vmem:[#allocation2 + $0x107] sm:$0xff] }
 0x139   : > { %6743 = vrcp.f32 %v821_v31  ;;  %v7642_v14 = vld [vmem:[#allocation2 + $0xef] sm:$0xff]  ;;  %v7660_v19 = vld [vmem:[#allocation2 + $0x127] sm:$0xff] }
 0x13a   : > { %1019 = vst.msk [vmem:[#allocation2 + $0x1d0] sm:$0xff] %vm373_vm0, %v914_v40  ;;  %v7507_v38 = vld [vmem:[#allocation2 + $0x190] sm:$0xff]  ;;  %v7672_v57 = vld [vmem:[#allocation2 + $0x147] sm:$0xff] }
 0x13b   : > { %v6736_v26 = vpop.eup %6735  ;;  %5925 = vmatmul.mubr.msk.f32.gmra.mrb[54].mxu0 %vm373_vm0, %v7496_v10  ;;  %v7500_v59 = vld [vmem:[#allocation2 + $0x188] sm:$0xff] }
 0x13c   : > { %v6738_v35 = vpop.eup %6737  ;;  %v913_v1 = vmul.f32 %v6736_v26, %v7391_v18  ;;  %5927 = vmatprep.mubr.msk.f32.mxu0 %vm373_vm0, %v7500_v59  ;;  %v7654_v15 = vld [vmem:[#allocation2 + $0x10f] sm:$0xff]  ;;  %v7684_v31 = vld [vmem:[#allocation2 + $0x167] sm:$0xff] }
 0x13d   : > { %v916_v56 = vmul.f32 %v6738_v35, %v7403_v53  ;;  %v7666_v22 = vld [vmem:[#allocation2 + $0x12f] sm:$0xff]  ;;  %v7696_v26 = vld [vmem:[#allocation2 + $0x187] sm:$0xff] }
 0x13e   : > { %1018 = vst.msk [vmem:[#allocation2 + $0x1c8] sm:$0xff] %vm373_vm0, %v913_v1  ;;  %v7519_v51 = vld [vmem:[#allocation2 + $0x1b0] sm:$0xff] }
 0x13f   : > { %v6740_v43 = vpop.eup %6739  ;;  %1021 = vst.msk [vmem:[#allocation2 + $0x1f0] sm:$0xff] %vm373_vm0, %v916_v56  ;;  %5928 = vmatmul.mubr.msk.f32.gmra.mrb[56].mxu0 %vm373_vm0, %v7507_v38  ;;  %v7512_v45 = vld [vmem:[#allocation2 + $0x1a8] sm:$0xff] }
 0x140   : > { %v6742_v46 = vpop.eup %6741  ;;  %v915_v18 = vmul.f32 %v6740_v43, %v7410_v6  ;;  %5930 = vmatprep.mubr.msk.f32.mxu0 %vm373_vm0, %v7512_v45  ;;  %v7678_v27 = vld [vmem:[#allocation2 + $0x14f] sm:$0xff]  ;;  %v7708_v1 = vld [vmem:[#allocation2 + $0x1a7] sm:$0xff] }
 0x141   : > { %v918_v53 = vmul.f32 %v6742_v46, %v7422_v41  ;;  %v7530_v6 = vld [vmem:[#allocation2 + $0x1d0] sm:$0xff] }
 0x142   : > { %1020 = vst.msk [vmem:[#allocation2 + $0x1e8] sm:$0xff] %vm373_vm0, %v915_v18  ;;  %v7690_v40 = vld [vmem:[#allocation2 + $0x16f] sm:$0xff] }
 0x143   : > { %v6744_v62 = vpop.eup %6743  ;;  %1023 = vst.msk [vmem:[#allocation2 + $0x210] sm:$0xff] %vm373_vm0, %v918_v53  ;;  %5931 = vmatmul.mubr.msk.f32.gmra.mrb[58].mxu0 %vm373_vm0, %v7519_v51  ;;  %v7702_v35 = vld [vmem:[#allocation2 + $0x18f] sm:$0xff] }
 0x144   : > { %v917_v55 = vmul.f32 %v6744_v62, %v7430_v47  ;;  %v1025_v47 = vld [vmem:[#allocation2 + $0xf] sm:$0xff] }
 0x145   : > { %v7525_v58 = vld [vmem:[#allocation2 + $0x1c8] sm:$0xff] }
 0x146   : > { %1022 = vst.msk [vmem:[#allocation2 + $0x208] sm:$0xff] %vm373_vm0, %v917_v55  ;;  %5933 = vmatprep.mubr.msk.f32.mxu0 %vm373_vm0, %v7525_v58  ;;  %v7538_v17 = vld [vmem:[#allocation2 + $0x1f0] sm:$0xff]  ;;  %v7720_v43 = vld [vmem:[#allocation2 + $0x1c7] sm:$0xff] }
 0x147   : > { %5934 = vmatmul.mubr.msk.f32.gmra.mrb[60].mxu0 %vm373_vm0, %v7530_v6  ;;  %v7714_v56 = vld [vmem:[#allocation2 + $0x1af] sm:$0xff] }
 0x148   : > { %v7726_v46 = vld [vmem:[#allocation2 + $0x1cf] sm:$0xff] }
 0x149   : > { %v7534_v41 = vld [vmem:[#allocation2 + $0x1e8] sm:$0xff] }
 0x14a   : > { %5936 = vmatprep.mubr.msk.f32.mxu0 %vm373_vm0, %v7534_v41  ;;  %v7732_v18 = vld [vmem:[#allocation2 + $0x1e7] sm:$0xff]  ;;  %v7738_v62 = vld [vmem:[#allocation2 + $0x1ef] sm:$0xff] }
 0x14b   : > { %5937 = vmatmul.mubr.msk.f32.gmra.mrb[62].mxu0 %vm373_vm0, %v7538_v17  ;;  %v1733_v53 = vld [vmem:[#allocation2 + $0x9] sm:$0xff] }
 0x14c   : > { %5941 = vmatprep.mubr.msk.f32.mxu0 %vm373_vm0, %v1024_v63  ;;  %v1734_v63 = vld [vmem:[#allocation2 + $0x11] sm:$0xff] }
 0x14d   : > { %v7543_v0 = vld [vmem:[#allocation2 + $0x207] sm:$0xff]  ;;  %v7545_v2 = vld [vmem:[#allocation2 + $0x20f] sm:$0xff] }
 0x14e   : > { %6086 = vmatprep.mubr.msk.f32.mxu1 %vm373_vm0, %v7543_v0  ;;  %v7744_v55 = vld [vmem:[#allocation2 + $0x208] sm:$0xff] }
 0x14f   : > { %5942 = vmatmul.mubr.msk.f32.vlgmr.msra.gmra.mrb[32].mxu0 %vm373_vm0, %v1025_v47  ;;  %6087 = vmatmul.mubr.msk.f32.vlgmr.msra.gmra.mrb[0].mxu1 %vm373_vm0, %v7545_v2  ;;  %8787 = vst [vmem:[#allocation3_spill] sm:$0xff] %v7744_v55  ;;  %v7749_v47 = vld [vmem:[#allocation2 + $0x210] sm:$0xff] }
 0x150   : > { %6090 = vmatpush3.msra.mxu1 %v7216_v39  ;;  %5944 = vmatprep.mubr.msk.f32.mxu0 %vm373_vm0, %v7555_v48  ;;  %v7574_v39 = vld [vmem:[#allocation2 + $0x47] sm:$0xff] }
 0x151   : > { %6091 = vmatprep.mubr.msk.f32.mxu1 %vm373_vm0, %v7320_v21  ;;  %6139 = vmatprep.subr.mxu1 %v5332_v30  ;;  %v7588_v21 = vld [vmem:[#allocation2 + $0x67] sm:$0xff] }
 0x152   : > { %5990 = vmatpush3.msra.mxu0 %v7311_v13  ;;  %v7581_v13 = vld [vmem:[#allocation2 + $0x4f] sm:$0xff] }
 0x153   : > { %5945 = vmatmul.mubr.msk.f32.gmra.mrb[34].mxu0 %vm373_vm0, %v7562_v5  ;;  %6092 = vmatmul.mubr.msk.f32.vlgmr.msra.gmra.mrb[2].mxu1 %vm373_vm0, %v7325_v24  ;;  %v7594_v24 = vld [vmem:[#allocation2 + $0x6f] sm:$0xff] }
 0x154   : > { %6140 = vmatpush3.msra.mxu1 %v5332_v30  ;;  %5947 = vmatprep.mubr.msk.f32.mxu0 %vm373_vm0, %v7574_v39  ;;  %v1735_v30 = vld [vmem:[#allocation2 + $0x29] sm:$0xff] }
 0x155   : > { %6094 = vmatprep.mubr.msk.f32.mxu1 %vm373_vm0, %v7339_v36  ;;  %6189 = vmatprep.subr.mxu1 %v7568_v9  ;;  %v7600_v36 = vld [vmem:[#allocation2 + $0x87] sm:$0xff] }
 0x156   : > { %6039 = vmatprep.subr.mxu0 %v7206_v37 }
 0x157   : > { %5948 = vmatmul.mubr.msk.f32.gmra.mrb[36].mxu0 %vm373_vm0, %v7581_v13  ;;  %6095 = vmatmul.mubr.msk.f32.gmra.mrb[4].mxu1 %vm373_vm0, %v7345_v49  ;;  %v7606_v49 = vld [vmem:[#allocation2 + $0x8f] sm:$0xff] }
 0x158   : > { %5950 = vmatprep.mubr.msk.f32.mxu0 %vm373_vm0, %v7588_v21  ;;  %6097 = vmatprep.mubr.msk.f32.mxu1 %vm373_vm0, %v7359_v61  ;;  %v7612_v61 = vld [vmem:[#allocation2 + $0xa7] sm:$0xff] }
 0x15b   : > { %5951 = vmatmul.mubr.msk.f32.gmra.mrb[38].mxu0 %vm373_vm0, %v7594_v24  ;;  %6098 = vmatmul.mubr.msk.f32.gmra.mrb[6].mxu1 %vm373_vm0, %v7365_v4  ;;  %v7618_v4 = vld [vmem:[#allocation2 + $0xaf] sm:$0xff] }
 0x15c   : > { %5953 = vmatprep.mubr.msk.f32.mxu0 %vm373_vm0, %v7600_v36  ;;  %6100 = vmatprep.mubr.msk.f32.mxu1 %vm373_vm0, %v7385_v25 }
 0x15f   : > { %5954 = vmatmul.mubr.msk.f32.gmra.mrb[40].mxu0 %vm373_vm0, %v7606_v49  ;;  %6101 = vmatmul.mubr.msk.f32.gmra.mrb[8].mxu1 %vm373_vm0, %v7393_v32 }
 0x160   : > { %5956 = vmatprep.mubr.msk.f32.mxu0 %vm373_vm0, %v7612_v61  ;;  %6103 = vmatprep.mubr.msk.f32.mxu1 %vm373_vm0, %v7405_v28 }
 0x163   : > { %5957 = vmatmul.mubr.msk.f32.gmra.mrb[42].mxu0 %vm373_vm0, %v7618_v4  ;;  %6104 = vmatmul.mubr.msk.f32.gmra.mrb[10].mxu1 %vm373_vm0, %v7412_v44 }
 0x164   : > { %5959 = vmatprep.mubr.msk.f32.mxu0 %vm373_vm0, %v7624_v8  ;;  %6106 = vmatprep.mubr.msk.f32.mxu1 %vm373_vm0, %v7424_v12 }
 0x167   : > { %5960 = vmatmul.mubr.msk.f32.gmra.mrb[44].mxu0 %vm373_vm0, %v7630_v50  ;;  %6107 = vmatmul.mubr.msk.f32.gmra.mrb[12].mxu1 %vm373_vm0, %v7432_v54 }
 0x168   : > { %5962 = vmatprep.mubr.msk.f32.mxu0 %vm373_vm0, %v7636_v16  ;;  %6109 = vmatprep.mubr.msk.f32.mxu1 %vm373_vm0, %v7439_v29 }
 0x16b   : > { %5963 = vmatmul.mubr.msk.f32.gmra.mrb[46].mxu0 %vm373_vm0, %v7642_v14  ;;  %6110 = vmatmul.mubr.msk.f32.gmra.mrb[14].mxu1 %vm373_vm0, %v7446_v60 }
 0x16c   : > { %5965 = vmatprep.mubr.msk.f32.mxu0 %vm373_vm0, %v7648_v42  ;;  %6112 = vmatprep.mubr.msk.f32.mxu1 %vm373_vm0, %v7453_v52 }
 0x16f   : > { %5966 = vmatmul.mubr.msk.f32.gmra.mrb[48].mxu0 %vm373_vm0, %v7654_v15  ;;  %6113 = vmatmul.mubr.msk.f32.gmra.mrb[16].mxu1 %vm373_vm0, %v7458_v11 }
 0x170   : > { %5968 = vmatprep.mubr.msk.f32.mxu0 %vm373_vm0, %v7660_v19  ;;  %6115 = vmatprep.mubr.msk.f32.mxu1 %vm373_vm0, %v7466_v3 }
 0x173   : > { %5969 = vmatmul.mubr.msk.f32.gmra.mrb[50].mxu0 %vm373_vm0, %v7666_v22  ;;  %6116 = vmatmul.mubr.msk.f32.gmra.mrb[18].mxu1 %vm373_vm0, %v7471_v34 }
 0x174   : > { %5971 = vmatprep.mubr.msk.f32.mxu0 %vm373_vm0, %v7672_v57  ;;  %6118 = vmatprep.mubr.msk.f32.mxu1 %vm373_vm0, %v7479_v20 }
 0x177   : > { %5972 = vmatmul.mubr.msk.f32.gmra.mrb[52].mxu0 %vm373_vm0, %v7678_v27  ;;  %6119 = vmatmul.mubr.msk.f32.gmra.mrb[20].mxu1 %vm373_vm0, %v7484_v23 }
 0x178   : > { %5974 = vmatprep.mubr.msk.f32.mxu0 %vm373_vm0, %v7684_v31  ;;  %6121 = vmatprep.mubr.msk.f32.mxu1 %vm373_vm0, %v7489_v7 }
 0x17b   : > { %5975 = vmatmul.mubr.msk.f32.gmra.mrb[54].mxu0 %vm373_vm0, %v7690_v40  ;;  %6122 = vmatmul.mubr.msk.f32.gmra.mrb[22].mxu1 %vm373_vm0, %v7496_v10 }
 0x17c   : > { %5977 = vmatprep.mubr.msk.f32.mxu0 %vm373_vm0, %v7696_v26  ;;  %6124 = vmatprep.mubr.msk.f32.mxu1 %vm373_vm0, %v7500_v59 }
 0x17f   : > { %5978 = vmatmul.mubr.msk.f32.gmra.mrb[56].mxu0 %vm373_vm0, %v7702_v35  ;;  %6125 = vmatmul.mubr.msk.f32.gmra.mrb[24].mxu1 %vm373_vm0, %v7507_v38 }
 0x180   : > { %5980 = vmatprep.mubr.msk.f32.mxu0 %vm373_vm0, %v7708_v1  ;;  %6127 = vmatprep.mubr.msk.f32.mxu1 %vm373_vm0, %v7512_v45 }
 0x183   : > { %5981 = vmatmul.mubr.msk.f32.gmra.mrb[58].mxu0 %vm373_vm0, %v7714_v56  ;;  %6128 = vmatmul.mubr.msk.f32.gmra.mrb[26].mxu1 %vm373_vm0, %v7519_v51 }
 0x184   : > { %5983 = vmatprep.mubr.msk.f32.mxu0 %vm373_vm0, %v7720_v43  ;;  %6130 = vmatprep.mubr.msk.f32.mxu1 %vm373_vm0, %v7525_v58 }
 0x187   : > { %5984 = vmatmul.mubr.msk.f32.gmra.mrb[60].mxu0 %vm373_vm0, %v7726_v46  ;;  %6131 = vmatmul.mubr.msk.f32.gmra.mrb[28].mxu1 %vm373_vm0, %v7530_v6 }
 0x188   : > { %5986 = vmatprep.mubr.msk.f32.mxu0 %vm373_vm0, %v7732_v18  ;;  %6133 = vmatprep.mubr.msk.f32.mxu1 %vm373_vm0, %v7534_v41 }
 0x18b   : > { %5987 = vmatmul.mubr.msk.f32.gmra.mrb[62].mxu0 %vm373_vm0, %v7738_v62  ;;  %6134 = vmatmul.mubr.msk.f32.gmra.mrb[30].mxu1 %vm373_vm0, %v7538_v17 }
 0x18c   : > { %6136 = vmatprep.mubr.msk.f32.mxu1 %vm373_vm0, %v7744_v55  ;;  %5991 = vmatprep.mubr.msk.f32.mxu0 %vm373_vm0, %v1733_v53  ;;  %v7760_v53 = vld [vmem:[%s8753_s3 + $0x38] sm:$0xff]  ;;  %v8788_v55 = vmov 0.0  }
 0x18f   : > { %5992 = vmatmul.mubr.msk.f32.vlgmr.msra.gmra.mrb[32].mxu0 %vm373_vm0, %v1734_v63  ;;  %6137 = vmatmul.mubr.msk.f32.gmra.mrb[0].mxu1 %vm373_vm0, %v7749_v47  ;;  %v7765_v63 = vld [vmem:[#allocation2 + $0x49] sm:$0xff] }
 0x190   : > { %5994 = vmatprep.mubr.msk.f32.mxu0 %vm373_vm0, %v1735_v30  ;;  %6141 = vmatprep.mubr.msk.f32.mxu1 %vm373_vm0, %v1735_v30  ;;  %v7791_v30 = vld [vmem:[#allocation2 + $0x89] sm:$0xff] }
 0x191   : > { %6040 = vmatpush3.msra.mxu0 %v7206_v37  ;;  %v7773_v37 = vld [vmem:[#allocation2 + $0x51] sm:$0xff]  ;;  %8791 = vst [vmem:[#allocation6_spill] sm:$0xff] %v7791_v30 }
 0x192   : > { %6339 = vmatprep.subr.mxu0 %v8788_v55  ;;  %v7797_v55 = vld [vmem:[#allocation2 + $0x91] sm:$0xff] }
 0x193   : > { %5995 = vmatmul.mubr.msk.f32.gmra.mrb[34].mxu0 %vm373_vm0, %v1736_v33  ;;  %6142 = vmatmul.mubr.msk.f32.vlgmr.msra.gmra.mrb[2].mxu1 %vm373_vm0, %v1736_v33  ;;  %v7779_v33 = vld [vmem:[#allocation2 + $0x69] sm:$0xff]  ;;  %8792 = vst [vmem:[#allocation7_spill] sm:$0xff] %v7797_v55 }
 0x194   : > { %6190 = vmatpush3.msra.mxu1 %v7568_v9  ;;  %5997 = vmatprep.mubr.msk.f32.mxu0 %vm373_vm0, %v7765_v63  ;;  %8789 = vst [vmem:[#allocation4_spill] sm:$0xff] %v7779_v33  ;;  %v7785_v9 = vld [vmem:[#allocation2 + $0x71] sm:$0xff] }
 0x195   : > { %6144 = vmatprep.mubr.msk.f32.mxu1 %vm373_vm0, %v7765_v63  ;;  %6239 = vmatprep.subr.mxu1 %v7760_v53  ;;  %8790 = vst [vmem:[#allocation5_spill] sm:$0xff] %v7785_v9 }
 0x197   : > { %5998 = vmatmul.mubr.msk.f32.gmra.mrb[36].mxu0 %vm373_vm0, %v7773_v37  ;;  %6145 = vmatmul.mubr.msk.f32.gmra.mrb[4].mxu1 %vm373_vm0, %v7773_v37 }
 0x198   : > { %6000 = vmatprep.mubr.msk.f32.mxu0 %vm373_vm0, %v7779_v33  ;;  %6147 = vmatprep.mubr.msk.f32.mxu1 %vm373_vm0, %v7779_v33  ;;  %v7803_v33 = vld [vmem:[#allocation2 + $0xa9] sm:$0xff] }
 0x199   : > { %8793 = vst [vmem:[#allocation8_spill] sm:$0xff] %v7803_v33 }
 0x19b   : > { %6001 = vmatmul.mubr.msk.f32.gmra.mrb[38].mxu0 %vm373_vm0, %v7785_v9  ;;  %6148 = vmatmul.mubr.msk.f32.gmra.mrb[6].mxu1 %vm373_vm0, %v7785_v9  ;;  %v7809_v9 = vld [vmem:[#allocation2 + $0xb1] sm:$0xff] }
 0x19c   : > { %6003 = vmatprep.mubr.msk.f32.mxu0 %vm373_vm0, %v7791_v30  ;;  %6150 = vmatprep.mubr.msk.f32.mxu1 %vm373_vm0, %v7791_v30  ;;  %8794 = vst [vmem:[#allocation9_spill] sm:$0xff] %v7809_v9  ;;  %v7815_v30 = vld [vmem:[#allocation2 + $0xc9] sm:$0xff] }
 0x19d   : > { %8795 = vst [vmem:[#allocation10_spill] sm:$0xff] %v7815_v30 }
 0x19f   : > { %6004 = vmatmul.mubr.msk.f32.gmra.mrb[40].mxu0 %vm373_vm0, %v7797_v55  ;;  %6151 = vmatmul.mubr.msk.f32.gmra.mrb[8].mxu1 %vm373_vm0, %v7797_v55  ;;  %v7821_v55 = vld [vmem:[#allocation2 + $0xd1] sm:$0xff] }
 0x1a0   : > { %6006 = vmatprep.mubr.msk.f32.mxu0 %vm373_vm0, %v7803_v33  ;;  %6153 = vmatprep.mubr.msk.f32.mxu1 %vm373_vm0, %v7803_v33  ;;  %8796 = vst [vmem:[#allocation11_spill] sm:$0xff] %v7821_v55  ;;  %v7827_v33 = vld [vmem:[#allocation2 + $0xe9] sm:$0xff] }
 0x1a1   : > { %8797 = vst [vmem:[#allocation12_spill] sm:$0xff] %v7827_v33 }
 0x1a3   : > { %6007 = vmatmul.mubr.msk.f32.gmra.mrb[42].mxu0 %vm373_vm0, %v7809_v9  ;;  %6154 = vmatmul.mubr.msk.f32.gmra.mrb[10].mxu1 %vm373_vm0, %v7809_v9  ;;  %v7833_v9 = vld [vmem:[#allocation2 + $0xf1] sm:$0xff] }
 0x1a4   : > { %6009 = vmatprep.mubr.msk.f32.mxu0 %vm373_vm0, %v7815_v30  ;;  %6156 = vmatprep.mubr.msk.f32.mxu1 %vm373_vm0, %v7815_v30  ;;  %8798 = vst [vmem:[#allocation13_spill] sm:$0xff] %v7833_v9  ;;  %v7839_v30 = vld [vmem:[#allocation2 + $0x109] sm:$0xff] }
 0x1a5   : > { %8799 = vst [vmem:[#allocation14_spill] sm:$0xff] %v7839_v30 }
 0x1a7   : > { %6010 = vmatmul.mubr.msk.f32.gmra.mrb[44].mxu0 %vm373_vm0, %v7821_v55  ;;  %6157 = vmatmul.mubr.msk.f32.gmra.mrb[12].mxu1 %vm373_vm0, %v7821_v55  ;;  %v7845_v55 = vld [vmem:[#allocation2 + $0x111] sm:$0xff] }
 0x1a8   : > { %6012 = vmatprep.mubr.msk.f32.mxu0 %vm373_vm0, %v7827_v33  ;;  %6159 = vmatprep.mubr.msk.f32.mxu1 %vm373_vm0, %v7827_v33  ;;  %8800 = vst [vmem:[#allocation15_spill] sm:$0xff] %v7845_v55  ;;  %v7851_v33 = vld [vmem:[#allocation2 + $0x129] sm:$0xff] }
 0x1a9   : > { %8801 = vst [vmem:[#allocation16_spill] sm:$0xff] %v7851_v33 }
 0x1ab   : > { %6013 = vmatmul.mubr.msk.f32.gmra.mrb[46].mxu0 %vm373_vm0, %v7833_v9  ;;  %6160 = vmatmul.mubr.msk.f32.gmra.mrb[14].mxu1 %vm373_vm0, %v7833_v9  ;;  %v7857_v9 = vld [vmem:[#allocation2 + $0x131] sm:$0xff] }
 0x1ac   : > { %6015 = vmatprep.mubr.msk.f32.mxu0 %vm373_vm0, %v7839_v30  ;;  %6162 = vmatprep.mubr.msk.f32.mxu1 %vm373_vm0, %v7839_v30  ;;  %8802 = vst [vmem:[#allocation17_spill] sm:$0xff] %v7857_v9  ;;  %v7863_v30 = vld [vmem:[#allocation2 + $0x149] sm:$0xff] }
 0x1ad   : > { %8803 = vst [vmem:[#allocation18_spill] sm:$0xff] %v7863_v30 }
 0x1af   : > { %6016 = vmatmul.mubr.msk.f32.gmra.mrb[48].mxu0 %vm373_vm0, %v7845_v55  ;;  %6163 = vmatmul.mubr.msk.f32.gmra.mrb[16].mxu1 %vm373_vm0, %v7845_v55  ;;  %v7869_v55 = vld [vmem:[#allocation2 + $0x151] sm:$0xff] }
 0x1b0   : > { %6018 = vmatprep.mubr.msk.f32.mxu0 %vm373_vm0, %v7851_v33  ;;  %6165 = vmatprep.mubr.msk.f32.mxu1 %vm373_vm0, %v7851_v33  ;;  %8804 = vst [vmem:[#allocation19_spill] sm:$0xff] %v7869_v55  ;;  %v7875_v33 = vld [vmem:[#allocation2 + $0x169] sm:$0xff] }
 0x1b1   : > { %8805 = vst [vmem:[#allocation20_spill] sm:$0xff] %v7875_v33 }
 0x1b3   : > { %6019 = vmatmul.mubr.msk.f32.gmra.mrb[50].mxu0 %vm373_vm0, %v7857_v9  ;;  %6166 = vmatmul.mubr.msk.f32.gmra.mrb[18].mxu1 %vm373_vm0, %v7857_v9  ;;  %v7881_v9 = vld [vmem:[#allocation2 + $0x171] sm:$0xff] }
 0x1b4   : > { %6021 = vmatprep.mubr.msk.f32.mxu0 %vm373_vm0, %v7863_v30  ;;  %6168 = vmatprep.mubr.msk.f32.mxu1 %vm373_vm0, %v7863_v30  ;;  %8806 = vst [vmem:[#allocation21_spill] sm:$0xff] %v7881_v9  ;;  %v7887_v30 = vld [vmem:[#allocation2 + $0x189] sm:$0xff] }
 0x1b5   : > { %8807 = vst [vmem:[#allocation22_spill] sm:$0xff] %v7887_v30 }
 0x1b7   : > { %6022 = vmatmul.mubr.msk.f32.gmra.mrb[52].mxu0 %vm373_vm0, %v7869_v55  ;;  %6169 = vmatmul.mubr.msk.f32.gmra.mrb[20].mxu1 %vm373_vm0, %v7869_v55  ;;  %v7893_v55 = vld [vmem:[#allocation2 + $0x191] sm:$0xff] }
 0x1b8   : > { %6024 = vmatprep.mubr.msk.f32.mxu0 %vm373_vm0, %v7875_v33  ;;  %6171 = vmatprep.mubr.msk.f32.mxu1 %vm373_vm0, %v7875_v33  ;;  %8808 = vst [vmem:[#allocation23_spill] sm:$0xff] %v7893_v55  ;;  %v7899_v33 = vld [vmem:[#allocation2 + $0x1a9] sm:$0xff] }
 0x1b9   : > { %8809 = vst [vmem:[#allocation24_spill] sm:$0xff] %v7899_v33 }
 0x1bb   : > { %6025 = vmatmul.mubr.msk.f32.gmra.mrb[54].mxu0 %vm373_vm0, %v7881_v9  ;;  %6172 = vmatmul.mubr.msk.f32.gmra.mrb[22].mxu1 %vm373_vm0, %v7881_v9  ;;  %v7905_v9 = vld [vmem:[#allocation2 + $0x1b1] sm:$0xff] }
 0x1bc   : > { %6027 = vmatprep.mubr.msk.f32.mxu0 %vm373_vm0, %v7887_v30  ;;  %6174 = vmatprep.mubr.msk.f32.mxu1 %vm373_vm0, %v7887_v30  ;;  %8810 = vst [vmem:[#allocation25_spill] sm:$0xff] %v7905_v9  ;;  %v7911_v30 = vld [vmem:[#allocation2 + $0x1c9] sm:$0xff] }
 0x1bd   : > { %8811 = vst [vmem:[#allocation26_spill] sm:$0xff] %v7911_v30 }
 0x1bf   : > { %6028 = vmatmul.mubr.msk.f32.gmra.mrb[56].mxu0 %vm373_vm0, %v7893_v55  ;;  %6175 = vmatmul.mubr.msk.f32.gmra.mrb[24].mxu1 %vm373_vm0, %v7893_v55  ;;  %v7917_v55 = vld [vmem:[#allocation2 + $0x1d1] sm:$0xff] }
 0x1c0   : > { %6030 = vmatprep.mubr.msk.f32.mxu0 %vm373_vm0, %v7899_v33  ;;  %6177 = vmatprep.mubr.msk.f32.mxu1 %vm373_vm0, %v7899_v33  ;;  %8812 = vst [vmem:[#allocation27_spill] sm:$0xff] %v7917_v55  ;;  %v7923_v33 = vld [vmem:[#allocation2 + $0x1e9] sm:$0xff] }
 0x1c3   : > { %6031 = vmatmul.mubr.msk.f32.gmra.mrb[58].mxu0 %vm373_vm0, %v7905_v9  ;;  %6178 = vmatmul.mubr.msk.f32.gmra.mrb[26].mxu1 %vm373_vm0, %v7905_v9  ;;  %v7929_v9 = vld [vmem:[#allocation2 + $0x1f1] sm:$0xff] }
 0x1c4   : > { %6033 = vmatprep.mubr.msk.f32.mxu0 %vm373_vm0, %v7911_v30  ;;  %6180 = vmatprep.mubr.msk.f32.mxu1 %vm373_vm0, %v7911_v30  ;;  %v7935_v30 = vld [vmem:[#allocation2 + $0x209] sm:$0xff] }
 0x1c7   : > { %6034 = vmatmul.mubr.msk.f32.gmra.mrb[60].mxu0 %vm373_vm0, %v7917_v55  ;;  %6181 = vmatmul.mubr.msk.f32.gmra.mrb[28].mxu1 %vm373_vm0, %v7917_v55  ;;  %v7941_v55 = vld [vmem:[#allocation2 + $0x211] sm:$0xff] }
 0x1c8   : > { %6036 = vmatprep.mubr.msk.f32.mxu0 %vm373_vm0, %v7923_v33  ;;  %6183 = vmatprep.mubr.msk.f32.mxu1 %vm373_vm0, %v7923_v33 }
 0x1cb   : > { %6037 = vmatmul.mubr.msk.f32.gmra.mrb[62].mxu0 %vm373_vm0, %v7929_v9  ;;  %6184 = vmatmul.mubr.msk.f32.gmra.mrb[30].mxu1 %vm373_vm0, %v7929_v9 }
 0x1cc   : > { %6041 = vmatprep.mubr.msk.f32.mxu0 %vm373_vm0, %v7555_v48  ;;  %6186 = vmatprep.mubr.msk.f32.mxu1 %vm373_vm0, %v7935_v30  ;;  %v7954_v48 = vld [vmem:[%s8753_s3 + $0x40] sm:$0xff] }
 0x1cf   : > { %6042 = vmatmul.mubr.msk.f32.vlgmr.msra.gmra.mrb[32].mxu0 %vm373_vm0, %v7562_v5  ;;  %6187 = vmatmul.mubr.msk.f32.gmra.mrb[0].mxu1 %vm373_vm0, %v7941_v55  ;;  %v3312_v5 = vld [vmem:[#allocation2 + $0x227] sm:$0xff] }
 0x1d0   : > { %6044 = vmatprep.mubr.msk.f32.mxu0 %vm373_vm0, %v7574_v39  ;;  %6191 = vmatprep.mubr.msk.f32.mxu1 %vm373_vm0, %v7574_v39  ;;  %v3313_v39 = vld [vmem:[#allocation2 + $0x22f] sm:$0xff] }
 0x1d3   : > { %6045 = vmatmul.mubr.msk.f32.gmra.mrb[34].mxu0 %vm373_vm0, %v7581_v13  ;;  %6192 = vmatmul.mubr.msk.f32.vlgmr.msra.gmra.mrb[2].mxu1 %vm373_vm0, %v7581_v13  ;;  %v3669_v13 = vld [vmem:[#allocation2 + $0x48] sm:$0xff] }
 0x1d4   : > { %6240 = vmatpush3.msra.mxu1 %v7760_v53  ;;  %6047 = vmatprep.mubr.msk.f32.mxu0 %vm373_vm0, %v7588_v21 }
 0x1d5   : > { %6194 = vmatprep.mubr.msk.f32.mxu1 %vm373_vm0, %v7588_v21  ;;  %6289 = vmatprep.subr.mxu1 %v7954_v48  ;;  %v3670_v21 = vld [vmem:[#allocation2 + $0x50] sm:$0xff] }
 0x1d7   : > { %6048 = vmatmul.mubr.msk.f32.gmra.mrb[36].mxu0 %vm373_vm0, %v7594_v24  ;;  %6195 = vmatmul.mubr.msk.f32.gmra.mrb[4].mxu1 %vm373_vm0, %v7594_v24  ;;  %v3671_v24 = vld [vmem:[#allocation2 + $0x68] sm:$0xff] }
 0x1d8   : > { %6050 = vmatprep.mubr.msk.f32.mxu0 %vm373_vm0, %v7600_v36  ;;  %6197 = vmatprep.mubr.msk.f32.mxu1 %vm373_vm0, %v7600_v36  ;;  %v8836_v36 = vld [vmem:[#allocation26_spill] sm:$0xff] }
 0x1db   : > { %6051 = vmatmul.mubr.msk.f32.gmra.mrb[38].mxu0 %vm373_vm0, %v7606_v49  ;;  %6198 = vmatmul.mubr.msk.f32.gmra.mrb[6].mxu1 %vm373_vm0, %v7606_v49  ;;  %v8837_v49 = vld [vmem:[#allocation27_spill] sm:$0xff] }
 0x1dc   : > { %6053 = vmatprep.mubr.msk.f32.mxu0 %vm373_vm0, %v7612_v61  ;;  %6200 = vmatprep.mubr.msk.f32.mxu1 %vm373_vm0, %v7612_v61  ;;  %v4086_v61 = vld [vmem:[#allocation2 + $0x229] sm:$0xff] }
 0x1df   : > { %6054 = vmatmul.mubr.msk.f32.gmra.mrb[40].mxu0 %vm373_vm0, %v7618_v4  ;;  %6201 = vmatmul.mubr.msk.f32.gmra.mrb[8].mxu1 %vm373_vm0, %v7618_v4  ;;  %v4087_v4 = vld [vmem:[#allocation2 + $0x231] sm:$0xff] }
 0x1e0   : > { %6056 = vmatprep.mubr.msk.f32.mxu0 %vm373_vm0, %v7624_v8  ;;  %6203 = vmatprep.mubr.msk.f32.mxu1 %vm373_vm0, %v7624_v8 }
 0x1e3   : > { %6057 = vmatmul.mubr.msk.f32.gmra.mrb[42].mxu0 %vm373_vm0, %v7630_v50  ;;  %6204 = vmatmul.mubr.msk.f32.gmra.mrb[10].mxu1 %vm373_vm0, %v7630_v50 }
 0x1e4   : > { %6059 = vmatprep.mubr.msk.f32.mxu0 %vm373_vm0, %v7636_v16  ;;  %6206 = vmatprep.mubr.msk.f32.mxu1 %vm373_vm0, %v7636_v16 }
 0x1e7   : > { %6060 = vmatmul.mubr.msk.f32.gmra.mrb[44].mxu0 %vm373_vm0, %v7642_v14  ;;  %6207 = vmatmul.mubr.msk.f32.gmra.mrb[12].mxu1 %vm373_vm0, %v7642_v14 }
 0x1e8   : > { %6062 = vmatprep.mubr.msk.f32.mxu0 %vm373_vm0, %v7648_v42  ;;  %6209 = vmatprep.mubr.msk.f32.mxu1 %vm373_vm0, %v7648_v42 }
 0x1eb   : > { %6063 = vmatmul.mubr.msk.f32.gmra.mrb[46].mxu0 %vm373_vm0, %v7654_v15  ;;  %6210 = vmatmul.mubr.msk.f32.gmra.mrb[14].mxu1 %vm373_vm0, %v7654_v15 }
 0x1ec   : > { %6065 = vmatprep.mubr.msk.f32.mxu0 %vm373_vm0, %v7660_v19  ;;  %6212 = vmatprep.mubr.msk.f32.mxu1 %vm373_vm0, %v7660_v19 }
 0x1ef   : > { %6066 = vmatmul.mubr.msk.f32.gmra.mrb[48].mxu0 %vm373_vm0, %v7666_v22  ;;  %6213 = vmatmul.mubr.msk.f32.gmra.mrb[16].mxu1 %vm373_vm0, %v7666_v22 }
 0x1f0   : > { %6068 = vmatprep.mubr.msk.f32.mxu0 %vm373_vm0, %v7672_v57  ;;  %6215 = vmatprep.mubr.msk.f32.mxu1 %vm373_vm0, %v7672_v57 }
 0x1f3   : > { %6069 = vmatmul.mubr.msk.f32.gmra.mrb[50].mxu0 %vm373_vm0, %v7678_v27  ;;  %6216 = vmatmul.mubr.msk.f32.gmra.mrb[18].mxu1 %vm373_vm0, %v7678_v27 }
 0x1f4   : > { %6071 = vmatprep.mubr.msk.f32.mxu0 %vm373_vm0, %v7684_v31  ;;  %6218 = vmatprep.mubr.msk.f32.mxu1 %vm373_vm0, %v7684_v31 }
 0x1f7   : > { %6072 = vmatmul.mubr.msk.f32.gmra.mrb[52].mxu0 %vm373_vm0, %v7690_v40  ;;  %6219 = vmatmul.mubr.msk.f32.gmra.mrb[20].mxu1 %vm373_vm0, %v7690_v40 }
 0x1f8   : > { %6074 = vmatprep.mubr.msk.f32.mxu0 %vm373_vm0, %v7696_v26  ;;  %6221 = vmatprep.mubr.msk.f32.mxu1 %vm373_vm0, %v7696_v26 }
 0x1fb   : > { %6075 = vmatmul.mubr.msk.f32.gmra.mrb[54].mxu0 %vm373_vm0, %v7702_v35  ;;  %6222 = vmatmul.mubr.msk.f32.gmra.mrb[22].mxu1 %vm373_vm0, %v7702_v35 }
 0x1fc   : > { %6077 = vmatprep.mubr.msk.f32.mxu0 %vm373_vm0, %v7708_v1  ;;  %6224 = vmatprep.mubr.msk.f32.mxu1 %vm373_vm0, %v7708_v1 }
 0x1ff   : > { %6078 = vmatmul.mubr.msk.f32.gmra.mrb[56].mxu0 %vm373_vm0, %v7714_v56  ;;  %6225 = vmatmul.mubr.msk.f32.gmra.mrb[24].mxu1 %vm373_vm0, %v7714_v56 }
 0x200   : > { %6080 = vmatprep.mubr.msk.f32.mxu0 %vm373_vm0, %v7720_v43  ;;  %6227 = vmatprep.mubr.msk.f32.mxu1 %vm373_vm0, %v7720_v43 }
 0x203   : > { %6081 = vmatmul.mubr.msk.f32.gmra.mrb[58].mxu0 %vm373_vm0, %v7726_v46  ;;  %6228 = vmatmul.mubr.msk.f32.gmra.mrb[26].mxu1 %vm373_vm0, %v7726_v46 }
 0x204   : > { %6083 = vmatprep.mubr.msk.f32.mxu0 %vm373_vm0, %v7732_v18  ;;  %6230 = vmatprep.mubr.msk.f32.mxu1 %vm373_vm0, %v7732_v18 }
 0x207   : > { %6084 = vmatmul.mubr.msk.f32.gmra.mrb[60].mxu0 %vm373_vm0, %v7738_v62  ;;  %6231 = vmatmul.mubr.msk.f32.gmra.mrb[28].mxu1 %vm373_vm0, %v7738_v62 }
 0x208   : > { %6233 = vmatprep.mubr.msk.f32.mxu1 %vm373_vm0, %v7543_v0  ;;  %v3672_v0 = vld [vmem:[#allocation2 + $0x70] sm:$0xff] }
 0x20b   : > { %6234 = vmatmul.mubr.msk.f32.gmra.mrb[30].mxu1 %vm373_vm0, %v7545_v2  ;;  %v8835_v2 = vld [vmem:[#allocation25_spill] sm:$0xff] }
 0x20c   : > { %6236 = vmatprep.mubr.msk.f32.mxu1 %vm373_vm0, %v3312_v5 }
 0x20f   : > { %6237 = vmatmul.mubr.msk.f32.gmra.mrb[0].mxu1 %vm373_vm0, %v3313_v39 }
 0x210   : > { %6241 = vmatprep.mubr.msk.f32.mxu1 %vm373_vm0, %v3669_v13 }
 0x213   : > { %6242 = vmatmul.mubr.msk.f32.vlgmr.msra.gmra.mrb[2].mxu1 %vm373_vm0, %v3670_v21  ;;  %v4777_v21 = vld [vmem:[%s8755_s5] sm:$0xff] }
 0x214   : > { %6290 = vmatpush3.msra.mxu1 %v7954_v48  ;;  %6244 = vmatprep.mubr.msk.f32.mxu1 %vm373_vm0, %v3671_v24  ;;  %v8838_v24 = vmov 0.0  }
 0x215   : > { %6340 = vmatpush3.msra.mxu0 %v4777_v21  ;;  %6341 = vmatprep.mubr.msk.f32.mxu0 %vm6918_vm1, %v8838_v24 }
 0x216   : > { %6344 = vmatprep.subr.mxu0 %v8838_v24 }
 0x217   : > { %6245 = vmatmul.mubr.msk.f32.gmra.mrb[4].mxu1 %vm373_vm0, %v3672_v0 }
 0x218   : > { %6247 = vmatprep.mubr.msk.f32.mxu1 %vm373_vm0, %v7385_v25  ;;  %v8813_v25 = vld [vmem:[#allocation3_spill] sm:$0xff] }
 0x21b   : > { %6248 = vmatmul.mubr.msk.f32.gmra.mrb[6].mxu1 %vm373_vm0, %v7393_v32  ;;  %v3699_v32 = vld [vmem:[#allocation2 + $0x228] sm:$0xff] }
 0x21c   : > { %6250 = vmatprep.mubr.msk.f32.mxu1 %vm373_vm0, %v7405_v28  ;;  %v3700_v28 = vld [vmem:[#allocation2 + $0x230] sm:$0xff] }
 0x21f   : > { %6251 = vmatmul.mubr.msk.f32.gmra.mrb[8].mxu1 %vm373_vm0, %v7412_v44  ;;  %v8814_v44 = vld [vmem:[#allocation4_spill] sm:$0xff] }
 0x220   : > { %6253 = vmatprep.mubr.msk.f32.mxu1 %vm373_vm0, %v7424_v12  ;;  %v8815_v12 = vld [vmem:[#allocation5_spill] sm:$0xff] }
 0x223   : > { %6254 = vmatmul.mubr.msk.f32.gmra.mrb[10].mxu1 %vm373_vm0, %v7432_v54  ;;  %v8816_v54 = vld [vmem:[#allocation6_spill] sm:$0xff] }
 0x224   : > { %6256 = vmatprep.mubr.msk.f32.mxu1 %vm373_vm0, %v7439_v29  ;;  %v8817_v29 = vld [vmem:[#allocation7_spill] sm:$0xff] }
 0x227   : > { %6257 = vmatmul.mubr.msk.f32.gmra.mrb[12].mxu1 %vm373_vm0, %v7446_v60  ;;  %v8818_v60 = vld [vmem:[#allocation8_spill] sm:$0xff] }
 0x228   : > { %6259 = vmatprep.mubr.msk.f32.mxu1 %vm373_vm0, %v7453_v52  ;;  %v8819_v52 = vld [vmem:[#allocation9_spill] sm:$0xff] }
 0x22b   : > { %6260 = vmatmul.mubr.msk.f32.gmra.mrb[14].mxu1 %vm373_vm0, %v7458_v11  ;;  %v8820_v11 = vld [vmem:[#allocation10_spill] sm:$0xff] }
 0x22c   : > { %6262 = vmatprep.mubr.msk.f32.mxu1 %vm373_vm0, %v7466_v3  ;;  %v8821_v3 = vld [vmem:[#allocation11_spill] sm:$0xff] }
 0x22f   : > { %6263 = vmatmul.mubr.msk.f32.gmra.mrb[16].mxu1 %vm373_vm0, %v7471_v34  ;;  %v8822_v34 = vld [vmem:[#allocation12_spill] sm:$0xff] }
 0x230   : > { %6265 = vmatprep.mubr.msk.f32.mxu1 %vm373_vm0, %v7479_v20  ;;  %v8823_v20 = vld [vmem:[#allocation13_spill] sm:$0xff] }
 0x233   : > { %6266 = vmatmul.mubr.msk.f32.gmra.mrb[18].mxu1 %vm373_vm0, %v7484_v23  ;;  %v8824_v23 = vld [vmem:[#allocation14_spill] sm:$0xff] }
 0x234   : > { %6268 = vmatprep.mubr.msk.f32.mxu1 %vm373_vm0, %v7489_v7  ;;  %v8825_v7 = vld [vmem:[#allocation15_spill] sm:$0xff] }
 0x237   : > { %6269 = vmatmul.mubr.msk.f32.gmra.mrb[20].mxu1 %vm373_vm0, %v7496_v10  ;;  %v8826_v10 = vld [vmem:[#allocation16_spill] sm:$0xff] }
 0x238   : > { %6271 = vmatprep.mubr.msk.f32.mxu1 %vm373_vm0, %v7500_v59  ;;  %v8827_v59 = vld [vmem:[#allocation17_spill] sm:$0xff] }
 0x23b   : > { %6272 = vmatmul.mubr.msk.f32.gmra.mrb[22].mxu1 %vm373_vm0, %v7507_v38  ;;  %v8828_v38 = vld [vmem:[#allocation18_spill] sm:$0xff] }
 0x23c   : > { %6274 = vmatprep.mubr.msk.f32.mxu1 %vm373_vm0, %v7512_v45  ;;  %v8829_v45 = vld [vmem:[#allocation19_spill] sm:$0xff] }
 0x23f   : > { %6275 = vmatmul.mubr.msk.f32.gmra.mrb[24].mxu1 %vm373_vm0, %v7519_v51  ;;  %v8830_v51 = vld [vmem:[#allocation20_spill] sm:$0xff] }
 0x240   : > { %6277 = vmatprep.mubr.msk.f32.mxu1 %vm373_vm0, %v7525_v58  ;;  %v8831_v58 = vld [vmem:[#allocation21_spill] sm:$0xff] }
 0x243   : > { %6278 = vmatmul.mubr.msk.f32.gmra.mrb[26].mxu1 %vm373_vm0, %v7530_v6  ;;  %v8832_v6 = vld [vmem:[#allocation22_spill] sm:$0xff] }
 0x244   : > { %6280 = vmatprep.mubr.msk.f32.mxu1 %vm373_vm0, %v7534_v41  ;;  %v8833_v41 = vld [vmem:[#allocation23_spill] sm:$0xff] }
 0x247   : > { %6281 = vmatmul.mubr.msk.f32.gmra.mrb[28].mxu1 %vm373_vm0, %v7538_v17  ;;  %v8834_v17 = vld [vmem:[#allocation24_spill] sm:$0xff] }
 0x248   : > { %6283 = vmatprep.mubr.msk.f32.mxu1 %vm373_vm0, %v8813_v25  ;;  %v8250_v25 = vld [vmem:[%s8754_s4] ss:$0 sm:$0xff] }
 0x24b   : > { %6284 = vmatmul.mubr.msk.f32.gmra.mrb[30].mxu1 %vm373_vm0, %v7749_v47 }
 0x24c   : > { %6286 = vmatprep.mubr.msk.f32.mxu1 %vm373_vm0, %v3699_v32 }
 0x24f   : > { %6287 = vmatmul.mubr.msk.f32.gmra.mrb[0].mxu1 %vm373_vm0, %v3700_v28 }
 0x250   : > { %6291 = vmatprep.mubr.msk.f32.mxu1 %vm373_vm0, %v7765_v63 }
 0x253   : > { %6292 = vmatmul.mubr.msk.f32.vlgmr.msra.gmra.mrb[2].mxu1 %vm373_vm0, %v7773_v37 }
 0x254   : > { %6294 = vmatprep.mubr.msk.f32.mxu1 %vm373_vm0, %v8814_v44 }
 0x257   : > { %6295 = vmatmul.mubr.msk.f32.gmra.mrb[4].mxu1 %vm373_vm0, %v8815_v12 }
 0x258   : > { %6297 = vmatprep.mubr.msk.f32.mxu1 %vm373_vm0, %v8816_v54 }
 0x25b   : > { %6298 = vmatmul.mubr.msk.f32.gmra.mrb[6].mxu1 %vm373_vm0, %v8817_v29 }
 0x25c   : > { %6300 = vmatprep.mubr.msk.f32.mxu1 %vm373_vm0, %v8818_v60 }
 0x25f   : > { %6301 = vmatmul.mubr.msk.f32.gmra.mrb[8].mxu1 %vm373_vm0, %v8819_v52 }
 0x260   : > { %6303 = vmatprep.mubr.msk.f32.mxu1 %vm373_vm0, %v8820_v11 }
 0x263   : > { %6304 = vmatmul.mubr.msk.f32.gmra.mrb[10].mxu1 %vm373_vm0, %v8821_v3 }
 0x264   : > { %6306 = vmatprep.mubr.msk.f32.mxu1 %vm373_vm0, %v8822_v34 }
 0x267   : > { %6307 = vmatmul.mubr.msk.f32.gmra.mrb[12].mxu1 %vm373_vm0, %v8823_v20 }
 0x268   : > { %6309 = vmatprep.mubr.msk.f32.mxu1 %vm373_vm0, %v8824_v23 }
 0x26b   : > { %6310 = vmatmul.mubr.msk.f32.gmra.mrb[14].mxu1 %vm373_vm0, %v8825_v7 }
 0x26c   : > { %6312 = vmatprep.mubr.msk.f32.mxu1 %vm373_vm0, %v8826_v10 }
 0x26f   : > { %6313 = vmatmul.mubr.msk.f32.gmra.mrb[16].mxu1 %vm373_vm0, %v8827_v59 }
 0x270   : > { %6315 = vmatprep.mubr.msk.f32.mxu1 %vm373_vm0, %v8828_v38 }
 0x273   : > { %6316 = vmatmul.mubr.msk.f32.gmra.mrb[18].mxu1 %vm373_vm0, %v8829_v45 }
 0x274   : > { %6318 = vmatprep.mubr.msk.f32.mxu1 %vm373_vm0, %v8830_v51 }
 0x277   : > { %6319 = vmatmul.mubr.msk.f32.gmra.mrb[20].mxu1 %vm373_vm0, %v8831_v58 }
 0x278   : > { %6321 = vmatprep.mubr.msk.f32.mxu1 %vm373_vm0, %v8832_v6 }
 0x27b   : > { %6322 = vmatmul.mubr.msk.f32.gmra.mrb[22].mxu1 %vm373_vm0, %v8833_v41 }
 0x27c   : > { %6324 = vmatprep.mubr.msk.f32.mxu1 %vm373_vm0, %v8834_v17 }
 0x27f   : > { %6325 = vmatmul.mubr.msk.f32.gmra.mrb[24].mxu1 %vm373_vm0, %v8835_v2 }
 0x280   : > { %6327 = vmatprep.mubr.msk.f32.mxu1 %vm373_vm0, %v8836_v36 }
 0x283   : > { %6328 = vmatmul.mubr.msk.f32.gmra.mrb[26].mxu1 %vm373_vm0, %v8837_v49 }
 0x284   : > { %6330 = vmatprep.mubr.msk.f32.mxu1 %vm373_vm0, %v7923_v33 }
 0x287   : > { %6331 = vmatmul.mubr.msk.f32.gmra.mrb[28].mxu1 %vm373_vm0, %v7929_v9 }
 0x288   : > { %6333 = vmatprep.mubr.msk.f32.mxu1 %vm373_vm0, %v7935_v30 }
 0x28b   : > { %6334 = vmatmul.mubr.msk.f32.gmra.mrb[30].mxu1 %vm373_vm0, %v7941_v55 }
 0x28c   : > { %6336 = vmatprep.mubr.msk.f32.mxu1 %vm373_vm0, %v4086_v61 }
 0x28f   : > { %6337 = vmatmul.mubr.msk.f32.gmra.mrb[0].mxu1 %vm373_vm0, %v4087_v4 }
 0x29e   : > { %v8193_v8 = vpop.f32.mrb[62].mxu0 }
 0x29f   : > { %v8195_v50 = vpop.f32.mrb[63].mxu0 }
 0x2a2   : > { %v6043_v16 = vpop.f32.mrb[32].mxu0 }
 0x2a3   : > { %v2316_v14 = vpop.f32.mrb[33].mxu0 }
 0x2a6   : > { %v6046_v42 = vpop.f32.mrb[34].mxu0 }
 0x2a7   : > { %v2326_v15 = vpop.f32.mrb[35].mxu0 }
 0x2aa   : > { %v6049_v19 = vpop.f32.mrb[36].mxu0 }
 0x2ab   : > { %v2336_v22 = vpop.f32.mrb[37].mxu0 }
 0x2ae   : > { %v6052_v57 = vpop.f32.mrb[38].mxu0 }
 0x2af   : > { %v2346_v27 = vpop.f32.mrb[39].mxu0 }
 0x2b2   : > { %v8197_v31 = vpop.f32.mrb[40].mxu0 }
 0x2b3   : > { %v8199_v40 = vpop.f32.mrb[41].mxu0 }
 0x2b6   : > { %v8201_v26 = vpop.f32.mrb[42].mxu0 }
 0x2b7   : > { %v8203_v35 = vpop.f32.mrb[43].mxu0 }
 0x2ba   : > { %v8205_v1 = vpop.f32.mrb[44].mxu0 }
 0x2bb   : > { %v8207_v56 = vpop.f32.mrb[45].mxu0 }
 0x2be   : > { %v8209_v43 = vpop.f32.mrb[46].mxu0 }
 0x2bf   : > { %v8211_v46 = vpop.f32.mrb[47].mxu0 }
 0x2c2   : > { %v8213_v18 = vpop.f32.mrb[48].mxu0 }
 0x2c3   : > { %v8215_v62 = vpop.f32.mrb[49].mxu0 }
 0x2c6   : > { %v8217_v55 = vpop.f32.mrb[50].mxu0 }
 0x2c7   : > { %v8219_v47 = vpop.f32.mrb[51].mxu0 }
 0x2ca   : > { %v8221_v53 = vpop.f32.mrb[52].mxu0 }
 0x2cb   : > { %v8223_v63 = vpop.f32.mrb[53].mxu0 }
 0x2ce   : > { %v8225_v37 = vpop.f32.mrb[54].mxu0 }
 0x2cf   : > { %v8227_v33 = vpop.f32.mrb[55].mxu0 }
 0x2d2   : > { %v8229_v9 = vpop.f32.mrb[56].mxu0 }
 0x2d3   : > { %v8231_v30 = vpop.f32.mrb[57].mxu0 }
 0x2d6   : > { %v8233_v48 = vpop.f32.mrb[58].mxu0 }
 0x2d7   : > { %v8235_v5 = vpop.f32.mrb[59].mxu0 }
 0x2da   : > { %v8237_v39 = vpop.f32.mrb[60].mxu0 }
 0x2db   : > { %v8239_v13 = vpop.f32.mrb[61].mxu0 }
 0x326   : > { %v6293_v0 = vpop.f32.mrb[2].mxu1 }
 0x327   : > { %v6351_v32 = vadd.f32 %v6293_v0, %v6043_v16  ;;  %v4252_v28 = vpop.f32.mrb[3].mxu1 }
 0x328   : > { %v6352_v44 = vadd.f32 %v4252_v28, %v2316_v14 }
 0x329   : > { %v8253_v12 = vadd.f32 %v6351_v32, %v8250_v25 }
 0x32a   : > { %v8256_v54 = vadd.f32 %v6352_v44, %v8250_v25  ;;  %v6296_v29 = vpop.f32.mrb[4].mxu1 }
 0x32b   : > { %v5466_v60 = vmul.f32 -1.442695, %v8253_v12  ;;  %v6353_v52 = vadd.f32 %v6296_v29, %v6046_v42  ;;  %v4262_v11 = vpop.f32.mrb[5].mxu1 }
 0x32c   : > { %v5465_v3 = vmul.f32 -1.442695, %v8256_v54  ;;  %v6354_v34 = vadd.f32 %v4262_v11, %v2326_v15 }
 0x32d   : > { %6745 = vpow2.f32 %v5466_v60  ;;  %v8261_v20 = vadd.f32 %v6353_v52, %v8250_v25 }
 0x32e   : > { %6747 = vpow2.f32 %v5465_v3  ;;  %v8264_v23 = vadd.f32 %v6354_v34, %v8250_v25  ;;  %v6299_v7 = vpop.f32.mrb[6].mxu1 }
 0x32f   : > { %v5468_v10 = vmul.f32 -1.442695, %v8261_v20  ;;  %v6355_v59 = vadd.f32 %v6299_v7, %v6049_v19  ;;  %v4272_v38 = vpop.f32.mrb[7].mxu1 }
 0x330   : > { %v5467_v45 = vmul.f32 -1.442695, %v8264_v23  ;;  %v6356_v51 = vadd.f32 %v4272_v38, %v2336_v22 }
 0x331   : > { %6749 = vpow2.f32 %v5468_v10  ;;  %v8269_v58 = vadd.f32 %v6355_v59, %v8250_v25 }
 0x332   : > { %6751 = vpow2.f32 %v5467_v45  ;;  %v8272_v6 = vadd.f32 %v6356_v51, %v8250_v25  ;;  %v6302_v41 = vpop.f32.mrb[8].mxu1 }
 0x333   : > { %v5470_v17 = vmul.f32 -1.442695, %v8269_v58  ;;  %v6357_v2 = vadd.f32 %v6302_v41, %v6052_v57  ;;  %v4282_v36 = vpop.f32.mrb[9].mxu1 }
 0x334   : > { %v5469_v49 = vmul.f32 -1.442695, %v8272_v6  ;;  %v6358_v61 = vadd.f32 %v4282_v36, %v2346_v27 }
 0x335   : > { %6753 = vpow2.f32 %v5470_v17  ;;  %v8277_v4 = vadd.f32 %v6357_v2, %v8250_v25 }
 0x336   : > { %6755 = vpow2.f32 %v5469_v49  ;;  %v8280_v16 = vadd.f32 %v6358_v61, %v8250_v25  ;;  %v6305_v14 = vpop.f32.mrb[10].mxu1 }
 0x337   : > { %v6746_v42 = vpop.eup %6745  ;;  %v5472_v15 = vmul.f32 -1.442695, %v8277_v4  ;;  %v6359_v19 = vadd.f32 %v6305_v14, %v8197_v31  ;;  %v4292_v22 = vpop.f32.mrb[11].mxu1 }
 0x338   : > { %v6748_v57 = vpop.eup %6747  ;;  %v4579_v21 = vadd.f32 1.0, %v6746_v42  ;;  %v5471_v0 = vmul.f32 -1.442695, %v8280_v16  ;;  %v6360_v27 = vadd.f32 %v4292_v22, %v8199_v40 }
 0x339   : > { %v4578_v32 = vadd.f32 1.0, %v6748_v57  ;;  %6757 = vpow2.f32 %v5472_v15  ;;  %v8287_v28 = vadd.f32 %v6359_v19, %v8250_v25 }
 0x33a   : > { %6759 = vrcp.f32 %v4579_v21  ;;  %v8290_v44 = vadd.f32 %v6360_v27, %v8250_v25  ;;  %v6308_v29 = vpop.f32.mrb[12].mxu1 }
 0x33b   : > { %v6750_v60 = vpop.eup %6749  ;;  %6761 = vrcp.f32 %v4578_v32  ;;  %v5474_v31 = vmul.f32 -1.442695, %v8287_v28  ;;  %v6361_v52 = vadd.f32 %v6308_v29, %v8201_v26  ;;  %v4302_v11 = vpop.f32.mrb[13].mxu1 }
 0x33c   : > { %v6752_v3 = vpop.eup %6751  ;;  %v4581_v34 = vadd.f32 1.0, %v6750_v60  ;;  %6763 = vpow2.f32 %v5471_v0  ;;  %v5473_v40 = vmul.f32 -1.442695, %v8290_v44  ;;  %v6362_v7 = vadd.f32 %v4302_v11, %v8203_v35 }
 0x33d   : > { %v4580_v10 = vadd.f32 1.0, %v6752_v3  ;;  %6765 = vpow2.f32 %v5474_v31  ;;  %v8297_v59 = vadd.f32 %v6361_v52, %v8250_v25 }
 0x33e   : > { %6767 = vrcp.f32 %v4581_v34  ;;  %v8300_v38 = vadd.f32 %v6362_v7, %v8250_v25  ;;  %v6311_v45 = vpop.f32.mrb[14].mxu1 }
 0x33f   : > { %v6754_v51 = vpop.eup %6753  ;;  %6769 = vrcp.f32 %v4580_v10  ;;  %v5476_v26 = vmul.f32 -1.442695, %v8297_v59  ;;  %v6363_v41 = vadd.f32 %v6311_v45, %v8205_v1  ;;  %v4312_v17 = vpop.f32.mrb[15].mxu1 }
 0x340   : > { %v6756_v2 = vpop.eup %6755  ;;  %v4583_v36 = vadd.f32 1.0, %v6754_v51  ;;  %6771 = vpow2.f32 %v5473_v40  ;;  %v5475_v35 = vmul.f32 -1.442695, %v8300_v38  ;;  %v6364_v49 = vadd.f32 %v4312_v17, %v8207_v56 }
 0x341   : > { %v4582_v61 = vadd.f32 1.0, %v6756_v2  ;;  %6773 = vpow2.f32 %v5476_v26  ;;  %v8307_v14 = vadd.f32 %v6363_v41, %v8250_v25 }
 0x342   : > { %6775 = vrcp.f32 %v4583_v36  ;;  %v8310_v42 = vadd.f32 %v6364_v49, %v8250_v25  ;;  %v6314_v15 = vpop.f32.mrb[16].mxu1 }
 0x343   : > { %v6758_v19 = vpop.eup %6757  ;;  %6777 = vrcp.f32 %v4582_v61  ;;  %v5478_v1 = vmul.f32 -1.442695, %v8307_v14  ;;  %v6365_v22 = vadd.f32 %v6314_v15, %v8209_v43  ;;  %v4322_v57 = vpop.f32.mrb[17].mxu1 }
 0x344   : > { %v6760_v21 = vpop.eup %6759  ;;  %v4585_v0 = vadd.f32 1.0, %v6758_v19  ;;  %6779 = vpow2.f32 %v5475_v35  ;;  %v5477_v56 = vmul.f32 -1.442695, %v8310_v42  ;;  %v6366_v27 = vadd.f32 %v4322_v57, %v8211_v46 }
 0x345   : > { %v6762_v32 = vpop.eup %6761  ;;  %v8317_v29 = vmul.f32 %v6760_v21, %v8253_v12  ;;  %6781 = vpow2.f32 %v5478_v1  ;;  %v8320_v60 = vadd.f32 %v6365_v22, %v8250_v25 }
 0x346   : > { %v6764_v31 = vpop.eup %6763  ;;  %v8323_v52 = vmul.f32 %v6762_v32, %v8256_v54  ;;  %6783 = vrcp.f32 %v4585_v0  ;;  %v8326_v43 = vadd.f32 %v6366_v27, %v8250_v25  ;;  %v6317_v11 = vpop.f32.mrb[18].mxu1 }
 0x347   : > { %v6766_v3 = vpop.eup %6765  ;;  %v4707_v46 = vsel %vm373_vm0, %v8317_v29, 0.0  ;;  %v4584_v34 = vadd.f32 1.0, %v6764_v31  ;;  %6785 = vpow2.f32 %v5477_v56  ;;  %v5480_v12 = vmul.f32 -1.442695, %v8320_v60  ;;  %v4332_v40 = vpop.f32.mrb[19].mxu1 }
 0x348   : > { %v6768_v7 = vpop.eup %6767  ;;  %v4706_v10 = vsel %vm373_vm0, %v8323_v52, 0.0  ;;  %v4587_v54 = vadd.f32 1.0, %v6766_v3  ;;  %v5479_v45 = vmul.f32 -1.442695, %v8326_v43  ;;  %v6367_v51 = vadd.f32 %v6317_v11, %v8213_v18 }
 0x349   : > { %v6770_v26 = vpop.eup %6769  ;;  %v8336_v41 = vmul.f32 %v6768_v7, %v8261_v20  ;;  %6787 = vrcp.f32 %v4584_v34  ;;  %v6368_v17 = vadd.f32 %v4332_v40, %v8215_v62  ;;  %v4708_v36 = vadd.f32 %v4707_v46, %v4706_v10 }
 0x34a   : > { %v6772_v2 = vpop.eup %6771  ;;  %v8340_v35 = vmul.f32 %v6770_v26, %v8264_v23  ;;  %6789 = vrcp.f32 %v4587_v54  ;;  %v8343_v49 = vadd.f32 %v6367_v51, %v8250_v25  ;;  %v6320_v61 = vpop.f32.mrb[20].mxu1 }
 0x34b   : > { %v6774_v15 = vpop.eup %6773  ;;  %v4711_v18 = vsel %vm373_vm0, %v8336_v41, 0.0  ;;  %v4586_v19 = vadd.f32 1.0, %v6772_v2  ;;  %6791 = vpow2.f32 %v5480_v12  ;;  %v8348_v20 = vadd.f32 %v6368_v17, %v8250_v25  ;;  %v4342_v62 = vpop.f32.mrb[21].mxu1 }
 0x34c   : > { %v6776_v1 = vpop.eup %6775  ;;  %v4709_v23 = vsel %vm373_vm0, %v8340_v35, 0.0  ;;  %v4589_v22 = vadd.f32 1.0, %v6774_v15  ;;  %6793 = vpow2.f32 %v5479_v45  ;;  %v5482_v57 = vmul.f32 -1.442695, %v8343_v49 }
 0x34d   : > { %v6778_v21 = vpop.eup %6777  ;;  %v4710_v0 = vadd.f32 %v4709_v23, %v4708_v36  ;;  %v8354_v56 = vmul.f32 %v6776_v1, %v8269_v58  ;;  %6795 = vrcp.f32 %v4586_v19  ;;  %v5481_v27 = vmul.f32 -1.442695, %v8348_v20 }
 0x34e   : > { %v6780_v32 = vpop.eup %6779  ;;  %v8358_v31 = vmul.f32 %v6778_v21, %v8272_v6  ;;  %6797 = vrcp.f32 %v4589_v22  ;;  %v6369_v11 = vadd.f32 %v6320_v61, %v8217_v55  ;;  %v6370_v3 = vadd.f32 %v4342_v62, %v8219_v47  ;;  %v6323_v46 = vpop.f32.mrb[22].mxu1 }
 0x34f   : > { %v6782_v34 = vpop.eup %6781  ;;  %v4715_v12 = vsel %vm373_vm0, %v8354_v56, 0.0  ;;  %v4712_v40 = vadd.f32 %v4711_v18, %v4710_v0  ;;  %v4588_v58 = vadd.f32 1.0, %v6780_v32  ;;  %6799 = vpow2.f32 %v5482_v57  ;;  %v4352_v7 = vpop.f32.mrb[23].mxu1 }
 0x350   : > { %v6784_v10 = vpop.eup %6783  ;;  %v4713_v54 = vsel %vm373_vm0, %v8358_v31, 0.0  ;;  %v4591_v6 = vadd.f32 1.0, %v6782_v34  ;;  %6801 = vpow2.f32 %v5481_v27  ;;  %v8367_v45 = vadd.f32 %v6369_v11, %v8250_v25 }
 0x351   : > { %v6786_v55 = vpop.eup %6785  ;;  %v4714_v47 = vadd.f32 %v4713_v54, %v4712_v40  ;;  %v8370_v51 = vmul.f32 %v6784_v10, %v8277_v4  ;;  %6803 = vrcp.f32 %v4588_v58  ;;  %v8373_v26 = vadd.f32 %v6370_v3, %v8250_v25 }
 0x352   : > { %6805 = vrcp.f32 %v4591_v6  ;;  %v4590_v17 = vadd.f32 1.0, %v6786_v55  ;;  %v5484_v2 = vmul.f32 -1.442695, %v8367_v45  ;;  %v6371_v36 = vadd.f32 %v6323_v46, %v8221_v53  ;;  %v6326_v61 = vpop.f32.mrb[24].mxu1 }
 0x353   : > { %v6788_v15 = vpop.eup %6787  ;;  %v4719_v18 = vsel %vm373_vm0, %v8370_v51, 0.0  ;;  %v4716_v19 = vadd.f32 %v4715_v12, %v4714_v47  ;;  %v5483_v62 = vmul.f32 -1.442695, %v8373_v26  ;;  %v6372_v4 = vadd.f32 %v4352_v7, %v8223_v63  ;;  %v4362_v1 = vpop.f32.mrb[25].mxu1 }
 0x354   : > { %v6790_v23 = vpop.eup %6789  ;;  %v8382_v22 = vmul.f32 %v6788_v15, %v8280_v16  ;;  %6807 = vrcp.f32 %v4590_v17  ;;  %v8385_v57 = vadd.f32 %v6371_v36, %v8250_v25  ;;  %v6373_v53 = vadd.f32 %v6326_v61, %v8225_v37 }
 0x355   : > { %v6792_v21 = vpop.eup %6791  ;;  %v8389_v0 = vmul.f32 %v6790_v23, %v8287_v28  ;;  %6809 = vpow2.f32 %v5484_v2  ;;  %v8392_v27 = vadd.f32 %v6372_v4, %v8250_v25  ;;  %v6374_v63 = vadd.f32 %v4362_v1, %v8227_v33 }
 0x356   : > { %v6794_v32 = vpop.eup %6793  ;;  %v4717_v16 = vsel %vm373_vm0, %v8382_v22, 0.0  ;;  %v4593_v11 = vadd.f32 1.0, %v6792_v21  ;;  %6811 = vpow2.f32 %v5483_v62  ;;  %v5486_v3 = vmul.f32 -1.442695, %v8385_v57  ;;  %v6329_v46 = vpop.f32.mrb[26].mxu1 }
 0x357   : > { %v6796_v37 = vpop.eup %6795  ;;  %v4718_v34 = vadd.f32 %v4717_v16, %v4716_v19  ;;  %v4723_v28 = vsel %vm373_vm0, %v8389_v0, 0.0  ;;  %v4592_v12 = vadd.f32 1.0, %v6794_v32  ;;  %v5485_v40 = vmul.f32 -1.442695, %v8392_v27  ;;  %v4372_v58 = vpop.f32.mrb[27].mxu1 }
 0x358   : > { %v6798_v7 = vpop.eup %6797  ;;  %v8402_v33 = vmul.f32 %v6796_v37, %v8290_v44  ;;  %6813 = vrcp.f32 %v4593_v11  ;;  %v8405_v10 = vadd.f32 %v6373_v53, %v8250_v25  ;;  %v8408_v54 = vadd.f32 %v6374_v63, %v8250_v25 }
 0x359   : > { %v6800_v6 = vpop.eup %6799  ;;  %v4720_v55 = vadd.f32 %v4719_v18, %v4718_v34  ;;  %v8411_v47 = vmul.f32 %v6798_v7, %v8297_v59  ;;  %6815 = vrcp.f32 %v4592_v12  ;;  %v6375_v17 = vadd.f32 %v6329_v46, %v8229_v9 }
 0x35a   : > { %v6802_v2 = vpop.eup %6801  ;;  %v4721_v44 = vsel %vm373_vm0, %v8402_v33, 0.0  ;;  %v4595_v36 = vadd.f32 1.0, %v6800_v6  ;;  %6817 = vpow2.f32 %v5486_v3  ;;  %v5488_v61 = vmul.f32 -1.442695, %v8405_v10  ;;  %v6332_v15 = vpop.f32.mrb[28].mxu1 }
 0x35b   : > { %v6804_v19 = vpop.eup %6803  ;;  %v4722_v62 = vadd.f32 %v4721_v44, %v4720_v55  ;;  %v4727_v18 = vsel %vm373_vm0, %v8411_v47, 0.0  ;;  %v4594_v4 = vadd.f32 1.0, %v6802_v2  ;;  %6819 = vpow2.f32 %v5485_v40  ;;  %v4382_v59 = vpop.f32.mrb[29].mxu1 }
 0x35c   : > { %v6806_v1 = vpop.eup %6805  ;;  %v8420_v9 = vmul.f32 %v6804_v19, %v8300_v38  ;;  %6821 = vrcp.f32 %v4595_v36  ;;  %v5487_v23 = vmul.f32 -1.442695, %v8408_v54  ;;  %v8424_v53 = vadd.f32 %v6375_v17, %v8250_v25 }
 0x35d   : > { %v4724_v21 = vadd.f32 %v4723_v28, %v4722_v62  ;;  %v8427_v63 = vmul.f32 %v6806_v1, %v8307_v14  ;;  %6823 = vrcp.f32 %v4594_v4  ;;  %v6376_v32 = vadd.f32 %v4372_v58, %v8231_v30 }
 0x35e   : > { %v6808_v16 = vpop.eup %6807  ;;  %v4725_v11 = vsel %vm373_vm0, %v8420_v9, 0.0  ;;  %6825 = vpow2.f32 %v5488_v61  ;;  %v5490_v38 = vmul.f32 -1.442695, %v8424_v53  ;;  %v6377_v3 = vadd.f32 %v6332_v15, %v8233_v48  ;;  %v6335_v46 = vpop.f32.mrb[30].mxu1 }
 0x35f   : > { %v6810_v37 = vpop.eup %6809  ;;  %v4726_v34 = vadd.f32 %v4725_v11, %v4724_v21  ;;  %v4731_v28 = vsel %vm373_vm0, %v8427_v63, 0.0  ;;  %v8437_v14 = vmul.f32 %v6808_v16, %v8310_v42  ;;  %6827 = vpow2.f32 %v5487_v23  ;;  %v4392_v30 = vpop.f32.mrb[31].mxu1 }
 0x360   : > { %v6812_v12 = vpop.eup %6811  ;;  %v4597_v40 = vadd.f32 1.0, %v6810_v37  ;;  %6829 = vpow2.f32 %v5490_v38  ;;  %v8440_v58 = vadd.f32 %v6376_v32, %v8250_v25  ;;  %v8443_v7 = vadd.f32 %v6377_v3, %v8250_v25 }
 0x361   : > { %v4728_v48 = vadd.f32 %v4727_v18, %v4726_v34  ;;  %v4729_v6 = vsel %vm373_vm0, %v8437_v14, 0.0  ;;  %v4596_v55 = vadd.f32 1.0, %v6812_v12  ;;  %v6378_v17 = vadd.f32 %v4382_v59, %v8235_v5 }
 0x362   : > { %v6814_v42 = vpop.eup %6813  ;;  %6831 = vrcp.f32 %v4597_v40  ;;  %v5489_v2 = vmul.f32 -1.442695, %v8440_v58  ;;  %v5492_v44 = vmul.f32 -1.442695, %v8443_v7  ;;  %v6379_v36 = vadd.f32 %v6335_v46, %v8237_v39  ;;  %v6338_v61 = vpop.f32.mrb[0].mxu1 }
 0x363   : > { %v6816_v15 = vpop.eup %6815  ;;  %v4730_v19 = vadd.f32 %v4729_v6, %v4728_v48  ;;  %v8452_v62 = vmul.f32 %v6814_v42, %v8320_v60  ;;  %6833 = vrcp.f32 %v4596_v55  ;;  %v8455_v18 = vadd.f32 %v6378_v17, %v8250_v25  ;;  %v4402_v4 = vpop.f32.mrb[1].mxu1 }
 0x364   : > { %v6818_v5 = vpop.eup %6817  ;;  %v8458_v59 = vmul.f32 %v6816_v15, %v8326_v43  ;;  %6835 = vpow2.f32 %v5489_v2  ;;  %v8461_v1 = vadd.f32 %v6379_v36, %v8250_v25  ;;  %v6380_v39 = vadd.f32 %v4392_v30, %v8239_v13 }
 0x365   : > { %v6820_v23 = vpop.eup %6819  ;;  %v4735_v60 = vsel %vm373_vm0, %v8452_v62, 0.0  ;;  %v4732_v21 = vadd.f32 %v4731_v28, %v4730_v19  ;;  %v4599_v32 = vadd.f32 1.0, %v6818_v5  ;;  %6837 = vpow2.f32 %v5492_v44 }
 0x366   : > { %v6822_v16 = vpop.eup %6821  ;;  %v4733_v11 = vsel %vm373_vm0, %v8458_v59, 0.0  ;;  %v4598_v38 = vadd.f32 1.0, %v6820_v23  ;;  %v5491_v43 = vmul.f32 -1.442695, %v8455_v18  ;;  %v5494_v3 = vmul.f32 -1.442695, %v8461_v1 }
 0x367   : > { %v6824_v46 = vpop.eup %6823  ;;  %v4734_v37 = vadd.f32 %v4733_v11, %v4732_v21  ;;  %v8471_v13 = vmul.f32 %v6822_v16, %v8343_v49  ;;  %6839 = vrcp.f32 %v4599_v32  ;;  %v8474_v34 = vadd.f32 %v6380_v39, %v8250_v25 }
 0x368   : > { %v6826_v28 = vpop.eup %6825  ;;  %v8477_v30 = vmul.f32 %v6824_v46, %v8348_v20  ;;  %6841 = vrcp.f32 %v4598_v38  ;;  %v6381_v12 = vadd.f32 %v6338_v61, %v8193_v8  ;;  %v6382_v40 = vadd.f32 %v4402_v4, %v8195_v50 }
 0x369   : > { %v6828_v48 = vpop.eup %6827  ;;  %v4736_v6 = vadd.f32 %v4735_v60, %v4734_v37  ;;  %v4601_v55 = vadd.f32 1.0, %v6826_v28  ;;  %6843 = vpow2.f32 %v5491_v43  ;;  %v5493_v2 = vmul.f32 -1.442695, %v8474_v34 }
 0x36a   : > { %v6830_v17 = vpop.eup %6829  ;;  %v4737_v49 = vsel %vm373_vm0, %v8477_v30, 0.0  ;;  %v4600_v42 = vadd.f32 1.0, %v6828_v48  ;;  %6845 = vpow2.f32 %v5494_v3  ;;  %v8485_v36 = vadd.f32 %v6381_v12, %v8250_v25 }
 0x36b   : > { %v4738_v44 = vadd.f32 %v4737_v49, %v4736_v6  ;;  %6847 = vrcp.f32 %v4601_v55  ;;  %v4603_v20 = vadd.f32 1.0, %v6830_v17  ;;  %v4739_v50 = vsel %vm373_vm0, %v8471_v13, 0.0 }
 0x36c   : > { %v6832_v8 = vpop.eup %6831  ;;  %6849 = vrcp.f32 %v4600_v42  ;;  %v8490_v61 = vadd.f32 %v6382_v40, %v8250_v25  ;;  %v5496_v4 = vmul.f32 -1.442695, %v8485_v36 }
 0x36d   : > { %v6834_v15 = vpop.eup %6833  ;;  %v4740_v19 = vadd.f32 %v4739_v50, %v4738_v44  ;;  %6851 = vrcp.f32 %v4603_v20  ;;  %v8494_v39 = vmul.f32 %v6832_v8, %v8367_v45 }
 0x36e   : > { %v6836_v5 = vpop.eup %6835  ;;  %v8497_v23 = vmul.f32 %v6834_v15, %v8373_v26  ;;  %6853 = vpow2.f32 %v5493_v2  ;;  %v5495_v60 = vmul.f32 -1.442695, %v8490_v61 }
 0x36f   : > { %v6838_v21 = vpop.eup %6837  ;;  %v4602_v32 = vadd.f32 1.0, %v6836_v5  ;;  %6855 = vpow2.f32 %v5496_v4  ;;  %v4743_v45 = vsel %vm373_vm0, %v8494_v39, 0.0 }
 0x370   : > { %v4741_v25 = vsel %vm373_vm0, %v8497_v23, 0.0  ;;  %v4605_v16 = vadd.f32 1.0, %v6838_v21  ;;  %6857 = vpow2.f32 %v5495_v60 }
 0x371   : > { %v6840_v11 = vpop.eup %6839  ;;  %v4742_v38 = vadd.f32 %v4741_v25, %v4740_v19  ;;  %6859 = vrcp.f32 %v4602_v32 }
 0x372   : > { %v6842_v43 = vpop.eup %6841  ;;  %v8505_v3 = vmul.f32 %v6840_v11, %v8385_v57  ;;  %6861 = vrcp.f32 %v4605_v16 }
 0x373   : > { %v6844_v26 = vpop.eup %6843  ;;  %v8508_v46 = vmul.f32 %v6842_v43, %v8392_v27  ;;  %v4744_v37 = vadd.f32 %v4743_v45, %v4742_v38 }
 0x374   : > { %v6846_v28 = vpop.eup %6845  ;;  %v4604_v12 = vadd.f32 1.0, %v6844_v26  ;;  %v4747_v57 = vsel %vm373_vm0, %v8505_v3, 0.0 }
 0x375   : > { %v6848_v40 = vpop.eup %6847  ;;  %v4745_v48 = vsel %vm373_vm0, %v8508_v46, 0.0  ;;  %v4607_v6 = vadd.f32 1.0, %v6846_v28 }
 0x376   : > { %v6850_v55 = vpop.eup %6849  ;;  %v4746_v17 = vadd.f32 %v4745_v48, %v4744_v37  ;;  %6863 = vrcp.f32 %v4604_v12  ;;  %v8515_v42 = vmul.f32 %v6848_v40, %v8405_v10 }
 0x377   : > { %v6852_v49 = vpop.eup %6851  ;;  %v8518_v27 = vmul.f32 %v6850_v55, %v8408_v54  ;;  %6865 = vrcp.f32 %v4607_v6 }
 0x378   : > { %v6854_v2 = vpop.eup %6853  ;;  %v4748_v44 = vadd.f32 %v4747_v57, %v4746_v17  ;;  %v4751_v60 = vsel %vm373_vm0, %v8515_v42, 0.0  ;;  %v8525_v54 = vmul.f32 %v6852_v49, %v8424_v53 }
 0x379   : > { %v6856_v20 = vpop.eup %6855  ;;  %v4749_v8 = vsel %vm373_vm0, %v8518_v27, 0.0  ;;  %v4606_v50 = vadd.f32 1.0, %v6854_v2 }
 0x37a   : > { %v6858_v15 = vpop.eup %6857  ;;  %v4750_v19 = vadd.f32 %v4749_v8, %v4748_v44  ;;  %v4609_v4 = vadd.f32 1.0, %v6856_v20  ;;  %v4755_v43 = vsel %vm373_vm0, %v8525_v54, 0.0 }
 0x37b   : > { %v6860_v5 = vpop.eup %6859  ;;  %6867 = vrcp.f32 %v4606_v50  ;;  %v4608_v10 = vadd.f32 1.0, %v6858_v15 }
 0x37c   : > { %v8528_v21 = vmul.f32 %v6860_v5, %v8440_v58  ;;  %v4752_v32 = vadd.f32 %v4751_v60, %v4750_v19  ;;  %6869 = vrcp.f32 %v4609_v4  ;;  %v6862_v25 = vpop.eup %6861 }
 0x37d   : > { %6871 = vrcp.f32 %v4608_v10  ;;  %v8535_v45 = vmul.f32 %v6862_v25, %v8443_v7 }
 0x37e   : > { %v4753_v16 = vsel %vm373_vm0, %v8528_v21, 0.0 }
 0x37f   : > { %v4754_v11 = vadd.f32 %v4753_v16, %v4752_v32  ;;  %v4759_v40 = vsel %vm373_vm0, %v8535_v45, 0.0  ;;  %v4778_v32 = vld [vmem:[%s8756_s6] sm:$0x1] }
 0x380   : > { %v6864_v38 = vpop.eup %6863 }
 0x381   : > { %v8538_v53 = vmul.f32 %v6864_v38, %v8455_v18  ;;  %v4756_v58 = vadd.f32 %v4755_v43, %v4754_v11  ;;  %v6866_v26 = vpop.eup %6865 }
 0x382   : > { %v8545_v6 = vmul.f32 %v6866_v26, %v8461_v1 }
 0x383   : > { %v4757_v37 = vsel %vm373_vm0, %v8538_v53, 0.0 }
 0x384   : > { %v4758_v28 = vadd.f32 %v4757_v37, %v4756_v58  ;;  %v4763_v2 = vsel %vm373_vm0, %v8545_v6, 0.0 }
 0x385   : > { %v6868_v12 = vpop.eup %6867 }
 0x386   : > { %v6870_v48 = vpop.eup %6869  ;;  %v8548_v7 = vmul.f32 %v6868_v12, %v8474_v34  ;;  %v4760_v55 = vadd.f32 %v4759_v40, %v4758_v28  ;;  %v4939_v40 = vlaneseq }
 0x387   : > { %v6872_v18 = vpop.eup %6871  ;;  %v8558_v44 = vmul.f32 %v6870_v48, %v8485_v36  ;;  %v4853_v36 = vld [vmem:[%s8757_s7] sm:$0x3] }
 0x388   : > { %v4761_v17 = vsel %vm373_vm0, %v8548_v7, 0.0  ;;  %v8553_v49 = vmul.f32 %v6872_v18, %v8490_v61  ;;  %v4940_v48 = vshrl.u32 %v4939_v40, 7 }
 0x389   : > { %v4762_v57 = vadd.f32 %v4761_v17, %v4760_v55  ;;  %v4767_v8 = vsel %vm373_vm0, %v8558_v44, 0.0 }
 0x38a   : > { %v4765_v1 = vsel %vm373_vm0, %v8553_v49, 0.0  ;;  %v4941_v55 = vsub.s32 0, %v4940_v48  ;;  %v6891_v48 = vld [vmem:[%s6988_s16 + $0x70] sm:$0xff] }
 0x38b   : > { %v4764_v34 = vadd.f32 %v4763_v2, %v4762_v57 }
 0x38d   : > { %v4766_v20 = vadd.f32 %v4765_v1, %v4764_v34 }
 0x38f   : > { %v4768_v50 = vadd.f32 %v4767_v8, %v4766_v20 }
 0x391   : > { %v4769_v15 = vrot.slane %v4768_v50, 4 }
 0x393   : > { %v4770_v19 = vadd.f32 %v4769_v15, %v4768_v50 }
 0x395   : > { %v4771_v61 = vrot.slane %v4770_v19, 2 }
 0x397   : > { %v4772_v4 = vadd.f32 %v4771_v61, %v4770_v19 }
 0x399   : > { %v4773_v5 = vrot.slane %v4772_v4, 1 }
 0x39b   : > { %v4774_v60 = vadd.f32 %v4773_v5, %v4772_v4  ;;  %v6881_v4 = vld [vmem:[%s6988_s16 + $0x20] sm:$0xff]  ;;  %v6882_v5 = vld [vmem:[%s6988_s16 + $0x28] sm:$0xff] }
 0x39d   : > { %v4776_v10 = vmul.f32 0.00390625, %v4774_v60  ;;  %v6883_v60 = vld [vmem:[%s6988_s16 + $0x30] sm:$0xff] }
 0x39f   : > { %6342 = vmatmul.mubr.msk.f32.vlgmr.msra.gmra.mrb[64].mxu0 %vm373_vm0, %v4776_v10 }
 0x3a0   : > { %6346 = vmatprep.mubr.msk.f32.mxu0 %vm6918_vm1, %v8838_v24  ;;  %6345 = vmatpush3.msk.msra.mxu0 %vm4859_vm2, %v4853_v36  ;;  %v4854_v24 = vld [vmem:[%s8758_s8] sm:$0x1]  ;;  %v6884_v36 = vld [vmem:[%s6988_s16 + $0x38] sm:$0xff] }
 0x472   : > { %v4848_v25 = vpop.f32.mrb[64].mxu0 }
 0x473   : > { %v4849_v16 = vadd.f32 %v4848_v25, %v4778_v32  ;;  %v6343_v11 = vpop.f32.mrb[65].mxu0  ;;  %v6885_v25 = vld [vmem:[%s6988_s16 + $0x40] sm:$0xff] }
 0x474   : > { %v6886_v11 = vld [vmem:[%s6988_s16 + $0x48] sm:$0xff] }
 0x475   : > { %v4852_v38 = vmax.f32 %v4849_v16, 0.0 }
 0x477   : > { %6347 = vmatmul.mubr.msk.f32.vlgmr.msra.gmra.mrb[66].mxu0 %vm4855_vm3, %v4852_v38 }
 0x54a   : > { %v4929_v43 = vpop.f32.mrb[66].mxu0 }
 0x54b   : > { %v4930_v58 = vadd.f32 %v4929_v43, %v4854_v24  ;;  %v6348_v26 = vpop.f32.mrb[67].mxu0  ;;  %v6887_v24 = vld [vmem:[%s6988_s16 + $0x50] sm:$0xff] }
 0x54d   : > { %v5500_v37 = vmul.f32 -1.442695, %v4930_v58  ;;  %v6888_v58 = vld [vmem:[%s6988_s16 + $0x58] sm:$0xff] }
 0x54f   : > { %6873 = vpow2.f32 %v5500_v37  ;;  %v6889_v37 = vld [vmem:[%s6988_s16 + $0x60] sm:$0xff] }
 0x559   : > { %v6874_v28 = vpop.eup %6873 }
 0x55a   : > { %v4936_v12 = vadd.f32 1.0, %v6874_v28 }
 0x55c   : > { %6875 = vrcp.f32 %v4936_v12  ;;  %v6890_v12 = vld [vmem:[%s6988_s16 + $0x68] sm:$0xff] }
 0x566   : > { %v6876_v18 = vpop.eup %6875 }
 0x567   : > { %v4942_v17 = vrot.slane %v6876_v18, %v4941_v55  ;;  %v6892_v18 = vld [vmem:[%s6988_s16 + $0x78] sm:$0xff] }
 0x569   : > { %v4943_v57 = vmul.f32 %v4942_v17, %v8323_v52  ;;  %v4944_v2 = vmul.f32 %v4942_v17, %v8317_v29  ;;  %v4945_v1 = vmul.f32 %v4942_v17, %v8340_v35  ;;  %v4946_v34 = vmul.f32 %v4942_v17, %v8336_v41 }
 0x56a   : > { %v4947_v20 = vmul.f32 %v4942_v17, %v8358_v31  ;;  %v4948_v8 = vmul.f32 %v4942_v17, %v8354_v56  ;;  %v4949_v50 = vmul.f32 %v4942_v17, %v8382_v22  ;;  %v4950_v15 = vmul.f32 %v4942_v17, %v8370_v51 }
 0x56b   : > { %v4951_v19 = vmul.f32 %v4942_v17, %v8402_v33  ;;  %v4952_v61 = vmul.f32 %v4942_v17, %v8389_v0  ;;  %v4953_v52 = vmul.f32 %v4942_v17, %v8420_v9  ;;  %v4954_v29 = vmul.f32 %v4942_v17, %v8411_v47 }
 0x56c   : > { %v4955_v35 = vmul.f32 %v4942_v17, %v8437_v14  ;;  %v4956_v41 = vmul.f32 %v4942_v17, %v8427_v63  ;;  %v4957_v31 = vmul.f32 %v4942_v17, %v8458_v59  ;;  %v4958_v56 = vmul.f32 %v4942_v17, %v8452_v62 }
 0x56d   : > { %v4959_v22 = vmul.f32 %v4942_v17, %v8477_v30  ;;  %v4960_v51 = vmul.f32 %v4942_v17, %v8471_v13  ;;  %v4961_v0 = vmul.f32 %v4942_v17, %v8497_v23  ;;  %v4962_v33 = vmul.f32 %v4942_v17, %v8494_v39 }
 0x56e   : > { %v8597_v47 = vmul.f32 %v4942_v17, %v8508_v46  ;;  %v8600_v9 = vmul.f32 %v4942_v17, %v8505_v3  ;;  %v8603_v63 = vmul.f32 %v4942_v17, %v8518_v27  ;;  %v8606_v14 = vmul.f32 %v4942_v17, %v8515_v42  ;;  %v6877_v42 = vld [vmem:[%s6988_s16] sm:$0xff] }
 0x56f   : > { %v8609_v62 = vmul.f32 %v4942_v17, %v8528_v21  ;;  %v8612_v59 = vmul.f32 %v4942_v17, %v8525_v54  ;;  %v8615_v13 = vmul.f32 %v4942_v17, %v8538_v53  ;;  %v8618_v30 = vmul.f32 %v4942_v17, %v8535_v45  ;;  %v6878_v54 = vld [vmem:[%s6988_s16 + $0x8] sm:$0xff]  ;;  %v6879_v45 = vld [vmem:[%s6988_s16 + $0x10] sm:$0xff] }
 0x570   : > { %v8628_v39 = vmul.f32 %v4942_v17, %v8548_v7  ;;  %v8631_v23 = vmul.f32 %v4942_v17, %v8545_v6  ;;  %v8634_v3 = vmul.f32 %v4942_v17, %v8553_v49  ;;  %v8637_v46 = vmul.f32 %v4942_v17, %v8558_v44  ;;  %v6880_v7 = vld [vmem:[%s6988_s16 + $0x18] sm:$0xff] }
 0x571   : > { %v4975_v27 = vadd.f32 %v6877_v42, %v4943_v57  ;;  %v4976_v21 = vadd.f32 %v6878_v54, %v4944_v2  ;;  %v4977_v53 = vadd.f32 %v6879_v45, %v4945_v1  ;;  %v4978_v6 = vadd.f32 %v6880_v7, %v4946_v34  ;;  %v6893_v57 = vld [vmem:[%s6988_s16 + $0x80] sm:$0xff]  ;;  %v6894_v1 = vld [vmem:[%s6988_s16 + $0x88] sm:$0xff]  ;;  %v6907_v42 = vld [vmem:[%s6988_s16 + $0xf0] sm:$0xff] }
 0x572   : > { %v4979_v49 = vadd.f32 %v6881_v4, %v4947_v20  ;;  %v4980_v44 = vadd.f32 %v6882_v5, %v4948_v8  ;;  %v4981_v10 = vadd.f32 %v6883_v60, %v4949_v50  ;;  %v4982_v32 = vadd.f32 %v6884_v36, %v4950_v15  ;;  %v6895_v20 = vld [vmem:[%s6988_s16 + $0x90] sm:$0xff]  ;;  %v6896_v50 = vld [vmem:[%s6988_s16 + $0x98] sm:$0xff] }
 0x573   : > { %v4983_v16 = vadd.f32 %v6885_v25, %v4951_v19  ;;  %v4984_v38 = vadd.f32 %v6886_v11, %v4952_v61  ;;  %v4985_v43 = vadd.f32 %v6887_v24, %v4953_v52  ;;  %v4986_v26 = vadd.f32 %v6888_v58, %v4954_v29  ;;  %5007 = vst.msk [vmem:[%s8625_s14] sm:$0xff] %vm373_vm0, %v4975_v27  ;;  %v6897_v19 = vld [vmem:[%s6988_s16 + $0xa0] sm:$0xff]  ;;  %v6898_v52 = vld [vmem:[%s6988_s16 + $0xa8] sm:$0xff]  ;;  %v6908_v54 = vld [vmem:[%s6988_s16 + $0xf8] sm:$0xff] }
 0x574   : > { %5008 = vst.msk [vmem:[%s8625_s14 + $0x8] sm:$0xff] %vm373_vm0, %v4976_v21  ;;  %5009 = vst.msk [vmem:[%s8625_s14 + $0x10] sm:$0xff] %vm373_vm0, %v4977_v53  ;;  %v4987_v28 = vadd.f32 %v6889_v37, %v4955_v35  ;;  %v4988_v40 = vadd.f32 %v6890_v12, %v4956_v41  ;;  %v4989_v55 = vadd.f32 %v6891_v48, %v4957_v31  ;;  %v6899_v35 = vld [vmem:[%s6988_s16 + $0xb0] sm:$0xff]  ;;  %v6900_v31 = vld [vmem:[%s6988_s16 + $0xb8] sm:$0xff] }
 0x575   : > { %5010 = vst.msk [vmem:[%s8625_s14 + $0x18] sm:$0xff] %vm373_vm0, %v4978_v6  ;;  %v4990_v17 = vadd.f32 %v6892_v18, %v4958_v56  ;;  %5011 = vst.msk [vmem:[%s8625_s14 + $0x20] sm:$0xff] %vm373_vm0, %v4979_v49  ;;  %v4991_v2 = vadd.f32 %v6893_v57, %v4959_v22  ;;  %v4992_v34 = vadd.f32 %v6894_v1, %v4960_v51  ;;  %v6901_v22 = vld [vmem:[%s6988_s16 + $0xc0] sm:$0xff] }
 0x576   : > { %5012 = vst.msk [vmem:[%s8625_s14 + $0x28] sm:$0xff] %vm373_vm0, %v4980_v44  ;;  %5013 = vst.msk [vmem:[%s8625_s14 + $0x30] sm:$0xff] %vm373_vm0, %v4981_v10  ;;  %v4993_v8 = vadd.f32 %v6895_v20, %v4961_v0  ;;  %v4994_v15 = vadd.f32 %v6896_v50, %v4962_v33  ;;  %v4995_v61 = vadd.f32 %v6897_v19, %v8597_v47  ;;  %v6902_v0 = vld [vmem:[%s6988_s16 + $0xc8] sm:$0xff]  ;;  %v6903_v47 = vld [vmem:[%s6988_s16 + $0xd0] sm:$0xff] }
 0x577   : > { %5014 = vst.msk [vmem:[%s8625_s14 + $0x38] sm:$0xff] %vm373_vm0, %v4982_v32  ;;  %5015 = vst.msk [vmem:[%s8625_s14 + $0x40] sm:$0xff] %vm373_vm0, %v4983_v16  ;;  %v4996_v29 = vadd.f32 %v6898_v52, %v8600_v9  ;;  %v4997_v41 = vadd.f32 %v6899_v35, %v8603_v63  ;;  %v4998_v56 = vadd.f32 %v6900_v31, %v8606_v14  ;;  %v6904_v63 = vld [vmem:[%s6988_s16 + $0xd8] sm:$0xff] }
 0x578   : > { %5016 = vst.msk [vmem:[%s8625_s14 + $0x48] sm:$0xff] %vm373_vm0, %v4984_v38  ;;  %5017 = vst.msk [vmem:[%s8625_s14 + $0x50] sm:$0xff] %vm373_vm0, %v4985_v43  ;;  %v4999_v51 = vadd.f32 %v6901_v22, %v8609_v62  ;;  %v5000_v33 = vadd.f32 %v6902_v0, %v8612_v59  ;;  %v5001_v9 = vadd.f32 %v6903_v47, %v8615_v13  ;;  %v6905_v62 = vld [vmem:[%s6988_s16 + $0xe0] sm:$0xff]  ;;  %v6906_v13 = vld [vmem:[%s6988_s16 + $0xe8] sm:$0xff] }
 0x579   : > { %5018 = vst.msk [vmem:[%s8625_s14 + $0x58] sm:$0xff] %vm373_vm0, %v4986_v26  ;;  %5019 = vst.msk [vmem:[%s8625_s14 + $0x60] sm:$0xff] %vm373_vm0, %v4987_v28  ;;  %v5002_v14 = vadd.f32 %v6904_v63, %v8618_v30  ;;  %v5003_v59 = vadd.f32 %v6905_v62, %v8628_v39  ;;  %v5004_v30 = vadd.f32 %v6906_v13, %v8631_v23 }
 0x57a   : > { %5020 = vst.msk [vmem:[%s8625_s14 + $0x68] sm:$0xff] %vm373_vm0, %v4988_v40  ;;  %5021 = vst.msk [vmem:[%s8625_s14 + $0x70] sm:$0xff] %vm373_vm0, %v4989_v55  ;;  %v5005_v27 = vadd.f32 %v6907_v42, %v8634_v3  ;;  %v5006_v21 = vadd.f32 %v6908_v54, %v8637_v46 }
 0x57b   : > { %5022 = vst.msk [vmem:[%s8625_s14 + $0x78] sm:$0xff] %vm373_vm0, %v4990_v17  ;;  %5023 = vst.msk [vmem:[%s8625_s14 + $0x80] sm:$0xff] %vm373_vm0, %v4991_v2 }
 0x57c   : > { %5024 = vst.msk [vmem:[%s8625_s14 + $0x88] sm:$0xff] %vm373_vm0, %v4992_v34  ;;  %5025 = vst.msk [vmem:[%s8625_s14 + $0x90] sm:$0xff] %vm373_vm0, %v4993_v8 }
 0x57d   : > { %5026 = vst.msk [vmem:[%s8625_s14 + $0x98] sm:$0xff] %vm373_vm0, %v4994_v15  ;;  %5027 = vst.msk [vmem:[%s8625_s14 + $0xa0] sm:$0xff] %vm373_vm0, %v4995_v61 }
 0x57e   : > { %5028 = vst.msk [vmem:[%s8625_s14 + $0xa8] sm:$0xff] %vm373_vm0, %v4996_v29  ;;  %5029 = vst.msk [vmem:[%s8625_s14 + $0xb0] sm:$0xff] %vm373_vm0, %v4997_v41 }
 0x57f   : > { %5030 = vst.msk [vmem:[%s8625_s14 + $0xb8] sm:$0xff] %vm373_vm0, %v4998_v56  ;;  %5031 = vst.msk [vmem:[%s8625_s14 + $0xc0] sm:$0xff] %vm373_vm0, %v4999_v51 }
 0x580   : > { %5032 = vst.msk [vmem:[%s8625_s14 + $0xc8] sm:$0xff] %vm373_vm0, %v5000_v33  ;;  %5033 = vst.msk [vmem:[%s8625_s14 + $0xd0] sm:$0xff] %vm373_vm0, %v5001_v9 }
 0x581   : > { %5034 = vst.msk [vmem:[%s8625_s14 + $0xd8] sm:$0xff] %vm373_vm0, %v5002_v14  ;;  %5035 = vst.msk [vmem:[%s8625_s14 + $0xe0] sm:$0xff] %vm373_vm0, %v5003_v59 }
 0x582   : > { %5036 = vst.msk [vmem:[%s8625_s14 + $0xe8] sm:$0xff] %vm373_vm0, %v5004_v30  ;;  %5037 = vst.msk [vmem:[%s8625_s14 + $0xf0] sm:$0xff] %vm373_vm0, %v5005_v27 }
 0x583   : > { %5038 = vst.msk [vmem:[%s8625_s14 + $0xf8] sm:$0xff] %vm373_vm0, %v5006_v21 }
 0x584 PF: > { %s19_s30 = sadd.s32 1, %s6915_s30  }
 0x585   : > { %p16_p4 = scmp.ge.s32.totalorder %s19_s30, 4  }
 0x587   :  { %18 = sbr.rel (!%p16_p4) target bundleno = 1 (0x1), region = 96 }

</bundles_post_ra>
